<compile_context>
chip_gen: v6e
topology: v6e:2x2x1
jax: 0.10.0
libtpu: 0.0.40
codegen_flags: <defaults>
</compile_context>

<pallas_src>
import functools

import jax
import jax.numpy as jnp
from jax import lax
from jax.experimental import pallas as pl
from jax.experimental.pallas import tpu as pltpu


_VMEM = pl.BlockSpec(memory_space=pltpu.MemorySpace.VMEM)


# ---------------------------------------------------------------------------
# Single fused kernel: encoder (2-layer biGRU + proj) -> self-attention -> heads.
# ---------------------------------------------------------------------------

def _sp_model_kernel(inp_ref, pos_ref, mask_ref,
                     wih1_ref, whh1_ref, bih1_ref, bhh1_ref,
                     wih2_ref, whh2_ref, bih2_ref, bhh2_ref,
                     pw_ref, pb_ref,
                     wqkv_ref, bqkv_ref, wo_ref, bo_ref,
                     w1_ref, b1_ref, w2_ref, b2_ref,
                     share_ref, sp_start_ref, sp_end_ref,
                     *, hidden, num_heads):
    # inp/pos: (B, S, E); mask: (B, S); wih: (Din, 6H) = [fwd | bwd];
    # whh: (2H, 6H) block-diagonal (fwd in [0:H, 0:3H], bwd in [H:2H, 3H:6H]);
    # proj: (2H, E); attention wqkv: (E, 3E); heads w1: (E, 2F), w2: blockdiag (2F, 2P).
    B, S, E = inp_ref.shape
    H = hidden
    mask = mask_ref[...]                                   # (B, S)

    # ----- RNNEncoder: 2-layer bidirectional GRU, batch folded into sublanes -----
    def bidir_layer(x_bsd, wih_ref_, whh_ref_, bih_ref_, bhh_ref_):
        din = x_bsd.shape[-1]
        wih = wih_ref_[...]
        whh = whh_ref_[...]
        bih = bih_ref_[...]
        bhh = bhh_ref_[...]
        # Input-side projection for ALL (batch, time, direction) at once: one MXU call
        # per layer, hoisted out of the serial recurrence.
        gi = jnp.dot(x_bsd.reshape(B * S, din), wih,
                     preferred_element_type=jnp.float32) + bih           # (B*S, 6H)
        gi = gi.reshape(B, S, 6 * H)
        h_f = jnp.zeros((B, H), jnp.float32)
        h_b = jnp.zeros((B, H), jnp.float32)
        outs_f = [None] * S
        outs_b = [None] * S
        # Static unroll over S (known at trace time) so the scheduler can overlap the
        # recurrent matmul with the gate VPU/EUP work across steps and directions.
        for t in range(S):
            tb = S - 1 - t
            # Single recurrent matmul per step drives BOTH directions and the whole
            # batch (block-diagonal whh).
            gh = jnp.dot(jnp.concatenate([h_f, h_b], axis=1), whh,
                         preferred_element_type=jnp.float32) + bhh       # (B, 6H)
            # forward direction, position t
            gi_f = gi[:, t, 0:3 * H]                                     # (B, 3H)
            r = jax.nn.sigmoid(gi_f[:, 0:H] + gh[:, 0:H])
            z = jax.nn.sigmoid(gi_f[:, H:2 * H] + gh[:, H:2 * H])
            n = jnp.tanh(gi_f[:, 2 * H:3 * H] + r * gh[:, 2 * H:3 * H])
            cand_f = (1.0 - z) * n + z * h_f
            m_t = mask[:, t:t + 1]                                       # (B, 1)
            h_f = m_t * cand_f + (1.0 - m_t) * h_f
            outs_f[t] = m_t * cand_f
            # backward direction, position tb; with right-padded masks h_b stays at its
            # zero init through the padded tail (pack_padded_sequence-like semantics).
            gi_b = gi[:, tb, 3 * H:6 * H]
            rb = jax.nn.sigmoid(gi_b[:, 0:H] + gh[:, 3 * H:4 * H])
            zb = jax.nn.sigmoid(gi_b[:, H:2 * H] + gh[:, 4 * H:5 * H])
            nb = jnp.tanh(gi_b[:, 2 * H:3 * H] + rb * gh[:, 5 * H:6 * H])
            cand_b = (1.0 - zb) * nb + zb * h_b
            m_tb = mask[:, tb:tb + 1]
            h_b = m_tb * cand_b + (1.0 - m_tb) * h_b
            outs_b[tb] = m_tb * cand_b
        rows = [jnp.concatenate([outs_f[t], outs_b[t]], axis=1)[:, None, :]
                for t in range(S)]
        return jnp.concatenate(rows, axis=1)                             # (B, S, 2H)

    x = inp_ref[...] + pos_ref[...]                                      # (B, S, E)
    h1 = bidir_layer(x, wih1_ref, whh1_ref, bih1_ref, bhh1_ref)
    h2 = bidir_layer(h1, wih2_ref, whh2_ref, bih2_ref, bhh2_ref)
    share2d = jnp.dot(h2.reshape(B * S, 2 * H), pw_ref[...],
                      preferred_element_type=jnp.float32) + pb_ref[...]  # (B*S, E)
    share_ref[...] = share2d.reshape(B, S, E).astype(share_ref.dtype)

    # ----- SelfAttention on the VMEM-resident share feature (no HBM round trip) -----
    dh = E // num_heads
    scale = 1.0 / (dh ** 0.5)
    P = sp_start_ref.shape[-1]
    qkv = (jnp.dot(share2d, wqkv_ref[...], preferred_element_type=jnp.float32)
           + bqkv_ref[...]).reshape(B, S, 3 * E)                         # (B, S, 3E)
    # Key-mask bias computed once, shared by all heads.
    neg_bias = ((1.0 - mask) * (-1e9))[:, None, :]                       # (B, 1, S)
    head_ctx = []
    for h in range(num_heads):
        q = qkv[:, :, h * dh:(h + 1) * dh]                               # (B, S, dh)
        k = qkv[:, :, E + h * dh:E + (h + 1) * dh]
        v = qkv[:, :, 2 * E + h * dh:2 * E + (h + 1) * dh]
        s = jnp.einsum('bqd,bkd->bqk', q, k,
                       preferred_element_type=jnp.float32) * scale       # (B, S, S)
        s = s + neg_bias
        s = s - jnp.max(s, axis=-1, keepdims=True)
        p = jnp.exp(s)
        p = p * pl.reciprocal(jnp.sum(p, axis=-1, keepdims=True), approx=True)
        head_ctx.append(jnp.einsum('bqk,bkd->bqd', p, v,
                                   preferred_element_type=jnp.float32))  # (B, S, dh)
    ctx = jnp.concatenate(head_ctx, axis=2).reshape(B * S, E)            # (B*S, E)
    outs = (jnp.dot(ctx, wo_ref[...], preferred_element_type=jnp.float32)
            + bo_ref[...])                                               # (B*S, E)

    # ----- Both prediction heads fused: W1s concatenated, W2s block-diagonal -----
    hmid = jnp.maximum(
        jnp.dot(outs, w1_ref[...], preferred_element_type=jnp.float32) + b1_ref[...],
        0.0)                                                             # (B*S, 2F)
    y = (jnp.dot(hmid, w2_ref[...], preferred_element_type=jnp.float32)
         + b2_ref[...]).reshape(B, S, 2 * P)
    sp_start_ref[...] = y[:, :, 0:P].astype(sp_start_ref.dtype)
    sp_end_ref[...] = y[:, :, P:2 * P].astype(sp_end_ref.dtype)


# ---------------------------------------------------------------------------
# Forward wrapper: exactly one pallas_call, no wrapper-level transposes/reshapes.
# ---------------------------------------------------------------------------

def subject_predicate_forward(params, input_embedding, mask, position_embedding,
                              *, num_heads, rnn_hidden_size):
    enc = params["encoder"]
    att = params["attention"]
    heads = params["heads"]
    b, s, e = input_embedding.shape
    num_predicate = heads["w2"].shape[1] // 2
    share_struct = jax.ShapeDtypeStruct((b, s, e), input_embedding.dtype)
    head_struct = jax.ShapeDtypeStruct((b, s, num_predicate), input_embedding.dtype)
    share_feature, sp_start, sp_end = pl.pallas_call(
        functools.partial(_sp_model_kernel, hidden=rnn_hidden_size,
                          num_heads=num_heads),
        out_shape=(share_struct, head_struct, head_struct),
        in_specs=[_VMEM] * 21,
        out_specs=(_VMEM, _VMEM, _VMEM),
    )(input_embedding, position_embedding, mask,
      enc["l1_wih"], enc["l1_whh"], enc["l1_bih"], enc["l1_bhh"],
      enc["l2_wih"], enc["l2_whh"], enc["l2_bih"], enc["l2_bhh"],
      enc["proj_w"], enc["proj_b"],
      att["wqkv"], att["bqkv"], att["wo"], att["bo"],
      heads["w1"], heads["b1"], heads["w2"], heads["b2"])
    return share_feature, sp_start, sp_end


# ---------------------------------------------------------------------------
# Pure-JAX reference (same fused parameter layout) for a correctness check.
# ---------------------------------------------------------------------------

def reference_forward(params, input_embedding, mask, position_embedding,
                      *, num_heads, rnn_hidden_size):
    H = rnn_hidden_size
    enc = params["encoder"]
    B, S, E = input_embedding.shape
    x = input_embedding + position_embedding

    def bidir_layer(x_bsd, wih, whh, bih, bhh):
        gi = x_bsd @ wih + bih                              # (B, S, 6H)
        h_f = jnp.zeros((B, H), jnp.float32)
        h_b = jnp.zeros((B, H), jnp.float32)
        outs_f = [None] * S
        outs_b = [None] * S
        for t in range(S):
            tb = S - 1 - t
            gh = jnp.concatenate([h_f, h_b], axis=1) @ whh + bhh
            gi_f = gi[:, t, 0:3 * H]
            r = jax.nn.sigmoid(gi_f[:, 0:H] + gh[:, 0:H])
            z = jax.nn.sigmoid(gi_f[:, H:2 * H] + gh[:, H:2 * H])
            n = jnp.tanh(gi_f[:, 2 * H:3 * H] + r * gh[:, 2 * H:3 * H])
            cand_f = (1.0 - z) * n + z * h_f
            m_t = mask[:, t:t + 1]
            h_f = m_t * cand_f + (1.0 - m_t) * h_f
            outs_f[t] = m_t * cand_f
            gi_b = gi[:, tb, 3 * H:6 * H]
            rb = jax.nn.sigmoid(gi_b[:, 0:H] + gh[:, 3 * H:4 * H])
            zb = jax.nn.sigmoid(gi_b[:, H:2 * H] + gh[:, 4 * H:5 * H])
            nb = jnp.tanh(gi_b[:, 2 * H:3 * H] + rb * gh[:, 5 * H:6 * H])
            cand_b = (1.0 - zb) * nb + zb * h_b
            m_tb = mask[:, tb:tb + 1]
            h_b = m_tb * cand_b + (1.0 - m_tb) * h_b
            outs_b[tb] = m_tb * cand_b
        return jnp.stack(
            [jnp.concatenate([outs_f[t], outs_b[t]], axis=1) for t in range(S)], axis=1)

    h1 = bidir_layer(x, enc["l1_wih"], enc["l1_whh"], enc["l1_bih"], enc["l1_bhh"])
    h2 = bidir_layer(h1, enc["l2_wih"], enc["l2_whh"], enc["l2_bih"], enc["l2_bhh"])
    share = h2 @ enc["proj_w"] + enc["proj_b"]

    att = params["attention"]
    heads = params["heads"]
    dh = E // num_heads
    qkv = share @ att["wqkv"] + att["bqkv"]                 # (B, S, 3E)
    q = qkv[..., 0:E].reshape(B, S, num_heads, dh)
    k = qkv[..., E:2 * E].reshape(B, S, num_heads, dh)
    v = qkv[..., 2 * E:3 * E].reshape(B, S, num_heads, dh)
    scores = jnp.einsum("bqhd,bkhd->bhqk", q, k) * (1.0 / (dh ** 0.5))
    scores = scores + (1.0 - mask)[:, None, None, :] * (-1e9)
    p = jax.nn.softmax(scores, axis=-1)
    ctx = jnp.einsum("bhqk,bkhd->bqhd", p, v).reshape(B, S, E)
    outs = ctx @ att["wo"] + att["bo"]
    hmid = jax.nn.relu(outs @ heads["w1"] + heads["b1"])
    y = hmid @ heads["w2"] + heads["b2"]
    P = y.shape[-1] // 2
    return share, y[..., 0:P], y[..., P:2 * P]


# ---------------------------------------------------------------------------
# Deterministic parameter init (fused layouts built once, at init time).
# ---------------------------------------------------------------------------

def init_params(key, embedding_size, num_predicate, num_heads, rnn_hidden_size,
                forward_dim):
    keys = iter(jax.random.split(key, 64))

    def w(shape, scale=0.05):
        return scale * jax.random.normal(next(keys), shape, jnp.float32)

    H, E, F, P = rnn_hidden_size, embedding_size, forward_dim, num_predicate

    def gru_layer(din):
        wih_f, wih_b = w((din, 3 * H)), w((din, 3 * H))
        whh_f, whh_b = w((H, 3 * H)), w((H, 3 * H))
        bih_f, bih_b = w((3 * H,)), w((3 * H,))
        bhh_f, bhh_b = w((3 * H,)), w((3 * H,))
        wih = jnp.concatenate([wih_f, wih_b], axis=1)                    # (din, 6H)
        whh = jnp.zeros((2 * H, 6 * H), jnp.float32)
        whh = whh.at[0:H, 0:3 * H].set(whh_f).at[H:2 * H, 3 * H:6 * H].set(whh_b)
        bih = jnp.concatenate([bih_f, bih_b]).reshape(1, 6 * H)
        bhh = jnp.concatenate([bhh_f, bhh_b]).reshape(1, 6 * H)
        return wih, whh, bih, bhh

    l1 = gru_layer(E)
    l2 = gru_layer(2 * H)
    encoder = {
        "l1_wih": l1[0], "l1_whh": l1[1], "l1_bih": l1[2], "l1_bhh": l1[3],
        "l2_wih": l2[0], "l2_whh": l2[1], "l2_bih": l2[2], "l2_bhh": l2[3],
        "proj_w": w((2 * H, E)), "proj_b": w((E,)).reshape(1, E),
    }

    wq, wk, wv = w((E, E)), w((E, E)), w((E, E))
    bq, bk, bv = w((E,)), w((E,)), w((E,))
    attention = {
        "wqkv": jnp.concatenate([wq, wk, wv], axis=1),                   # (E, 3E)
        "bqkv": jnp.concatenate([bq, bk, bv]).reshape(1, 3 * E),
        "wo": w((E, E)), "bo": w((E,)).reshape(1, E),
    }

    # sp_start / sp_end heads: Linear(E->F) + ReLU + Linear(F->P) each, fused as
    # W1 = [W1_start | W1_end] (E, 2F) and W2 = blockdiag(W2_start, W2_end) (2F, 2P).
    w1_s, b1_s, w2_s, b2_s = w((E, F)), w((F,)), w((F, P)), w((P,))
    w1_e, b1_e, w2_e, b2_e = w((E, F)), w((F,)), w((F, P)), w((P,))
    w2 = jnp.zeros((2 * F, 2 * P), jnp.float32)
    w2 = w2.at[0:F, 0:P].set(w2_s).at[F:2 * F, P:2 * P].set(w2_e)
    heads = {
        "w1": jnp.concatenate([w1_s, w1_e], axis=1),                     # (E, 2F)
        "b1": jnp.concatenate([b1_s, b1_e]).reshape(1, 2 * F),
        "w2": w2,
        "b2": jnp.concatenate([b2_s, b2_e]).reshape(1, 2 * P),
    }

    # NOTE: DGCNNDecoder parameters exist in the PyTorch module but are never used in
    # forward(), so they are intentionally not materialized here.
    return {"encoder": encoder, "attention": attention, "heads": heads}


if __name__ == "__main__":
    embedding_size = 32
    num_predicate = 8
    num_heads = 4
    rnn_hidden_size = 32
    forward_dim = 64
    batch, seq = 2, 8

    key = jax.random.PRNGKey(0)
    kp, kx, kpos = jax.random.split(key, 3)
    params = init_params(kp, embedding_size, num_predicate, num_heads,
                         rnn_hidden_size, forward_dim)
    input_embedding = jax.random.normal(kx, (batch, seq, embedding_size), jnp.float32)
    position_embedding = 0.1 * jax.random.normal(
        kpos, (batch, seq, embedding_size), jnp.float32)
    mask = jnp.ones((batch, seq), jnp.float32).at[1, 6:].set(0.0)

    fwd = jax.jit(functools.partial(subject_predicate_forward,
                                    num_heads=num_heads,
                                    rnn_hidden_size=rnn_hidden_size))
    share_feature, sp_start, sp_end = fwd(params, input_embedding, mask,
                                          position_embedding)
    jax.block_until_ready((share_feature, sp_start, sp_end))

    assert share_feature.shape == (batch, seq, embedding_size)
    assert sp_start.shape == (batch, seq, num_predicate)
    assert sp_end.shape == (batch, seq, num_predicate)

    # Pure-JAX reference check (same fused parameter layout as the kernel).
    ref_fwd = jax.jit(functools.partial(reference_forward,
                                        num_heads=num_heads,
                                        rnn_hidden_size=rnn_hidden_size))
    ref_share, ref_start, ref_end = ref_fwd(params, input_embedding, mask,
                                            position_embedding)
    assert bool(jnp.allclose(share_feature, ref_share, rtol=1e-2, atol=1e-2))
    assert bool(jnp.allclose(sp_start, ref_start, rtol=1e-2, atol=1e-2))
    assert bool(jnp.allclose(sp_end, ref_end, rtol=1e-2, atol=1e-2))

    print("KERNEL_OK")
</pallas_src>

<mosaic_0001>
module attributes {stable_mosaic.version = 11 : i64} {
  func.func @_sp_model_kernel(%arg0: memref<2x8x32xf32, #tpu.memory_space<vmem>>, %arg1: memref<2x8x32xf32, #tpu.memory_space<vmem>>, %arg2: memref<2x8xf32, #tpu.memory_space<vmem>>, %arg3: memref<32x192xf32, #tpu.memory_space<vmem>>, %arg4: memref<64x192xf32, #tpu.memory_space<vmem>>, %arg5: memref<1x192xf32, #tpu.memory_space<vmem>>, %arg6: memref<1x192xf32, #tpu.memory_space<vmem>>, %arg7: memref<64x192xf32, #tpu.memory_space<vmem>>, %arg8: memref<64x192xf32, #tpu.memory_space<vmem>>, %arg9: memref<1x192xf32, #tpu.memory_space<vmem>>, %arg10: memref<1x192xf32, #tpu.memory_space<vmem>>, %arg11: memref<64x32xf32, #tpu.memory_space<vmem>>, %arg12: memref<1x32xf32, #tpu.memory_space<vmem>>, %arg13: memref<32x96xf32, #tpu.memory_space<vmem>>, %arg14: memref<1x96xf32, #tpu.memory_space<vmem>>, %arg15: memref<32x32xf32, #tpu.memory_space<vmem>>, %arg16: memref<1x32xf32, #tpu.memory_space<vmem>>, %arg17: memref<32x128xf32, #tpu.memory_space<vmem>>, %arg18: memref<1x128xf32, #tpu.memory_space<vmem>>, %arg19: memref<128x16xf32, #tpu.memory_space<vmem>>, %arg20: memref<1x16xf32, #tpu.memory_space<vmem>>, %arg21: memref<2x8x32xf32, #tpu.memory_space<vmem>>, %arg22: memref<2x8x8xf32, #tpu.memory_space<vmem>>, %arg23: memref<2x8x8xf32, #tpu.memory_space<vmem>>) attributes {dimension_semantics = [], scalar_prefetch = 0 : i64, scratch_operands = 0 : i64, tpu.core_type = #tpu.core_type<tc>} {
    %c0 = arith.constant 0 : index
    %c0_0 = arith.constant 0 : index
    %0 = vector.load %arg2[%c0, %c0_0] : memref<2x8xf32, #tpu.memory_space<vmem>>, vector<2x8xf32>
    %c0_1 = arith.constant 0 : index
    %c0_2 = arith.constant 0 : index
    %c0_3 = arith.constant 0 : index
    %1 = vector.load %arg0[%c0_1, %c0_2, %c0_3] : memref<2x8x32xf32, #tpu.memory_space<vmem>>, vector<2x8x32xf32>
    %c0_4 = arith.constant 0 : index
    %c0_5 = arith.constant 0 : index
    %c0_6 = arith.constant 0 : index
    %2 = vector.load %arg1[%c0_4, %c0_5, %c0_6] : memref<2x8x32xf32, #tpu.memory_space<vmem>>, vector<2x8x32xf32>
    %3 = arith.addf %1, %2 : vector<2x8x32xf32>
    %c0_7 = arith.constant 0 : index
    %c0_8 = arith.constant 0 : index
    %4 = vector.load %arg3[%c0_7, %c0_8] : memref<32x192xf32, #tpu.memory_space<vmem>>, vector<32x192xf32>
    %c0_9 = arith.constant 0 : index
    %c0_10 = arith.constant 0 : index
    %5 = vector.load %arg4[%c0_9, %c0_10] : memref<64x192xf32, #tpu.memory_space<vmem>>, vector<64x192xf32>
    %c0_11 = arith.constant 0 : index
    %c0_12 = arith.constant 0 : index
    %6 = vector.load %arg5[%c0_11, %c0_12] : memref<1x192xf32, #tpu.memory_space<vmem>>, vector<1x192xf32>
    %c0_13 = arith.constant 0 : index
    %c0_14 = arith.constant 0 : index
    %7 = vector.load %arg6[%c0_13, %c0_14] : memref<1x192xf32, #tpu.memory_space<vmem>>, vector<1x192xf32>
    %8 = vector.shape_cast %3 : vector<2x8x32xf32> to vector<16x32xf32>
    %cst = arith.constant dense<0.000000e+00> : vector<16x192xf32>
    %9 = tpu.matmul %8, %4, %cst {dimension_numbers = #tpu.dot_dimension_numbers<[1], [0], [0], [1], [0, 0, 1, 1], [], []>} : vector<16x32xf32>, vector<32x192xf32>, vector<16x192xf32> -> vector<16x192xf32>
    %10 = vector.broadcast %6 : vector<1x192xf32> to vector<16x192xf32>
    %11 = arith.addf %9, %10 : vector<16x192xf32>
    %12 = vector.shape_cast %11 : vector<16x192xf32> to vector<2x8x192xf32>
    %cst_15 = arith.constant 0.000000e+00 : f32
    %13 = vector.broadcast %cst_15 : f32 to vector<2x32xf32>
    %cst_16 = arith.constant 0.000000e+00 : f32
    %14 = vector.broadcast %cst_16 : f32 to vector<2x32xf32>
    %15 = tpu.concatenate %13, %14 in 1 : vector<2x32xf32>, vector<2x32xf32> -> vector<2x64xf32>
    %cst_17 = arith.constant dense<0.000000e+00> : vector<2x192xf32>
    %16 = tpu.matmul %15, %5, %cst_17 {dimension_numbers = #tpu.dot_dimension_numbers<[1], [0], [0], [1], [0, 0, 1, 1], [], []>} : vector<2x64xf32>, vector<64x192xf32>, vector<2x192xf32> -> vector<2x192xf32>
    %17 = vector.broadcast %7 : vector<1x192xf32> to vector<2x192xf32>
    %18 = arith.addf %16, %17 : vector<2x192xf32>
    %19 = vector.extract_strided_slice %12 {offsets = [0, 0, 0], sizes = [2, 1, 96], strides = [1, 1, 1]} : vector<2x8x192xf32> to vector<2x1x96xf32>
    %20 = vector.shape_cast %19 : vector<2x1x96xf32> to vector<2x96xf32>
    %21 = vector.extract_strided_slice %20 {offsets = [0, 0], sizes = [2, 32], strides = [1, 1]} : vector<2x96xf32> to vector<2x32xf32>
    %22 = vector.extract_strided_slice %18 {offsets = [0, 0], sizes = [2, 32], strides = [1, 1]} : vector<2x192xf32> to vector<2x32xf32>
    %23 = arith.addf %21, %22 : vector<2x32xf32>
    %24 = arith.negf %23 : vector<2x32xf32>
    %25 = math.exp %24 : vector<2x32xf32>
    %cst_18 = arith.constant 1.000000e+00 : f32
    %26 = vector.broadcast %cst_18 : f32 to vector<2x32xf32>
    %27 = arith.addf %26, %25 : vector<2x32xf32>
    %28 = arith.divf %26, %27 : vector<2x32xf32>
    %29 = vector.extract_strided_slice %20 {offsets = [0, 32], sizes = [2, 32], strides = [1, 1]} : vector<2x96xf32> to vector<2x32xf32>
    %30 = vector.extract_strided_slice %18 {offsets = [0, 32], sizes = [2, 32], strides = [1, 1]} : vector<2x192xf32> to vector<2x32xf32>
    %31 = arith.addf %29, %30 : vector<2x32xf32>
    %32 = arith.negf %31 : vector<2x32xf32>
    %33 = math.exp %32 : vector<2x32xf32>
    %cst_19 = arith.constant 1.000000e+00 : f32
    %34 = vector.broadcast %cst_19 : f32 to vector<2x32xf32>
    %35 = arith.addf %34, %33 : vector<2x32xf32>
    %36 = arith.divf %34, %35 : vector<2x32xf32>
    %37 = vector.extract_strided_slice %20 {offsets = [0, 64], sizes = [2, 32], strides = [1, 1]} : vector<2x96xf32> to vector<2x32xf32>
    %38 = vector.extract_strided_slice %18 {offsets = [0, 64], sizes = [2, 32], strides = [1, 1]} : vector<2x192xf32> to vector<2x32xf32>
    %39 = arith.mulf %28, %38 : vector<2x32xf32>
    %40 = arith.addf %37, %39 : vector<2x32xf32>
    %41 = math.tanh %40 : vector<2x32xf32>
    %cst_20 = arith.constant 1.000000e+00 : f32
    %42 = vector.broadcast %cst_20 : f32 to vector<2x32xf32>
    %43 = arith.subf %42, %36 : vector<2x32xf32>
    %44 = arith.mulf %43, %41 : vector<2x32xf32>
    %45 = arith.mulf %36, %13 : vector<2x32xf32>
    %46 = arith.addf %44, %45 : vector<2x32xf32>
    %47 = vector.extract_strided_slice %0 {offsets = [0, 0], sizes = [2, 1], strides = [1, 1]} : vector<2x8xf32> to vector<2x1xf32>
    %48 = vector.broadcast %47 : vector<2x1xf32> to vector<2x32xf32>
    %49 = arith.mulf %48, %46 : vector<2x32xf32>
    %cst_21 = arith.constant 1.000000e+00 : f32
    %50 = vector.broadcast %cst_21 : f32 to vector<2x1xf32>
    %51 = arith.subf %50, %47 : vector<2x1xf32>
    %52 = vector.broadcast %51 : vector<2x1xf32> to vector<2x32xf32>
    %53 = arith.mulf %52, %13 : vector<2x32xf32>
    %54 = arith.addf %49, %53 : vector<2x32xf32>
    %55 = vector.broadcast %47 : vector<2x1xf32> to vector<2x32xf32>
    %56 = arith.mulf %55, %46 : vector<2x32xf32>
    %57 = vector.extract_strided_slice %12 {offsets = [0, 7, 96], sizes = [2, 1, 96], strides = [1, 1, 1]} : vector<2x8x192xf32> to vector<2x1x96xf32>
    %58 = vector.shape_cast %57 : vector<2x1x96xf32> to vector<2x96xf32>
    %59 = vector.extract_strided_slice %58 {offsets = [0, 0], sizes = [2, 32], strides = [1, 1]} : vector<2x96xf32> to vector<2x32xf32>
    %60 = vector.extract_strided_slice %18 {offsets = [0, 96], sizes = [2, 32], strides = [1, 1]} : vector<2x192xf32> to vector<2x32xf32>
    %61 = arith.addf %59, %60 : vector<2x32xf32>
    %62 = arith.negf %61 : vector<2x32xf32>
    %63 = math.exp %62 : vector<2x32xf32>
    %cst_22 = arith.constant 1.000000e+00 : f32
    %64 = vector.broadcast %cst_22 : f32 to vector<2x32xf32>
    %65 = arith.addf %64, %63 : vector<2x32xf32>
    %66 = arith.divf %64, %65 : vector<2x32xf32>
    %67 = vector.extract_strided_slice %58 {offsets = [0, 32], sizes = [2, 32], strides = [1, 1]} : vector<2x96xf32> to vector<2x32xf32>
    %68 = vector.extract_strided_slice %18 {offsets = [0, 128], sizes = [2, 32], strides = [1, 1]} : vector<2x192xf32> to vector<2x32xf32>
    %69 = arith.addf %67, %68 : vector<2x32xf32>
    %70 = arith.negf %69 : vector<2x32xf32>
    %71 = math.exp %70 : vector<2x32xf32>
    %cst_23 = arith.constant 1.000000e+00 : f32
    %72 = vector.broadcast %cst_23 : f32 to vector<2x32xf32>
    %73 = arith.addf %72, %71 : vector<2x32xf32>
    %74 = arith.divf %72, %73 : vector<2x32xf32>
    %75 = vector.extract_strided_slice %58 {offsets = [0, 64], sizes = [2, 32], strides = [1, 1]} : vector<2x96xf32> to vector<2x32xf32>
    %76 = vector.extract_strided_slice %18 {offsets = [0, 160], sizes = [2, 32], strides = [1, 1]} : vector<2x192xf32> to vector<2x32xf32>
    %77 = arith.mulf %66, %76 : vector<2x32xf32>
    %78 = arith.addf %75, %77 : vector<2x32xf32>
    %79 = math.tanh %78 : vector<2x32xf32>
    %cst_24 = arith.constant 1.000000e+00 : f32
    %80 = vector.broadcast %cst_24 : f32 to vector<2x32xf32>
    %81 = arith.subf %80, %74 : vector<2x32xf32>
    %82 = arith.mulf %81, %79 : vector<2x32xf32>
    %83 = arith.mulf %74, %14 : vector<2x32xf32>
    %84 = arith.addf %82, %83 : vector<2x32xf32>
    %85 = vector.extract_strided_slice %0 {offsets = [0, 7], sizes = [2, 1], strides = [1, 1]} : vector<2x8xf32> to vector<2x1xf32>
    %86 = vector.broadcast %85 : vector<2x1xf32> to vector<2x32xf32>
    %87 = arith.mulf %86, %84 : vector<2x32xf32>
    %cst_25 = arith.constant 1.000000e+00 : f32
    %88 = vector.broadcast %cst_25 : f32 to vector<2x1xf32>
    %89 = arith.subf %88, %85 : vector<2x1xf32>
    %90 = vector.broadcast %89 : vector<2x1xf32> to vector<2x32xf32>
    %91 = arith.mulf %90, %14 : vector<2x32xf32>
    %92 = arith.addf %87, %91 : vector<2x32xf32>
    %93 = vector.broadcast %85 : vector<2x1xf32> to vector<2x32xf32>
    %94 = arith.mulf %93, %84 : vector<2x32xf32>
    %95 = tpu.concatenate %54, %92 in 1 : vector<2x32xf32>, vector<2x32xf32> -> vector<2x64xf32>
    %cst_26 = arith.constant dense<0.000000e+00> : vector<2x192xf32>
    %96 = tpu.matmul %95, %5, %cst_26 {dimension_numbers = #tpu.dot_dimension_numbers<[1], [0], [0], [1], [0, 0, 1, 1], [], []>} : vector<2x64xf32>, vector<64x192xf32>, vector<2x192xf32> -> vector<2x192xf32>
    %97 = vector.broadcast %7 : vector<1x192xf32> to vector<2x192xf32>
    %98 = arith.addf %96, %97 : vector<2x192xf32>
    %99 = vector.extract_strided_slice %12 {offsets = [0, 1, 0], sizes = [2, 1, 96], strides = [1, 1, 1]} : vector<2x8x192xf32> to vector<2x1x96xf32>
    %100 = vector.shape_cast %99 : vector<2x1x96xf32> to vector<2x96xf32>
    %101 = vector.extract_strided_slice %100 {offsets = [0, 0], sizes = [2, 32], strides = [1, 1]} : vector<2x96xf32> to vector<2x32xf32>
    %102 = vector.extract_strided_slice %98 {offsets = [0, 0], sizes = [2, 32], strides = [1, 1]} : vector<2x192xf32> to vector<2x32xf32>
    %103 = arith.addf %101, %102 : vector<2x32xf32>
    %104 = arith.negf %103 : vector<2x32xf32>
    %105 = math.exp %104 : vector<2x32xf32>
    %cst_27 = arith.constant 1.000000e+00 : f32
    %106 = vector.broadcast %cst_27 : f32 to vector<2x32xf32>
    %107 = arith.addf %106, %105 : vector<2x32xf32>
    %108 = arith.divf %106, %107 : vector<2x32xf32>
    %109 = vector.extract_strided_slice %100 {offsets = [0, 32], sizes = [2, 32], strides = [1, 1]} : vector<2x96xf32> to vector<2x32xf32>
    %110 = vector.extract_strided_slice %98 {offsets = [0, 32], sizes = [2, 32], strides = [1, 1]} : vector<2x192xf32> to vector<2x32xf32>
    %111 = arith.addf %109, %110 : vector<2x32xf32>
    %112 = arith.negf %111 : vector<2x32xf32>
    %113 = math.exp %112 : vector<2x32xf32>
    %cst_28 = arith.constant 1.000000e+00 : f32
    %114 = vector.broadcast %cst_28 : f32 to vector<2x32xf32>
    %115 = arith.addf %114, %113 : vector<2x32xf32>
    %116 = arith.divf %114, %115 : vector<2x32xf32>
    %117 = vector.extract_strided_slice %100 {offsets = [0, 64], sizes = [2, 32], strides = [1, 1]} : vector<2x96xf32> to vector<2x32xf32>
    %118 = vector.extract_strided_slice %98 {offsets = [0, 64], sizes = [2, 32], strides = [1, 1]} : vector<2x192xf32> to vector<2x32xf32>
    %119 = arith.mulf %108, %118 : vector<2x32xf32>
    %120 = arith.addf %117, %119 : vector<2x32xf32>
    %121 = math.tanh %120 : vector<2x32xf32>
    %cst_29 = arith.constant 1.000000e+00 : f32
    %122 = vector.broadcast %cst_29 : f32 to vector<2x32xf32>
    %123 = arith.subf %122, %116 : vector<2x32xf32>
    %124 = arith.mulf %123, %121 : vector<2x32xf32>
    %125 = arith.mulf %116, %54 : vector<2x32xf32>
    %126 = arith.addf %124, %125 : vector<2x32xf32>
    %127 = vector.extract_strided_slice %0 {offsets = [0, 1], sizes = [2, 1], strides = [1, 1]} : vector<2x8xf32> to vector<2x1xf32>
    %128 = vector.broadcast %127 : vector<2x1xf32> to vector<2x32xf32>
    %129 = arith.mulf %128, %126 : vector<2x32xf32>
    %cst_30 = arith.constant 1.000000e+00 : f32
    %130 = vector.broadcast %cst_30 : f32 to vector<2x1xf32>
    %131 = arith.subf %130, %127 : vector<2x1xf32>
    %132 = vector.broadcast %131 : vector<2x1xf32> to vector<2x32xf32>
    %133 = arith.mulf %132, %54 : vector<2x32xf32>
    %134 = arith.addf %129, %133 : vector<2x32xf32>
    %135 = vector.broadcast %127 : vector<2x1xf32> to vector<2x32xf32>
    %136 = arith.mulf %135, %126 : vector<2x32xf32>
    %137 = vector.extract_strided_slice %12 {offsets = [0, 6, 96], sizes = [2, 1, 96], strides = [1, 1, 1]} : vector<2x8x192xf32> to vector<2x1x96xf32>
    %138 = vector.shape_cast %137 : vector<2x1x96xf32> to vector<2x96xf32>
    %139 = vector.extract_strided_slice %138 {offsets = [0, 0], sizes = [2, 32], strides = [1, 1]} : vector<2x96xf32> to vector<2x32xf32>
    %140 = vector.extract_strided_slice %98 {offsets = [0, 96], sizes = [2, 32], strides = [1, 1]} : vector<2x192xf32> to vector<2x32xf32>
    %141 = arith.addf %139, %140 : vector<2x32xf32>
    %142 = arith.negf %141 : vector<2x32xf32>
    %143 = math.exp %142 : vector<2x32xf32>
    %cst_31 = arith.constant 1.000000e+00 : f32
    %144 = vector.broadcast %cst_31 : f32 to vector<2x32xf32>
    %145 = arith.addf %144, %143 : vector<2x32xf32>
    %146 = arith.divf %144, %145 : vector<2x32xf32>
    %147 = vector.extract_strided_slice %138 {offsets = [0, 32], sizes = [2, 32], strides = [1, 1]} : vector<2x96xf32> to vector<2x32xf32>
    %148 = vector.extract_strided_slice %98 {offsets = [0, 128], sizes = [2, 32], strides = [1, 1]} : vector<2x192xf32> to vector<2x32xf32>
    %149 = arith.addf %147, %148 : vector<2x32xf32>
    %150 = arith.negf %149 : vector<2x32xf32>
    %151 = math.exp %150 : vector<2x32xf32>
    %cst_32 = arith.constant 1.000000e+00 : f32
    %152 = vector.broadcast %cst_32 : f32 to vector<2x32xf32>
    %153 = arith.addf %152, %151 : vector<2x32xf32>
    %154 = arith.divf %152, %153 : vector<2x32xf32>
    %155 = vector.extract_strided_slice %138 {offsets = [0, 64], sizes = [2, 32], strides = [1, 1]} : vector<2x96xf32> to vector<2x32xf32>
    %156 = vector.extract_strided_slice %98 {offsets = [0, 160], sizes = [2, 32], strides = [1, 1]} : vector<2x192xf32> to vector<2x32xf32>
    %157 = arith.mulf %146, %156 : vector<2x32xf32>
    %158 = arith.addf %155, %157 : vector<2x32xf32>
    %159 = math.tanh %158 : vector<2x32xf32>
    %cst_33 = arith.constant 1.000000e+00 : f32
    %160 = vector.broadcast %cst_33 : f32 to vector<2x32xf32>
    %161 = arith.subf %160, %154 : vector<2x32xf32>
    %162 = arith.mulf %161, %159 : vector<2x32xf32>
    %163 = arith.mulf %154, %92 : vector<2x32xf32>
    %164 = arith.addf %162, %163 : vector<2x32xf32>
    %165 = vector.extract_strided_slice %0 {offsets = [0, 6], sizes = [2, 1], strides = [1, 1]} : vector<2x8xf32> to vector<2x1xf32>
    %166 = vector.broadcast %165 : vector<2x1xf32> to vector<2x32xf32>
    %167 = arith.mulf %166, %164 : vector<2x32xf32>
    %cst_34 = arith.constant 1.000000e+00 : f32
    %168 = vector.broadcast %cst_34 : f32 to vector<2x1xf32>
    %169 = arith.subf %168, %165 : vector<2x1xf32>
    %170 = vector.broadcast %169 : vector<2x1xf32> to vector<2x32xf32>
    %171 = arith.mulf %170, %92 : vector<2x32xf32>
    %172 = arith.addf %167, %171 : vector<2x32xf32>
    %173 = vector.broadcast %165 : vector<2x1xf32> to vector<2x32xf32>
    %174 = arith.mulf %173, %164 : vector<2x32xf32>
    %175 = tpu.concatenate %134, %172 in 1 : vector<2x32xf32>, vector<2x32xf32> -> vector<2x64xf32>
    %cst_35 = arith.constant dense<0.000000e+00> : vector<2x192xf32>
    %176 = tpu.matmul %175, %5, %cst_35 {dimension_numbers = #tpu.dot_dimension_numbers<[1], [0], [0], [1], [0, 0, 1, 1], [], []>} : vector<2x64xf32>, vector<64x192xf32>, vector<2x192xf32> -> vector<2x192xf32>
    %177 = vector.broadcast %7 : vector<1x192xf32> to vector<2x192xf32>
    %178 = arith.addf %176, %177 : vector<2x192xf32>
    %179 = vector.extract_strided_slice %12 {offsets = [0, 2, 0], sizes = [2, 1, 96], strides = [1, 1, 1]} : vector<2x8x192xf32> to vector<2x1x96xf32>
    %180 = vector.shape_cast %179 : vector<2x1x96xf32> to vector<2x96xf32>
    %181 = vector.extract_strided_slice %180 {offsets = [0, 0], sizes = [2, 32], strides = [1, 1]} : vector<2x96xf32> to vector<2x32xf32>
    %182 = vector.extract_strided_slice %178 {offsets = [0, 0], sizes = [2, 32], strides = [1, 1]} : vector<2x192xf32> to vector<2x32xf32>
    %183 = arith.addf %181, %182 : vector<2x32xf32>
    %184 = arith.negf %183 : vector<2x32xf32>
    %185 = math.exp %184 : vector<2x32xf32>
    %cst_36 = arith.constant 1.000000e+00 : f32
    %186 = vector.broadcast %cst_36 : f32 to vector<2x32xf32>
    %187 = arith.addf %186, %185 : vector<2x32xf32>
    %188 = arith.divf %186, %187 : vector<2x32xf32>
    %189 = vector.extract_strided_slice %180 {offsets = [0, 32], sizes = [2, 32], strides = [1, 1]} : vector<2x96xf32> to vector<2x32xf32>
    %190 = vector.extract_strided_slice %178 {offsets = [0, 32], sizes = [2, 32], strides = [1, 1]} : vector<2x192xf32> to vector<2x32xf32>
    %191 = arith.addf %189, %190 : vector<2x32xf32>
    %192 = arith.negf %191 : vector<2x32xf32>
    %193 = math.exp %192 : vector<2x32xf32>
    %cst_37 = arith.constant 1.000000e+00 : f32
    %194 = vector.broadcast %cst_37 : f32 to vector<2x32xf32>
    %195 = arith.addf %194, %193 : vector<2x32xf32>
    %196 = arith.divf %194, %195 : vector<2x32xf32>
    %197 = vector.extract_strided_slice %180 {offsets = [0, 64], sizes = [2, 32], strides = [1, 1]} : vector<2x96xf32> to vector<2x32xf32>
    %198 = vector.extract_strided_slice %178 {offsets = [0, 64], sizes = [2, 32], strides = [1, 1]} : vector<2x192xf32> to vector<2x32xf32>
    %199 = arith.mulf %188, %198 : vector<2x32xf32>
    %200 = arith.addf %197, %199 : vector<2x32xf32>
    %201 = math.tanh %200 : vector<2x32xf32>
    %cst_38 = arith.constant 1.000000e+00 : f32
    %202 = vector.broadcast %cst_38 : f32 to vector<2x32xf32>
    %203 = arith.subf %202, %196 : vector<2x32xf32>
    %204 = arith.mulf %203, %201 : vector<2x32xf32>
    %205 = arith.mulf %196, %134 : vector<2x32xf32>
    %206 = arith.addf %204, %205 : vector<2x32xf32>
    %207 = vector.extract_strided_slice %0 {offsets = [0, 2], sizes = [2, 1], strides = [1, 1]} : vector<2x8xf32> to vector<2x1xf32>
    %208 = vector.broadcast %207 : vector<2x1xf32> to vector<2x32xf32>
    %209 = arith.mulf %208, %206 : vector<2x32xf32>
    %cst_39 = arith.constant 1.000000e+00 : f32
    %210 = vector.broadcast %cst_39 : f32 to vector<2x1xf32>
    %211 = arith.subf %210, %207 : vector<2x1xf32>
    %212 = vector.broadcast %211 : vector<2x1xf32> to vector<2x32xf32>
    %213 = arith.mulf %212, %134 : vector<2x32xf32>
    %214 = arith.addf %209, %213 : vector<2x32xf32>
    %215 = vector.broadcast %207 : vector<2x1xf32> to vector<2x32xf32>
    %216 = arith.mulf %215, %206 : vector<2x32xf32>
    %217 = vector.extract_strided_slice %12 {offsets = [0, 5, 96], sizes = [2, 1, 96], strides = [1, 1, 1]} : vector<2x8x192xf32> to vector<2x1x96xf32>
    %218 = vector.shape_cast %217 : vector<2x1x96xf32> to vector<2x96xf32>
    %219 = vector.extract_strided_slice %218 {offsets = [0, 0], sizes = [2, 32], strides = [1, 1]} : vector<2x96xf32> to vector<2x32xf32>
    %220 = vector.extract_strided_slice %178 {offsets = [0, 96], sizes = [2, 32], strides = [1, 1]} : vector<2x192xf32> to vector<2x32xf32>
    %221 = arith.addf %219, %220 : vector<2x32xf32>
    %222 = arith.negf %221 : vector<2x32xf32>
    %223 = math.exp %222 : vector<2x32xf32>
    %cst_40 = arith.constant 1.000000e+00 : f32
    %224 = vector.broadcast %cst_40 : f32 to vector<2x32xf32>
    %225 = arith.addf %224, %223 : vector<2x32xf32>
    %226 = arith.divf %224, %225 : vector<2x32xf32>
    %227 = vector.extract_strided_slice %218 {offsets = [0, 32], sizes = [2, 32], strides = [1, 1]} : vector<2x96xf32> to vector<2x32xf32>
    %228 = vector.extract_strided_slice %178 {offsets = [0, 128], sizes = [2, 32], strides = [1, 1]} : vector<2x192xf32> to vector<2x32xf32>
    %229 = arith.addf %227, %228 : vector<2x32xf32>
    %230 = arith.negf %229 : vector<2x32xf32>
    %231 = math.exp %230 : vector<2x32xf32>
    %cst_41 = arith.constant 1.000000e+00 : f32
    %232 = vector.broadcast %cst_41 : f32 to vector<2x32xf32>
    %233 = arith.addf %232, %231 : vector<2x32xf32>
    %234 = arith.divf %232, %233 : vector<2x32xf32>
    %235 = vector.extract_strided_slice %218 {offsets = [0, 64], sizes = [2, 32], strides = [1, 1]} : vector<2x96xf32> to vector<2x32xf32>
    %236 = vector.extract_strided_slice %178 {offsets = [0, 160], sizes = [2, 32], strides = [1, 1]} : vector<2x192xf32> to vector<2x32xf32>
    %237 = arith.mulf %226, %236 : vector<2x32xf32>
    %238 = arith.addf %235, %237 : vector<2x32xf32>
    %239 = math.tanh %238 : vector<2x32xf32>
    %cst_42 = arith.constant 1.000000e+00 : f32
    %240 = vector.broadcast %cst_42 : f32 to vector<2x32xf32>
    %241 = arith.subf %240, %234 : vector<2x32xf32>
    %242 = arith.mulf %241, %239 : vector<2x32xf32>
    %243 = arith.mulf %234, %172 : vector<2x32xf32>
    %244 = arith.addf %242, %243 : vector<2x32xf32>
    %245 = vector.extract_strided_slice %0 {offsets = [0, 5], sizes = [2, 1], strides = [1, 1]} : vector<2x8xf32> to vector<2x1xf32>
    %246 = vector.broadcast %245 : vector<2x1xf32> to vector<2x32xf32>
    %247 = arith.mulf %246, %244 : vector<2x32xf32>
    %cst_43 = arith.constant 1.000000e+00 : f32
    %248 = vector.broadcast %cst_43 : f32 to vector<2x1xf32>
    %249 = arith.subf %248, %245 : vector<2x1xf32>
    %250 = vector.broadcast %249 : vector<2x1xf32> to vector<2x32xf32>
    %251 = arith.mulf %250, %172 : vector<2x32xf32>
    %252 = arith.addf %247, %251 : vector<2x32xf32>
    %253 = vector.broadcast %245 : vector<2x1xf32> to vector<2x32xf32>
    %254 = arith.mulf %253, %244 : vector<2x32xf32>
    %255 = tpu.concatenate %214, %252 in 1 : vector<2x32xf32>, vector<2x32xf32> -> vector<2x64xf32>
    %cst_44 = arith.constant dense<0.000000e+00> : vector<2x192xf32>
    %256 = tpu.matmul %255, %5, %cst_44 {dimension_numbers = #tpu.dot_dimension_numbers<[1], [0], [0], [1], [0, 0, 1, 1], [], []>} : vector<2x64xf32>, vector<64x192xf32>, vector<2x192xf32> -> vector<2x192xf32>
    %257 = vector.broadcast %7 : vector<1x192xf32> to vector<2x192xf32>
    %258 = arith.addf %256, %257 : vector<2x192xf32>
    %259 = vector.extract_strided_slice %12 {offsets = [0, 3, 0], sizes = [2, 1, 96], strides = [1, 1, 1]} : vector<2x8x192xf32> to vector<2x1x96xf32>
    %260 = vector.shape_cast %259 : vector<2x1x96xf32> to vector<2x96xf32>
    %261 = vector.extract_strided_slice %260 {offsets = [0, 0], sizes = [2, 32], strides = [1, 1]} : vector<2x96xf32> to vector<2x32xf32>
    %262 = vector.extract_strided_slice %258 {offsets = [0, 0], sizes = [2, 32], strides = [1, 1]} : vector<2x192xf32> to vector<2x32xf32>
    %263 = arith.addf %261, %262 : vector<2x32xf32>
    %264 = arith.negf %263 : vector<2x32xf32>
    %265 = math.exp %264 : vector<2x32xf32>
    %cst_45 = arith.constant 1.000000e+00 : f32
    %266 = vector.broadcast %cst_45 : f32 to vector<2x32xf32>
    %267 = arith.addf %266, %265 : vector<2x32xf32>
    %268 = arith.divf %266, %267 : vector<2x32xf32>
    %269 = vector.extract_strided_slice %260 {offsets = [0, 32], sizes = [2, 32], strides = [1, 1]} : vector<2x96xf32> to vector<2x32xf32>
    %270 = vector.extract_strided_slice %258 {offsets = [0, 32], sizes = [2, 32], strides = [1, 1]} : vector<2x192xf32> to vector<2x32xf32>
    %271 = arith.addf %269, %270 : vector<2x32xf32>
    %272 = arith.negf %271 : vector<2x32xf32>
    %273 = math.exp %272 : vector<2x32xf32>
    %cst_46 = arith.constant 1.000000e+00 : f32
    %274 = vector.broadcast %cst_46 : f32 to vector<2x32xf32>
    %275 = arith.addf %274, %273 : vector<2x32xf32>
    %276 = arith.divf %274, %275 : vector<2x32xf32>
    %277 = vector.extract_strided_slice %260 {offsets = [0, 64], sizes = [2, 32], strides = [1, 1]} : vector<2x96xf32> to vector<2x32xf32>
    %278 = vector.extract_strided_slice %258 {offsets = [0, 64], sizes = [2, 32], strides = [1, 1]} : vector<2x192xf32> to vector<2x32xf32>
    %279 = arith.mulf %268, %278 : vector<2x32xf32>
    %280 = arith.addf %277, %279 : vector<2x32xf32>
    %281 = math.tanh %280 : vector<2x32xf32>
    %cst_47 = arith.constant 1.000000e+00 : f32
    %282 = vector.broadcast %cst_47 : f32 to vector<2x32xf32>
    %283 = arith.subf %282, %276 : vector<2x32xf32>
    %284 = arith.mulf %283, %281 : vector<2x32xf32>
    %285 = arith.mulf %276, %214 : vector<2x32xf32>
    %286 = arith.addf %284, %285 : vector<2x32xf32>
    %287 = vector.extract_strided_slice %0 {offsets = [0, 3], sizes = [2, 1], strides = [1, 1]} : vector<2x8xf32> to vector<2x1xf32>
    %288 = vector.broadcast %287 : vector<2x1xf32> to vector<2x32xf32>
    %289 = arith.mulf %288, %286 : vector<2x32xf32>
    %cst_48 = arith.constant 1.000000e+00 : f32
    %290 = vector.broadcast %cst_48 : f32 to vector<2x1xf32>
    %291 = arith.subf %290, %287 : vector<2x1xf32>
    %292 = vector.broadcast %291 : vector<2x1xf32> to vector<2x32xf32>
    %293 = arith.mulf %292, %214 : vector<2x32xf32>
    %294 = arith.addf %289, %293 : vector<2x32xf32>
    %295 = vector.broadcast %287 : vector<2x1xf32> to vector<2x32xf32>
    %296 = arith.mulf %295, %286 : vector<2x32xf32>
    %297 = vector.extract_strided_slice %12 {offsets = [0, 4, 96], sizes = [2, 1, 96], strides = [1, 1, 1]} : vector<2x8x192xf32> to vector<2x1x96xf32>
    %298 = vector.shape_cast %297 : vector<2x1x96xf32> to vector<2x96xf32>
    %299 = vector.extract_strided_slice %298 {offsets = [0, 0], sizes = [2, 32], strides = [1, 1]} : vector<2x96xf32> to vector<2x32xf32>
    %300 = vector.extract_strided_slice %258 {offsets = [0, 96], sizes = [2, 32], strides = [1, 1]} : vector<2x192xf32> to vector<2x32xf32>
    %301 = arith.addf %299, %300 : vector<2x32xf32>
    %302 = arith.negf %301 : vector<2x32xf32>
    %303 = math.exp %302 : vector<2x32xf32>
    %cst_49 = arith.constant 1.000000e+00 : f32
    %304 = vector.broadcast %cst_49 : f32 to vector<2x32xf32>
    %305 = arith.addf %304, %303 : vector<2x32xf32>
    %306 = arith.divf %304, %305 : vector<2x32xf32>
    %307 = vector.extract_strided_slice %298 {offsets = [0, 32], sizes = [2, 32], strides = [1, 1]} : vector<2x96xf32> to vector<2x32xf32>
    %308 = vector.extract_strided_slice %258 {offsets = [0, 128], sizes = [2, 32], strides = [1, 1]} : vector<2x192xf32> to vector<2x32xf32>
    %309 = arith.addf %307, %308 : vector<2x32xf32>
    %310 = arith.negf %309 : vector<2x32xf32>
    %311 = math.exp %310 : vector<2x32xf32>
    %cst_50 = arith.constant 1.000000e+00 : f32
    %312 = vector.broadcast %cst_50 : f32 to vector<2x32xf32>
    %313 = arith.addf %312, %311 : vector<2x32xf32>
    %314 = arith.divf %312, %313 : vector<2x32xf32>
    %315 = vector.extract_strided_slice %298 {offsets = [0, 64], sizes = [2, 32], strides = [1, 1]} : vector<2x96xf32> to vector<2x32xf32>
    %316 = vector.extract_strided_slice %258 {offsets = [0, 160], sizes = [2, 32], strides = [1, 1]} : vector<2x192xf32> to vector<2x32xf32>
    %317 = arith.mulf %306, %316 : vector<2x32xf32>
    %318 = arith.addf %315, %317 : vector<2x32xf32>
    %319 = math.tanh %318 : vector<2x32xf32>
    %cst_51 = arith.constant 1.000000e+00 : f32
    %320 = vector.broadcast %cst_51 : f32 to vector<2x32xf32>
    %321 = arith.subf %320, %314 : vector<2x32xf32>
    %322 = arith.mulf %321, %319 : vector<2x32xf32>
    %323 = arith.mulf %314, %252 : vector<2x32xf32>
    %324 = arith.addf %322, %323 : vector<2x32xf32>
    %325 = vector.extract_strided_slice %0 {offsets = [0, 4], sizes = [2, 1], strides = [1, 1]} : vector<2x8xf32> to vector<2x1xf32>
    %326 = vector.broadcast %325 : vector<2x1xf32> to vector<2x32xf32>
    %327 = arith.mulf %326, %324 : vector<2x32xf32>
    %cst_52 = arith.constant 1.000000e+00 : f32
    %328 = vector.broadcast %cst_52 : f32 to vector<2x1xf32>
    %329 = arith.subf %328, %325 : vector<2x1xf32>
    %330 = vector.broadcast %329 : vector<2x1xf32> to vector<2x32xf32>
    %331 = arith.mulf %330, %252 : vector<2x32xf32>
    %332 = arith.addf %327, %331 : vector<2x32xf32>
    %333 = vector.broadcast %325 : vector<2x1xf32> to vector<2x32xf32>
    %334 = arith.mulf %333, %324 : vector<2x32xf32>
    %335 = tpu.concatenate %294, %332 in 1 : vector<2x32xf32>, vector<2x32xf32> -> vector<2x64xf32>
    %cst_53 = arith.constant dense<0.000000e+00> : vector<2x192xf32>
    %336 = tpu.matmul %335, %5, %cst_53 {dimension_numbers = #tpu.dot_dimension_numbers<[1], [0], [0], [1], [0, 0, 1, 1], [], []>} : vector<2x64xf32>, vector<64x192xf32>, vector<2x192xf32> -> vector<2x192xf32>
    %337 = vector.broadcast %7 : vector<1x192xf32> to vector<2x192xf32>
    %338 = arith.addf %336, %337 : vector<2x192xf32>
    %339 = vector.extract_strided_slice %12 {offsets = [0, 4, 0], sizes = [2, 1, 96], strides = [1, 1, 1]} : vector<2x8x192xf32> to vector<2x1x96xf32>
    %340 = vector.shape_cast %339 : vector<2x1x96xf32> to vector<2x96xf32>
    %341 = vector.extract_strided_slice %340 {offsets = [0, 0], sizes = [2, 32], strides = [1, 1]} : vector<2x96xf32> to vector<2x32xf32>
    %342 = vector.extract_strided_slice %338 {offsets = [0, 0], sizes = [2, 32], strides = [1, 1]} : vector<2x192xf32> to vector<2x32xf32>
    %343 = arith.addf %341, %342 : vector<2x32xf32>
    %344 = arith.negf %343 : vector<2x32xf32>
    %345 = math.exp %344 : vector<2x32xf32>
    %cst_54 = arith.constant 1.000000e+00 : f32
    %346 = vector.broadcast %cst_54 : f32 to vector<2x32xf32>
    %347 = arith.addf %346, %345 : vector<2x32xf32>
    %348 = arith.divf %346, %347 : vector<2x32xf32>
    %349 = vector.extract_strided_slice %340 {offsets = [0, 32], sizes = [2, 32], strides = [1, 1]} : vector<2x96xf32> to vector<2x32xf32>
    %350 = vector.extract_strided_slice %338 {offsets = [0, 32], sizes = [2, 32], strides = [1, 1]} : vector<2x192xf32> to vector<2x32xf32>
    %351 = arith.addf %349, %350 : vector<2x32xf32>
    %352 = arith.negf %351 : vector<2x32xf32>
    %353 = math.exp %352 : vector<2x32xf32>
    %cst_55 = arith.constant 1.000000e+00 : f32
    %354 = vector.broadcast %cst_55 : f32 to vector<2x32xf32>
    %355 = arith.addf %354, %353 : vector<2x32xf32>
    %356 = arith.divf %354, %355 : vector<2x32xf32>
    %357 = vector.extract_strided_slice %340 {offsets = [0, 64], sizes = [2, 32], strides = [1, 1]} : vector<2x96xf32> to vector<2x32xf32>
    %358 = vector.extract_strided_slice %338 {offsets = [0, 64], sizes = [2, 32], strides = [1, 1]} : vector<2x192xf32> to vector<2x32xf32>
    %359 = arith.mulf %348, %358 : vector<2x32xf32>
    %360 = arith.addf %357, %359 : vector<2x32xf32>
    %361 = math.tanh %360 : vector<2x32xf32>
    %cst_56 = arith.constant 1.000000e+00 : f32
    %362 = vector.broadcast %cst_56 : f32 to vector<2x32xf32>
    %363 = arith.subf %362, %356 : vector<2x32xf32>
    %364 = arith.mulf %363, %361 : vector<2x32xf32>
    %365 = arith.mulf %356, %294 : vector<2x32xf32>
    %366 = arith.addf %364, %365 : vector<2x32xf32>
    %367 = vector.extract_strided_slice %0 {offsets = [0, 4], sizes = [2, 1], strides = [1, 1]} : vector<2x8xf32> to vector<2x1xf32>
    %368 = vector.broadcast %367 : vector<2x1xf32> to vector<2x32xf32>
    %369 = arith.mulf %368, %366 : vector<2x32xf32>
    %cst_57 = arith.constant 1.000000e+00 : f32
    %370 = vector.broadcast %cst_57 : f32 to vector<2x1xf32>
    %371 = arith.subf %370, %367 : vector<2x1xf32>
    %372 = vector.broadcast %371 : vector<2x1xf32> to vector<2x32xf32>
    %373 = arith.mulf %372, %294 : vector<2x32xf32>
    %374 = arith.addf %369, %373 : vector<2x32xf32>
    %375 = vector.broadcast %367 : vector<2x1xf32> to vector<2x32xf32>
    %376 = arith.mulf %375, %366 : vector<2x32xf32>
    %377 = vector.extract_strided_slice %12 {offsets = [0, 3, 96], sizes = [2, 1, 96], strides = [1, 1, 1]} : vector<2x8x192xf32> to vector<2x1x96xf32>
    %378 = vector.shape_cast %377 : vector<2x1x96xf32> to vector<2x96xf32>
    %379 = vector.extract_strided_slice %378 {offsets = [0, 0], sizes = [2, 32], strides = [1, 1]} : vector<2x96xf32> to vector<2x32xf32>
    %380 = vector.extract_strided_slice %338 {offsets = [0, 96], sizes = [2, 32], strides = [1, 1]} : vector<2x192xf32> to vector<2x32xf32>
    %381 = arith.addf %379, %380 : vector<2x32xf32>
    %382 = arith.negf %381 : vector<2x32xf32>
    %383 = math.exp %382 : vector<2x32xf32>
    %cst_58 = arith.constant 1.000000e+00 : f32
    %384 = vector.broadcast %cst_58 : f32 to vector<2x32xf32>
    %385 = arith.addf %384, %383 : vector<2x32xf32>
    %386 = arith.divf %384, %385 : vector<2x32xf32>
    %387 = vector.extract_strided_slice %378 {offsets = [0, 32], sizes = [2, 32], strides = [1, 1]} : vector<2x96xf32> to vector<2x32xf32>
    %388 = vector.extract_strided_slice %338 {offsets = [0, 128], sizes = [2, 32], strides = [1, 1]} : vector<2x192xf32> to vector<2x32xf32>
    %389 = arith.addf %387, %388 : vector<2x32xf32>
    %390 = arith.negf %389 : vector<2x32xf32>
    %391 = math.exp %390 : vector<2x32xf32>
    %cst_59 = arith.constant 1.000000e+00 : f32
    %392 = vector.broadcast %cst_59 : f32 to vector<2x32xf32>
    %393 = arith.addf %392, %391 : vector<2x32xf32>
    %394 = arith.divf %392, %393 : vector<2x32xf32>
    %395 = vector.extract_strided_slice %378 {offsets = [0, 64], sizes = [2, 32], strides = [1, 1]} : vector<2x96xf32> to vector<2x32xf32>
    %396 = vector.extract_strided_slice %338 {offsets = [0, 160], sizes = [2, 32], strides = [1, 1]} : vector<2x192xf32> to vector<2x32xf32>
    %397 = arith.mulf %386, %396 : vector<2x32xf32>
    %398 = arith.addf %395, %397 : vector<2x32xf32>
    %399 = math.tanh %398 : vector<2x32xf32>
    %cst_60 = arith.constant 1.000000e+00 : f32
    %400 = vector.broadcast %cst_60 : f32 to vector<2x32xf32>
    %401 = arith.subf %400, %394 : vector<2x32xf32>
    %402 = arith.mulf %401, %399 : vector<2x32xf32>
    %403 = arith.mulf %394, %332 : vector<2x32xf32>
    %404 = arith.addf %402, %403 : vector<2x32xf32>
    %405 = vector.extract_strided_slice %0 {offsets = [0, 3], sizes = [2, 1], strides = [1, 1]} : vector<2x8xf32> to vector<2x1xf32>
    %406 = vector.broadcast %405 : vector<2x1xf32> to vector<2x32xf32>
    %407 = arith.mulf %406, %404 : vector<2x32xf32>
    %cst_61 = arith.constant 1.000000e+00 : f32
    %408 = vector.broadcast %cst_61 : f32 to vector<2x1xf32>
    %409 = arith.subf %408, %405 : vector<2x1xf32>
    %410 = vector.broadcast %409 : vector<2x1xf32> to vector<2x32xf32>
    %411 = arith.mulf %410, %332 : vector<2x32xf32>
    %412 = arith.addf %407, %411 : vector<2x32xf32>
    %413 = vector.broadcast %405 : vector<2x1xf32> to vector<2x32xf32>
    %414 = arith.mulf %413, %404 : vector<2x32xf32>
    %415 = tpu.concatenate %374, %412 in 1 : vector<2x32xf32>, vector<2x32xf32> -> vector<2x64xf32>
    %cst_62 = arith.constant dense<0.000000e+00> : vector<2x192xf32>
    %416 = tpu.matmul %415, %5, %cst_62 {dimension_numbers = #tpu.dot_dimension_numbers<[1], [0], [0], [1], [0, 0, 1, 1], [], []>} : vector<2x64xf32>, vector<64x192xf32>, vector<2x192xf32> -> vector<2x192xf32>
    %417 = vector.broadcast %7 : vector<1x192xf32> to vector<2x192xf32>
    %418 = arith.addf %416, %417 : vector<2x192xf32>
    %419 = vector.extract_strided_slice %12 {offsets = [0, 5, 0], sizes = [2, 1, 96], strides = [1, 1, 1]} : vector<2x8x192xf32> to vector<2x1x96xf32>
    %420 = vector.shape_cast %419 : vector<2x1x96xf32> to vector<2x96xf32>
    %421 = vector.extract_strided_slice %420 {offsets = [0, 0], sizes = [2, 32], strides = [1, 1]} : vector<2x96xf32> to vector<2x32xf32>
    %422 = vector.extract_strided_slice %418 {offsets = [0, 0], sizes = [2, 32], strides = [1, 1]} : vector<2x192xf32> to vector<2x32xf32>
    %423 = arith.addf %421, %422 : vector<2x32xf32>
    %424 = arith.negf %423 : vector<2x32xf32>
    %425 = math.exp %424 : vector<2x32xf32>
    %cst_63 = arith.constant 1.000000e+00 : f32
    %426 = vector.broadcast %cst_63 : f32 to vector<2x32xf32>
    %427 = arith.addf %426, %425 : vector<2x32xf32>
    %428 = arith.divf %426, %427 : vector<2x32xf32>
    %429 = vector.extract_strided_slice %420 {offsets = [0, 32], sizes = [2, 32], strides = [1, 1]} : vector<2x96xf32> to vector<2x32xf32>
    %430 = vector.extract_strided_slice %418 {offsets = [0, 32], sizes = [2, 32], strides = [1, 1]} : vector<2x192xf32> to vector<2x32xf32>
    %431 = arith.addf %429, %430 : vector<2x32xf32>
    %432 = arith.negf %431 : vector<2x32xf32>
    %433 = math.exp %432 : vector<2x32xf32>
    %cst_64 = arith.constant 1.000000e+00 : f32
    %434 = vector.broadcast %cst_64 : f32 to vector<2x32xf32>
    %435 = arith.addf %434, %433 : vector<2x32xf32>
    %436 = arith.divf %434, %435 : vector<2x32xf32>
    %437 = vector.extract_strided_slice %420 {offsets = [0, 64], sizes = [2, 32], strides = [1, 1]} : vector<2x96xf32> to vector<2x32xf32>
    %438 = vector.extract_strided_slice %418 {offsets = [0, 64], sizes = [2, 32], strides = [1, 1]} : vector<2x192xf32> to vector<2x32xf32>
    %439 = arith.mulf %428, %438 : vector<2x32xf32>
    %440 = arith.addf %437, %439 : vector<2x32xf32>
    %441 = math.tanh %440 : vector<2x32xf32>
    %cst_65 = arith.constant 1.000000e+00 : f32
    %442 = vector.broadcast %cst_65 : f32 to vector<2x32xf32>
    %443 = arith.subf %442, %436 : vector<2x32xf32>
    %444 = arith.mulf %443, %441 : vector<2x32xf32>
    %445 = arith.mulf %436, %374 : vector<2x32xf32>
    %446 = arith.addf %444, %445 : vector<2x32xf32>
    %447 = vector.extract_strided_slice %0 {offsets = [0, 5], sizes = [2, 1], strides = [1, 1]} : vector<2x8xf32> to vector<2x1xf32>
    %448 = vector.broadcast %447 : vector<2x1xf32> to vector<2x32xf32>
    %449 = arith.mulf %448, %446 : vector<2x32xf32>
    %cst_66 = arith.constant 1.000000e+00 : f32
    %450 = vector.broadcast %cst_66 : f32 to vector<2x1xf32>
    %451 = arith.subf %450, %447 : vector<2x1xf32>
    %452 = vector.broadcast %451 : vector<2x1xf32> to vector<2x32xf32>
    %453 = arith.mulf %452, %374 : vector<2x32xf32>
    %454 = arith.addf %449, %453 : vector<2x32xf32>
    %455 = vector.broadcast %447 : vector<2x1xf32> to vector<2x32xf32>
    %456 = arith.mulf %455, %446 : vector<2x32xf32>
    %457 = vector.extract_strided_slice %12 {offsets = [0, 2, 96], sizes = [2, 1, 96], strides = [1, 1, 1]} : vector<2x8x192xf32> to vector<2x1x96xf32>
    %458 = vector.shape_cast %457 : vector<2x1x96xf32> to vector<2x96xf32>
    %459 = vector.extract_strided_slice %458 {offsets = [0, 0], sizes = [2, 32], strides = [1, 1]} : vector<2x96xf32> to vector<2x32xf32>
    %460 = vector.extract_strided_slice %418 {offsets = [0, 96], sizes = [2, 32], strides = [1, 1]} : vector<2x192xf32> to vector<2x32xf32>
    %461 = arith.addf %459, %460 : vector<2x32xf32>
    %462 = arith.negf %461 : vector<2x32xf32>
    %463 = math.exp %462 : vector<2x32xf32>
    %cst_67 = arith.constant 1.000000e+00 : f32
    %464 = vector.broadcast %cst_67 : f32 to vector<2x32xf32>
    %465 = arith.addf %464, %463 : vector<2x32xf32>
    %466 = arith.divf %464, %465 : vector<2x32xf32>
    %467 = vector.extract_strided_slice %458 {offsets = [0, 32], sizes = [2, 32], strides = [1, 1]} : vector<2x96xf32> to vector<2x32xf32>
    %468 = vector.extract_strided_slice %418 {offsets = [0, 128], sizes = [2, 32], strides = [1, 1]} : vector<2x192xf32> to vector<2x32xf32>
    %469 = arith.addf %467, %468 : vector<2x32xf32>
    %470 = arith.negf %469 : vector<2x32xf32>
    %471 = math.exp %470 : vector<2x32xf32>
    %cst_68 = arith.constant 1.000000e+00 : f32
    %472 = vector.broadcast %cst_68 : f32 to vector<2x32xf32>
    %473 = arith.addf %472, %471 : vector<2x32xf32>
    %474 = arith.divf %472, %473 : vector<2x32xf32>
    %475 = vector.extract_strided_slice %458 {offsets = [0, 64], sizes = [2, 32], strides = [1, 1]} : vector<2x96xf32> to vector<2x32xf32>
    %476 = vector.extract_strided_slice %418 {offsets = [0, 160], sizes = [2, 32], strides = [1, 1]} : vector<2x192xf32> to vector<2x32xf32>
    %477 = arith.mulf %466, %476 : vector<2x32xf32>
    %478 = arith.addf %475, %477 : vector<2x32xf32>
    %479 = math.tanh %478 : vector<2x32xf32>
    %cst_69 = arith.constant 1.000000e+00 : f32
    %480 = vector.broadcast %cst_69 : f32 to vector<2x32xf32>
    %481 = arith.subf %480, %474 : vector<2x32xf32>
    %482 = arith.mulf %481, %479 : vector<2x32xf32>
    %483 = arith.mulf %474, %412 : vector<2x32xf32>
    %484 = arith.addf %482, %483 : vector<2x32xf32>
    %485 = vector.extract_strided_slice %0 {offsets = [0, 2], sizes = [2, 1], strides = [1, 1]} : vector<2x8xf32> to vector<2x1xf32>
    %486 = vector.broadcast %485 : vector<2x1xf32> to vector<2x32xf32>
    %487 = arith.mulf %486, %484 : vector<2x32xf32>
    %cst_70 = arith.constant 1.000000e+00 : f32
    %488 = vector.broadcast %cst_70 : f32 to vector<2x1xf32>
    %489 = arith.subf %488, %485 : vector<2x1xf32>
    %490 = vector.broadcast %489 : vector<2x1xf32> to vector<2x32xf32>
    %491 = arith.mulf %490, %412 : vector<2x32xf32>
    %492 = arith.addf %487, %491 : vector<2x32xf32>
    %493 = vector.broadcast %485 : vector<2x1xf32> to vector<2x32xf32>
    %494 = arith.mulf %493, %484 : vector<2x32xf32>
    %495 = tpu.concatenate %454, %492 in 1 : vector<2x32xf32>, vector<2x32xf32> -> vector<2x64xf32>
    %cst_71 = arith.constant dense<0.000000e+00> : vector<2x192xf32>
    %496 = tpu.matmul %495, %5, %cst_71 {dimension_numbers = #tpu.dot_dimension_numbers<[1], [0], [0], [1], [0, 0, 1, 1], [], []>} : vector<2x64xf32>, vector<64x192xf32>, vector<2x192xf32> -> vector<2x192xf32>
    %497 = vector.broadcast %7 : vector<1x192xf32> to vector<2x192xf32>
    %498 = arith.addf %496, %497 : vector<2x192xf32>
    %499 = vector.extract_strided_slice %12 {offsets = [0, 6, 0], sizes = [2, 1, 96], strides = [1, 1, 1]} : vector<2x8x192xf32> to vector<2x1x96xf32>
    %500 = vector.shape_cast %499 : vector<2x1x96xf32> to vector<2x96xf32>
    %501 = vector.extract_strided_slice %500 {offsets = [0, 0], sizes = [2, 32], strides = [1, 1]} : vector<2x96xf32> to vector<2x32xf32>
    %502 = vector.extract_strided_slice %498 {offsets = [0, 0], sizes = [2, 32], strides = [1, 1]} : vector<2x192xf32> to vector<2x32xf32>
    %503 = arith.addf %501, %502 : vector<2x32xf32>
    %504 = arith.negf %503 : vector<2x32xf32>
    %505 = math.exp %504 : vector<2x32xf32>
    %cst_72 = arith.constant 1.000000e+00 : f32
    %506 = vector.broadcast %cst_72 : f32 to vector<2x32xf32>
    %507 = arith.addf %506, %505 : vector<2x32xf32>
    %508 = arith.divf %506, %507 : vector<2x32xf32>
    %509 = vector.extract_strided_slice %500 {offsets = [0, 32], sizes = [2, 32], strides = [1, 1]} : vector<2x96xf32> to vector<2x32xf32>
    %510 = vector.extract_strided_slice %498 {offsets = [0, 32], sizes = [2, 32], strides = [1, 1]} : vector<2x192xf32> to vector<2x32xf32>
    %511 = arith.addf %509, %510 : vector<2x32xf32>
    %512 = arith.negf %511 : vector<2x32xf32>
    %513 = math.exp %512 : vector<2x32xf32>
    %cst_73 = arith.constant 1.000000e+00 : f32
    %514 = vector.broadcast %cst_73 : f32 to vector<2x32xf32>
    %515 = arith.addf %514, %513 : vector<2x32xf32>
    %516 = arith.divf %514, %515 : vector<2x32xf32>
    %517 = vector.extract_strided_slice %500 {offsets = [0, 64], sizes = [2, 32], strides = [1, 1]} : vector<2x96xf32> to vector<2x32xf32>
    %518 = vector.extract_strided_slice %498 {offsets = [0, 64], sizes = [2, 32], strides = [1, 1]} : vector<2x192xf32> to vector<2x32xf32>
    %519 = arith.mulf %508, %518 : vector<2x32xf32>
    %520 = arith.addf %517, %519 : vector<2x32xf32>
    %521 = math.tanh %520 : vector<2x32xf32>
    %cst_74 = arith.constant 1.000000e+00 : f32
    %522 = vector.broadcast %cst_74 : f32 to vector<2x32xf32>
    %523 = arith.subf %522, %516 : vector<2x32xf32>
    %524 = arith.mulf %523, %521 : vector<2x32xf32>
    %525 = arith.mulf %516, %454 : vector<2x32xf32>
    %526 = arith.addf %524, %525 : vector<2x32xf32>
    %527 = vector.extract_strided_slice %0 {offsets = [0, 6], sizes = [2, 1], strides = [1, 1]} : vector<2x8xf32> to vector<2x1xf32>
    %528 = vector.broadcast %527 : vector<2x1xf32> to vector<2x32xf32>
    %529 = arith.mulf %528, %526 : vector<2x32xf32>
    %cst_75 = arith.constant 1.000000e+00 : f32
    %530 = vector.broadcast %cst_75 : f32 to vector<2x1xf32>
    %531 = arith.subf %530, %527 : vector<2x1xf32>
    %532 = vector.broadcast %531 : vector<2x1xf32> to vector<2x32xf32>
    %533 = arith.mulf %532, %454 : vector<2x32xf32>
    %534 = arith.addf %529, %533 : vector<2x32xf32>
    %535 = vector.broadcast %527 : vector<2x1xf32> to vector<2x32xf32>
    %536 = arith.mulf %535, %526 : vector<2x32xf32>
    %537 = vector.extract_strided_slice %12 {offsets = [0, 1, 96], sizes = [2, 1, 96], strides = [1, 1, 1]} : vector<2x8x192xf32> to vector<2x1x96xf32>
    %538 = vector.shape_cast %537 : vector<2x1x96xf32> to vector<2x96xf32>
    %539 = vector.extract_strided_slice %538 {offsets = [0, 0], sizes = [2, 32], strides = [1, 1]} : vector<2x96xf32> to vector<2x32xf32>
    %540 = vector.extract_strided_slice %498 {offsets = [0, 96], sizes = [2, 32], strides = [1, 1]} : vector<2x192xf32> to vector<2x32xf32>
    %541 = arith.addf %539, %540 : vector<2x32xf32>
    %542 = arith.negf %541 : vector<2x32xf32>
    %543 = math.exp %542 : vector<2x32xf32>
    %cst_76 = arith.constant 1.000000e+00 : f32
    %544 = vector.broadcast %cst_76 : f32 to vector<2x32xf32>
    %545 = arith.addf %544, %543 : vector<2x32xf32>
    %546 = arith.divf %544, %545 : vector<2x32xf32>
    %547 = vector.extract_strided_slice %538 {offsets = [0, 32], sizes = [2, 32], strides = [1, 1]} : vector<2x96xf32> to vector<2x32xf32>
    %548 = vector.extract_strided_slice %498 {offsets = [0, 128], sizes = [2, 32], strides = [1, 1]} : vector<2x192xf32> to vector<2x32xf32>
    %549 = arith.addf %547, %548 : vector<2x32xf32>
    %550 = arith.negf %549 : vector<2x32xf32>
    %551 = math.exp %550 : vector<2x32xf32>
    %cst_77 = arith.constant 1.000000e+00 : f32
    %552 = vector.broadcast %cst_77 : f32 to vector<2x32xf32>
    %553 = arith.addf %552, %551 : vector<2x32xf32>
    %554 = arith.divf %552, %553 : vector<2x32xf32>
    %555 = vector.extract_strided_slice %538 {offsets = [0, 64], sizes = [2, 32], strides = [1, 1]} : vector<2x96xf32> to vector<2x32xf32>
    %556 = vector.extract_strided_slice %498 {offsets = [0, 160], sizes = [2, 32], strides = [1, 1]} : vector<2x192xf32> to vector<2x32xf32>
    %557 = arith.mulf %546, %556 : vector<2x32xf32>
    %558 = arith.addf %555, %557 : vector<2x32xf32>
    %559 = math.tanh %558 : vector<2x32xf32>
    %cst_78 = arith.constant 1.000000e+00 : f32
    %560 = vector.broadcast %cst_78 : f32 to vector<2x32xf32>
    %561 = arith.subf %560, %554 : vector<2x32xf32>
    %562 = arith.mulf %561, %559 : vector<2x32xf32>
    %563 = arith.mulf %554, %492 : vector<2x32xf32>
    %564 = arith.addf %562, %563 : vector<2x32xf32>
    %565 = vector.extract_strided_slice %0 {offsets = [0, 1], sizes = [2, 1], strides = [1, 1]} : vector<2x8xf32> to vector<2x1xf32>
    %566 = vector.broadcast %565 : vector<2x1xf32> to vector<2x32xf32>
    %567 = arith.mulf %566, %564 : vector<2x32xf32>
    %cst_79 = arith.constant 1.000000e+00 : f32
    %568 = vector.broadcast %cst_79 : f32 to vector<2x1xf32>
    %569 = arith.subf %568, %565 : vector<2x1xf32>
    %570 = vector.broadcast %569 : vector<2x1xf32> to vector<2x32xf32>
    %571 = arith.mulf %570, %492 : vector<2x32xf32>
    %572 = arith.addf %567, %571 : vector<2x32xf32>
    %573 = vector.broadcast %565 : vector<2x1xf32> to vector<2x32xf32>
    %574 = arith.mulf %573, %564 : vector<2x32xf32>
    %575 = tpu.concatenate %534, %572 in 1 : vector<2x32xf32>, vector<2x32xf32> -> vector<2x64xf32>
    %cst_80 = arith.constant dense<0.000000e+00> : vector<2x192xf32>
    %576 = tpu.matmul %575, %5, %cst_80 {dimension_numbers = #tpu.dot_dimension_numbers<[1], [0], [0], [1], [0, 0, 1, 1], [], []>} : vector<2x64xf32>, vector<64x192xf32>, vector<2x192xf32> -> vector<2x192xf32>
    %577 = vector.broadcast %7 : vector<1x192xf32> to vector<2x192xf32>
    %578 = arith.addf %576, %577 : vector<2x192xf32>
    %579 = vector.extract_strided_slice %12 {offsets = [0, 7, 0], sizes = [2, 1, 96], strides = [1, 1, 1]} : vector<2x8x192xf32> to vector<2x1x96xf32>
    %580 = vector.shape_cast %579 : vector<2x1x96xf32> to vector<2x96xf32>
    %581 = vector.extract_strided_slice %580 {offsets = [0, 0], sizes = [2, 32], strides = [1, 1]} : vector<2x96xf32> to vector<2x32xf32>
    %582 = vector.extract_strided_slice %578 {offsets = [0, 0], sizes = [2, 32], strides = [1, 1]} : vector<2x192xf32> to vector<2x32xf32>
    %583 = arith.addf %581, %582 : vector<2x32xf32>
    %584 = arith.negf %583 : vector<2x32xf32>
    %585 = math.exp %584 : vector<2x32xf32>
    %cst_81 = arith.constant 1.000000e+00 : f32
    %586 = vector.broadcast %cst_81 : f32 to vector<2x32xf32>
    %587 = arith.addf %586, %585 : vector<2x32xf32>
    %588 = arith.divf %586, %587 : vector<2x32xf32>
    %589 = vector.extract_strided_slice %580 {offsets = [0, 32], sizes = [2, 32], strides = [1, 1]} : vector<2x96xf32> to vector<2x32xf32>
    %590 = vector.extract_strided_slice %578 {offsets = [0, 32], sizes = [2, 32], strides = [1, 1]} : vector<2x192xf32> to vector<2x32xf32>
    %591 = arith.addf %589, %590 : vector<2x32xf32>
    %592 = arith.negf %591 : vector<2x32xf32>
    %593 = math.exp %592 : vector<2x32xf32>
    %cst_82 = arith.constant 1.000000e+00 : f32
    %594 = vector.broadcast %cst_82 : f32 to vector<2x32xf32>
    %595 = arith.addf %594, %593 : vector<2x32xf32>
    %596 = arith.divf %594, %595 : vector<2x32xf32>
    %597 = vector.extract_strided_slice %580 {offsets = [0, 64], sizes = [2, 32], strides = [1, 1]} : vector<2x96xf32> to vector<2x32xf32>
    %598 = vector.extract_strided_slice %578 {offsets = [0, 64], sizes = [2, 32], strides = [1, 1]} : vector<2x192xf32> to vector<2x32xf32>
    %599 = arith.mulf %588, %598 : vector<2x32xf32>
    %600 = arith.addf %597, %599 : vector<2x32xf32>
    %601 = math.tanh %600 : vector<2x32xf32>
    %cst_83 = arith.constant 1.000000e+00 : f32
    %602 = vector.broadcast %cst_83 : f32 to vector<2x32xf32>
    %603 = arith.subf %602, %596 : vector<2x32xf32>
    %604 = arith.mulf %603, %601 : vector<2x32xf32>
    %605 = arith.mulf %596, %534 : vector<2x32xf32>
    %606 = arith.addf %604, %605 : vector<2x32xf32>
    %607 = vector.extract_strided_slice %0 {offsets = [0, 7], sizes = [2, 1], strides = [1, 1]} : vector<2x8xf32> to vector<2x1xf32>
    %608 = vector.broadcast %607 : vector<2x1xf32> to vector<2x32xf32>
    %609 = arith.mulf %608, %606 : vector<2x32xf32>
    %610 = vector.extract_strided_slice %12 {offsets = [0, 0, 96], sizes = [2, 1, 96], strides = [1, 1, 1]} : vector<2x8x192xf32> to vector<2x1x96xf32>
    %611 = vector.shape_cast %610 : vector<2x1x96xf32> to vector<2x96xf32>
    %612 = vector.extract_strided_slice %611 {offsets = [0, 0], sizes = [2, 32], strides = [1, 1]} : vector<2x96xf32> to vector<2x32xf32>
    %613 = vector.extract_strided_slice %578 {offsets = [0, 96], sizes = [2, 32], strides = [1, 1]} : vector<2x192xf32> to vector<2x32xf32>
    %614 = arith.addf %612, %613 : vector<2x32xf32>
    %615 = arith.negf %614 : vector<2x32xf32>
    %616 = math.exp %615 : vector<2x32xf32>
    %cst_84 = arith.constant 1.000000e+00 : f32
    %617 = vector.broadcast %cst_84 : f32 to vector<2x32xf32>
    %618 = arith.addf %617, %616 : vector<2x32xf32>
    %619 = arith.divf %617, %618 : vector<2x32xf32>
    %620 = vector.extract_strided_slice %611 {offsets = [0, 32], sizes = [2, 32], strides = [1, 1]} : vector<2x96xf32> to vector<2x32xf32>
    %621 = vector.extract_strided_slice %578 {offsets = [0, 128], sizes = [2, 32], strides = [1, 1]} : vector<2x192xf32> to vector<2x32xf32>
    %622 = arith.addf %620, %621 : vector<2x32xf32>
    %623 = arith.negf %622 : vector<2x32xf32>
    %624 = math.exp %623 : vector<2x32xf32>
    %cst_85 = arith.constant 1.000000e+00 : f32
    %625 = vector.broadcast %cst_85 : f32 to vector<2x32xf32>
    %626 = arith.addf %625, %624 : vector<2x32xf32>
    %627 = arith.divf %625, %626 : vector<2x32xf32>
    %628 = vector.extract_strided_slice %611 {offsets = [0, 64], sizes = [2, 32], strides = [1, 1]} : vector<2x96xf32> to vector<2x32xf32>
    %629 = vector.extract_strided_slice %578 {offsets = [0, 160], sizes = [2, 32], strides = [1, 1]} : vector<2x192xf32> to vector<2x32xf32>
    %630 = arith.mulf %619, %629 : vector<2x32xf32>
    %631 = arith.addf %628, %630 : vector<2x32xf32>
    %632 = math.tanh %631 : vector<2x32xf32>
    %cst_86 = arith.constant 1.000000e+00 : f32
    %633 = vector.broadcast %cst_86 : f32 to vector<2x32xf32>
    %634 = arith.subf %633, %627 : vector<2x32xf32>
    %635 = arith.mulf %634, %632 : vector<2x32xf32>
    %636 = arith.mulf %627, %572 : vector<2x32xf32>
    %637 = arith.addf %635, %636 : vector<2x32xf32>
    %638 = vector.extract_strided_slice %0 {offsets = [0, 0], sizes = [2, 1], strides = [1, 1]} : vector<2x8xf32> to vector<2x1xf32>
    %639 = vector.broadcast %638 : vector<2x1xf32> to vector<2x32xf32>
    %640 = arith.mulf %639, %637 : vector<2x32xf32>
    %641 = tpu.concatenate %56, %640 in 1 : vector<2x32xf32>, vector<2x32xf32> -> vector<2x64xf32>
    %642 = vector.shape_cast %641 : vector<2x64xf32> to vector<2x1x64xf32>
    %643 = tpu.concatenate %136, %574 in 1 : vector<2x32xf32>, vector<2x32xf32> -> vector<2x64xf32>
    %644 = vector.shape_cast %643 : vector<2x64xf32> to vector<2x1x64xf32>
    %645 = tpu.concatenate %216, %494 in 1 : vector<2x32xf32>, vector<2x32xf32> -> vector<2x64xf32>
    %646 = vector.shape_cast %645 : vector<2x64xf32> to vector<2x1x64xf32>
    %647 = tpu.concatenate %296, %414 in 1 : vector<2x32xf32>, vector<2x32xf32> -> vector<2x64xf32>
    %648 = vector.shape_cast %647 : vector<2x64xf32> to vector<2x1x64xf32>
    %649 = tpu.concatenate %376, %334 in 1 : vector<2x32xf32>, vector<2x32xf32> -> vector<2x64xf32>
    %650 = vector.shape_cast %649 : vector<2x64xf32> to vector<2x1x64xf32>
    %651 = tpu.concatenate %456, %254 in 1 : vector<2x32xf32>, vector<2x32xf32> -> vector<2x64xf32>
    %652 = vector.shape_cast %651 : vector<2x64xf32> to vector<2x1x64xf32>
    %653 = tpu.concatenate %536, %174 in 1 : vector<2x32xf32>, vector<2x32xf32> -> vector<2x64xf32>
    %654 = vector.shape_cast %653 : vector<2x64xf32> to vector<2x1x64xf32>
    %655 = tpu.concatenate %609, %94 in 1 : vector<2x32xf32>, vector<2x32xf32> -> vector<2x64xf32>
    %656 = vector.shape_cast %655 : vector<2x64xf32> to vector<2x1x64xf32>
    %657 = tpu.concatenate %642, %644, %646, %648, %650, %652, %654, %656 in 1 : vector<2x1x64xf32>, vector<2x1x64xf32>, vector<2x1x64xf32>, vector<2x1x64xf32>, vector<2x1x64xf32>, vector<2x1x64xf32>, vector<2x1x64xf32>, vector<2x1x64xf32> -> vector<2x8x64xf32>
    %c0_87 = arith.constant 0 : index
    %c0_88 = arith.constant 0 : index
    %658 = vector.load %arg7[%c0_87, %c0_88] : memref<64x192xf32, #tpu.memory_space<vmem>>, vector<64x192xf32>
    %c0_89 = arith.constant 0 : index
    %c0_90 = arith.constant 0 : index
    %659 = vector.load %arg8[%c0_89, %c0_90] : memref<64x192xf32, #tpu.memory_space<vmem>>, vector<64x192xf32>
    %c0_91 = arith.constant 0 : index
    %c0_92 = arith.constant 0 : index
    %660 = vector.load %arg9[%c0_91, %c0_92] : memref<1x192xf32, #tpu.memory_space<vmem>>, vector<1x192xf32>
    %c0_93 = arith.constant 0 : index
    %c0_94 = arith.constant 0 : index
    %661 = vector.load %arg10[%c0_93, %c0_94] : memref<1x192xf32, #tpu.memory_space<vmem>>, vector<1x192xf32>
    %662 = vector.shape_cast %657 : vector<2x8x64xf32> to vector<16x64xf32>
    %cst_95 = arith.constant dense<0.000000e+00> : vector<16x192xf32>
    %663 = tpu.matmul %662, %658, %cst_95 {dimension_numbers = #tpu.dot_dimension_numbers<[1], [0], [0], [1], [0, 0, 1, 1], [], []>} : vector<16x64xf32>, vector<64x192xf32>, vector<16x192xf32> -> vector<16x192xf32>
    %664 = vector.broadcast %660 : vector<1x192xf32> to vector<16x192xf32>
    %665 = arith.addf %663, %664 : vector<16x192xf32>
    %666 = vector.shape_cast %665 : vector<16x192xf32> to vector<2x8x192xf32>
    %cst_96 = arith.constant 0.000000e+00 : f32
    %667 = vector.broadcast %cst_96 : f32 to vector<2x32xf32>
    %cst_97 = arith.constant 0.000000e+00 : f32
    %668 = vector.broadcast %cst_97 : f32 to vector<2x32xf32>
    %669 = tpu.concatenate %667, %668 in 1 : vector<2x32xf32>, vector<2x32xf32> -> vector<2x64xf32>
    %cst_98 = arith.constant dense<0.000000e+00> : vector<2x192xf32>
    %670 = tpu.matmul %669, %659, %cst_98 {dimension_numbers = #tpu.dot_dimension_numbers<[1], [0], [0], [1], [0, 0, 1, 1], [], []>} : vector<2x64xf32>, vector<64x192xf32>, vector<2x192xf32> -> vector<2x192xf32>
    %671 = vector.broadcast %661 : vector<1x192xf32> to vector<2x192xf32>
    %672 = arith.addf %670, %671 : vector<2x192xf32>
    %673 = vector.extract_strided_slice %666 {offsets = [0, 0, 0], sizes = [2, 1, 96], strides = [1, 1, 1]} : vector<2x8x192xf32> to vector<2x1x96xf32>
    %674 = vector.shape_cast %673 : vector<2x1x96xf32> to vector<2x96xf32>
    %675 = vector.extract_strided_slice %674 {offsets = [0, 0], sizes = [2, 32], strides = [1, 1]} : vector<2x96xf32> to vector<2x32xf32>
    %676 = vector.extract_strided_slice %672 {offsets = [0, 0], sizes = [2, 32], strides = [1, 1]} : vector<2x192xf32> to vector<2x32xf32>
    %677 = arith.addf %675, %676 : vector<2x32xf32>
    %678 = arith.negf %677 : vector<2x32xf32>
    %679 = math.exp %678 : vector<2x32xf32>
    %cst_99 = arith.constant 1.000000e+00 : f32
    %680 = vector.broadcast %cst_99 : f32 to vector<2x32xf32>
    %681 = arith.addf %680, %679 : vector<2x32xf32>
    %682 = arith.divf %680, %681 : vector<2x32xf32>
    %683 = vector.extract_strided_slice %674 {offsets = [0, 32], sizes = [2, 32], strides = [1, 1]} : vector<2x96xf32> to vector<2x32xf32>
    %684 = vector.extract_strided_slice %672 {offsets = [0, 32], sizes = [2, 32], strides = [1, 1]} : vector<2x192xf32> to vector<2x32xf32>
    %685 = arith.addf %683, %684 : vector<2x32xf32>
    %686 = arith.negf %685 : vector<2x32xf32>
    %687 = math.exp %686 : vector<2x32xf32>
    %cst_100 = arith.constant 1.000000e+00 : f32
    %688 = vector.broadcast %cst_100 : f32 to vector<2x32xf32>
    %689 = arith.addf %688, %687 : vector<2x32xf32>
    %690 = arith.divf %688, %689 : vector<2x32xf32>
    %691 = vector.extract_strided_slice %674 {offsets = [0, 64], sizes = [2, 32], strides = [1, 1]} : vector<2x96xf32> to vector<2x32xf32>
    %692 = vector.extract_strided_slice %672 {offsets = [0, 64], sizes = [2, 32], strides = [1, 1]} : vector<2x192xf32> to vector<2x32xf32>
    %693 = arith.mulf %682, %692 : vector<2x32xf32>
    %694 = arith.addf %691, %693 : vector<2x32xf32>
    %695 = math.tanh %694 : vector<2x32xf32>
    %cst_101 = arith.constant 1.000000e+00 : f32
    %696 = vector.broadcast %cst_101 : f32 to vector<2x32xf32>
    %697 = arith.subf %696, %690 : vector<2x32xf32>
    %698 = arith.mulf %697, %695 : vector<2x32xf32>
    %699 = arith.mulf %690, %667 : vector<2x32xf32>
    %700 = arith.addf %698, %699 : vector<2x32xf32>
    %701 = vector.extract_strided_slice %0 {offsets = [0, 0], sizes = [2, 1], strides = [1, 1]} : vector<2x8xf32> to vector<2x1xf32>
    %702 = vector.broadcast %701 : vector<2x1xf32> to vector<2x32xf32>
    %703 = arith.mulf %702, %700 : vector<2x32xf32>
    %cst_102 = arith.constant 1.000000e+00 : f32
    %704 = vector.broadcast %cst_102 : f32 to vector<2x1xf32>
    %705 = arith.subf %704, %701 : vector<2x1xf32>
    %706 = vector.broadcast %705 : vector<2x1xf32> to vector<2x32xf32>
    %707 = arith.mulf %706, %667 : vector<2x32xf32>
    %708 = arith.addf %703, %707 : vector<2x32xf32>
    %709 = vector.broadcast %701 : vector<2x1xf32> to vector<2x32xf32>
    %710 = arith.mulf %709, %700 : vector<2x32xf32>
    %711 = vector.extract_strided_slice %666 {offsets = [0, 7, 96], sizes = [2, 1, 96], strides = [1, 1, 1]} : vector<2x8x192xf32> to vector<2x1x96xf32>
    %712 = vector.shape_cast %711 : vector<2x1x96xf32> to vector<2x96xf32>
    %713 = vector.extract_strided_slice %712 {offsets = [0, 0], sizes = [2, 32], strides = [1, 1]} : vector<2x96xf32> to vector<2x32xf32>
    %714 = vector.extract_strided_slice %672 {offsets = [0, 96], sizes = [2, 32], strides = [1, 1]} : vector<2x192xf32> to vector<2x32xf32>
    %715 = arith.addf %713, %714 : vector<2x32xf32>
    %716 = arith.negf %715 : vector<2x32xf32>
    %717 = math.exp %716 : vector<2x32xf32>
    %cst_103 = arith.constant 1.000000e+00 : f32
    %718 = vector.broadcast %cst_103 : f32 to vector<2x32xf32>
    %719 = arith.addf %718, %717 : vector<2x32xf32>
    %720 = arith.divf %718, %719 : vector<2x32xf32>
    %721 = vector.extract_strided_slice %712 {offsets = [0, 32], sizes = [2, 32], strides = [1, 1]} : vector<2x96xf32> to vector<2x32xf32>
    %722 = vector.extract_strided_slice %672 {offsets = [0, 128], sizes = [2, 32], strides = [1, 1]} : vector<2x192xf32> to vector<2x32xf32>
    %723 = arith.addf %721, %722 : vector<2x32xf32>
    %724 = arith.negf %723 : vector<2x32xf32>
    %725 = math.exp %724 : vector<2x32xf32>
    %cst_104 = arith.constant 1.000000e+00 : f32
    %726 = vector.broadcast %cst_104 : f32 to vector<2x32xf32>
    %727 = arith.addf %726, %725 : vector<2x32xf32>
    %728 = arith.divf %726, %727 : vector<2x32xf32>
    %729 = vector.extract_strided_slice %712 {offsets = [0, 64], sizes = [2, 32], strides = [1, 1]} : vector<2x96xf32> to vector<2x32xf32>
    %730 = vector.extract_strided_slice %672 {offsets = [0, 160], sizes = [2, 32], strides = [1, 1]} : vector<2x192xf32> to vector<2x32xf32>
    %731 = arith.mulf %720, %730 : vector<2x32xf32>
    %732 = arith.addf %729, %731 : vector<2x32xf32>
    %733 = math.tanh %732 : vector<2x32xf32>
    %cst_105 = arith.constant 1.000000e+00 : f32
    %734 = vector.broadcast %cst_105 : f32 to vector<2x32xf32>
    %735 = arith.subf %734, %728 : vector<2x32xf32>
    %736 = arith.mulf %735, %733 : vector<2x32xf32>
    %737 = arith.mulf %728, %668 : vector<2x32xf32>
    %738 = arith.addf %736, %737 : vector<2x32xf32>
    %739 = vector.extract_strided_slice %0 {offsets = [0, 7], sizes = [2, 1], strides = [1, 1]} : vector<2x8xf32> to vector<2x1xf32>
    %740 = vector.broadcast %739 : vector<2x1xf32> to vector<2x32xf32>
    %741 = arith.mulf %740, %738 : vector<2x32xf32>
    %cst_106 = arith.constant 1.000000e+00 : f32
    %742 = vector.broadcast %cst_106 : f32 to vector<2x1xf32>
    %743 = arith.subf %742, %739 : vector<2x1xf32>
    %744 = vector.broadcast %743 : vector<2x1xf32> to vector<2x32xf32>
    %745 = arith.mulf %744, %668 : vector<2x32xf32>
    %746 = arith.addf %741, %745 : vector<2x32xf32>
    %747 = vector.broadcast %739 : vector<2x1xf32> to vector<2x32xf32>
    %748 = arith.mulf %747, %738 : vector<2x32xf32>
    %749 = tpu.concatenate %708, %746 in 1 : vector<2x32xf32>, vector<2x32xf32> -> vector<2x64xf32>
    %cst_107 = arith.constant dense<0.000000e+00> : vector<2x192xf32>
    %750 = tpu.matmul %749, %659, %cst_107 {dimension_numbers = #tpu.dot_dimension_numbers<[1], [0], [0], [1], [0, 0, 1, 1], [], []>} : vector<2x64xf32>, vector<64x192xf32>, vector<2x192xf32> -> vector<2x192xf32>
    %751 = vector.broadcast %661 : vector<1x192xf32> to vector<2x192xf32>
    %752 = arith.addf %750, %751 : vector<2x192xf32>
    %753 = vector.extract_strided_slice %666 {offsets = [0, 1, 0], sizes = [2, 1, 96], strides = [1, 1, 1]} : vector<2x8x192xf32> to vector<2x1x96xf32>
    %754 = vector.shape_cast %753 : vector<2x1x96xf32> to vector<2x96xf32>
    %755 = vector.extract_strided_slice %754 {offsets = [0, 0], sizes = [2, 32], strides = [1, 1]} : vector<2x96xf32> to vector<2x32xf32>
    %756 = vector.extract_strided_slice %752 {offsets = [0, 0], sizes = [2, 32], strides = [1, 1]} : vector<2x192xf32> to vector<2x32xf32>
    %757 = arith.addf %755, %756 : vector<2x32xf32>
    %758 = arith.negf %757 : vector<2x32xf32>
    %759 = math.exp %758 : vector<2x32xf32>
    %cst_108 = arith.constant 1.000000e+00 : f32
    %760 = vector.broadcast %cst_108 : f32 to vector<2x32xf32>
    %761 = arith.addf %760, %759 : vector<2x32xf32>
    %762 = arith.divf %760, %761 : vector<2x32xf32>
    %763 = vector.extract_strided_slice %754 {offsets = [0, 32], sizes = [2, 32], strides = [1, 1]} : vector<2x96xf32> to vector<2x32xf32>
    %764 = vector.extract_strided_slice %752 {offsets = [0, 32], sizes = [2, 32], strides = [1, 1]} : vector<2x192xf32> to vector<2x32xf32>
    %765 = arith.addf %763, %764 : vector<2x32xf32>
    %766 = arith.negf %765 : vector<2x32xf32>
    %767 = math.exp %766 : vector<2x32xf32>
    %cst_109 = arith.constant 1.000000e+00 : f32
    %768 = vector.broadcast %cst_109 : f32 to vector<2x32xf32>
    %769 = arith.addf %768, %767 : vector<2x32xf32>
    %770 = arith.divf %768, %769 : vector<2x32xf32>
    %771 = vector.extract_strided_slice %754 {offsets = [0, 64], sizes = [2, 32], strides = [1, 1]} : vector<2x96xf32> to vector<2x32xf32>
    %772 = vector.extract_strided_slice %752 {offsets = [0, 64], sizes = [2, 32], strides = [1, 1]} : vector<2x192xf32> to vector<2x32xf32>
    %773 = arith.mulf %762, %772 : vector<2x32xf32>
    %774 = arith.addf %771, %773 : vector<2x32xf32>
    %775 = math.tanh %774 : vector<2x32xf32>
    %cst_110 = arith.constant 1.000000e+00 : f32
    %776 = vector.broadcast %cst_110 : f32 to vector<2x32xf32>
    %777 = arith.subf %776, %770 : vector<2x32xf32>
    %778 = arith.mulf %777, %775 : vector<2x32xf32>
    %779 = arith.mulf %770, %708 : vector<2x32xf32>
    %780 = arith.addf %778, %779 : vector<2x32xf32>
    %781 = vector.extract_strided_slice %0 {offsets = [0, 1], sizes = [2, 1], strides = [1, 1]} : vector<2x8xf32> to vector<2x1xf32>
    %782 = vector.broadcast %781 : vector<2x1xf32> to vector<2x32xf32>
    %783 = arith.mulf %782, %780 : vector<2x32xf32>
    %cst_111 = arith.constant 1.000000e+00 : f32
    %784 = vector.broadcast %cst_111 : f32 to vector<2x1xf32>
    %785 = arith.subf %784, %781 : vector<2x1xf32>
    %786 = vector.broadcast %785 : vector<2x1xf32> to vector<2x32xf32>
    %787 = arith.mulf %786, %708 : vector<2x32xf32>
    %788 = arith.addf %783, %787 : vector<2x32xf32>
    %789 = vector.broadcast %781 : vector<2x1xf32> to vector<2x32xf32>
    %790 = arith.mulf %789, %780 : vector<2x32xf32>
    %791 = vector.extract_strided_slice %666 {offsets = [0, 6, 96], sizes = [2, 1, 96], strides = [1, 1, 1]} : vector<2x8x192xf32> to vector<2x1x96xf32>
    %792 = vector.shape_cast %791 : vector<2x1x96xf32> to vector<2x96xf32>
    %793 = vector.extract_strided_slice %792 {offsets = [0, 0], sizes = [2, 32], strides = [1, 1]} : vector<2x96xf32> to vector<2x32xf32>
    %794 = vector.extract_strided_slice %752 {offsets = [0, 96], sizes = [2, 32], strides = [1, 1]} : vector<2x192xf32> to vector<2x32xf32>
    %795 = arith.addf %793, %794 : vector<2x32xf32>
    %796 = arith.negf %795 : vector<2x32xf32>
    %797 = math.exp %796 : vector<2x32xf32>
    %cst_112 = arith.constant 1.000000e+00 : f32
    %798 = vector.broadcast %cst_112 : f32 to vector<2x32xf32>
    %799 = arith.addf %798, %797 : vector<2x32xf32>
    %800 = arith.divf %798, %799 : vector<2x32xf32>
    %801 = vector.extract_strided_slice %792 {offsets = [0, 32], sizes = [2, 32], strides = [1, 1]} : vector<2x96xf32> to vector<2x32xf32>
    %802 = vector.extract_strided_slice %752 {offsets = [0, 128], sizes = [2, 32], strides = [1, 1]} : vector<2x192xf32> to vector<2x32xf32>
    %803 = arith.addf %801, %802 : vector<2x32xf32>
    %804 = arith.negf %803 : vector<2x32xf32>
    %805 = math.exp %804 : vector<2x32xf32>
    %cst_113 = arith.constant 1.000000e+00 : f32
    %806 = vector.broadcast %cst_113 : f32 to vector<2x32xf32>
    %807 = arith.addf %806, %805 : vector<2x32xf32>
    %808 = arith.divf %806, %807 : vector<2x32xf32>
    %809 = vector.extract_strided_slice %792 {offsets = [0, 64], sizes = [2, 32], strides = [1, 1]} : vector<2x96xf32> to vector<2x32xf32>
    %810 = vector.extract_strided_slice %752 {offsets = [0, 160], sizes = [2, 32], strides = [1, 1]} : vector<2x192xf32> to vector<2x32xf32>
    %811 = arith.mulf %800, %810 : vector<2x32xf32>
    %812 = arith.addf %809, %811 : vector<2x32xf32>
    %813 = math.tanh %812 : vector<2x32xf32>
    %cst_114 = arith.constant 1.000000e+00 : f32
    %814 = vector.broadcast %cst_114 : f32 to vector<2x32xf32>
    %815 = arith.subf %814, %808 : vector<2x32xf32>
    %816 = arith.mulf %815, %813 : vector<2x32xf32>
    %817 = arith.mulf %808, %746 : vector<2x32xf32>
    %818 = arith.addf %816, %817 : vector<2x32xf32>
    %819 = vector.extract_strided_slice %0 {offsets = [0, 6], sizes = [2, 1], strides = [1, 1]} : vector<2x8xf32> to vector<2x1xf32>
    %820 = vector.broadcast %819 : vector<2x1xf32> to vector<2x32xf32>
    %821 = arith.mulf %820, %818 : vector<2x32xf32>
    %cst_115 = arith.constant 1.000000e+00 : f32
    %822 = vector.broadcast %cst_115 : f32 to vector<2x1xf32>
    %823 = arith.subf %822, %819 : vector<2x1xf32>
    %824 = vector.broadcast %823 : vector<2x1xf32> to vector<2x32xf32>
    %825 = arith.mulf %824, %746 : vector<2x32xf32>
    %826 = arith.addf %821, %825 : vector<2x32xf32>
    %827 = vector.broadcast %819 : vector<2x1xf32> to vector<2x32xf32>
    %828 = arith.mulf %827, %818 : vector<2x32xf32>
    %829 = tpu.concatenate %788, %826 in 1 : vector<2x32xf32>, vector<2x32xf32> -> vector<2x64xf32>
    %cst_116 = arith.constant dense<0.000000e+00> : vector<2x192xf32>
    %830 = tpu.matmul %829, %659, %cst_116 {dimension_numbers = #tpu.dot_dimension_numbers<[1], [0], [0], [1], [0, 0, 1, 1], [], []>} : vector<2x64xf32>, vector<64x192xf32>, vector<2x192xf32> -> vector<2x192xf32>
    %831 = vector.broadcast %661 : vector<1x192xf32> to vector<2x192xf32>
    %832 = arith.addf %830, %831 : vector<2x192xf32>
    %833 = vector.extract_strided_slice %666 {offsets = [0, 2, 0], sizes = [2, 1, 96], strides = [1, 1, 1]} : vector<2x8x192xf32> to vector<2x1x96xf32>
    %834 = vector.shape_cast %833 : vector<2x1x96xf32> to vector<2x96xf32>
    %835 = vector.extract_strided_slice %834 {offsets = [0, 0], sizes = [2, 32], strides = [1, 1]} : vector<2x96xf32> to vector<2x32xf32>
    %836 = vector.extract_strided_slice %832 {offsets = [0, 0], sizes = [2, 32], strides = [1, 1]} : vector<2x192xf32> to vector<2x32xf32>
    %837 = arith.addf %835, %836 : vector<2x32xf32>
    %838 = arith.negf %837 : vector<2x32xf32>
    %839 = math.exp %838 : vector<2x32xf32>
    %cst_117 = arith.constant 1.000000e+00 : f32
    %840 = vector.broadcast %cst_117 : f32 to vector<2x32xf32>
    %841 = arith.addf %840, %839 : vector<2x32xf32>
    %842 = arith.divf %840, %841 : vector<2x32xf32>
    %843 = vector.extract_strided_slice %834 {offsets = [0, 32], sizes = [2, 32], strides = [1, 1]} : vector<2x96xf32> to vector<2x32xf32>
    %844 = vector.extract_strided_slice %832 {offsets = [0, 32], sizes = [2, 32], strides = [1, 1]} : vector<2x192xf32> to vector<2x32xf32>
    %845 = arith.addf %843, %844 : vector<2x32xf32>
    %846 = arith.negf %845 : vector<2x32xf32>
    %847 = math.exp %846 : vector<2x32xf32>
    %cst_118 = arith.constant 1.000000e+00 : f32
    %848 = vector.broadcast %cst_118 : f32 to vector<2x32xf32>
    %849 = arith.addf %848, %847 : vector<2x32xf32>
    %850 = arith.divf %848, %849 : vector<2x32xf32>
    %851 = vector.extract_strided_slice %834 {offsets = [0, 64], sizes = [2, 32], strides = [1, 1]} : vector<2x96xf32> to vector<2x32xf32>
    %852 = vector.extract_strided_slice %832 {offsets = [0, 64], sizes = [2, 32], strides = [1, 1]} : vector<2x192xf32> to vector<2x32xf32>
    %853 = arith.mulf %842, %852 : vector<2x32xf32>
    %854 = arith.addf %851, %853 : vector<2x32xf32>
    %855 = math.tanh %854 : vector<2x32xf32>
    %cst_119 = arith.constant 1.000000e+00 : f32
    %856 = vector.broadcast %cst_119 : f32 to vector<2x32xf32>
    %857 = arith.subf %856, %850 : vector<2x32xf32>
    %858 = arith.mulf %857, %855 : vector<2x32xf32>
    %859 = arith.mulf %850, %788 : vector<2x32xf32>
    %860 = arith.addf %858, %859 : vector<2x32xf32>
    %861 = vector.extract_strided_slice %0 {offsets = [0, 2], sizes = [2, 1], strides = [1, 1]} : vector<2x8xf32> to vector<2x1xf32>
    %862 = vector.broadcast %861 : vector<2x1xf32> to vector<2x32xf32>
    %863 = arith.mulf %862, %860 : vector<2x32xf32>
    %cst_120 = arith.constant 1.000000e+00 : f32
    %864 = vector.broadcast %cst_120 : f32 to vector<2x1xf32>
    %865 = arith.subf %864, %861 : vector<2x1xf32>
    %866 = vector.broadcast %865 : vector<2x1xf32> to vector<2x32xf32>
    %867 = arith.mulf %866, %788 : vector<2x32xf32>
    %868 = arith.addf %863, %867 : vector<2x32xf32>
    %869 = vector.broadcast %861 : vector<2x1xf32> to vector<2x32xf32>
    %870 = arith.mulf %869, %860 : vector<2x32xf32>
    %871 = vector.extract_strided_slice %666 {offsets = [0, 5, 96], sizes = [2, 1, 96], strides = [1, 1, 1]} : vector<2x8x192xf32> to vector<2x1x96xf32>
    %872 = vector.shape_cast %871 : vector<2x1x96xf32> to vector<2x96xf32>
    %873 = vector.extract_strided_slice %872 {offsets = [0, 0], sizes = [2, 32], strides = [1, 1]} : vector<2x96xf32> to vector<2x32xf32>
    %874 = vector.extract_strided_slice %832 {offsets = [0, 96], sizes = [2, 32], strides = [1, 1]} : vector<2x192xf32> to vector<2x32xf32>
    %875 = arith.addf %873, %874 : vector<2x32xf32>
    %876 = arith.negf %875 : vector<2x32xf32>
    %877 = math.exp %876 : vector<2x32xf32>
    %cst_121 = arith.constant 1.000000e+00 : f32
    %878 = vector.broadcast %cst_121 : f32 to vector<2x32xf32>
    %879 = arith.addf %878, %877 : vector<2x32xf32>
    %880 = arith.divf %878, %879 : vector<2x32xf32>
    %881 = vector.extract_strided_slice %872 {offsets = [0, 32], sizes = [2, 32], strides = [1, 1]} : vector<2x96xf32> to vector<2x32xf32>
    %882 = vector.extract_strided_slice %832 {offsets = [0, 128], sizes = [2, 32], strides = [1, 1]} : vector<2x192xf32> to vector<2x32xf32>
    %883 = arith.addf %881, %882 : vector<2x32xf32>
    %884 = arith.negf %883 : vector<2x32xf32>
    %885 = math.exp %884 : vector<2x32xf32>
    %cst_122 = arith.constant 1.000000e+00 : f32
    %886 = vector.broadcast %cst_122 : f32 to vector<2x32xf32>
    %887 = arith.addf %886, %885 : vector<2x32xf32>
    %888 = arith.divf %886, %887 : vector<2x32xf32>
    %889 = vector.extract_strided_slice %872 {offsets = [0, 64], sizes = [2, 32], strides = [1, 1]} : vector<2x96xf32> to vector<2x32xf32>
    %890 = vector.extract_strided_slice %832 {offsets = [0, 160], sizes = [2, 32], strides = [1, 1]} : vector<2x192xf32> to vector<2x32xf32>
    %891 = arith.mulf %880, %890 : vector<2x32xf32>
    %892 = arith.addf %889, %891 : vector<2x32xf32>
    %893 = math.tanh %892 : vector<2x32xf32>
    %cst_123 = arith.constant 1.000000e+00 : f32
    %894 = vector.broadcast %cst_123 : f32 to vector<2x32xf32>
    %895 = arith.subf %894, %888 : vector<2x32xf32>
    %896 = arith.mulf %895, %893 : vector<2x32xf32>
    %897 = arith.mulf %888, %826 : vector<2x32xf32>
    %898 = arith.addf %896, %897 : vector<2x32xf32>
    %899 = vector.extract_strided_slice %0 {offsets = [0, 5], sizes = [2, 1], strides = [1, 1]} : vector<2x8xf32> to vector<2x1xf32>
    %900 = vector.broadcast %899 : vector<2x1xf32> to vector<2x32xf32>
    %901 = arith.mulf %900, %898 : vector<2x32xf32>
    %cst_124 = arith.constant 1.000000e+00 : f32
    %902 = vector.broadcast %cst_124 : f32 to vector<2x1xf32>
    %903 = arith.subf %902, %899 : vector<2x1xf32>
    %904 = vector.broadcast %903 : vector<2x1xf32> to vector<2x32xf32>
    %905 = arith.mulf %904, %826 : vector<2x32xf32>
    %906 = arith.addf %901, %905 : vector<2x32xf32>
    %907 = vector.broadcast %899 : vector<2x1xf32> to vector<2x32xf32>
    %908 = arith.mulf %907, %898 : vector<2x32xf32>
    %909 = tpu.concatenate %868, %906 in 1 : vector<2x32xf32>, vector<2x32xf32> -> vector<2x64xf32>
    %cst_125 = arith.constant dense<0.000000e+00> : vector<2x192xf32>
    %910 = tpu.matmul %909, %659, %cst_125 {dimension_numbers = #tpu.dot_dimension_numbers<[1], [0], [0], [1], [0, 0, 1, 1], [], []>} : vector<2x64xf32>, vector<64x192xf32>, vector<2x192xf32> -> vector<2x192xf32>
    %911 = vector.broadcast %661 : vector<1x192xf32> to vector<2x192xf32>
    %912 = arith.addf %910, %911 : vector<2x192xf32>
    %913 = vector.extract_strided_slice %666 {offsets = [0, 3, 0], sizes = [2, 1, 96], strides = [1, 1, 1]} : vector<2x8x192xf32> to vector<2x1x96xf32>
    %914 = vector.shape_cast %913 : vector<2x1x96xf32> to vector<2x96xf32>
    %915 = vector.extract_strided_slice %914 {offsets = [0, 0], sizes = [2, 32], strides = [1, 1]} : vector<2x96xf32> to vector<2x32xf32>
    %916 = vector.extract_strided_slice %912 {offsets = [0, 0], sizes = [2, 32], strides = [1, 1]} : vector<2x192xf32> to vector<2x32xf32>
    %917 = arith.addf %915, %916 : vector<2x32xf32>
    %918 = arith.negf %917 : vector<2x32xf32>
    %919 = math.exp %918 : vector<2x32xf32>
    %cst_126 = arith.constant 1.000000e+00 : f32
    %920 = vector.broadcast %cst_126 : f32 to vector<2x32xf32>
    %921 = arith.addf %920, %919 : vector<2x32xf32>
    %922 = arith.divf %920, %921 : vector<2x32xf32>
    %923 = vector.extract_strided_slice %914 {offsets = [0, 32], sizes = [2, 32], strides = [1, 1]} : vector<2x96xf32> to vector<2x32xf32>
    %924 = vector.extract_strided_slice %912 {offsets = [0, 32], sizes = [2, 32], strides = [1, 1]} : vector<2x192xf32> to vector<2x32xf32>
    %925 = arith.addf %923, %924 : vector<2x32xf32>
    %926 = arith.negf %925 : vector<2x32xf32>
    %927 = math.exp %926 : vector<2x32xf32>
    %cst_127 = arith.constant 1.000000e+00 : f32
    %928 = vector.broadcast %cst_127 : f32 to vector<2x32xf32>
    %929 = arith.addf %928, %927 : vector<2x32xf32>
    %930 = arith.divf %928, %929 : vector<2x32xf32>
    %931 = vector.extract_strided_slice %914 {offsets = [0, 64], sizes = [2, 32], strides = [1, 1]} : vector<2x96xf32> to vector<2x32xf32>
    %932 = vector.extract_strided_slice %912 {offsets = [0, 64], sizes = [2, 32], strides = [1, 1]} : vector<2x192xf32> to vector<2x32xf32>
    %933 = arith.mulf %922, %932 : vector<2x32xf32>
    %934 = arith.addf %931, %933 : vector<2x32xf32>
    %935 = math.tanh %934 : vector<2x32xf32>
    %cst_128 = arith.constant 1.000000e+00 : f32
    %936 = vector.broadcast %cst_128 : f32 to vector<2x32xf32>
    %937 = arith.subf %936, %930 : vector<2x32xf32>
    %938 = arith.mulf %937, %935 : vector<2x32xf32>
    %939 = arith.mulf %930, %868 : vector<2x32xf32>
    %940 = arith.addf %938, %939 : vector<2x32xf32>
    %941 = vector.extract_strided_slice %0 {offsets = [0, 3], sizes = [2, 1], strides = [1, 1]} : vector<2x8xf32> to vector<2x1xf32>
    %942 = vector.broadcast %941 : vector<2x1xf32> to vector<2x32xf32>
    %943 = arith.mulf %942, %940 : vector<2x32xf32>
    %cst_129 = arith.constant 1.000000e+00 : f32
    %944 = vector.broadcast %cst_129 : f32 to vector<2x1xf32>
    %945 = arith.subf %944, %941 : vector<2x1xf32>
    %946 = vector.broadcast %945 : vector<2x1xf32> to vector<2x32xf32>
    %947 = arith.mulf %946, %868 : vector<2x32xf32>
    %948 = arith.addf %943, %947 : vector<2x32xf32>
    %949 = vector.broadcast %941 : vector<2x1xf32> to vector<2x32xf32>
    %950 = arith.mulf %949, %940 : vector<2x32xf32>
    %951 = vector.extract_strided_slice %666 {offsets = [0, 4, 96], sizes = [2, 1, 96], strides = [1, 1, 1]} : vector<2x8x192xf32> to vector<2x1x96xf32>
    %952 = vector.shape_cast %951 : vector<2x1x96xf32> to vector<2x96xf32>
    %953 = vector.extract_strided_slice %952 {offsets = [0, 0], sizes = [2, 32], strides = [1, 1]} : vector<2x96xf32> to vector<2x32xf32>
    %954 = vector.extract_strided_slice %912 {offsets = [0, 96], sizes = [2, 32], strides = [1, 1]} : vector<2x192xf32> to vector<2x32xf32>
    %955 = arith.addf %953, %954 : vector<2x32xf32>
    %956 = arith.negf %955 : vector<2x32xf32>
    %957 = math.exp %956 : vector<2x32xf32>
    %cst_130 = arith.constant 1.000000e+00 : f32
    %958 = vector.broadcast %cst_130 : f32 to vector<2x32xf32>
    %959 = arith.addf %958, %957 : vector<2x32xf32>
    %960 = arith.divf %958, %959 : vector<2x32xf32>
    %961 = vector.extract_strided_slice %952 {offsets = [0, 32], sizes = [2, 32], strides = [1, 1]} : vector<2x96xf32> to vector<2x32xf32>
    %962 = vector.extract_strided_slice %912 {offsets = [0, 128], sizes = [2, 32], strides = [1, 1]} : vector<2x192xf32> to vector<2x32xf32>
    %963 = arith.addf %961, %962 : vector<2x32xf32>
    %964 = arith.negf %963 : vector<2x32xf32>
    %965 = math.exp %964 : vector<2x32xf32>
    %cst_131 = arith.constant 1.000000e+00 : f32
    %966 = vector.broadcast %cst_131 : f32 to vector<2x32xf32>
    %967 = arith.addf %966, %965 : vector<2x32xf32>
    %968 = arith.divf %966, %967 : vector<2x32xf32>
    %969 = vector.extract_strided_slice %952 {offsets = [0, 64], sizes = [2, 32], strides = [1, 1]} : vector<2x96xf32> to vector<2x32xf32>
    %970 = vector.extract_strided_slice %912 {offsets = [0, 160], sizes = [2, 32], strides = [1, 1]} : vector<2x192xf32> to vector<2x32xf32>
    %971 = arith.mulf %960, %970 : vector<2x32xf32>
    %972 = arith.addf %969, %971 : vector<2x32xf32>
    %973 = math.tanh %972 : vector<2x32xf32>
    %cst_132 = arith.constant 1.000000e+00 : f32
    %974 = vector.broadcast %cst_132 : f32 to vector<2x32xf32>
    %975 = arith.subf %974, %968 : vector<2x32xf32>
    %976 = arith.mulf %975, %973 : vector<2x32xf32>
    %977 = arith.mulf %968, %906 : vector<2x32xf32>
    %978 = arith.addf %976, %977 : vector<2x32xf32>
    %979 = vector.extract_strided_slice %0 {offsets = [0, 4], sizes = [2, 1], strides = [1, 1]} : vector<2x8xf32> to vector<2x1xf32>
    %980 = vector.broadcast %979 : vector<2x1xf32> to vector<2x32xf32>
    %981 = arith.mulf %980, %978 : vector<2x32xf32>
    %cst_133 = arith.constant 1.000000e+00 : f32
    %982 = vector.broadcast %cst_133 : f32 to vector<2x1xf32>
    %983 = arith.subf %982, %979 : vector<2x1xf32>
    %984 = vector.broadcast %983 : vector<2x1xf32> to vector<2x32xf32>
    %985 = arith.mulf %984, %906 : vector<2x32xf32>
    %986 = arith.addf %981, %985 : vector<2x32xf32>
    %987 = vector.broadcast %979 : vector<2x1xf32> to vector<2x32xf32>
    %988 = arith.mulf %987, %978 : vector<2x32xf32>
    %989 = tpu.concatenate %948, %986 in 1 : vector<2x32xf32>, vector<2x32xf32> -> vector<2x64xf32>
    %cst_134 = arith.constant dense<0.000000e+00> : vector<2x192xf32>
    %990 = tpu.matmul %989, %659, %cst_134 {dimension_numbers = #tpu.dot_dimension_numbers<[1], [0], [0], [1], [0, 0, 1, 1], [], []>} : vector<2x64xf32>, vector<64x192xf32>, vector<2x192xf32> -> vector<2x192xf32>
    %991 = vector.broadcast %661 : vector<1x192xf32> to vector<2x192xf32>
    %992 = arith.addf %990, %991 : vector<2x192xf32>
    %993 = vector.extract_strided_slice %666 {offsets = [0, 4, 0], sizes = [2, 1, 96], strides = [1, 1, 1]} : vector<2x8x192xf32> to vector<2x1x96xf32>
    %994 = vector.shape_cast %993 : vector<2x1x96xf32> to vector<2x96xf32>
    %995 = vector.extract_strided_slice %994 {offsets = [0, 0], sizes = [2, 32], strides = [1, 1]} : vector<2x96xf32> to vector<2x32xf32>
    %996 = vector.extract_strided_slice %992 {offsets = [0, 0], sizes = [2, 32], strides = [1, 1]} : vector<2x192xf32> to vector<2x32xf32>
    %997 = arith.addf %995, %996 : vector<2x32xf32>
    %998 = arith.negf %997 : vector<2x32xf32>
    %999 = math.exp %998 : vector<2x32xf32>
    %cst_135 = arith.constant 1.000000e+00 : f32
    %1000 = vector.broadcast %cst_135 : f32 to vector<2x32xf32>
    %1001 = arith.addf %1000, %999 : vector<2x32xf32>
    %1002 = arith.divf %1000, %1001 : vector<2x32xf32>
    %1003 = vector.extract_strided_slice %994 {offsets = [0, 32], sizes = [2, 32], strides = [1, 1]} : vector<2x96xf32> to vector<2x32xf32>
    %1004 = vector.extract_strided_slice %992 {offsets = [0, 32], sizes = [2, 32], strides = [1, 1]} : vector<2x192xf32> to vector<2x32xf32>
    %1005 = arith.addf %1003, %1004 : vector<2x32xf32>
    %1006 = arith.negf %1005 : vector<2x32xf32>
    %1007 = math.exp %1006 : vector<2x32xf32>
    %cst_136 = arith.constant 1.000000e+00 : f32
    %1008 = vector.broadcast %cst_136 : f32 to vector<2x32xf32>
    %1009 = arith.addf %1008, %1007 : vector<2x32xf32>
    %1010 = arith.divf %1008, %1009 : vector<2x32xf32>
    %1011 = vector.extract_strided_slice %994 {offsets = [0, 64], sizes = [2, 32], strides = [1, 1]} : vector<2x96xf32> to vector<2x32xf32>
    %1012 = vector.extract_strided_slice %992 {offsets = [0, 64], sizes = [2, 32], strides = [1, 1]} : vector<2x192xf32> to vector<2x32xf32>
    %1013 = arith.mulf %1002, %1012 : vector<2x32xf32>
    %1014 = arith.addf %1011, %1013 : vector<2x32xf32>
    %1015 = math.tanh %1014 : vector<2x32xf32>
    %cst_137 = arith.constant 1.000000e+00 : f32
    %1016 = vector.broadcast %cst_137 : f32 to vector<2x32xf32>
    %1017 = arith.subf %1016, %1010 : vector<2x32xf32>
    %1018 = arith.mulf %1017, %1015 : vector<2x32xf32>
    %1019 = arith.mulf %1010, %948 : vector<2x32xf32>
    %1020 = arith.addf %1018, %1019 : vector<2x32xf32>
    %1021 = vector.extract_strided_slice %0 {offsets = [0, 4], sizes = [2, 1], strides = [1, 1]} : vector<2x8xf32> to vector<2x1xf32>
    %1022 = vector.broadcast %1021 : vector<2x1xf32> to vector<2x32xf32>
    %1023 = arith.mulf %1022, %1020 : vector<2x32xf32>
    %cst_138 = arith.constant 1.000000e+00 : f32
    %1024 = vector.broadcast %cst_138 : f32 to vector<2x1xf32>
    %1025 = arith.subf %1024, %1021 : vector<2x1xf32>
    %1026 = vector.broadcast %1025 : vector<2x1xf32> to vector<2x32xf32>
    %1027 = arith.mulf %1026, %948 : vector<2x32xf32>
    %1028 = arith.addf %1023, %1027 : vector<2x32xf32>
    %1029 = vector.broadcast %1021 : vector<2x1xf32> to vector<2x32xf32>
    %1030 = arith.mulf %1029, %1020 : vector<2x32xf32>
    %1031 = vector.extract_strided_slice %666 {offsets = [0, 3, 96], sizes = [2, 1, 96], strides = [1, 1, 1]} : vector<2x8x192xf32> to vector<2x1x96xf32>
    %1032 = vector.shape_cast %1031 : vector<2x1x96xf32> to vector<2x96xf32>
    %1033 = vector.extract_strided_slice %1032 {offsets = [0, 0], sizes = [2, 32], strides = [1, 1]} : vector<2x96xf32> to vector<2x32xf32>
    %1034 = vector.extract_strided_slice %992 {offsets = [0, 96], sizes = [2, 32], strides = [1, 1]} : vector<2x192xf32> to vector<2x32xf32>
    %1035 = arith.addf %1033, %1034 : vector<2x32xf32>
    %1036 = arith.negf %1035 : vector<2x32xf32>
    %1037 = math.exp %1036 : vector<2x32xf32>
    %cst_139 = arith.constant 1.000000e+00 : f32
    %1038 = vector.broadcast %cst_139 : f32 to vector<2x32xf32>
    %1039 = arith.addf %1038, %1037 : vector<2x32xf32>
    %1040 = arith.divf %1038, %1039 : vector<2x32xf32>
    %1041 = vector.extract_strided_slice %1032 {offsets = [0, 32], sizes = [2, 32], strides = [1, 1]} : vector<2x96xf32> to vector<2x32xf32>
    %1042 = vector.extract_strided_slice %992 {offsets = [0, 128], sizes = [2, 32], strides = [1, 1]} : vector<2x192xf32> to vector<2x32xf32>
    %1043 = arith.addf %1041, %1042 : vector<2x32xf32>
    %1044 = arith.negf %1043 : vector<2x32xf32>
    %1045 = math.exp %1044 : vector<2x32xf32>
    %cst_140 = arith.constant 1.000000e+00 : f32
    %1046 = vector.broadcast %cst_140 : f32 to vector<2x32xf32>
    %1047 = arith.addf %1046, %1045 : vector<2x32xf32>
    %1048 = arith.divf %1046, %1047 : vector<2x32xf32>
    %1049 = vector.extract_strided_slice %1032 {offsets = [0, 64], sizes = [2, 32], strides = [1, 1]} : vector<2x96xf32> to vector<2x32xf32>
    %1050 = vector.extract_strided_slice %992 {offsets = [0, 160], sizes = [2, 32], strides = [1, 1]} : vector<2x192xf32> to vector<2x32xf32>
    %1051 = arith.mulf %1040, %1050 : vector<2x32xf32>
    %1052 = arith.addf %1049, %1051 : vector<2x32xf32>
    %1053 = math.tanh %1052 : vector<2x32xf32>
    %cst_141 = arith.constant 1.000000e+00 : f32
    %1054 = vector.broadcast %cst_141 : f32 to vector<2x32xf32>
    %1055 = arith.subf %1054, %1048 : vector<2x32xf32>
    %1056 = arith.mulf %1055, %1053 : vector<2x32xf32>
    %1057 = arith.mulf %1048, %986 : vector<2x32xf32>
    %1058 = arith.addf %1056, %1057 : vector<2x32xf32>
    %1059 = vector.extract_strided_slice %0 {offsets = [0, 3], sizes = [2, 1], strides = [1, 1]} : vector<2x8xf32> to vector<2x1xf32>
    %1060 = vector.broadcast %1059 : vector<2x1xf32> to vector<2x32xf32>
    %1061 = arith.mulf %1060, %1058 : vector<2x32xf32>
    %cst_142 = arith.constant 1.000000e+00 : f32
    %1062 = vector.broadcast %cst_142 : f32 to vector<2x1xf32>
    %1063 = arith.subf %1062, %1059 : vector<2x1xf32>
    %1064 = vector.broadcast %1063 : vector<2x1xf32> to vector<2x32xf32>
    %1065 = arith.mulf %1064, %986 : vector<2x32xf32>
    %1066 = arith.addf %1061, %1065 : vector<2x32xf32>
    %1067 = vector.broadcast %1059 : vector<2x1xf32> to vector<2x32xf32>
    %1068 = arith.mulf %1067, %1058 : vector<2x32xf32>
    %1069 = tpu.concatenate %1028, %1066 in 1 : vector<2x32xf32>, vector<2x32xf32> -> vector<2x64xf32>
    %cst_143 = arith.constant dense<0.000000e+00> : vector<2x192xf32>
    %1070 = tpu.matmul %1069, %659, %cst_143 {dimension_numbers = #tpu.dot_dimension_numbers<[1], [0], [0], [1], [0, 0, 1, 1], [], []>} : vector<2x64xf32>, vector<64x192xf32>, vector<2x192xf32> -> vector<2x192xf32>
    %1071 = vector.broadcast %661 : vector<1x192xf32> to vector<2x192xf32>
    %1072 = arith.addf %1070, %1071 : vector<2x192xf32>
    %1073 = vector.extract_strided_slice %666 {offsets = [0, 5, 0], sizes = [2, 1, 96], strides = [1, 1, 1]} : vector<2x8x192xf32> to vector<2x1x96xf32>
    %1074 = vector.shape_cast %1073 : vector<2x1x96xf32> to vector<2x96xf32>
    %1075 = vector.extract_strided_slice %1074 {offsets = [0, 0], sizes = [2, 32], strides = [1, 1]} : vector<2x96xf32> to vector<2x32xf32>
    %1076 = vector.extract_strided_slice %1072 {offsets = [0, 0], sizes = [2, 32], strides = [1, 1]} : vector<2x192xf32> to vector<2x32xf32>
    %1077 = arith.addf %1075, %1076 : vector<2x32xf32>
    %1078 = arith.negf %1077 : vector<2x32xf32>
    %1079 = math.exp %1078 : vector<2x32xf32>
    %cst_144 = arith.constant 1.000000e+00 : f32
    %1080 = vector.broadcast %cst_144 : f32 to vector<2x32xf32>
    %1081 = arith.addf %1080, %1079 : vector<2x32xf32>
    %1082 = arith.divf %1080, %1081 : vector<2x32xf32>
    %1083 = vector.extract_strided_slice %1074 {offsets = [0, 32], sizes = [2, 32], strides = [1, 1]} : vector<2x96xf32> to vector<2x32xf32>
    %1084 = vector.extract_strided_slice %1072 {offsets = [0, 32], sizes = [2, 32], strides = [1, 1]} : vector<2x192xf32> to vector<2x32xf32>
    %1085 = arith.addf %1083, %1084 : vector<2x32xf32>
    %1086 = arith.negf %1085 : vector<2x32xf32>
    %1087 = math.exp %1086 : vector<2x32xf32>
    %cst_145 = arith.constant 1.000000e+00 : f32
    %1088 = vector.broadcast %cst_145 : f32 to vector<2x32xf32>
    %1089 = arith.addf %1088, %1087 : vector<2x32xf32>
    %1090 = arith.divf %1088, %1089 : vector<2x32xf32>
    %1091 = vector.extract_strided_slice %1074 {offsets = [0, 64], sizes = [2, 32], strides = [1, 1]} : vector<2x96xf32> to vector<2x32xf32>
    %1092 = vector.extract_strided_slice %1072 {offsets = [0, 64], sizes = [2, 32], strides = [1, 1]} : vector<2x192xf32> to vector<2x32xf32>
    %1093 = arith.mulf %1082, %1092 : vector<2x32xf32>
    %1094 = arith.addf %1091, %1093 : vector<2x32xf32>
    %1095 = math.tanh %1094 : vector<2x32xf32>
    %cst_146 = arith.constant 1.000000e+00 : f32
    %1096 = vector.broadcast %cst_146 : f32 to vector<2x32xf32>
    %1097 = arith.subf %1096, %1090 : vector<2x32xf32>
    %1098 = arith.mulf %1097, %1095 : vector<2x32xf32>
    %1099 = arith.mulf %1090, %1028 : vector<2x32xf32>
    %1100 = arith.addf %1098, %1099 : vector<2x32xf32>
    %1101 = vector.extract_strided_slice %0 {offsets = [0, 5], sizes = [2, 1], strides = [1, 1]} : vector<2x8xf32> to vector<2x1xf32>
    %1102 = vector.broadcast %1101 : vector<2x1xf32> to vector<2x32xf32>
    %1103 = arith.mulf %1102, %1100 : vector<2x32xf32>
    %cst_147 = arith.constant 1.000000e+00 : f32
    %1104 = vector.broadcast %cst_147 : f32 to vector<2x1xf32>
    %1105 = arith.subf %1104, %1101 : vector<2x1xf32>
    %1106 = vector.broadcast %1105 : vector<2x1xf32> to vector<2x32xf32>
    %1107 = arith.mulf %1106, %1028 : vector<2x32xf32>
    %1108 = arith.addf %1103, %1107 : vector<2x32xf32>
    %1109 = vector.broadcast %1101 : vector<2x1xf32> to vector<2x32xf32>
    %1110 = arith.mulf %1109, %1100 : vector<2x32xf32>
    %1111 = vector.extract_strided_slice %666 {offsets = [0, 2, 96], sizes = [2, 1, 96], strides = [1, 1, 1]} : vector<2x8x192xf32> to vector<2x1x96xf32>
    %1112 = vector.shape_cast %1111 : vector<2x1x96xf32> to vector<2x96xf32>
    %1113 = vector.extract_strided_slice %1112 {offsets = [0, 0], sizes = [2, 32], strides = [1, 1]} : vector<2x96xf32> to vector<2x32xf32>
    %1114 = vector.extract_strided_slice %1072 {offsets = [0, 96], sizes = [2, 32], strides = [1, 1]} : vector<2x192xf32> to vector<2x32xf32>
    %1115 = arith.addf %1113, %1114 : vector<2x32xf32>
    %1116 = arith.negf %1115 : vector<2x32xf32>
    %1117 = math.exp %1116 : vector<2x32xf32>
    %cst_148 = arith.constant 1.000000e+00 : f32
    %1118 = vector.broadcast %cst_148 : f32 to vector<2x32xf32>
    %1119 = arith.addf %1118, %1117 : vector<2x32xf32>
    %1120 = arith.divf %1118, %1119 : vector<2x32xf32>
    %1121 = vector.extract_strided_slice %1112 {offsets = [0, 32], sizes = [2, 32], strides = [1, 1]} : vector<2x96xf32> to vector<2x32xf32>
    %1122 = vector.extract_strided_slice %1072 {offsets = [0, 128], sizes = [2, 32], strides = [1, 1]} : vector<2x192xf32> to vector<2x32xf32>
    %1123 = arith.addf %1121, %1122 : vector<2x32xf32>
    %1124 = arith.negf %1123 : vector<2x32xf32>
    %1125 = math.exp %1124 : vector<2x32xf32>
    %cst_149 = arith.constant 1.000000e+00 : f32
    %1126 = vector.broadcast %cst_149 : f32 to vector<2x32xf32>
    %1127 = arith.addf %1126, %1125 : vector<2x32xf32>
    %1128 = arith.divf %1126, %1127 : vector<2x32xf32>
    %1129 = vector.extract_strided_slice %1112 {offsets = [0, 64], sizes = [2, 32], strides = [1, 1]} : vector<2x96xf32> to vector<2x32xf32>
    %1130 = vector.extract_strided_slice %1072 {offsets = [0, 160], sizes = [2, 32], strides = [1, 1]} : vector<2x192xf32> to vector<2x32xf32>
    %1131 = arith.mulf %1120, %1130 : vector<2x32xf32>
    %1132 = arith.addf %1129, %1131 : vector<2x32xf32>
    %1133 = math.tanh %1132 : vector<2x32xf32>
    %cst_150 = arith.constant 1.000000e+00 : f32
    %1134 = vector.broadcast %cst_150 : f32 to vector<2x32xf32>
    %1135 = arith.subf %1134, %1128 : vector<2x32xf32>
    %1136 = arith.mulf %1135, %1133 : vector<2x32xf32>
    %1137 = arith.mulf %1128, %1066 : vector<2x32xf32>
    %1138 = arith.addf %1136, %1137 : vector<2x32xf32>
    %1139 = vector.extract_strided_slice %0 {offsets = [0, 2], sizes = [2, 1], strides = [1, 1]} : vector<2x8xf32> to vector<2x1xf32>
    %1140 = vector.broadcast %1139 : vector<2x1xf32> to vector<2x32xf32>
    %1141 = arith.mulf %1140, %1138 : vector<2x32xf32>
    %cst_151 = arith.constant 1.000000e+00 : f32
    %1142 = vector.broadcast %cst_151 : f32 to vector<2x1xf32>
    %1143 = arith.subf %1142, %1139 : vector<2x1xf32>
    %1144 = vector.broadcast %1143 : vector<2x1xf32> to vector<2x32xf32>
    %1145 = arith.mulf %1144, %1066 : vector<2x32xf32>
    %1146 = arith.addf %1141, %1145 : vector<2x32xf32>
    %1147 = vector.broadcast %1139 : vector<2x1xf32> to vector<2x32xf32>
    %1148 = arith.mulf %1147, %1138 : vector<2x32xf32>
    %1149 = tpu.concatenate %1108, %1146 in 1 : vector<2x32xf32>, vector<2x32xf32> -> vector<2x64xf32>
    %cst_152 = arith.constant dense<0.000000e+00> : vector<2x192xf32>
    %1150 = tpu.matmul %1149, %659, %cst_152 {dimension_numbers = #tpu.dot_dimension_numbers<[1], [0], [0], [1], [0, 0, 1, 1], [], []>} : vector<2x64xf32>, vector<64x192xf32>, vector<2x192xf32> -> vector<2x192xf32>
    %1151 = vector.broadcast %661 : vector<1x192xf32> to vector<2x192xf32>
    %1152 = arith.addf %1150, %1151 : vector<2x192xf32>
    %1153 = vector.extract_strided_slice %666 {offsets = [0, 6, 0], sizes = [2, 1, 96], strides = [1, 1, 1]} : vector<2x8x192xf32> to vector<2x1x96xf32>
    %1154 = vector.shape_cast %1153 : vector<2x1x96xf32> to vector<2x96xf32>
    %1155 = vector.extract_strided_slice %1154 {offsets = [0, 0], sizes = [2, 32], strides = [1, 1]} : vector<2x96xf32> to vector<2x32xf32>
    %1156 = vector.extract_strided_slice %1152 {offsets = [0, 0], sizes = [2, 32], strides = [1, 1]} : vector<2x192xf32> to vector<2x32xf32>
    %1157 = arith.addf %1155, %1156 : vector<2x32xf32>
    %1158 = arith.negf %1157 : vector<2x32xf32>
    %1159 = math.exp %1158 : vector<2x32xf32>
    %cst_153 = arith.constant 1.000000e+00 : f32
    %1160 = vector.broadcast %cst_153 : f32 to vector<2x32xf32>
    %1161 = arith.addf %1160, %1159 : vector<2x32xf32>
    %1162 = arith.divf %1160, %1161 : vector<2x32xf32>
    %1163 = vector.extract_strided_slice %1154 {offsets = [0, 32], sizes = [2, 32], strides = [1, 1]} : vector<2x96xf32> to vector<2x32xf32>
    %1164 = vector.extract_strided_slice %1152 {offsets = [0, 32], sizes = [2, 32], strides = [1, 1]} : vector<2x192xf32> to vector<2x32xf32>
    %1165 = arith.addf %1163, %1164 : vector<2x32xf32>
    %1166 = arith.negf %1165 : vector<2x32xf32>
    %1167 = math.exp %1166 : vector<2x32xf32>
    %cst_154 = arith.constant 1.000000e+00 : f32
    %1168 = vector.broadcast %cst_154 : f32 to vector<2x32xf32>
    %1169 = arith.addf %1168, %1167 : vector<2x32xf32>
    %1170 = arith.divf %1168, %1169 : vector<2x32xf32>
    %1171 = vector.extract_strided_slice %1154 {offsets = [0, 64], sizes = [2, 32], strides = [1, 1]} : vector<2x96xf32> to vector<2x32xf32>
    %1172 = vector.extract_strided_slice %1152 {offsets = [0, 64], sizes = [2, 32], strides = [1, 1]} : vector<2x192xf32> to vector<2x32xf32>
    %1173 = arith.mulf %1162, %1172 : vector<2x32xf32>
    %1174 = arith.addf %1171, %1173 : vector<2x32xf32>
    %1175 = math.tanh %1174 : vector<2x32xf32>
    %cst_155 = arith.constant 1.000000e+00 : f32
    %1176 = vector.broadcast %cst_155 : f32 to vector<2x32xf32>
    %1177 = arith.subf %1176, %1170 : vector<2x32xf32>
    %1178 = arith.mulf %1177, %1175 : vector<2x32xf32>
    %1179 = arith.mulf %1170, %1108 : vector<2x32xf32>
    %1180 = arith.addf %1178, %1179 : vector<2x32xf32>
    %1181 = vector.extract_strided_slice %0 {offsets = [0, 6], sizes = [2, 1], strides = [1, 1]} : vector<2x8xf32> to vector<2x1xf32>
    %1182 = vector.broadcast %1181 : vector<2x1xf32> to vector<2x32xf32>
    %1183 = arith.mulf %1182, %1180 : vector<2x32xf32>
    %cst_156 = arith.constant 1.000000e+00 : f32
    %1184 = vector.broadcast %cst_156 : f32 to vector<2x1xf32>
    %1185 = arith.subf %1184, %1181 : vector<2x1xf32>
    %1186 = vector.broadcast %1185 : vector<2x1xf32> to vector<2x32xf32>
    %1187 = arith.mulf %1186, %1108 : vector<2x32xf32>
    %1188 = arith.addf %1183, %1187 : vector<2x32xf32>
    %1189 = vector.broadcast %1181 : vector<2x1xf32> to vector<2x32xf32>
    %1190 = arith.mulf %1189, %1180 : vector<2x32xf32>
    %1191 = vector.extract_strided_slice %666 {offsets = [0, 1, 96], sizes = [2, 1, 96], strides = [1, 1, 1]} : vector<2x8x192xf32> to vector<2x1x96xf32>
    %1192 = vector.shape_cast %1191 : vector<2x1x96xf32> to vector<2x96xf32>
    %1193 = vector.extract_strided_slice %1192 {offsets = [0, 0], sizes = [2, 32], strides = [1, 1]} : vector<2x96xf32> to vector<2x32xf32>
    %1194 = vector.extract_strided_slice %1152 {offsets = [0, 96], sizes = [2, 32], strides = [1, 1]} : vector<2x192xf32> to vector<2x32xf32>
    %1195 = arith.addf %1193, %1194 : vector<2x32xf32>
    %1196 = arith.negf %1195 : vector<2x32xf32>
    %1197 = math.exp %1196 : vector<2x32xf32>
    %cst_157 = arith.constant 1.000000e+00 : f32
    %1198 = vector.broadcast %cst_157 : f32 to vector<2x32xf32>
    %1199 = arith.addf %1198, %1197 : vector<2x32xf32>
    %1200 = arith.divf %1198, %1199 : vector<2x32xf32>
    %1201 = vector.extract_strided_slice %1192 {offsets = [0, 32], sizes = [2, 32], strides = [1, 1]} : vector<2x96xf32> to vector<2x32xf32>
    %1202 = vector.extract_strided_slice %1152 {offsets = [0, 128], sizes = [2, 32], strides = [1, 1]} : vector<2x192xf32> to vector<2x32xf32>
    %1203 = arith.addf %1201, %1202 : vector<2x32xf32>
    %1204 = arith.negf %1203 : vector<2x32xf32>
    %1205 = math.exp %1204 : vector<2x32xf32>
    %cst_158 = arith.constant 1.000000e+00 : f32
    %1206 = vector.broadcast %cst_158 : f32 to vector<2x32xf32>
    %1207 = arith.addf %1206, %1205 : vector<2x32xf32>
    %1208 = arith.divf %1206, %1207 : vector<2x32xf32>
    %1209 = vector.extract_strided_slice %1192 {offsets = [0, 64], sizes = [2, 32], strides = [1, 1]} : vector<2x96xf32> to vector<2x32xf32>
    %1210 = vector.extract_strided_slice %1152 {offsets = [0, 160], sizes = [2, 32], strides = [1, 1]} : vector<2x192xf32> to vector<2x32xf32>
    %1211 = arith.mulf %1200, %1210 : vector<2x32xf32>
    %1212 = arith.addf %1209, %1211 : vector<2x32xf32>
    %1213 = math.tanh %1212 : vector<2x32xf32>
    %cst_159 = arith.constant 1.000000e+00 : f32
    %1214 = vector.broadcast %cst_159 : f32 to vector<2x32xf32>
    %1215 = arith.subf %1214, %1208 : vector<2x32xf32>
    %1216 = arith.mulf %1215, %1213 : vector<2x32xf32>
    %1217 = arith.mulf %1208, %1146 : vector<2x32xf32>
    %1218 = arith.addf %1216, %1217 : vector<2x32xf32>
    %1219 = vector.extract_strided_slice %0 {offsets = [0, 1], sizes = [2, 1], strides = [1, 1]} : vector<2x8xf32> to vector<2x1xf32>
    %1220 = vector.broadcast %1219 : vector<2x1xf32> to vector<2x32xf32>
    %1221 = arith.mulf %1220, %1218 : vector<2x32xf32>
    %cst_160 = arith.constant 1.000000e+00 : f32
    %1222 = vector.broadcast %cst_160 : f32 to vector<2x1xf32>
    %1223 = arith.subf %1222, %1219 : vector<2x1xf32>
    %1224 = vector.broadcast %1223 : vector<2x1xf32> to vector<2x32xf32>
    %1225 = arith.mulf %1224, %1146 : vector<2x32xf32>
    %1226 = arith.addf %1221, %1225 : vector<2x32xf32>
    %1227 = vector.broadcast %1219 : vector<2x1xf32> to vector<2x32xf32>
    %1228 = arith.mulf %1227, %1218 : vector<2x32xf32>
    %1229 = tpu.concatenate %1188, %1226 in 1 : vector<2x32xf32>, vector<2x32xf32> -> vector<2x64xf32>
    %cst_161 = arith.constant dense<0.000000e+00> : vector<2x192xf32>
    %1230 = tpu.matmul %1229, %659, %cst_161 {dimension_numbers = #tpu.dot_dimension_numbers<[1], [0], [0], [1], [0, 0, 1, 1], [], []>} : vector<2x64xf32>, vector<64x192xf32>, vector<2x192xf32> -> vector<2x192xf32>
    %1231 = vector.broadcast %661 : vector<1x192xf32> to vector<2x192xf32>
    %1232 = arith.addf %1230, %1231 : vector<2x192xf32>
    %1233 = vector.extract_strided_slice %666 {offsets = [0, 7, 0], sizes = [2, 1, 96], strides = [1, 1, 1]} : vector<2x8x192xf32> to vector<2x1x96xf32>
    %1234 = vector.shape_cast %1233 : vector<2x1x96xf32> to vector<2x96xf32>
    %1235 = vector.extract_strided_slice %1234 {offsets = [0, 0], sizes = [2, 32], strides = [1, 1]} : vector<2x96xf32> to vector<2x32xf32>
    %1236 = vector.extract_strided_slice %1232 {offsets = [0, 0], sizes = [2, 32], strides = [1, 1]} : vector<2x192xf32> to vector<2x32xf32>
    %1237 = arith.addf %1235, %1236 : vector<2x32xf32>
    %1238 = arith.negf %1237 : vector<2x32xf32>
    %1239 = math.exp %1238 : vector<2x32xf32>
    %cst_162 = arith.constant 1.000000e+00 : f32
    %1240 = vector.broadcast %cst_162 : f32 to vector<2x32xf32>
    %1241 = arith.addf %1240, %1239 : vector<2x32xf32>
    %1242 = arith.divf %1240, %1241 : vector<2x32xf32>
    %1243 = vector.extract_strided_slice %1234 {offsets = [0, 32], sizes = [2, 32], strides = [1, 1]} : vector<2x96xf32> to vector<2x32xf32>
    %1244 = vector.extract_strided_slice %1232 {offsets = [0, 32], sizes = [2, 32], strides = [1, 1]} : vector<2x192xf32> to vector<2x32xf32>
    %1245 = arith.addf %1243, %1244 : vector<2x32xf32>
    %1246 = arith.negf %1245 : vector<2x32xf32>
    %1247 = math.exp %1246 : vector<2x32xf32>
    %cst_163 = arith.constant 1.000000e+00 : f32
    %1248 = vector.broadcast %cst_163 : f32 to vector<2x32xf32>
    %1249 = arith.addf %1248, %1247 : vector<2x32xf32>
    %1250 = arith.divf %1248, %1249 : vector<2x32xf32>
    %1251 = vector.extract_strided_slice %1234 {offsets = [0, 64], sizes = [2, 32], strides = [1, 1]} : vector<2x96xf32> to vector<2x32xf32>
    %1252 = vector.extract_strided_slice %1232 {offsets = [0, 64], sizes = [2, 32], strides = [1, 1]} : vector<2x192xf32> to vector<2x32xf32>
    %1253 = arith.mulf %1242, %1252 : vector<2x32xf32>
    %1254 = arith.addf %1251, %1253 : vector<2x32xf32>
    %1255 = math.tanh %1254 : vector<2x32xf32>
    %cst_164 = arith.constant 1.000000e+00 : f32
    %1256 = vector.broadcast %cst_164 : f32 to vector<2x32xf32>
    %1257 = arith.subf %1256, %1250 : vector<2x32xf32>
    %1258 = arith.mulf %1257, %1255 : vector<2x32xf32>
    %1259 = arith.mulf %1250, %1188 : vector<2x32xf32>
    %1260 = arith.addf %1258, %1259 : vector<2x32xf32>
    %1261 = vector.extract_strided_slice %0 {offsets = [0, 7], sizes = [2, 1], strides = [1, 1]} : vector<2x8xf32> to vector<2x1xf32>
    %1262 = vector.broadcast %1261 : vector<2x1xf32> to vector<2x32xf32>
    %1263 = arith.mulf %1262, %1260 : vector<2x32xf32>
    %1264 = vector.extract_strided_slice %666 {offsets = [0, 0, 96], sizes = [2, 1, 96], strides = [1, 1, 1]} : vector<2x8x192xf32> to vector<2x1x96xf32>
    %1265 = vector.shape_cast %1264 : vector<2x1x96xf32> to vector<2x96xf32>
    %1266 = vector.extract_strided_slice %1265 {offsets = [0, 0], sizes = [2, 32], strides = [1, 1]} : vector<2x96xf32> to vector<2x32xf32>
    %1267 = vector.extract_strided_slice %1232 {offsets = [0, 96], sizes = [2, 32], strides = [1, 1]} : vector<2x192xf32> to vector<2x32xf32>
    %1268 = arith.addf %1266, %1267 : vector<2x32xf32>
    %1269 = arith.negf %1268 : vector<2x32xf32>
    %1270 = math.exp %1269 : vector<2x32xf32>
    %cst_165 = arith.constant 1.000000e+00 : f32
    %1271 = vector.broadcast %cst_165 : f32 to vector<2x32xf32>
    %1272 = arith.addf %1271, %1270 : vector<2x32xf32>
    %1273 = arith.divf %1271, %1272 : vector<2x32xf32>
    %1274 = vector.extract_strided_slice %1265 {offsets = [0, 32], sizes = [2, 32], strides = [1, 1]} : vector<2x96xf32> to vector<2x32xf32>
    %1275 = vector.extract_strided_slice %1232 {offsets = [0, 128], sizes = [2, 32], strides = [1, 1]} : vector<2x192xf32> to vector<2x32xf32>
    %1276 = arith.addf %1274, %1275 : vector<2x32xf32>
    %1277 = arith.negf %1276 : vector<2x32xf32>
    %1278 = math.exp %1277 : vector<2x32xf32>
    %cst_166 = arith.constant 1.000000e+00 : f32
    %1279 = vector.broadcast %cst_166 : f32 to vector<2x32xf32>
    %1280 = arith.addf %1279, %1278 : vector<2x32xf32>
    %1281 = arith.divf %1279, %1280 : vector<2x32xf32>
    %1282 = vector.extract_strided_slice %1265 {offsets = [0, 64], sizes = [2, 32], strides = [1, 1]} : vector<2x96xf32> to vector<2x32xf32>
    %1283 = vector.extract_strided_slice %1232 {offsets = [0, 160], sizes = [2, 32], strides = [1, 1]} : vector<2x192xf32> to vector<2x32xf32>
    %1284 = arith.mulf %1273, %1283 : vector<2x32xf32>
    %1285 = arith.addf %1282, %1284 : vector<2x32xf32>
    %1286 = math.tanh %1285 : vector<2x32xf32>
    %cst_167 = arith.constant 1.000000e+00 : f32
    %1287 = vector.broadcast %cst_167 : f32 to vector<2x32xf32>
    %1288 = arith.subf %1287, %1281 : vector<2x32xf32>
    %1289 = arith.mulf %1288, %1286 : vector<2x32xf32>
    %1290 = arith.mulf %1281, %1226 : vector<2x32xf32>
    %1291 = arith.addf %1289, %1290 : vector<2x32xf32>
    %1292 = vector.extract_strided_slice %0 {offsets = [0, 0], sizes = [2, 1], strides = [1, 1]} : vector<2x8xf32> to vector<2x1xf32>
    %1293 = vector.broadcast %1292 : vector<2x1xf32> to vector<2x32xf32>
    %1294 = arith.mulf %1293, %1291 : vector<2x32xf32>
    %1295 = tpu.concatenate %710, %1294 in 1 : vector<2x32xf32>, vector<2x32xf32> -> vector<2x64xf32>
    %1296 = vector.shape_cast %1295 : vector<2x64xf32> to vector<2x1x64xf32>
    %1297 = tpu.concatenate %790, %1228 in 1 : vector<2x32xf32>, vector<2x32xf32> -> vector<2x64xf32>
    %1298 = vector.shape_cast %1297 : vector<2x64xf32> to vector<2x1x64xf32>
    %1299 = tpu.concatenate %870, %1148 in 1 : vector<2x32xf32>, vector<2x32xf32> -> vector<2x64xf32>
    %1300 = vector.shape_cast %1299 : vector<2x64xf32> to vector<2x1x64xf32>
    %1301 = tpu.concatenate %950, %1068 in 1 : vector<2x32xf32>, vector<2x32xf32> -> vector<2x64xf32>
    %1302 = vector.shape_cast %1301 : vector<2x64xf32> to vector<2x1x64xf32>
    %1303 = tpu.concatenate %1030, %988 in 1 : vector<2x32xf32>, vector<2x32xf32> -> vector<2x64xf32>
    %1304 = vector.shape_cast %1303 : vector<2x64xf32> to vector<2x1x64xf32>
    %1305 = tpu.concatenate %1110, %908 in 1 : vector<2x32xf32>, vector<2x32xf32> -> vector<2x64xf32>
    %1306 = vector.shape_cast %1305 : vector<2x64xf32> to vector<2x1x64xf32>
    %1307 = tpu.concatenate %1190, %828 in 1 : vector<2x32xf32>, vector<2x32xf32> -> vector<2x64xf32>
    %1308 = vector.shape_cast %1307 : vector<2x64xf32> to vector<2x1x64xf32>
    %1309 = tpu.concatenate %1263, %748 in 1 : vector<2x32xf32>, vector<2x32xf32> -> vector<2x64xf32>
    %1310 = vector.shape_cast %1309 : vector<2x64xf32> to vector<2x1x64xf32>
    %1311 = tpu.concatenate %1296, %1298, %1300, %1302, %1304, %1306, %1308, %1310 in 1 : vector<2x1x64xf32>, vector<2x1x64xf32>, vector<2x1x64xf32>, vector<2x1x64xf32>, vector<2x1x64xf32>, vector<2x1x64xf32>, vector<2x1x64xf32>, vector<2x1x64xf32> -> vector<2x8x64xf32>
    %1312 = vector.shape_cast %1311 : vector<2x8x64xf32> to vector<16x64xf32>
    %c0_168 = arith.constant 0 : index
    %c0_169 = arith.constant 0 : index
    %1313 = vector.load %arg11[%c0_168, %c0_169] : memref<64x32xf32, #tpu.memory_space<vmem>>, vector<64x32xf32>
    %cst_170 = arith.constant dense<0.000000e+00> : vector<16x32xf32>
    %1314 = tpu.matmul %1312, %1313, %cst_170 {dimension_numbers = #tpu.dot_dimension_numbers<[1], [0], [0], [1], [0, 0, 1, 1], [], []>} : vector<16x64xf32>, vector<64x32xf32>, vector<16x32xf32> -> vector<16x32xf32>
    %c0_171 = arith.constant 0 : index
    %c0_172 = arith.constant 0 : index
    %1315 = vector.load %arg12[%c0_171, %c0_172] : memref<1x32xf32, #tpu.memory_space<vmem>>, vector<1x32xf32>
    %1316 = vector.broadcast %1315 : vector<1x32xf32> to vector<16x32xf32>
    %1317 = arith.addf %1314, %1316 : vector<16x32xf32>
    %1318 = vector.shape_cast %1317 : vector<16x32xf32> to vector<2x8x32xf32>
    %c0_173 = arith.constant 0 : index
    %c0_174 = arith.constant 0 : index
    %c0_175 = arith.constant 0 : index
    %1319 = vector.load %arg21[%c0_173, %c0_174, %c0_175] : memref<2x8x32xf32, #tpu.memory_space<vmem>>, vector<2x8x32xf32>
    tpu.vector_store %arg21[%c0_173, %c0_174, %c0_175], %1318 {strides = array<i32>} : memref<2x8x32xf32, #tpu.memory_space<vmem>>, vector<2x8x32xf32>,
    %c0_176 = arith.constant 0 : index
    %c0_177 = arith.constant 0 : index
    %1320 = vector.load %arg13[%c0_176, %c0_177] : memref<32x96xf32, #tpu.memory_space<vmem>>, vector<32x96xf32>
    %cst_178 = arith.constant dense<0.000000e+00> : vector<16x96xf32>
    %1321 = tpu.matmul %1317, %1320, %cst_178 {dimension_numbers = #tpu.dot_dimension_numbers<[1], [0], [0], [1], [0, 0, 1, 1], [], []>} : vector<16x32xf32>, vector<32x96xf32>, vector<16x96xf32> -> vector<16x96xf32>
    %c0_179 = arith.constant 0 : index
    %c0_180 = arith.constant 0 : index
    %1322 = vector.load %arg14[%c0_179, %c0_180] : memref<1x96xf32, #tpu.memory_space<vmem>>, vector<1x96xf32>
    %1323 = vector.broadcast %1322 : vector<1x96xf32> to vector<16x96xf32>
    %1324 = arith.addf %1321, %1323 : vector<16x96xf32>
    %1325 = vector.shape_cast %1324 : vector<16x96xf32> to vector<2x8x96xf32>
    %cst_181 = arith.constant 1.000000e+00 : f32
    %1326 = vector.broadcast %cst_181 : f32 to vector<2x8xf32>
    %1327 = arith.subf %1326, %0 : vector<2x8xf32>
    %cst_182 = arith.constant -1.000000e+09 : f32
    %1328 = vector.broadcast %cst_182 : f32 to vector<2x8xf32>
    %1329 = arith.mulf %1327, %1328 : vector<2x8xf32>
    %1330 = vector.shape_cast %1329 : vector<2x8xf32> to vector<2x1x8xf32>
    %1331 = vector.extract_strided_slice %1325 {offsets = [0, 0, 0], sizes = [2, 8, 8], strides = [1, 1, 1]} : vector<2x8x96xf32> to vector<2x8x8xf32>
    %1332 = vector.extract_strided_slice %1325 {offsets = [0, 0, 32], sizes = [2, 8, 8], strides = [1, 1, 1]} : vector<2x8x96xf32> to vector<2x8x8xf32>
    %1333 = vector.extract_strided_slice %1325 {offsets = [0, 0, 64], sizes = [2, 8, 8], strides = [1, 1, 1]} : vector<2x8x96xf32> to vector<2x8x8xf32>
    "tpu.trace_start"() <{level = 10 : i32, message = "bqd,bkd->bqk"}> : () -> ()
    %cst_183 = arith.constant dense<0.000000e+00> : vector<2x8x8xf32>
    %1334 = tpu.matmul %1331, %1332, %cst_183 {dimension_numbers = #tpu.dot_dimension_numbers<[2], [2], [1], [1], [0, 0, 0, 1, 1, 1], [0], [0]>} : vector<2x8x8xf32>, vector<2x8x8xf32>, vector<2x8x8xf32> -> vector<2x8x8xf32>
    "tpu.trace_stop"() : () -> ()
    %cst_184 = arith.constant 0.353553385 : f32
    %1335 = vector.broadcast %cst_184 : f32 to vector<2x8x8xf32>
    %1336 = arith.mulf %1334, %1335 : vector<2x8x8xf32>
    %1337 = vector.broadcast %1330 : vector<2x1x8xf32> to vector<2x8x8xf32>
    %1338 = arith.addf %1336, %1337 : vector<2x8x8xf32>
    %cst_185 = arith.constant dense<0xFF800000> : vector<2x8xf32>
    %1339 = vector.multi_reduction <maximumf>, %1338, %cst_185 [2] : vector<2x8x8xf32> to vector<2x8xf32>
    %1340 = vector.shape_cast %1339 : vector<2x8xf32> to vector<2x8x1xf32>
    %1341 = vector.broadcast %1340 : vector<2x8x1xf32> to vector<2x8x8xf32>
    %1342 = arith.subf %1338, %1341 : vector<2x8x8xf32>
    %1343 = math.exp %1342 : vector<2x8x8xf32>
    %cst_186 = arith.constant dense<0.000000e+00> : vector<2x8xf32>
    %1344 = vector.multi_reduction <add>, %1343, %cst_186 [2] : vector<2x8x8xf32> to vector<2x8xf32>
    %1345 = vector.shape_cast %1344 : vector<2x8xf32> to vector<2x8x1xf32>
    %1346 = tpu.reciprocal %1345 {approx = true} : vector<2x8x1xf32> -> vector<2x8x1xf32>
    %1347 = vector.broadcast %1346 : vector<2x8x1xf32> to vector<2x8x8xf32>
    %1348 = arith.mulf %1343, %1347 : vector<2x8x8xf32>
    "tpu.trace_start"() <{level = 10 : i32, message = "bqk,bkd->bqd"}> : () -> ()
    %cst_187 = arith.constant dense<0.000000e+00> : vector<2x8x8xf32>
    %1349 = tpu.matmul %1348, %1333, %cst_187 {dimension_numbers = #tpu.dot_dimension_numbers<[2], [1], [1], [2], [0, 0, 0, 1, 1, 2], [0], [0]>} : vector<2x8x8xf32>, vector<2x8x8xf32>, vector<2x8x8xf32> -> vector<2x8x8xf32>
    "tpu.trace_stop"() : () -> ()
    %1350 = vector.extract_strided_slice %1325 {offsets = [0, 0, 8], sizes = [2, 8, 8], strides = [1, 1, 1]} : vector<2x8x96xf32> to vector<2x8x8xf32>
    %1351 = vector.extract_strided_slice %1325 {offsets = [0, 0, 40], sizes = [2, 8, 8], strides = [1, 1, 1]} : vector<2x8x96xf32> to vector<2x8x8xf32>
    %1352 = vector.extract_strided_slice %1325 {offsets = [0, 0, 72], sizes = [2, 8, 8], strides = [1, 1, 1]} : vector<2x8x96xf32> to vector<2x8x8xf32>
    "tpu.trace_start"() <{level = 10 : i32, message = "bqd,bkd->bqk"}> : () -> ()
    %cst_188 = arith.constant dense<0.000000e+00> : vector<2x8x8xf32>
    %1353 = tpu.matmul %1350, %1351, %cst_188 {dimension_numbers = #tpu.dot_dimension_numbers<[2], [2], [1], [1], [0, 0, 0, 1, 1, 1], [0], [0]>} : vector<2x8x8xf32>, vector<2x8x8xf32>, vector<2x8x8xf32> -> vector<2x8x8xf32>
    "tpu.trace_stop"() : () -> ()
    %cst_189 = arith.constant 0.353553385 : f32
    %1354 = vector.broadcast %cst_189 : f32 to vector<2x8x8xf32>
    %1355 = arith.mulf %1353, %1354 : vector<2x8x8xf32>
    %1356 = vector.broadcast %1330 : vector<2x1x8xf32> to vector<2x8x8xf32>
    %1357 = arith.addf %1355, %1356 : vector<2x8x8xf32>
    %cst_190 = arith.constant dense<0xFF800000> : vector<2x8xf32>
    %1358 = vector.multi_reduction <maximumf>, %1357, %cst_190 [2] : vector<2x8x8xf32> to vector<2x8xf32>
    %1359 = vector.shape_cast %1358 : vector<2x8xf32> to vector<2x8x1xf32>
    %1360 = vector.broadcast %1359 : vector<2x8x1xf32> to vector<2x8x8xf32>
    %1361 = arith.subf %1357, %1360 : vector<2x8x8xf32>
    %1362 = math.exp %1361 : vector<2x8x8xf32>
    %cst_191 = arith.constant dense<0.000000e+00> : vector<2x8xf32>
    %1363 = vector.multi_reduction <add>, %1362, %cst_191 [2] : vector<2x8x8xf32> to vector<2x8xf32>
    %1364 = vector.shape_cast %1363 : vector<2x8xf32> to vector<2x8x1xf32>
    %1365 = tpu.reciprocal %1364 {approx = true} : vector<2x8x1xf32> -> vector<2x8x1xf32>
    %1366 = vector.broadcast %1365 : vector<2x8x1xf32> to vector<2x8x8xf32>
    %1367 = arith.mulf %1362, %1366 : vector<2x8x8xf32>
    "tpu.trace_start"() <{level = 10 : i32, message = "bqk,bkd->bqd"}> : () -> ()
    %cst_192 = arith.constant dense<0.000000e+00> : vector<2x8x8xf32>
    %1368 = tpu.matmul %1367, %1352, %cst_192 {dimension_numbers = #tpu.dot_dimension_numbers<[2], [1], [1], [2], [0, 0, 0, 1, 1, 2], [0], [0]>} : vector<2x8x8xf32>, vector<2x8x8xf32>, vector<2x8x8xf32> -> vector<2x8x8xf32>
    "tpu.trace_stop"() : () -> ()
    %1369 = vector.extract_strided_slice %1325 {offsets = [0, 0, 16], sizes = [2, 8, 8], strides = [1, 1, 1]} : vector<2x8x96xf32> to vector<2x8x8xf32>
    %1370 = vector.extract_strided_slice %1325 {offsets = [0, 0, 48], sizes = [2, 8, 8], strides = [1, 1, 1]} : vector<2x8x96xf32> to vector<2x8x8xf32>
    %1371 = vector.extract_strided_slice %1325 {offsets = [0, 0, 80], sizes = [2, 8, 8], strides = [1, 1, 1]} : vector<2x8x96xf32> to vector<2x8x8xf32>
    "tpu.trace_start"() <{level = 10 : i32, message = "bqd,bkd->bqk"}> : () -> ()
    %cst_193 = arith.constant dense<0.000000e+00> : vector<2x8x8xf32>
    %1372 = tpu.matmul %1369, %1370, %cst_193 {dimension_numbers = #tpu.dot_dimension_numbers<[2], [2], [1], [1], [0, 0, 0, 1, 1, 1], [0], [0]>} : vector<2x8x8xf32>, vector<2x8x8xf32>, vector<2x8x8xf32> -> vector<2x8x8xf32>
    "tpu.trace_stop"() : () -> ()
    %cst_194 = arith.constant 0.353553385 : f32
    %1373 = vector.broadcast %cst_194 : f32 to vector<2x8x8xf32>
    %1374 = arith.mulf %1372, %1373 : vector<2x8x8xf32>
    %1375 = vector.broadcast %1330 : vector<2x1x8xf32> to vector<2x8x8xf32>
    %1376 = arith.addf %1374, %1375 : vector<2x8x8xf32>
    %cst_195 = arith.constant dense<0xFF800000> : vector<2x8xf32>
    %1377 = vector.multi_reduction <maximumf>, %1376, %cst_195 [2] : vector<2x8x8xf32> to vector<2x8xf32>
    %1378 = vector.shape_cast %1377 : vector<2x8xf32> to vector<2x8x1xf32>
    %1379 = vector.broadcast %1378 : vector<2x8x1xf32> to vector<2x8x8xf32>
    %1380 = arith.subf %1376, %1379 : vector<2x8x8xf32>
    %1381 = math.exp %1380 : vector<2x8x8xf32>
    %cst_196 = arith.constant dense<0.000000e+00> : vector<2x8xf32>
    %1382 = vector.multi_reduction <add>, %1381, %cst_196 [2] : vector<2x8x8xf32> to vector<2x8xf32>
    %1383 = vector.shape_cast %1382 : vector<2x8xf32> to vector<2x8x1xf32>
    %1384 = tpu.reciprocal %1383 {approx = true} : vector<2x8x1xf32> -> vector<2x8x1xf32>
    %1385 = vector.broadcast %1384 : vector<2x8x1xf32> to vector<2x8x8xf32>
    %1386 = arith.mulf %1381, %1385 : vector<2x8x8xf32>
    "tpu.trace_start"() <{level = 10 : i32, message = "bqk,bkd->bqd"}> : () -> ()
    %cst_197 = arith.constant dense<0.000000e+00> : vector<2x8x8xf32>
    %1387 = tpu.matmul %1386, %1371, %cst_197 {dimension_numbers = #tpu.dot_dimension_numbers<[2], [1], [1], [2], [0, 0, 0, 1, 1, 2], [0], [0]>} : vector<2x8x8xf32>, vector<2x8x8xf32>, vector<2x8x8xf32> -> vector<2x8x8xf32>
    "tpu.trace_stop"() : () -> ()
    %1388 = vector.extract_strided_slice %1325 {offsets = [0, 0, 24], sizes = [2, 8, 8], strides = [1, 1, 1]} : vector<2x8x96xf32> to vector<2x8x8xf32>
    %1389 = vector.extract_strided_slice %1325 {offsets = [0, 0, 56], sizes = [2, 8, 8], strides = [1, 1, 1]} : vector<2x8x96xf32> to vector<2x8x8xf32>
    %1390 = vector.extract_strided_slice %1325 {offsets = [0, 0, 88], sizes = [2, 8, 8], strides = [1, 1, 1]} : vector<2x8x96xf32> to vector<2x8x8xf32>
    "tpu.trace_start"() <{level = 10 : i32, message = "bqd,bkd->bqk"}> : () -> ()
    %cst_198 = arith.constant dense<0.000000e+00> : vector<2x8x8xf32>
    %1391 = tpu.matmul %1388, %1389, %cst_198 {dimension_numbers = #tpu.dot_dimension_numbers<[2], [2], [1], [1], [0, 0, 0, 1, 1, 1], [0], [0]>} : vector<2x8x8xf32>, vector<2x8x8xf32>, vector<2x8x8xf32> -> vector<2x8x8xf32>
    "tpu.trace_stop"() : () -> ()
    %cst_199 = arith.constant 0.353553385 : f32
    %1392 = vector.broadcast %cst_199 : f32 to vector<2x8x8xf32>
    %1393 = arith.mulf %1391, %1392 : vector<2x8x8xf32>
    %1394 = vector.broadcast %1330 : vector<2x1x8xf32> to vector<2x8x8xf32>
    %1395 = arith.addf %1393, %1394 : vector<2x8x8xf32>
    %cst_200 = arith.constant dense<0xFF800000> : vector<2x8xf32>
    %1396 = vector.multi_reduction <maximumf>, %1395, %cst_200 [2] : vector<2x8x8xf32> to vector<2x8xf32>
    %1397 = vector.shape_cast %1396 : vector<2x8xf32> to vector<2x8x1xf32>
    %1398 = vector.broadcast %1397 : vector<2x8x1xf32> to vector<2x8x8xf32>
    %1399 = arith.subf %1395, %1398 : vector<2x8x8xf32>
    %1400 = math.exp %1399 : vector<2x8x8xf32>
    %cst_201 = arith.constant dense<0.000000e+00> : vector<2x8xf32>
    %1401 = vector.multi_reduction <add>, %1400, %cst_201 [2] : vector<2x8x8xf32> to vector<2x8xf32>
    %1402 = vector.shape_cast %1401 : vector<2x8xf32> to vector<2x8x1xf32>
    %1403 = tpu.reciprocal %1402 {approx = true} : vector<2x8x1xf32> -> vector<2x8x1xf32>
    %1404 = vector.broadcast %1403 : vector<2x8x1xf32> to vector<2x8x8xf32>
    %1405 = arith.mulf %1400, %1404 : vector<2x8x8xf32>
    "tpu.trace_start"() <{level = 10 : i32, message = "bqk,bkd->bqd"}> : () -> ()
    %cst_202 = arith.constant dense<0.000000e+00> : vector<2x8x8xf32>
    %1406 = tpu.matmul %1405, %1390, %cst_202 {dimension_numbers = #tpu.dot_dimension_numbers<[2], [1], [1], [2], [0, 0, 0, 1, 1, 2], [0], [0]>} : vector<2x8x8xf32>, vector<2x8x8xf32>, vector<2x8x8xf32> -> vector<2x8x8xf32>
    "tpu.trace_stop"() : () -> ()
    %1407 = tpu.concatenate %1349, %1368, %1387, %1406 in 2 : vector<2x8x8xf32>, vector<2x8x8xf32>, vector<2x8x8xf32>, vector<2x8x8xf32> -> vector<2x8x32xf32>
    %1408 = vector.shape_cast %1407 : vector<2x8x32xf32> to vector<16x32xf32>
    %c0_203 = arith.constant 0 : index
    %c0_204 = arith.constant 0 : index
    %1409 = vector.load %arg15[%c0_203, %c0_204] : memref<32x32xf32, #tpu.memory_space<vmem>>, vector<32x32xf32>
    %cst_205 = arith.constant dense<0.000000e+00> : vector<16x32xf32>
    %1410 = tpu.matmul %1408, %1409, %cst_205 {dimension_numbers = #tpu.dot_dimension_numbers<[1], [0], [0], [1], [0, 0, 1, 1], [], []>} : vector<16x32xf32>, vector<32x32xf32>, vector<16x32xf32> -> vector<16x32xf32>
    %c0_206 = arith.constant 0 : index
    %c0_207 = arith.constant 0 : index
    %1411 = vector.load %arg16[%c0_206, %c0_207] : memref<1x32xf32, #tpu.memory_space<vmem>>, vector<1x32xf32>
    %1412 = vector.broadcast %1411 : vector<1x32xf32> to vector<16x32xf32>
    %1413 = arith.addf %1410, %1412 : vector<16x32xf32>
    %c0_208 = arith.constant 0 : index
    %c0_209 = arith.constant 0 : index
    %1414 = vector.load %arg17[%c0_208, %c0_209] : memref<32x128xf32, #tpu.memory_space<vmem>>, vector<32x128xf32>
    %cst_210 = arith.constant dense<0.000000e+00> : vector<16x128xf32>
    %1415 = tpu.matmul %1413, %1414, %cst_210 {dimension_numbers = #tpu.dot_dimension_numbers<[1], [0], [0], [1], [0, 0, 1, 1], [], []>} : vector<16x32xf32>, vector<32x128xf32>, vector<16x128xf32> -> vector<16x128xf32>
    %c0_211 = arith.constant 0 : index
    %c0_212 = arith.constant 0 : index
    %1416 = vector.load %arg18[%c0_211, %c0_212] : memref<1x128xf32, #tpu.memory_space<vmem>>, vector<1x128xf32>
    %1417 = vector.broadcast %1416 : vector<1x128xf32> to vector<16x128xf32>
    %1418 = arith.addf %1415, %1417 : vector<16x128xf32>
    %cst_213 = arith.constant 0.000000e+00 : f32
    %1419 = vector.broadcast %cst_213 : f32 to vector<16x128xf32>
    %1420 = arith.maximumf %1418, %1419 : vector<16x128xf32>
    %c0_214 = arith.constant 0 : index
    %c0_215 = arith.constant 0 : index
    %1421 = vector.load %arg19[%c0_214, %c0_215] : memref<128x16xf32, #tpu.memory_space<vmem>>, vector<128x16xf32>
    %cst_216 = arith.constant dense<0.000000e+00> : vector<16x16xf32>
    %1422 = tpu.matmul %1420, %1421, %cst_216 {dimension_numbers = #tpu.dot_dimension_numbers<[1], [0], [0], [1], [0, 0, 1, 1], [], []>} : vector<16x128xf32>, vector<128x16xf32>, vector<16x16xf32> -> vector<16x16xf32>
    %c0_217 = arith.constant 0 : index
    %c0_218 = arith.constant 0 : index
    %1423 = vector.load %arg20[%c0_217, %c0_218] : memref<1x16xf32, #tpu.memory_space<vmem>>, vector<1x16xf32>
    %1424 = vector.broadcast %1423 : vector<1x16xf32> to vector<16x16xf32>
    %1425 = arith.addf %1422, %1424 : vector<16x16xf32>
    %1426 = vector.shape_cast %1425 : vector<16x16xf32> to vector<2x8x16xf32>
    %1427 = vector.extract_strided_slice %1426 {offsets = [0, 0, 0], sizes = [2, 8, 8], strides = [1, 1, 1]} : vector<2x8x16xf32> to vector<2x8x8xf32>
    %c0_219 = arith.constant 0 : index
    %c0_220 = arith.constant 0 : index
    %c0_221 = arith.constant 0 : index
    %1428 = vector.load %arg22[%c0_219, %c0_220, %c0_221] : memref<2x8x8xf32, #tpu.memory_space<vmem>>, vector<2x8x8xf32>
    tpu.vector_store %arg22[%c0_219, %c0_220, %c0_221], %1427 {strides = array<i32>} : memref<2x8x8xf32, #tpu.memory_space<vmem>>, vector<2x8x8xf32>,
    %1429 = vector.extract_strided_slice %1426 {offsets = [0, 0, 8], sizes = [2, 8, 8], strides = [1, 1, 1]} : vector<2x8x16xf32> to vector<2x8x8xf32>
    %c0_222 = arith.constant 0 : index
    %c0_223 = arith.constant 0 : index
    %c0_224 = arith.constant 0 : index
    %1430 = vector.load %arg23[%c0_222, %c0_223, %c0_224] : memref<2x8x8xf32, #tpu.memory_space<vmem>>, vector<2x8x8xf32>
    tpu.vector_store %arg23[%c0_222, %c0_223, %c0_224], %1429 {strides = array<i32>} : memref<2x8x8xf32, #tpu.memory_space<vmem>>, vector<2x8x8xf32>,
    return
  }
}

</mosaic_0001>

<bundles_post_ra>
// kernel: subject_predicate_forward.1
= control target key start
LH: loop header
LB: loop body
LE: loop exit
PB: predicated region body
PF: predicated region fallthrough
CT: control target
= control target key end

     0   :  { %s10763_s0 = inlined_call_operand.vmem [shape: f32[2,8,32], index: 0, kind: input, shape index: {}]   ;;  %s10764_s1 = inlined_call_operand.hbm [shape: f32[2,8,32], index: 1, kind: input, shape index: {}]   ;;  %s10765_s2 = inlined_call_operand.hbm [shape: f32[2,8], index: 2, kind: input, shape index: {}]   ;;  %s10766_s3 = inlined_call_operand.hbm [shape: f32[32,192], index: 3, kind: input, shape index: {}]   ;;  %s10767_s4 = inlined_call_operand.vmem [shape: f32[64,192], index: 4, kind: input, shape index: {}]   ;;  %s10768_s5 = inlined_call_operand.hbm [shape: f32[1,192], index: 5, kind: input, shape index: {}]   ;;  %s10769_s6 = inlined_call_operand.hbm [shape: f32[1,192], index: 6, kind: input, shape index: {}]   ;;  %s10770_s7 = inlined_call_operand.vmem [shape: f32[64,192], index: 7, kind: input, shape index: {}]   ;;  %s10771_s8 = inlined_call_operand.hbm [shape: f32[64,192], index: 8, kind: input, shape index: {}]   ;;  %s10772_s9 = inlined_call_operand.hbm [shape: f32[1,192], index: 9, kind: input, shape index: {}]   ;;  %s10773_s10 = inlined_call_operand.hbm [shape: f32[1,192], index: 10, kind: input, shape index: {}]   ;;  %s10774_s11 = inlined_call_operand.vmem [shape: f32[64,32], index: 11, kind: input, shape index: {}]   ;;  %s10775_s12 = inlined_call_operand.hbm [shape: f32[1,32], index: 12, kind: input, shape index: {}]   ;;  %s10776_s13 = inlined_call_operand.hbm [shape: f32[32,96], index: 13, kind: input, shape index: {}]   ;;  %s10777_s14 = inlined_call_operand.hbm [shape: f32[1,96], index: 14, kind: input, shape index: {}]   ;;  %s10778_s15 = inlined_call_operand.hbm [shape: f32[32,32], index: 15, kind: input, shape index: {}]   ;;  %s10779_s16 = inlined_call_operand.hbm [shape: f32[1,32], index: 16, kind: input, shape index: {}]   ;;  %s10780_s17 = inlined_call_operand.hbm [shape: f32[32,128], index: 17, kind: input, shape index: {}]   ;;  %s10781_s18 = inlined_call_operand.hbm [shape: f32[1,128], index: 18, kind: input, shape index: {}]   ;;  %s10782_s19 = inlined_call_operand.vmem [shape: f32[128,16], index: 19, kind: input, shape index: {}]   ;;  %s10783_s20 = inlined_call_operand.hbm [shape: f32[1,16], index: 20, kind: input, shape index: {}]   ;;  %s10784_s21 = inlined_call_operand.hbm [shape: f32[2,8,32], index: 21, kind: output, shape index: {0}]   ;;  %s10785_s22 = inlined_call_operand.hbm [shape: f32[2,8,8], index: 22, kind: output, shape index: {1}]   ;;  %s10786_s23 = inlined_call_operand.hbm [shape: f32[2,8,8], index: 23, kind: output, shape index: {2}]  }
   0x1   :  { %10829 = sst [smem:[#allocation59_spill]] %s10763_s0 }
   0x2   :  { %10830 = sst [smem:[#allocation60_spill]] %s10764_s1 }
   0x3   :  { %10831 = sst [smem:[#allocation61_spill]] %s10765_s2 }
   0x4   :  { %10832 = sst [smem:[#allocation62_spill]] %s10766_s3 }
   0x5   :  { %10833 = sst [smem:[#allocation63_spill]] %s10767_s4 }
   0x6   :  { %10834 = sst [smem:[#allocation64_spill]] %s10768_s5 }
   0x7   :  { %10835 = sst [smem:[#allocation65_spill]] %s10769_s6 }
   0x8   :  { %10836 = sst [smem:[#allocation66_spill]] %s10770_s7 }
   0x9   :  { %29 = vsyncpa [#allocation3], 0 }
   0xa   :  { %30 = vsyncpa [#allocation6], 0 }
   0xb   :  { %31 = vsyncpa [#allocation9], 0 }
   0xc   :  { %32 = vsyncpa [#allocation12], 0 }
   0xd   :  { %33 = vsyncpa [#allocation15], 0 }
   0xe   :  { %34 = vsyncpa [#allocation18], 0 }
   0xf   :  { %35 = vsyncpa [#allocation21], 0 }
  0x10   :  { %36 = vsyncpa [#allocation24], 0 }
  0x11   :  { %37 = vsyncpa [#allocation27], 0 }
  0x12   :  { %38 = vsyncpa [#allocation4], 0 }
  0x13   :  { %39 = vsyncpa [#allocation30], 0  ;;  %s8374_s4 = smov [#allocation5]   ;;  %s8375_s24 = smov [#allocation8]  }
  0x14   :  { %s60_s30 = sshll.u32 %s8374_s4, 4  ;;  %s84_s25 = sshll.u32 %s8375_s24, 4  ;;  %s61_s30 = int_to_ptr.vmem [resolvable:$true] %s60_s30  ;;  %s85_s25 = int_to_ptr.vmem [resolvable:$true] %s84_s25 }
  0x15   :  { %s7980_s5 = scalar_lea.vmem %s61_s30, 32  ;;  %p7985_p1 = scmp.lt.s32.totalorder %s61_s30, %s61_s30 }
  0x16   :  { %p7981_p0 = scmp.ne.s32.totalorder %s61_s30, %s7980_s5  ;;  %p7986_p2 = scmp.lt.s32.totalorder %s7980_s5, %s7980_s5 }
  0x18   :  { %p7987_p3 = por %p7986_p2, %p7985_p1 }
  0x1a   :  { %p7988_p4 = pnand %p7987_p3, %p7981_p0 }
  0x1c   :  { %7991 = shalt.err (!%p7988_p4)
}
  0x1d   :  { %s10837_s2 = sld [smem:[#allocation61_spill]]  ;;  %s8000_s6 = scalar_lea.vmem %s85_s25, 32 }
  0x1e   :  { %p8001_p5 = scmp.ne.s32.totalorder %s85_s25, %s8000_s6  ;;  %p8005_p6 = scmp.lt.s32.totalorder %s85_s25, %s85_s25 }
  0x1f   :  { %p8006_p7 = scmp.lt.s32.totalorder %s8000_s6, %s8000_s6 }
  0x21   :  { %p8007_p8 = por %p8006_p7, %p8005_p6 }
  0x23   :  { %63 = dma.hbm_to_vmem [thread:$0]  %s10837_s2, 32, %s61_s30, [#allocation6]  }
  0x24   :  { %p8008_p9 = pnand %p8007_p8, %p8001_p5 }
  0x26   :  { %8011 = shalt.err (!%p8008_p9)
}
  0x27   :  { %s10838_s28 = sld [smem:[#allocation64_spill]]  ;;  %s8376_s29 = smov [#allocation11]  }
  0x28   :  { %s105_s3 = sshll.u32 %s8376_s29, 4  ;;  %s8377_s0 = smov [#allocation14]   ;;  %s106_s3 = int_to_ptr.vmem [resolvable:$true] %s105_s3 }
  0x29   :  { %s128_s4 = sshll.u32 %s8377_s0, 4  ;;  %s8020_s24 = scalar_lea.vmem %s106_s3, 2048  ;;  %s129_s4 = int_to_ptr.vmem [resolvable:$true] %s128_s4 }
  0x2a   :  { %p8021_p10 = scmp.ne.s32.totalorder %s106_s3, %s8020_s24  ;;  %p8025_p11 = scmp.lt.s32.totalorder %s106_s3, %s106_s3 }
  0x2b   :  { %p8026_p12 = scmp.lt.s32.totalorder %s8020_s24, %s8020_s24 }
  0x2d   :  { %87 = dma.hbm_to_vmem [thread:$0]  %s10838_s28, 32, %s85_s25, [#allocation9]  }
  0x2e   :  { %p8027_p13 = por %p8026_p12, %p8025_p11 }
  0x30   :  { %p8028_p0 = pnand %p8027_p13, %p8021_p10 }
  0x32   :  { %8031 = shalt.err (!%p8028_p0)
}
  0x33   :  { %s8378_s30 = smov 256   ;;  %s8379_s5 = smov 16  }
  0x34   :  { %111 = dma.hbm_to_vmem [thread:$0]  %s10771_s8, 2048, %s106_s3, [#allocation12], %s8378_s30, %s8378_s30, %s8379_s5  }
  0x35   :  { %s8040_s26 = scalar_lea.vmem %s129_s4, 32  ;;  %p8045_p2 = scmp.lt.s32.totalorder %s129_s4, %s129_s4 }
  0x36   :  { %p8041_p1 = scmp.ne.s32.totalorder %s129_s4, %s8040_s26  ;;  %p8046_p3 = scmp.lt.s32.totalorder %s8040_s26, %s8040_s26 }
  0x38   :  { %p8047_p4 = por %p8046_p3, %p8045_p2 }
  0x3a   :  { %p8048_p5 = pnand %p8047_p4, %p8041_p1 }
  0x3c   :  { %8051 = shalt.err (!%p8048_p5)
}
  0x3d   :  { %131 = dma.hbm_to_vmem [thread:$0]  %s10773_s10, 32, %s129_s4, [#allocation15]  }
  0x3e   :  { %s8380_s27 = smov [#allocation17]   ;;  %s8381_s28 = smov [#allocation20]  }
  0x3f   :  { %s149_s7 = sshll.u32 %s8380_s27, 4  ;;  %s171_s29 = sshll.u32 %s8381_s28, 4  ;;  %s150_s7 = int_to_ptr.vmem [resolvable:$true] %s149_s7  ;;  %s172_s29 = int_to_ptr.vmem [resolvable:$true] %s171_s29 }
  0x40   :  { %s8060_s0 = scalar_lea.vmem %s150_s7, 512  ;;  %p8065_p7 = scmp.lt.s32.totalorder %s150_s7, %s150_s7 }
  0x41   :  { %p8061_p6 = scmp.ne.s32.totalorder %s150_s7, %s8060_s0  ;;  %p8066_p8 = scmp.lt.s32.totalorder %s8060_s0, %s8060_s0 }
  0x43   :  { %p8067_p9 = por %p8066_p8, %p8065_p7 }
  0x45   :  { %p8068_p10 = pnand %p8067_p9, %p8061_p6 }
  0x47   :  { %8071 = shalt.err (!%p8068_p10)
}
  0x48   :  { %s8382_s8 = smov 128   ;;  %s8383_s3 = smov 8  }
  0x49   :  { %155 = dma.hbm_to_vmem [thread:$0]  %s10776_s13, 512, %s150_s7, [#allocation18], %s8382_s8, %s8382_s8, %s8383_s3  }
  0x4a   :  { %s8080_s4 = scalar_lea.vmem %s172_s29, 512  ;;  %p8085_p12 = scmp.lt.s32.totalorder %s172_s29, %s172_s29 }
  0x4b   :  { %p8081_p11 = scmp.ne.s32.totalorder %s172_s29, %s8080_s4  ;;  %p8086_p13 = scmp.lt.s32.totalorder %s8080_s4, %s8080_s4 }
  0x4d   :  { %p8087_p0 = por %p8086_p13, %p8085_p12 }
  0x4f   :  { %p8088_p1 = pnand %p8087_p0, %p8081_p11 }
  0x51   :  { %8091 = shalt.err (!%p8088_p1)
}
  0x52   :  { %177 = dma.hbm_to_vmem [thread:$0]  %s10778_s15, 512, %s172_s29, [#allocation21], %s8382_s8, %s8382_s8, %s8383_s3  }
  0x53   :  { %s8384_s26 = smov [#allocation23]   ;;  %s8385_s6 = smov [#allocation2]  }
  0x54   :  { %s193_s2 = sshll.u32 %s8384_s26, 4  ;;  %s47_s27 = sshll.u32 %s8385_s6, 4  ;;  %s194_s2 = int_to_ptr.vmem [resolvable:$true] %s193_s2  ;;  %s48_s27 = int_to_ptr.vmem [resolvable:$true] %s47_s27 }
  0x55   :  { %s8100_s13 = scalar_lea.vmem %s194_s2, 512  ;;  %p8105_p3 = scmp.lt.s32.totalorder %s194_s2, %s194_s2 }
  0x56   :  { %p8101_p2 = scmp.ne.s32.totalorder %s194_s2, %s8100_s13  ;;  %p8106_p4 = scmp.lt.s32.totalorder %s8100_s13, %s8100_s13 }
  0x58   :  { %p8107_p5 = por %p8106_p4, %p8105_p3 }
  0x5a   :  { %p8108_p6 = pnand %p8107_p5, %p8101_p2 }
  0x5c   :  { %8111 = shalt.err (!%p8108_p6)
}
  0x5d   :  { %199 = dma.hbm_to_vmem [thread:$0]  %s10780_s17, 512, %s194_s2, [#allocation24], %s8382_s8, %s8382_s8, %s8383_s3  }
  0x5e   :  { %s8120_s15 = scalar_lea.vmem %s48_s27, 256  ;;  %p8125_p8 = scmp.lt.s32.totalorder %s48_s27, %s48_s27 }
  0x5f   :  { %p8121_p7 = scmp.ne.s32.totalorder %s48_s27, %s8120_s15  ;;  %p8126_p9 = scmp.lt.s32.totalorder %s8120_s15, %s8120_s15 }
  0x61   :  { %p8127_p10 = por %p8126_p9, %p8125_p8 }
  0x63   :  { %p8128_p11 = pnand %p8127_p10, %p8121_p7 }
  0x65   :  { %8131 = shalt.err (!%p8128_p11)
}
  0x66   :  { %s10839_s24 = sld [smem:[#allocation60_spill]]  ;;  %s8386_s10 = smov [#allocation7]  }
  0x67   :  { %s69_s4 = sshll.u32 %s8386_s10, 4  ;;  %s8387_s1 = smov [#allocation10]   ;;  %s70_s4 = int_to_ptr.vmem [resolvable:$true] %s69_s4 }
  0x68   :  { %s94_s25 = sshll.u32 %s8387_s1, 4  ;;  %s8140_s17 = scalar_lea.vmem %s70_s4, 1024  ;;  %s95_s25 = int_to_ptr.vmem [resolvable:$true] %s94_s25 }
  0x69   :  { %p8141_p12 = scmp.ne.s32.totalorder %s70_s4, %s8140_s17  ;;  %p8145_p13 = scmp.lt.s32.totalorder %s70_s4, %s70_s4 }
  0x6a   :  { %p8146_p0 = scmp.lt.s32.totalorder %s8140_s17, %s8140_s17 }
  0x6c   :  { %53 = dma.hbm_to_vmem [thread:$0]  %s10839_s24, 256, %s48_s27, [#allocation3], %s8382_s8, %s8382_s8, %s8383_s3  }
  0x6d   :  { %p8147_p1 = por %p8146_p0, %p8145_p13 }
  0x6f   :  { %p8148_p2 = pnand %p8147_p1, %p8141_p12 }
  0x71   :  { %8151 = shalt.err (!%p8148_p2)
}
  0x72   :  { %s10840_s6 = sld [smem:[#allocation62_spill]]  ;;  %s8160_s27 = scalar_lea.vmem %s95_s25, 32 }
  0x73   :  { %p8161_p3 = scmp.ne.s32.totalorder %s95_s25, %s8160_s27  ;;  %p8165_p4 = scmp.lt.s32.totalorder %s95_s25, %s95_s25 }
  0x74   :  { %p8166_p5 = scmp.lt.s32.totalorder %s8160_s27, %s8160_s27 }
  0x76   :  { %p8167_p6 = por %p8166_p5, %p8165_p4 }
  0x78   :  { %75 = dma.hbm_to_vmem [thread:$0]  %s10840_s6, 1024, %s70_s4, [#allocation6], %s8378_s30, %s8378_s30, %s8379_s5  }
  0x79   :  { %p8168_p7 = pnand %p8167_p6, %p8161_p3 }
  0x7b   :  { %8171 = shalt.err (!%p8168_p7)
}
  0x7c   :  { %s10841_s28 = sld [smem:[#allocation65_spill]]  ;;  %s8388_s15 = smov [#allocation13]  }
  0x7d   :  { %s118_s29 = sshll.u32 %s8388_s15, 4  ;;  %s8389_s0 = smov [#allocation16]   ;;  %s119_s29 = int_to_ptr.vmem [resolvable:$true] %s118_s29 }
  0x7e   :  { %s140_s24 = sshll.u32 %s8389_s0, 4  ;;  %s8180_s10 = scalar_lea.vmem %s119_s29, 32  ;;  %s141_s24 = int_to_ptr.vmem [resolvable:$true] %s140_s24 }
  0x7f   :  { %p8181_p8 = scmp.ne.s32.totalorder %s119_s29, %s8180_s10  ;;  %p8185_p9 = scmp.lt.s32.totalorder %s119_s29, %s119_s29 }
  0x80   :  { %p8186_p10 = scmp.lt.s32.totalorder %s8180_s10, %s8180_s10 }
  0x82   :  { %97 = dma.hbm_to_vmem [thread:$0]  %s10841_s28, 32, %s95_s25, [#allocation9]  }
  0x83   :  { %p8187_p11 = por %p8186_p10, %p8185_p9 }
  0x85   :  { %p8188_p12 = pnand %p8187_p11, %p8181_p8 }
  0x87   :  { %8191 = shalt.err (!%p8188_p12)
}
  0x88   :  { %121 = dma.hbm_to_vmem [thread:$0]  %s10772_s9, 32, %s119_s29, [#allocation12]  }
  0x89   :  { %s8200_s1 = scalar_lea.vmem %s141_s24, 16  ;;  %s8204_s25 = scalar_lea.vmem %s141_s24, 32 }
  0x8a   :  { %p8201_p13 = scmp.ne.s32.totalorder %s141_s24, %s8200_s1  ;;  %p8205_p0 = scmp.lt.s32.totalorder %s141_s24, %s141_s24 }
  0x8b   :  { %p8206_p1 = scmp.lt.s32.totalorder %s8204_s25, %s8200_s1 }
  0x8d   :  { %p8207_p2 = por %p8206_p1, %p8205_p0 }
  0x8f   :  { %p8208_p3 = pnand %p8207_p2, %p8201_p13 }
  0x91   :  { %8211 = shalt.err (!%p8208_p3)
}
  0x92   :  { %143 = dma.hbm_to_vmem [thread:$0]  %s10775_s12, 16, %s141_s24, [#allocation15]  }
  0x93   :  { %s8390_s2 = smov [#allocation19]   ;;  %s8391_s27 = smov [#allocation22]  }
  0x94   :  { %s162_s6 = sshll.u32 %s8390_s2, 4  ;;  %s184_s13 = sshll.u32 %s8391_s27, 4  ;;  %s163_s6 = int_to_ptr.vmem [resolvable:$true] %s162_s6  ;;  %s185_s13 = int_to_ptr.vmem [resolvable:$true] %s184_s13 }
  0x95   :  { %s8220_s7 = scalar_lea.vmem %s163_s6, 16  ;;  %s8224_s9 = scalar_lea.vmem %s163_s6, 32 }
  0x96   :  { %p8221_p4 = scmp.ne.s32.totalorder %s163_s6, %s8220_s7  ;;  %p8225_p5 = scmp.lt.s32.totalorder %s163_s6, %s163_s6 }
  0x97   :  { %p8226_p6 = scmp.lt.s32.totalorder %s8224_s9, %s8220_s7 }
  0x99   :  { %p8227_p7 = por %p8226_p6, %p8225_p5 }
  0x9b   :  { %p8228_p8 = pnand %p8227_p7, %p8221_p4 }
  0x9d   :  { %8231 = shalt.err (!%p8228_p8)
}
  0x9e   :  { %165 = dma.hbm_to_vmem [thread:$0]  %s10777_s14, 16, %s163_s6, [#allocation18]  }
  0x9f   :  { %s8240_s29 = scalar_lea.vmem %s185_s13, 16  ;;  %s8244_s12 = scalar_lea.vmem %s185_s13, 32 }
  0xa0   :  { %p8241_p9 = scmp.ne.s32.totalorder %s185_s13, %s8240_s29  ;;  %p8245_p10 = scmp.lt.s32.totalorder %s185_s13, %s185_s13 }
  0xa1   :  { %p8246_p11 = scmp.lt.s32.totalorder %s8244_s12, %s8240_s29 }
  0xa3   :  { %p8247_p12 = por %p8246_p11, %p8245_p10 }
  0xa5   :  { %p8248_p13 = pnand %p8247_p12, %p8241_p9 }
  0xa7   :  { %8251 = shalt.err (!%p8248_p13)
}
  0xa8   :  { %187 = dma.hbm_to_vmem [thread:$0]  %s10779_s16, 16, %s185_s13, [#allocation21]  }
  0xa9   :  { %s8392_s10 = smov [#allocation25]   ;;  %s8393_s4 = smov [#allocation26]  }
  0xaa   :  { %s206_s30 = sshll.u32 %s8392_s10, 4  ;;  %s218_s1 = sshll.u32 %s8393_s4, 4  ;;  %s207_s30 = int_to_ptr.vmem [resolvable:$true] %s206_s30  ;;  %s219_s1 = int_to_ptr.vmem [resolvable:$true] %s218_s1 }
  0xab   :  { %s8260_s25 = scalar_lea.vmem %s207_s30, 16  ;;  %s8264_s14 = scalar_lea.vmem %s207_s30, 32 }
  0xac   :  { %p8261_p0 = scmp.ne.s32.totalorder %s207_s30, %s8260_s25  ;;  %p8265_p1 = scmp.lt.s32.totalorder %s207_s30, %s207_s30 }
  0xad   :  { %p8266_p2 = scmp.lt.s32.totalorder %s8264_s14, %s8260_s25 }
  0xaf   :  { %p8267_p3 = por %p8266_p2, %p8265_p1 }
  0xb1   :  { %p8268_p4 = pnand %p8267_p3, %p8261_p0 }
  0xb3   :  { %8271 = shalt.err (!%p8268_p4)
}
  0xb4   :  { %209 = dma.hbm_to_vmem [thread:$0]  %s10781_s18, 16, %s207_s30, [#allocation24]  }
  0xb5   :  { %s8280_s2 = scalar_lea.vmem %s219_s1, 16  ;;  %s8284_s16 = scalar_lea.vmem %s219_s1, 32 }
  0xb6   :  { %p8281_p5 = scmp.ne.s32.totalorder %s219_s1, %s8280_s2  ;;  %p8285_p6 = scmp.lt.s32.totalorder %s219_s1, %s219_s1 }
  0xb7   :  { %p8286_p7 = scmp.lt.s32.totalorder %s8284_s16, %s8280_s2 }
  0xb9   :  { %p8287_p8 = por %p8286_p7, %p8285_p6 }
  0xbb   :  { %p8288_p9 = pnand %p8287_p8, %p8281_p5 }
  0xbd   :  { %8291 = shalt.err (!%p8288_p9)
}
  0xbe   :  { %221 = dma.hbm_to_vmem [thread:$0]  %s10783_s20, 16, %s219_s1, [#allocation27]  }
  0xbf   :  { %8352 = dma.done.wait [#allocation3], 256  }
  0xc0   :  { %8353 = vsyncadd [#allocation3], 4294967040 }
  0xc1   :  { %8354 = dma.done.wait [#allocation6], 1056  }
  0xc2   :  { %8355 = vsyncadd [#allocation6], 4294966240 }
  0xc3   :  { %8356 = dma.done.wait [#allocation9], 64  }
  0xc4   :  { %8357 = vsyncadd [#allocation9], 4294967232 }
  0xc5   :  { %8358 = dma.done.wait [#allocation12], 2080  }
  0xc6   :  { %8359 = vsyncadd [#allocation12], 4294965216 }
  0xc7   :  { %8360 = dma.done.wait [#allocation15], 48  }
  0xc8   :  { %8361 = vsyncadd [#allocation15], 4294967248 }
  0xc9   :  { %8362 = dma.done.wait [#allocation18], 528  }
  0xca   :  { %8363 = vsyncadd [#allocation18], 4294966768 }
  0xcb   :  { %8364 = dma.done.wait [#allocation21], 528  }
  0xcc   :  { %8365 = vsyncadd [#allocation21], 4294966768 }
  0xcd   :  { %8366 = dma.done.wait [#allocation24], 528  }
  0xce   :  { %8367 = vsyncadd [#allocation24], 4294966768 }
  0xcf   :  { %8368 = dma.done.wait [#allocation27], 16  }
  0xd0   :  { %8369 = vsyncadd [#allocation27], 4294967280  ;;  %v10790_v0 = vmov 0.0   ;;  %s10842_s13 = sld [smem:[#allocation63_spill]]  ;;  %v284_v6 = vld [vmem:[#allocation7 + $0x38] sm:$0xff]  ;;  %v283_v7 = vld [vmem:[#allocation7 + $0x30] sm:$0xff]  ;;  %v304_v31 = vlaneseq }
  0xd1   :  { %385 = vmatprep.mubr.f32.mxu0 %v10790_v0  ;;  %477 = vmatprep.mubr.f32.mxu1 %v10790_v0  ;;  %v282_v9 = vld [vmem:[#allocation7 + $0x28] sm:$0xff]  ;;  %v281_v11 = vld [vmem:[#allocation7 + $0x20] sm:$0xff]  ;;  %v280_v12 = vld [vmem:[#allocation7 + $0x18] sm:$0xff]  ;;  %s10843_s18 = sld [smem:[#allocation59_spill]]  ;;  %vm314_vm0 = vcmask 261120   ;;  %s8395_s14 = smov 64  }
  0xd2   :  { %345 = vmatprep.subr.mxu0 %v284_v6  ;;  %v279_v14 = vld [vmem:[#allocation7 + $0x10] sm:$0xff]  ;;  %v278_v17 = vld [vmem:[#allocation7 + $0x8] sm:$0xff]  ;;  %v277_v18 = vld [vmem:[#allocation7] sm:$0xff]  ;;  %v8751_v32 = vshrl.u32 %v304_v31, 7  ;;  %s8397_s17 = smov 96   ;;  %vm546_vm1 = vcmask 1041409  }
  0xd3   :  { %346 = vmatpush1.msra.mxu0 %v283_v7  ;;  %v273_v20 = vld [vmem:[#allocation2] sm:$0xff]  ;;  %v274_v25 = vld [vmem:[#allocation2 + $0x8] sm:$0xff]  ;;  %v302_v34 = vld [vmem:[#allocation10] sm:$0x3]  ;;  %s8399_s26 = smov 32   ;;  %vm409_vm2 = vcmask 523264  }
  0xd4   :  { %347 = vmatprep.subr.mxu0 %v282_v9  ;;  %10844 = vst [vmem:[#allocation43_spill] sm:$0xff] %v8751_v32  ;;  %v8754_v33 = vsub.s32 0, %v8751_v32  ;;  %v8757_v35 = vsub.s32 1, %v8751_v32  ;;  %v301_v47 = vld [vmem:[#allocation8] sm:$0x3]  ;;  %s10863_s10 = sld [smem:[#allocation66_spill]] }
  0xd5   :  { %348 = vmatpush1.msra.mxu0 %v281_v11  ;;  %vm2651_vm3 = vcmask 1040384   ;;  %vm2654_vm4 = vcmask 1041408   ;;  %vm2657_vm5 = vcmask 1042432   ;;  %vm2660_vm6 = vcmask 1043456   ;;  %s8412_s27 = smov 112   ;;  %s8414_s20 = smov 72  }
  0xd6   :  { %v8612_v1 = vld [vmem:[%s10842_s13 + $0x78] sm:$0xff]  ;;  %v8617_v2 = vld [vmem:[%s10842_s13 + $0x70] sm:$0xff]  ;;  %v8622_v3 = vld [vmem:[%s10842_s13 + $0x68] sm:$0xff]  ;;  %349 = vmatprep.subr.mxu0 %v280_v12  ;;  %10845 = vst [vmem:[#allocation44_spill] sm:$0xff] %v8754_v33  ;;  %v8760_v36 = vrot.slane %v302_v34, %v8754_v33  ;;  %v8763_v37 = vrot.slane %v302_v34, %v8757_v35  ;;  %v307_v49 = vrot.slane %v301_v47, %v8754_v33  ;;  %vm2663_vm7 = vcmask 1044480   ;;  %s8415_s7 = smov 104  }
  0xd7   :  { %429 = vmatprep.subr.mxu1 %v8612_v1  ;;  %v8628_v4 = vld [vmem:[%s10842_s13 + $0x60] sm:$0xff]  ;;  %v8634_v5 = vld [vmem:[%s10842_s13 + $0x58] sm:$0xff]  ;;  %v8640_v8 = vld [vmem:[%s10842_s13 + $0x50] sm:$0xff]  ;;  %350 = vmatpush1.msra.mxu0 %v279_v14  ;;  %10846 = vst [vmem:[#allocation45_spill] sm:$0xff] %v8757_v35  ;;  %vm2666_vm8 = vcmask 1045504   ;;  %vm2669_vm9 = vcmask 1046528  }
  0xd8   :  { %430 = vmatpush1.msra.mxu1 %v8617_v2  ;;  %v8646_v10 = vld [vmem:[%s10842_s13 + $0x48] sm:$0xff]  ;;  %v8652_v13 = vld [vmem:[%s10842_s13 + $0x40] sm:$0xff]  ;;  %v8658_v15 = vld [vmem:[%s10842_s13 + $0x38] sm:$0xff]  ;;  %351 = vmatprep.subr.mxu0 %v278_v17  ;;  %vm8407_vm10 = vmmov 0   ;;  %vm5210_vm11 = vcmask 64512   ;;  %vm6578_vm12 = vcmask 130048  }
  0xd9   :  { %431 = vmatprep.subr.mxu1 %v8622_v3  ;;  %v8663_v16 = vld [vmem:[%s10842_s13 + $0x30] sm:$0xff]  ;;  %v271_v19 = vld [vmem:[%s10843_s18] sm:$0xff]  ;;  %v8673_v21 = vld [vmem:[%s10842_s13 + $0x28] sm:$0xff]  ;;  %352 = vmatpush1.msra.mxu0 %v277_v18  ;;  %vm6581_vm13 = vcmask 195584   ;;  %s8418_s30 = smov [#allocation28]  }
  0xda   :  { %432 = vmatpush1.msra.mxu1 %v8628_v4  ;;  %v275_v22 = vadd.f32 %v273_v20, %v271_v19  ;;  %v272_v23 = vld [vmem:[%s10843_s18 + $0x8] sm:$0xff]  ;;  %v8682_v24 = vld [vmem:[%s10842_s13 + $0x20] sm:$0xff]  ;;  %v8688_v26 = vld [vmem:[%s10842_s13 + $0x18] sm:$0xff]  ;;  %1181 = vmatprep.subr.mxu0 %v8612_v1  ;;  %s8413_s18 = smov 48   ;;  %s6885_s4 = sshll.u32 %s8418_s30, 4  ;;  %s6886_s4 = int_to_ptr.vmem [resolvable:$true] %s6885_s4 }
  0xdb   :  { %433 = vmatprep.subr.mxu1 %v8634_v5  ;;  %v8694_v27 = vld [vmem:[%s10842_s13 + $0x10] sm:$0xff]  ;;  %v276_v28 = vadd.f32 %v274_v25, %v272_v23  ;;  %v8701_v29 = vld [vmem:[%s10842_s13 + $0x8] sm:$0xff]  ;;  %v8708_v30 = vld [vmem:[%s10842_s13] sm:$0xff]  ;;  %s8292_s1 = scalar_lea.vmem %s6886_s4, 256  ;;  %p8297_p11 = scmp.lt.s32.totalorder %s6886_s4, %s6886_s4 }
  0xdc   :  { %434 = vmatpush1.msra.mxu1 %v8640_v8  ;;  %6936 = vmatmul.mubr.msk.f32.vlgmr.msra.gmra.mxu0 %vm314_vm0, %v275_v22  ;;  %p8293_p10 = scmp.ne.s32.totalorder %s6886_s4, %s8292_s1  ;;  %p8298_p12 = scmp.lt.s32.totalorder %s8292_s1, %s8292_s1 }
  0xdd   :  { %435 = vmatprep.subr.mxu1 %v8646_v10  ;;  %391 = vmatprep.mubr.f32.mxu0 %v10790_v0 }
  0xde   :  { %436 = vmatpush1.msra.mxu1 %v8652_v13  ;;  %1182 = vmatpush1.msra.mxu0 %v8617_v2  ;;  %p8299_p13 = por %p8298_p12, %p8297_p11 }
  0xdf   :  { %437 = vmatprep.subr.mxu1 %v8658_v15  ;;  %1183 = vmatprep.subr.mxu0 %v8622_v3 }
  0xe0   :  { %438 = vmatpush1.msra.mxu1 %v8663_v16  ;;  %6937 = vmatmul.mubr.msk.f32.gmra.mxu0 %vm314_vm0, %v276_v28  ;;  %p8300_p0 = pnand %p8299_p13, %p8293_p10 }
  0xe1   :  { %439 = vmatprep.subr.mxu1 %v8673_v21  ;;  %1184 = vmatpush1.msra.mxu0 %v8628_v4 }
  0xe2   :  { %440 = vmatpush1.msra.mxu1 %v8682_v24  ;;  %1185 = vmatprep.subr.mxu0 %v8634_v5 }
  0xe3   :  { %441 = vmatprep.subr.mxu1 %v8688_v26  ;;  %1186 = vmatpush1.msra.mxu0 %v8640_v8 }
  0xe4   :  { %442 = vmatpush1.msra.mxu1 %v8694_v27  ;;  %1187 = vmatprep.subr.mxu0 %v8646_v10 }
  0xe5   :  { %443 = vmatprep.subr.mxu1 %v8701_v29  ;;  %1188 = vmatpush1.msra.mxu0 %v8652_v13 }
  0xe6   :  { %444 = vmatpush1.msra.mxu1 %v8708_v30  ;;  %1189 = vmatprep.subr.mxu0 %v8658_v15 }
  0xe7   :  { %478 = vmatmul.mubr.f32.vlgmr.msra.gmra.mxu1 %v10790_v0  ;;  %672 = vmatprep.subr.mxu1 %v8612_v1 }
  0xe8   :  { %673 = vmatpush1.msra.mxu1 %v8617_v2  ;;  %720 = vmatprep.mubr.f32.mxu1 %v10790_v0 }
  0xe9   :  { %674 = vmatprep.subr.mxu1 %v8622_v3  ;;  %1190 = vmatpush1.msra.mxu0 %v8663_v16 }
  0xea   :  { %675 = vmatpush1.msra.mxu1 %v8628_v4  ;;  %1191 = vmatprep.subr.mxu0 %v8673_v21 }
  0xeb   :  { %676 = vmatprep.subr.mxu1 %v8634_v5  ;;  %1192 = vmatpush1.msra.mxu0 %v8682_v24 }
  0xec   :  { %677 = vmatpush1.msra.mxu1 %v8640_v8  ;;  %1193 = vmatprep.subr.mxu0 %v8688_v26 }
  0xed   :  { %678 = vmatprep.subr.mxu1 %v8646_v10  ;;  %1194 = vmatpush1.msra.mxu0 %v8694_v27 }
  0xee   :  { %679 = vmatpush1.msra.mxu1 %v8652_v13  ;;  %1195 = vmatprep.subr.mxu0 %v8701_v29 }
  0xef   :  { %680 = vmatprep.subr.mxu1 %v8658_v15  ;;  %1196 = vmatpush1.msra.mxu0 %v8708_v30 }
  0xf0   :  { %681 = vmatpush1.msra.mxu1 %v8663_v16  ;;  %1229 = vmatprep.mubr.f32.mxu0 %v10790_v0 }
  0xf1   :  { %682 = vmatprep.subr.mxu1 %v8673_v21  ;;  %1673 = vmatprep.subr.mxu0 %v8612_v1 }
  0xf2   :  { %683 = vmatpush1.msra.mxu1 %v8682_v24 }
  0xf3   :  { %684 = vmatprep.subr.mxu1 %v8688_v26 }
  0xf4   :  { %685 = vmatpush1.msra.mxu1 %v8694_v27 }
  0xf5   :  { %686 = vmatprep.subr.mxu1 %v8701_v29 }
  0xf6   :  { %687 = vmatpush1.msra.mxu1 %v8708_v30 }
  0xf7   :  { %925 = vmatprep.subr.mxu1 %v8612_v1 }
 0x19c   :  { %v387_v45 = vpop.f32.mrf.mxu0 }
 0x19d   :  { %v8783_v53 = vadd.f32 %v387_v45, %v307_v49 }
 0x19e   :  { %v389_v46 = vpop.f32.mrf.mxu0 }
 0x1a0   :  { %v393_v48 = vpop.f32.mrf.mxu0 }
 0x1a1   :  { %v8780_v50 = vadd.f32 %v393_v48, %v307_v49 }
 0x1a7   :  { %v479_v38 = vpop.f32.mrf.mxu1 }
 0x1a8   :  { %v480_v39 = vadd.f32 %v479_v38, %v8760_v36 }
 0x1a9   :  { %v481_v40 = vpop.f32.mrf.mxu1 }
 0x1aa   :  { %v8767_v41 = vadd.f32 %v481_v40, %v8763_v37  ;;  %v485_v42 = vrot.slane %v480_v39, 1  ;;  %v560_v51 = vrot.slane %v480_v39, 2  ;;  %v488_v58 = vadd.f32 %v480_v39, %v8783_v53 }
 0x1ab   :  { %v311_v40 = vrot.slane %v301_v47, %v8757_v35 }
 0x1ac   :  { %504 = vrot.lane.b32.xlu0 %v485_v42, %s8395_s14  ;;  %v578_v43 = vrot.slane %v8767_v41, 2  ;;  %v577_v44 = vrot.slane %v8767_v41, 1  ;;  %v489_v52 = vadd.f32 %v485_v42, %v8780_v50  ;;  %v562_v54 = vadd.f32 %v485_v42, %v8783_v53  ;;  %v395_v42 = vpop.f32.mrf.mxu0 }
 0x1ad   :  { %v563_v56 = vadd.f32 %v560_v51, %v8780_v50  ;;  %v6938_v60 = vmul.f32 -1.442695, %v488_v58  ;;  %v8800_v49 = vadd.f32 %v395_v42, %v311_v40 }
 0x1ae   :  { %597 = vrot.lane.b32.xlu1 %v578_v43, %s8395_s14  ;;  %v6939_v55 = vmul.f32 -1.442695, %v489_v52  ;;  %v6940_v57 = vmul.f32 -1.442695, %v562_v54 }
 0x1af   :  { %v6941_v59 = vmul.f32 -1.442695, %v563_v56  ;;  %v8803_v56 = vadd.f32 %v389_v46, %v311_v40 }
 0x1b0   :  { %595 = vrot.lane.b32.xlu0 %v577_v44, %s8395_s14  ;;  %7396 = vpow2.f32 %v6939_v55 }
 0x1b1   :  { %7398 = vpow2.f32 %v6940_v57 }
 0x1b2   :  { %502 = vrot.lane.b32.xlu1 %v480_v39, %s8395_s14  ;;  %7400 = vpow2.f32 %v6941_v59  ;;  %v8396_v39 = vmov 7  }
 0x1b3   :  { %7402 = vpow2.f32 %v6938_v60  ;;  %7379 = vset.pattern.permute.xlu0 %v8396_v39  ;;  %7380 = vset.pattern.permute.xlu1 %v8396_v39  ;;  %v8809_v60 = vld [vmem:[#allocation5] sm:$0x3] }
 0x1bd   :  { %v7397_v61 = vpop.eup %7396 }
 0x1be   :  { %v7399_v62 = vpop.eup %7398  ;;  %v497_v63 = vadd.f32 1.0, %v7397_v61 }
 0x1bf   :  { %v7401_v6 = vpop.eup %7400  ;;  %v570_v7 = vadd.f32 1.0, %v7399_v62  ;;  %v8814_v62 = vsub.f32 1.0, %v8809_v60 }
 0x1c0   :  { %7404 = vrcp.f32 %v497_v63  ;;  %v571_v9 = vadd.f32 1.0, %v7401_v6  ;;  %v7403_v11 = vpop.eup %7402  ;;  %v8398_v63 = vmov 0   ;;  %v582_v6 = vadd.f32 %v578_v43, %v8800_v49 }
 0x1c1   :  { %7406 = vrcp.f32 %v570_v7  ;;  %v496_v12 = vadd.f32 1.0, %v7403_v11  ;;  %10847 = vst [vmem:[#allocation46_spill] sm:$0xff] %v8814_v62  ;;  %v581_v7 = vadd.f32 %v577_v44, %v8803_v56 }
 0x1c2   :  { %7408 = vrcp.f32 %v571_v9  ;;  %v6943_v9 = vmul.f32 -1.442695, %v582_v6 }
 0x1c3   :  { %7410 = vrcp.f32 %v496_v12  ;;  %v6942_v11 = vmul.f32 -1.442695, %v581_v7 }
 0x1cd   :  { %v8788_v14 = vpop.eup %7404 }
 0x1ce   :  { %v7407_v19 = vpop.eup %7406  ;;  %v535_v43 = vmul.f32 0.0, %v8788_v14 }
 0x1cf   :  { %v7409_v22 = vpop.eup %7408 }
 0x1d0   :  { %v8794_v34 = vpop.eup %7410 }
 0x1d1   :  { %v534_v42 = vmul.f32 0.0, %v8794_v34 }
 0x21e   :  { %v505_v17 = vpop.permute.xlu0 %504 }
 0x21f   :  { %v509_v18 = vmul.f32 %v8788_v14, %v505_v17 }
 0x220   :  { %v598_v20 = vpop.permute.xlu1 %597 }
 0x221   :  { %514 = vrot.lane.b32.xlu0 %v509_v18, %s8395_s14  ;;  %v602_v25 = vmul.f32 %v7409_v22, %v598_v20  ;;  %v523_v22 = vsub.f32 1.0, %v8788_v14 }
 0x222   :  { %v596_v23 = vpop.permute.xlu0 %595 }
 0x223   :  { %v601_v28 = vmul.f32 %v7407_v19, %v596_v23 }
 0x224   :  { %v503_v31 = vpop.permute.xlu1 %502 }
 0x225   :  { %607 = vrot.lane.b32.xlu0 %v602_v25, %s8395_s14  ;;  %605 = vrot.lane.b32.xlu1 %v601_v28, %s8395_s14  ;;  %v508_v38 = vmul.f32 %v8794_v34, %v503_v31  ;;  %v522_v31 = vsub.f32 1.0, %v8794_v34 }
 0x229   :  { %512 = vrot.lane.b32.xlu1 %v508_v38, %s8395_s14 }
 0x293   :  { %v515_v45 = vpop.permute.xlu0 %514 }
 0x294   :  { %v519_v48 = vadd.f32 %v515_v45, %v8780_v50 }
 0x296   :  { %7412 = vtanh.f32 %v519_v48 }
 0x297   :  { %v608_v51 = vpop.permute.xlu0 %607  ;;  %v606_v52 = vpop.permute.xlu1 %605 }
 0x298   :  { %v612_v54 = vadd.f32 %v608_v51, %v8800_v49  ;;  %v611_v58 = vadd.f32 %v606_v52, %v8803_v56 }
 0x29a   :  { %7414 = vtanh.f32 %v612_v54 }
 0x29b   :  { %v513_v55 = vpop.permute.xlu1 %512 }
 0x29c   :  { %v518_v57 = vadd.f32 %v513_v55, %v8783_v53 }
 0x29e   :  { %7416 = vtanh.f32 %v518_v57 }
 0x29f   :  { %7418 = vtanh.f32 %v611_v58 }
 0x2a0   :  { %7420 = vpow2.f32 %v6943_v9 }
 0x2a1   :  { %7422 = vpow2.f32 %v6942_v11 }
 0x2a3   :  { %v7413_v47 = vpop.eup %7412 }
 0x2a4   :  { %528 = vrot.lane.b32.xlu0 %v7413_v47, %s8397_s17 }
 0x2a7   :  { %v7415_v59 = vpop.eup %7414 }
 0x2a8   :  { %621 = vrot.lane.b32.xlu0 %v7415_v59, %s8397_s17 }
 0x2ab   :  { %v7417_v61 = vpop.eup %7416 }
 0x2ac   :  { %526 = vrot.lane.b32.xlu1 %v7417_v61, %s8397_s17  ;;  %632 = vperm.xlu0 %7379, %v8809_v60   ;;  %v7419_v46 = vpop.eup %7418 }
 0x2ad   :  { %v7421_v12 = vpop.eup %7420 }
 0x2ae   :  { %v590_v17 = vadd.f32 1.0, %v7421_v12  ;;  %v7423_v18 = vpop.eup %7422 }
 0x2af   :  { %v589_v19 = vadd.f32 1.0, %v7423_v18 }
 0x2b0   :  { %619 = vrot.lane.b32.xlu1 %v7419_v46, %s8397_s17  ;;  %7382 = vset.pattern.permute.xlu0 %v8398_v63  ;;  %7424 = vrcp.f32 %v590_v17 }
 0x2b1   :  { %555 = vperm.xlu0 %7382, %v8814_v62   ;;  %7426 = vrcp.f32 %v589_v19 }
 0x2b4   :  { %643 = vperm.xlu1 %7380, %v8814_v62  }
 0x2b8   :  { %7381 = vset.pattern.permute.xlu1 %v8398_v63 }
 0x2b9   :  { %540 = vperm.xlu1 %7381, %v8809_v60  }
 0x2bd   :  { %v7425_v25 = vpop.eup %7424 }
 0x2be   :  { %v616_v44 = vsub.f32 1.0, %v7425_v25  ;;  %v7427_v38 = vpop.eup %7426  ;;  %v628_v51 = vmul.f32 0.0, %v7425_v25 }
 0x2bf   :  { %v615_v54 = vsub.f32 1.0, %v7427_v38  ;;  %v627_v58 = vmul.f32 0.0, %v7427_v38 }
 0x316   :  { %v529_v20 = vpop.permute.xlu0 %528 }
 0x317   :  { %v533_v23 = vmul.f32 %v529_v20, %v523_v22 }
 0x319   :  { %v537_v41 = vadd.f32 %v535_v43, %v533_v23 }
 0x31a   :  { %v622_v28 = vpop.permute.xlu0 %621 }
 0x31b   :  { %v626_v40 = vmul.f32 %v622_v28, %v616_v44  ;;  %v545_v48 = vrot.slane %v537_v41, 7 }
 0x31d   :  { %v630_v57 = vadd.f32 %v628_v51, %v626_v40 }
 0x31e   :  { %v527_v39 = vpop.permute.xlu1 %526 }
 0x31f   :  { %v532_v45 = vmul.f32 %v527_v39, %v522_v31  ;;  %v638_v61 = vrot.slane %v630_v57, 6 }
 0x321   :  { %v536_v52 = vadd.f32 %v534_v42, %v532_v45 }
 0x322   :  { %v620_v55 = vpop.permute.xlu1 %619 }
 0x323   :  { %v625_v14 = vmul.f32 %v620_v55, %v615_v54  ;;  %v547_v47 = vsel %vm546_vm1, %v545_v48, %v536_v52 }
 0x324   :  { %548 = vrot.lane.b32.xlu1 %v547_v47, %s8397_s17 }
 0x325   :  { %v629_v59 = vadd.f32 %v627_v58, %v625_v14 }
 0x327   :  { %v637_v46 = vrot.slane %v629_v59, 7  ;;  %v8833_v34 = vpop.permute.xlu0 %632 }
 0x328   :  { %10848 = vst [vmem:[#allocation47_spill] sm:$0xff] %v8833_v34 }
 0x329   :  { %v639_v63 = vsel %vm546_vm1, %v638_v61, %v637_v46 }
 0x32a   :  { %v8836_v7 = vmul.f32 %v639_v63, %v8833_v34 }
 0x32c   :  { %10849 = vst [vmem:[#allocation48_spill] sm:$0xff] %v8836_v7  ;;  %v556_v17 = vpop.permute.xlu0 %555 }
 0x32d   :  { %v8848_v19 = vmul.f32 0.0, %v556_v17 }
 0x32f   :  { %v644_v6 = vpop.permute.xlu1 %643  ;;  %10852 = vst [vmem:[#allocation51_spill] sm:$0xff] %v8848_v19 }
 0x330   :  { %v8838_v9 = vmul.f32 0.0, %v644_v6 }
 0x332   :  { %10850 = vst [vmem:[#allocation49_spill] sm:$0xff] %v8838_v9  ;;  %v8842_v11 = vadd.f32 %v8838_v9, %v8836_v7 }
 0x334   :  { %649 = vrot.lane.b32.xlu1 %v8842_v11, %s8399_s26  ;;  %v8846_v12 = vpop.permute.xlu1 %540 }
 0x335   :  { %10851 = vst [vmem:[#allocation50_spill] sm:$0xff] %v8846_v12 }
 0x396   :  { %v549_v18 = vpop.permute.xlu1 %548 }
 0x397   :  { %v8851_v20 = vmul.f32 %v549_v18, %v8846_v12 }
 0x399   :  { %10853 = vst [vmem:[#allocation52_spill] sm:$0xff] %v8851_v20  ;;  %v8855_v22 = vadd.f32 %v8848_v19, %v8851_v20 }
 0x3a6   :  { %v650_v23 = vpop.permute.xlu1 %649 }
 0x3a7   :  { %v652_v25 = vsel %vm314_vm0, %v8855_v22, %v650_v23 }
 0x3a8   :  { %6944 = vmatmul.mubr.msk.f32.vlgmr.msra.gmra.mxu1 %vm409_vm2, %v652_v25 }
 0x3a9   :  { %926 = vmatpush1.msra.mxu1 %v8617_v2  ;;  %973 = vmatprep.mubr.f32.mxu1 %v10790_v0 }
 0x3aa   :  { %927 = vmatprep.subr.mxu1 %v8622_v3 }
 0x3ab   :  { %928 = vmatpush1.msra.mxu1 %v8628_v4 }
 0x3ac   :  { %929 = vmatprep.subr.mxu1 %v8634_v5 }
 0x3ad   :  { %930 = vmatpush1.msra.mxu1 %v8640_v8 }
 0x3ae   :  { %931 = vmatprep.subr.mxu1 %v8646_v10 }
 0x3af   :  { %932 = vmatpush1.msra.mxu1 %v8652_v13 }
 0x3b0   :  { %933 = vmatprep.subr.mxu1 %v8658_v15 }
 0x3b1   :  { %934 = vmatpush1.msra.mxu1 %v8663_v16 }
 0x3b2   :  { %935 = vmatprep.subr.mxu1 %v8673_v21 }
 0x3b3   :  { %936 = vmatpush1.msra.mxu1 %v8682_v24 }
 0x3b4   :  { %937 = vmatprep.subr.mxu1 %v8688_v26 }
 0x3b5   :  { %938 = vmatpush1.msra.mxu1 %v8694_v27 }
 0x3b6   :  { %939 = vmatprep.subr.mxu1 %v8701_v29 }
 0x3b7   :  { %940 = vmatpush1.msra.mxu1 %v8708_v30 }
 0x3b8   :  { %1435 = vmatprep.subr.mxu1 %v8612_v1 }
 0x468   :  { %v722_v43 = vpop.f32.mrf.mxu1 }
 0x469   :  { %v723_v28 = vadd.f32 %v722_v43, %v8760_v36 }
 0x46a   :  { %v724_v41 = vpop.f32.mrf.mxu1 }
 0x46b   :  { %v8879_v44 = vadd.f32 %v724_v41, %v8763_v37  ;;  %v728_v31 = vrot.slane %v723_v28, 7  ;;  %v807_v40 = vrot.slane %v723_v28, 2  ;;  %v808_v42 = vrot.slane %v723_v28, 3 }
 0x46c   :  { %v732_v54 = vadd.f32 %v723_v28, %v8780_v50 }
 0x46d   :  { %v826_v38 = vrot.slane %v8879_v44, 2  ;;  %745 = vrot.lane.b32.xlu0 %v728_v31, %s8395_s14  ;;  %v827_v39 = vrot.slane %v8879_v44, 3  ;;  %v731_v45 = vadd.f32 %v728_v31, %v8783_v53  ;;  %v811_v48 = vadd.f32 %v807_v40, %v8783_v53 }
 0x46e   :  { %v812_v51 = vadd.f32 %v808_v42, %v8780_v50  ;;  %v6946_v58 = vmul.f32 -1.442695, %v732_v54  ;;  %v8400_v54 = vmov 6  }
 0x46f   :  { %844 = vrot.lane.b32.xlu1 %v826_v38, %s8395_s14  ;;  %v6945_v52 = vmul.f32 -1.442695, %v731_v45  ;;  %v6947_v55 = vmul.f32 -1.442695, %v811_v48  ;;  %7383 = vset.pattern.permute.xlu0 %v8400_v54 }
 0x470   :  { %v6948_v57 = vmul.f32 -1.442695, %v812_v51  ;;  %7384 = vset.pattern.permute.xlu1 %v8400_v54 }
 0x471   :  { %846 = vrot.lane.b32.xlu0 %v827_v39, %s8395_s14  ;;  %7428 = vpow2.f32 %v6945_v52  ;;  %v778_v52 = vrot.slane %v8855_v22, 7 }
 0x472   :  { %7430 = vpow2.f32 %v6947_v55 }
 0x473   :  { %747 = vrot.lane.b32.xlu1 %v723_v28, %s8395_s14  ;;  %7432 = vpow2.f32 %v6948_v57 }
 0x474   :  { %7434 = vpow2.f32 %v6946_v58 }
 0x47e   :  { %v7429_v14 = vpop.eup %7428 }
 0x47f   :  { %v7431_v47 = vpop.eup %7430  ;;  %v739_v59 = vadd.f32 1.0, %v7429_v14 }
 0x480   :  { %v7433_v61 = vpop.eup %7432  ;;  %v819_v46 = vadd.f32 1.0, %v7431_v47 }
 0x481   :  { %v7435_v63 = vpop.eup %7434  ;;  %7436 = vrcp.f32 %v739_v59  ;;  %v820_v6 = vadd.f32 1.0, %v7433_v61 }
 0x482   :  { %v740_v17 = vadd.f32 1.0, %v7435_v63  ;;  %7438 = vrcp.f32 %v819_v46 }
 0x483   :  { %7440 = vrcp.f32 %v820_v6 }
 0x484   :  { %7442 = vrcp.f32 %v740_v17 }
 0x48e   :  { %v8895_v18 = vpop.eup %7436 }
 0x48f   :  { %v7439_v25 = vpop.eup %7438  ;;  %v765_v44 = vsub.f32 1.0, %v8895_v18 }
 0x490   :  { %v7441_v31 = vpop.eup %7440 }
 0x491   :  { %v8900_v42 = vpop.eup %7442 }
 0x4df   :  { %v746_v23 = vpop.permute.xlu0 %745 }
 0x4e0   :  { %v751_v43 = vmul.f32 %v8895_v18, %v746_v23 }
 0x4e1   :  { %v845_v28 = vpop.permute.xlu1 %844 }
 0x4e2   :  { %v850_v41 = vmul.f32 %v7439_v25, %v845_v28  ;;  %755 = vrot.lane.b32.xlu0 %v751_v43, %s8395_s14  ;;  %v8401_v25 = vmov 1   ;;  %v831_v43 = vadd.f32 %v827_v39, %v8800_v49  ;;  %v830_v28 = vadd.f32 %v826_v38, %v8803_v56 }
 0x4e3   :  { %v847_v40 = vpop.permute.xlu0 %846 }
 0x4e4   :  { %854 = vrot.lane.b32.xlu1 %v850_v41, %s8395_s14  ;;  %v851_v45 = vmul.f32 %v7441_v31, %v847_v40  ;;  %v6950_v41 = vmul.f32 -1.442695, %v831_v43  ;;  %v6949_v31 = vmul.f32 -1.442695, %v830_v28 }
 0x4e5   :  { %v748_v48 = vpop.permute.xlu1 %747 }
 0x4e6   :  { %v752_v51 = vmul.f32 %v8900_v42, %v748_v48  ;;  %856 = vrot.lane.b32.xlu0 %v851_v45, %s8395_s14 }
 0x4e8   :  { %757 = vrot.lane.b32.xlu1 %v752_v51, %s8395_s14 }
 0x4ec   :  { %779 = vrot.lane.b32.xlu1 %v778_v52, %s8399_s26 }
 0x4f0   :  { %781 = vrot.lane.b32.xlu1 %v8855_v22, %s8399_s26 }
 0x554   :  { %v756_v55 = vpop.permute.xlu0 %755 }
 0x555   :  { %v761_v61 = vadd.f32 %v756_v55, %v8783_v53 }
 0x556   :  { %v855_v57 = vpop.permute.xlu1 %854 }
 0x557   :  { %v860_v46 = vadd.f32 %v855_v57, %v8803_v56 }
 0x558   :  { %v857_v58 = vpop.permute.xlu0 %856 }
 0x559   :  { %v861_v14 = vadd.f32 %v857_v58, %v8800_v49 }
 0x55a   :  { %v758_v47 = vpop.permute.xlu1 %757 }
 0x55b   :  { %v762_v59 = vadd.f32 %v758_v47, %v8780_v50  ;;  %7444 = vtanh.f32 %v861_v14  ;;  %v766_v14 = vsub.f32 1.0, %v8900_v42  ;;  %v877_v47 = vrot.slane %v8842_v11, 3 }
 0x55d   :  { %7446 = vtanh.f32 %v762_v59 }
 0x55e   :  { %7448 = vtanh.f32 %v761_v61  ;;  %v780_v52 = vpop.permute.xlu1 %779 }
 0x55f   :  { %7450 = vtanh.f32 %v860_v46  ;;  %v785_v61 = vmul.f32 %v8895_v18, %v780_v52 }
 0x560   :  { %7452 = vpow2.f32 %v6950_v41 }
 0x561   :  { %7454 = vpow2.f32 %v6949_v31 }
 0x562   :  { %v782_v54 = vpop.permute.xlu1 %781 }
 0x568   :  { %v7445_v63 = vpop.eup %7444 }
 0x569   :  { %870 = vrot.lane.b32.xlu1 %v7445_v63, %s8397_s17 }
 0x56a   :  { %v7447_v6 = vpop.eup %7446 }
 0x56b   :  { %771 = vrot.lane.b32.xlu0 %v7447_v6, %s8397_s17  ;;  %v7449_v17 = vpop.eup %7448 }
 0x56c   :  { %v7451_v23 = vpop.eup %7450 }
 0x56d   :  { %896 = vperm.xlu1 %7384, %v8814_v62   ;;  %v7453_v40 = vpop.eup %7452 }
 0x56e   :  { %v839_v45 = vadd.f32 1.0, %v7453_v40  ;;  %v7455_v48 = vpop.eup %7454 }
 0x56f   :  { %769 = vrot.lane.b32.xlu0 %v7449_v17, %s8397_s17  ;;  %v838_v51 = vadd.f32 1.0, %v7455_v48  ;;  %v876_v17 = vrot.slane %v8842_v11, 2 }
 0x570   :  { %7456 = vrcp.f32 %v839_v45 }
 0x571   :  { %7385 = vset.pattern.permute.xlu1 %v8401_v25  ;;  %7458 = vrcp.f32 %v838_v51 }
 0x572   :  { %790 = vperm.xlu1 %7385, %v8809_v60  }
 0x573   :  { %868 = vrot.lane.b32.xlu0 %v7451_v23, %s8397_s17  ;;  %v786_v23 = vmul.f32 %v8900_v42, %v782_v54 }
 0x577   :  { %885 = vperm.xlu0 %7383, %v8809_v60  }
 0x57b   :  { %7386 = vset.pattern.permute.xlu0 %v8401_v25 }
 0x57c   :  { %802 = vperm.xlu0 %7386, %v8814_v62  }
 0x57d   :  { %v7457_v55 = vpop.eup %7456 }
 0x57e   :  { %v865_v39 = vsub.f32 1.0, %v7457_v55  ;;  %v7459_v38 = vpop.eup %7458  ;;  %v881_v25 = vmul.f32 %v7457_v55, %v877_v47 }
 0x57f   :  { %v864_v28 = vsub.f32 1.0, %v7459_v38  ;;  %v880_v41 = vmul.f32 %v7459_v38, %v876_v17 }
 0x5db   :  { %v871_v58 = vpop.permute.xlu1 %870 }
 0x5dc   :  { %v875_v46 = vmul.f32 %v871_v58, %v865_v39 }
 0x5dd   :  { %v772_v57 = vpop.permute.xlu0 %771 }
 0x5de   :  { %v776_v63 = vmul.f32 %v772_v57, %v766_v14  ;;  %v883_v40 = vadd.f32 %v881_v25, %v875_v46 }
 0x5e0   :  { %v788_v45 = vadd.f32 %v786_v23, %v776_v63  ;;  %v891_v18 = vrot.slane %v883_v40, 5 }
 0x5e1   :  { %v770_v59 = vpop.permute.xlu0 %769 }
 0x5e2   :  { %v775_v6 = vmul.f32 %v770_v59, %v765_v44 }
 0x5e4   :  { %v787_v43 = vadd.f32 %v785_v61, %v775_v6  ;;  %v10856_v61 = vmov 0.0  }
 0x5e5   :  { %v869_v31 = vpop.permute.xlu0 %868 }
 0x5e6   :  { %v795_v48 = vrot.slane %v787_v43, 1  ;;  %v874_v51 = vmul.f32 %v869_v31, %v864_v28 }
 0x5e8   :  { %v882_v0 = vadd.f32 %v880_v41, %v874_v51  ;;  %v796_v19 = vsel %vm546_vm1, %v788_v45, %v795_v48  ;;  %v8936_v58 = vpop.permute.xlu1 %896 }
 0x5e9   :  { %797 = vrot.lane.b32.xlu1 %v796_v19, %s8397_s17  ;;  %v899_v54 = vmul.f32 %v8936_v58, %v8842_v11 }
 0x5ea   :  { %v890_v52 = vrot.slane %v882_v0, 6 }
 0x5ec   :  { %v892_v57 = vsel %vm546_vm1, %v891_v18, %v890_v52 }
 0x5ed   :  { %v8950_v19 = vpop.permute.xlu1 %790 }
 0x5f2   :  { %v8938_v42 = vpop.permute.xlu0 %885 }
 0x5f3   :  { %v8943_v55 = vmul.f32 %v892_v57, %v8938_v42 }
 0x5f5   :  { %10854 = vst [vmem:[#allocation53_spill] sm:$0xff] %v8943_v55  ;;  %v8946_v39 = vadd.f32 %v899_v54, %v8943_v55 }
 0x5f7   :  { %902 = vrot.lane.b32.xlu1 %v8946_v39, %s8399_s26  ;;  %v8952_v14 = vpop.permute.xlu0 %802 }
 0x5f8   :  { %v805_v11 = vmul.f32 %v8952_v14, %v8855_v22 }
 0x65b   :  { %v798_v0 = vpop.permute.xlu1 %797 }
 0x65c   :  { %v8955_v44 = vmul.f32 %v798_v0, %v8950_v19 }
 0x65e   :  { %10855 = vst [vmem:[#allocation54_spill] sm:$0xff] %v8955_v44  ;;  %v8960_v38 = vadd.f32 %v805_v11, %v8955_v44 }
 0x669   :  { %v903_v47 = vpop.permute.xlu1 %902 }
 0x66a   :  { %v905_v59 = vsel %vm314_vm0, %v8960_v38, %v903_v47 }
 0x66b   :  { %6951 = vmatmul.mubr.msk.f32.vlgmr.msra.gmra.mxu1 %vm409_vm2, %v905_v59  ;;  %v1033_v59 = vrot.slane %v8960_v38, 7 }
 0x66c   :  { %1436 = vmatpush1.msra.mxu1 %v8617_v2  ;;  %1483 = vmatprep.mubr.f32.mxu1 %v10856_v61 }
 0x66d   :  { %1437 = vmatprep.subr.mxu1 %v8622_v3 }
 0x66e   :  { %1438 = vmatpush1.msra.mxu1 %v8628_v4 }
 0x66f   :  { %1439 = vmatprep.subr.mxu1 %v8634_v5 }
 0x670   :  { %1440 = vmatpush1.msra.mxu1 %v8640_v8 }
 0x671   :  { %1441 = vmatprep.subr.mxu1 %v8646_v10 }
 0x672   :  { %1442 = vmatpush1.msra.mxu1 %v8652_v13 }
 0x673   :  { %1443 = vmatprep.subr.mxu1 %v8658_v15 }
 0x674   :  { %1444 = vmatpush1.msra.mxu1 %v8663_v16 }
 0x675   :  { %1445 = vmatprep.subr.mxu1 %v8673_v21 }
 0x676   :  { %1446 = vmatpush1.msra.mxu1 %v8682_v24 }
 0x677   :  { %1447 = vmatprep.subr.mxu1 %v8688_v26 }
 0x678   :  { %1448 = vmatpush1.msra.mxu1 %v8694_v27 }
 0x679   :  { %1449 = vmatprep.subr.mxu1 %v8701_v29 }
 0x67a   :  { %1450 = vmatpush1.msra.mxu1 %v8708_v30 }
 0x67b   :  { %1913 = vmatprep.subr.mxu1 %v8612_v1 }
 0x72b   :  { %v975_v2 = vpop.f32.mrf.mxu1 }
 0x72c   :  { %v976_v3 = vadd.f32 %v975_v2, %v8760_v36  ;;  %v1032_v2 = vrot.slane %v8960_v38, 6 }
 0x72d   :  { %v977_v4 = vpop.f32.mrf.mxu1 }
 0x72e   :  { %v8984_v5 = vadd.f32 %v977_v4, %v8763_v37  ;;  %v982_v8 = vrot.slane %v976_v3, 7  ;;  %v981_v10 = vrot.slane %v976_v3, 6  ;;  %v1064_v1 = vrot.slane %v976_v3, 4 }
 0x72f   :  { %v1063_v21 = vrot.slane %v976_v3, 3  ;;  %v8402_v3 = vmov 5  }
 0x730   :  { %1001 = vrot.lane.b32.xlu1 %v982_v8, %s8395_s14  ;;  %999 = vrot.lane.b32.xlu0 %v981_v10, %s8395_s14  ;;  %v1083_v13 = vrot.slane %v8984_v5, 4  ;;  %v1082_v15 = vrot.slane %v8984_v5, 3  ;;  %v986_v16 = vadd.f32 %v982_v8, %v8780_v50  ;;  %v985_v24 = vadd.f32 %v981_v10, %v8783_v53 }
 0x731   :  { %v1068_v26 = vadd.f32 %v1064_v1, %v8780_v50  ;;  %v1067_v29 = vadd.f32 %v1063_v21, %v8783_v53  ;;  %7388 = vset.pattern.permute.xlu1 %v8402_v3  ;;  %7387 = vset.pattern.permute.xlu0 %v8402_v3 }
 0x732   :  { %v6953_v27 = vmul.f32 -1.442695, %v986_v16  ;;  %v6952_v30 = vmul.f32 -1.442695, %v985_v24 }
 0x733   :  { %v6955_v22 = vmul.f32 -1.442695, %v1068_v26  ;;  %v6954_v46 = vmul.f32 -1.442695, %v1067_v29 }
 0x734   :  { %1102 = vrot.lane.b32.xlu1 %v1083_v13, %s8395_s14  ;;  %1100 = vrot.lane.b32.xlu0 %v1082_v15, %s8395_s14  ;;  %7460 = vpow2.f32 %v6953_v27 }
 0x735   :  { %7462 = vpow2.f32 %v6952_v30 }
 0x736   :  { %7464 = vpow2.f32 %v6955_v22 }
 0x737   :  { %7466 = vpow2.f32 %v6954_v46  ;;  %v8403_v46 = vmov 2  }
 0x741   :  { %v7461_v63 = vpop.eup %7460 }
 0x742   :  { %v7463_v6 = vpop.eup %7462  ;;  %v994_v17 = vadd.f32 1.0, %v7461_v63  ;;  %v1087_v63 = vadd.f32 %v1083_v13, %v8800_v49 }
 0x743   :  { %v7465_v23 = vpop.eup %7464  ;;  %v993_v25 = vadd.f32 1.0, %v7463_v6  ;;  %v1086_v6 = vadd.f32 %v1082_v15, %v8803_v56 }
 0x744   :  { %v7467_v43 = vpop.eup %7466  ;;  %v1076_v28 = vadd.f32 1.0, %v7465_v23  ;;  %7468 = vrcp.f32 %v994_v17  ;;  %v6957_v17 = vmul.f32 -1.442695, %v1087_v63 }
 0x745   :  { %v1075_v41 = vadd.f32 1.0, %v7467_v43  ;;  %7470 = vrcp.f32 %v993_v25  ;;  %v6956_v23 = vmul.f32 -1.442695, %v1086_v6 }
 0x746   :  { %7472 = vrcp.f32 %v1076_v28 }
 0x747   :  { %7474 = vrcp.f32 %v1075_v41 }
 0x751   :  { %v9000_v31 = vpop.eup %7468 }
 0x752   :  { %v9002_v45 = vpop.eup %7470 }
 0x753   :  { %v7473_v52 = vpop.eup %7472 }
 0x754   :  { %v7475_v54 = vpop.eup %7474 }
 0x7a2   :  { %v1002_v40 = vpop.permute.xlu1 %1001  ;;  %v1000_v51 = vpop.permute.xlu0 %999 }
 0x7a3   :  { %v1006_v48 = vmul.f32 %v9000_v31, %v1002_v40  ;;  %v1005_v18 = vmul.f32 %v9002_v45, %v1000_v51  ;;  %v1020_v51 = vsub.f32 1.0, %v9000_v31 }
 0x7a5   :  { %1011 = vrot.lane.b32.xlu1 %v1006_v48, %s8395_s14  ;;  %1009 = vrot.lane.b32.xlu0 %v1005_v18, %s8395_s14 }
 0x7a6   :  { %v1103_v57 = vpop.permute.xlu1 %1102  ;;  %v1101_v11 = vpop.permute.xlu0 %1100 }
 0x7a7   :  { %v1107_v0 = vmul.f32 %v7473_v52, %v1103_v57  ;;  %v1106_v47 = vmul.f32 %v7475_v54, %v1101_v11  ;;  %v1019_v52 = vsub.f32 1.0, %v9002_v45 }
 0x7a9   :  { %1112 = vrot.lane.b32.xlu1 %v1107_v0, %s8395_s14  ;;  %1110 = vrot.lane.b32.xlu0 %v1106_v47, %s8395_s14 }
 0x7ad   :  { %1036 = vrot.lane.b32.xlu1 %v1033_v59, %s8399_s26  ;;  %1034 = vrot.lane.b32.xlu0 %v1032_v2, %s8399_s26  ;;  %v1133_v2 = vrot.slane %v8946_v39, 4 }
 0x817   :  { %v1012_v4 = vpop.permute.xlu1 %1011  ;;  %v1010_v10 = vpop.permute.xlu0 %1009 }
 0x818   :  { %v1016_v8 = vadd.f32 %v1012_v4, %v8780_v50  ;;  %v1015_v1 = vadd.f32 %v1010_v10, %v8783_v53  ;;  %v1132_v10 = vrot.slane %v8946_v39, 3 }
 0x81a   :  { %7476 = vtanh.f32 %v1016_v8 }
 0x81b   :  { %7478 = vtanh.f32 %v1015_v1  ;;  %v1113_v16 = vpop.permute.xlu1 %1112  ;;  %v1111_v24 = vpop.permute.xlu0 %1110 }
 0x81c   :  { %v1117_v21 = vadd.f32 %v1113_v16, %v8800_v49  ;;  %v1116_v26 = vadd.f32 %v1111_v24, %v8803_v56 }
 0x81e   :  { %7480 = vtanh.f32 %v1117_v21 }
 0x81f   :  { %7482 = vtanh.f32 %v1116_v26  ;;  %v1037_v40 = vpop.permute.xlu1 %1036  ;;  %v1035_v48 = vpop.permute.xlu0 %1034 }
 0x820   :  { %7484 = vpow2.f32 %v6957_v17  ;;  %v1041_v15 = vmul.f32 %v9000_v31, %v1037_v40  ;;  %v1040_v0 = vmul.f32 %v9002_v45, %v1035_v48 }
 0x821   :  { %7486 = vpow2.f32 %v6956_v23 }
 0x827   :  { %v7477_v27 = vpop.eup %7476 }
 0x828   :  { %v7479_v29 = vpop.eup %7478  ;;  %1025 = vrot.lane.b32.xlu1 %v7477_v27, %s8397_s17 }
 0x829   :  { %1023 = vrot.lane.b32.xlu0 %v7479_v29, %s8397_s17 }
 0x82b   :  { %v7481_v30 = vpop.eup %7480 }
 0x82c   :  { %v7483_v22 = vpop.eup %7482  ;;  %1126 = vrot.lane.b32.xlu1 %v7481_v30, %s8397_s17 }
 0x82d   :  { %1124 = vrot.lane.b32.xlu0 %v7483_v22, %s8397_s17  ;;  %v7485_v25 = vpop.eup %7484 }
 0x82e   :  { %v7487_v43 = vpop.eup %7486  ;;  %v1095_v28 = vadd.f32 1.0, %v7485_v25 }
 0x82f   :  { %v1094_v41 = vadd.f32 1.0, %v7487_v43 }
 0x830   :  { %1152 = vperm.xlu1 %7388, %v8814_v62   ;;  %7488 = vrcp.f32 %v1095_v28 }
 0x831   :  { %1141 = vperm.xlu0 %7387, %v8809_v60   ;;  %7490 = vrcp.f32 %v1094_v41 }
 0x834   :  { %7389 = vset.pattern.permute.xlu1 %v8403_v46 }
 0x835   :  { %7390 = vset.pattern.permute.xlu0 %v8403_v46  ;;  %1045 = vperm.xlu1 %7389, %v8809_v60  }
 0x836   :  { %1058 = vperm.xlu0 %7390, %v8814_v62  }
 0x83d   :  { %v7489_v18 = vpop.eup %7488 }
 0x83e   :  { %v7491_v5 = vpop.eup %7490  ;;  %v1121_v59 = vsub.f32 1.0, %v7489_v18  ;;  %v1137_v16 = vmul.f32 %v7489_v18, %v1133_v2  ;;  %v9134_v2 = vld [vmem:[%s10842_s13 + $0x20] sm:$0xff] }
 0x83f   :  { %v1120_v8 = vsub.f32 1.0, %v7491_v5  ;;  %v1136_v31 = vmul.f32 %v7491_v5, %v1132_v10  ;;  %v9086_v5 = vld [vmem:[%s10842_s13 + $0x60] sm:$0xff] }
 0x840   :  { %v9158_v10 = vld [vmem:[%s10842_s13] sm:$0xff] }
 0x89a   :  { %v1026_v13 = vpop.permute.xlu1 %1025 }
 0x89b   :  { %v1030_v57 = vmul.f32 %v1026_v13, %v1020_v51  ;;  %v1024_v54 = vpop.permute.xlu0 %1023 }
 0x89c   :  { %v1029_v11 = vmul.f32 %v1024_v54, %v1019_v52  ;;  %v9073_v52 = vld [vmem:[%s10842_s13 + $0x70] sm:$0xff]  ;;  %v9104_v54 = vld [vmem:[%s10842_s13 + $0x48] sm:$0xff] }
 0x89d   :  { %v1043_v47 = vadd.f32 %v1041_v15, %v1030_v57  ;;  %v9092_v15 = vld [vmem:[%s10842_s13 + $0x58] sm:$0xff]  ;;  %v9098_v57 = vld [vmem:[%s10842_s13 + $0x50] sm:$0xff] }
 0x89e   :  { %v1042_v3 = vadd.f32 %v1040_v0, %v1029_v11  ;;  %v1127_v4 = vpop.permute.xlu1 %1126  ;;  %v9110_v0 = vld [vmem:[%s10842_s13 + $0x40] sm:$0xff]  ;;  %v9116_v11 = vld [vmem:[%s10842_s13 + $0x38] sm:$0xff] }
 0x89f   :  { %v1051_v1 = vrot.slane %v1043_v47, 1  ;;  %v1131_v21 = vmul.f32 %v1127_v4, %v1121_v59  ;;  %v1125_v24 = vpop.permute.xlu0 %1124  ;;  %v9122_v47 = vld [vmem:[%s10842_s13 + $0x30] sm:$0xff]  ;;  %v9128_v59 = vld [vmem:[%s10842_s13 + $0x28] sm:$0xff] }
 0x8a0   :  { %v1050_v26 = vrot.slane %v1042_v3, 2  ;;  %v1130_v27 = vmul.f32 %v1125_v24, %v1120_v8  ;;  %v9140_v3 = vld [vmem:[%s10842_s13 + $0x18] sm:$0xff]  ;;  %v9146_v4 = vld [vmem:[%s10842_s13 + $0x10] sm:$0xff]  ;;  %v9152_v8 = vld [vmem:[%s10842_s13 + $0x8] sm:$0xff] }
 0x8a1   :  { %v1139_v29 = vadd.f32 %v1137_v16, %v1131_v21 }
 0x8a2   :  { %v1138_v30 = vadd.f32 %v1136_v31, %v1130_v27  ;;  %v1052_v45 = vsel %vm546_vm1, %v1051_v1, %v1050_v26  ;;  %v7955_v1 = vld [vmem:[%s10842_s13 + $0x78] sm:$0xff] }
 0x8a3   :  { %v1147_v22 = vrot.slane %v1139_v29, 4  ;;  %1053 = vrot.lane.b32.xlu1 %v1052_v45, %s8397_s17 }
 0x8a4   :  { %v1146_v46 = vrot.slane %v1138_v30, 5 }
 0x8a6   :  { %v1148_v63 = vsel %vm546_vm1, %v1147_v22, %v1146_v46 }
 0x8ab   :  { %v9041_v6 = vpop.permute.xlu1 %1152 }
 0x8ac   :  { %v1155_v17 = vmul.f32 %v9041_v6, %v8946_v39  ;;  %v9045_v23 = vpop.permute.xlu0 %1141 }
 0x8ad   :  { %v9048_v25 = vmul.f32 %v1148_v63, %v9045_v23 }
 0x8af   :  { %10857 = vst [vmem:[#allocation55_spill] sm:$0xff] %v9048_v25  ;;  %v9051_v43 = vadd.f32 %v1155_v17, %v9048_v25 }
 0x8b0   :  { %v9055_v28 = vpop.permute.xlu1 %1045 }
 0x8b1   :  { %1158 = vrot.lane.b32.xlu1 %v9051_v43, %s8399_s26  ;;  %v9057_v40 = vpop.permute.xlu0 %1058  ;;  %v1386_v9 = vrot.slane %v9051_v43, 4 }
 0x8b2   :  { %v1061_v39 = vmul.f32 %v9057_v40, %v8960_v38  ;;  %v9080_v38 = vld [vmem:[%s10842_s13 + $0x68] sm:$0xff] }
 0x915   :  { %v1054_v41 = vpop.permute.xlu1 %1053 }
 0x916   :  { %v9060_v48 = vmul.f32 %v1054_v41, %v9055_v28 }
 0x918   :  { %10858 = vst [vmem:[#allocation56_spill] sm:$0xff] %v9060_v48  ;;  %v9065_v51 = vadd.f32 %v1061_v39, %v9060_v48 }
 0x923   :  { %v1159_v18 = vpop.permute.xlu1 %1158 }
 0x924   :  { %v1161_v13 = vsel %vm314_vm0, %v9065_v51, %v1159_v18 }
 0x925   :  { %6958 = vmatmul.mubr.msk.f32.vlgmr.msra.gmra.mxu0 %vm409_vm2, %v1161_v13 }
 0x926   :  { %1674 = vmatpush1.msra.mxu0 %v9073_v52  ;;  %1721 = vmatprep.mubr.f32.mxu0 %v10856_v61 }
 0x927   :  { %1675 = vmatprep.subr.mxu0 %v9080_v38 }
 0x928   :  { %1676 = vmatpush1.msra.mxu0 %v9086_v5 }
 0x929   :  { %1677 = vmatprep.subr.mxu0 %v9092_v15 }
 0x92a   :  { %1678 = vmatpush1.msra.mxu0 %v9098_v57 }
 0x92b   :  { %1679 = vmatprep.subr.mxu0 %v9104_v54 }
 0x92c   :  { %1680 = vmatpush1.msra.mxu0 %v9110_v0 }
 0x92d   :  { %1681 = vmatprep.subr.mxu0 %v9116_v11 }
 0x92e   :  { %1682 = vmatpush1.msra.mxu0 %v9122_v47 }
 0x92f   :  { %1683 = vmatprep.subr.mxu0 %v9128_v59 }
 0x930   :  { %1684 = vmatpush1.msra.mxu0 %v9134_v2 }
 0x931   :  { %1685 = vmatprep.subr.mxu0 %v9140_v3 }
 0x932   :  { %1686 = vmatpush1.msra.mxu0 %v9146_v4 }
 0x933   :  { %1687 = vmatprep.subr.mxu0 %v9152_v8 }
 0x934   :  { %1688 = vmatpush1.msra.mxu0 %v9158_v10 }
 0x935   :  { %2149 = vmatprep.subr.mxu0 %v7955_v1 }
 0x9e5   :  { %v1231_v16 = vpop.f32.mrf.mxu0 }
 0x9e6   :  { %v1232_v21 = vadd.f32 %v1231_v16, %v8760_v36 }
 0x9e7   :  { %v1233_v24 = vpop.f32.mrf.mxu0 }
 0x9e8   :  { %v9166_v26 = vadd.f32 %v1233_v24, %v8763_v37  ;;  %v1238_v31 = vrot.slane %v1232_v21, 6  ;;  %v1237_v27 = vrot.slane %v1232_v21, 5  ;;  %v1319_v45 = vrot.slane %v1232_v21, 4 }
 0x9ea   :  { %1257 = vrot.lane.b32.xlu1 %v1238_v31, %s8395_s14  ;;  %1255 = vrot.lane.b32.xlu0 %v1237_v27, %s8395_s14  ;;  %v10793_v29 = vrot.slane %v9166_v26, 4  ;;  %v10794_v30 = vrot.slane %v9166_v26, 5  ;;  %v1242_v22 = vadd.f32 %v1238_v31, %v8780_v50  ;;  %v1241_v46 = vadd.f32 %v1237_v27, %v8783_v53 }
 0x9eb   :  { %v1321_v63 = vadd.f32 %v1319_v45, %v8783_v53  ;;  %v1322_v39 = vadd.f32 %v1237_v27, %v8780_v50 }
 0x9ec   :  { %v6960_v17 = vmul.f32 -1.442695, %v1242_v22  ;;  %v6959_v41 = vmul.f32 -1.442695, %v1241_v46 }
 0x9ed   :  { %v6961_v18 = vmul.f32 -1.442695, %v1321_v63  ;;  %v6962_v13 = vmul.f32 -1.442695, %v1322_v39 }
 0x9ee   :  { %1356 = vrot.lane.b32.xlu1 %v10794_v30, %s8395_s14  ;;  %1354 = vrot.lane.b32.xlu0 %v10793_v29, %s8395_s14  ;;  %7492 = vpow2.f32 %v6960_v17 }
 0x9ef   :  { %7494 = vpow2.f32 %v6959_v41 }
 0x9f0   :  { %7496 = vpow2.f32 %v6961_v18 }
 0x9f1   :  { %7498 = vpow2.f32 %v6962_v13 }
 0x9fb   :  { %v7493_v1 = vpop.eup %7492 }
 0x9fc   :  { %v7495_v16 = vpop.eup %7494  ;;  %v1250_v24 = vadd.f32 1.0, %v7493_v1 }
 0x9fd   :  { %v7497_v21 = vpop.eup %7496  ;;  %v1249_v29 = vadd.f32 1.0, %v7495_v16  ;;  %v1289_v16 = vrot.slane %v9065_v51, 6 }
 0x9fe   :  { %v7499_v31 = vpop.eup %7498  ;;  %v1329_v30 = vadd.f32 1.0, %v7497_v21  ;;  %7500 = vrcp.f32 %v1250_v24  ;;  %v1288_v24 = vrot.slane %v9065_v51, 5  ;;  %v8404_v21 = vmov 4  }
 0x9ff   :  { %7502 = vrcp.f32 %v1249_v29  ;;  %v1330_v45 = vadd.f32 1.0, %v7499_v31  ;;  %7392 = vset.pattern.permute.xlu1 %v8404_v21  ;;  %7391 = vset.pattern.permute.xlu0 %v8404_v21 }
 0xa00   :  { %7504 = vrcp.f32 %v1329_v30 }
 0xa01   :  { %7506 = vrcp.f32 %v1330_v45 }
 0xa0b   :  { %v9182_v22 = vpop.eup %7500 }
 0xa0c   :  { %v9184_v27 = vpop.eup %7502 }
 0xa0d   :  { %v7505_v39 = vpop.eup %7504 }
 0xa0e   :  { %v7507_v18 = vpop.eup %7506 }
 0xa5c   :  { %v1258_v46 = vpop.permute.xlu1 %1257  ;;  %v1256_v63 = vpop.permute.xlu0 %1255 }
 0xa5d   :  { %v1262_v17 = vmul.f32 %v9182_v22, %v1258_v46  ;;  %v1261_v41 = vmul.f32 %v9184_v27, %v1256_v63 }
 0xa5f   :  { %1267 = vrot.lane.b32.xlu1 %v1262_v17, %s8395_s14  ;;  %1265 = vrot.lane.b32.xlu0 %v1261_v41, %s8395_s14 }
 0xa60   :  { %v1357_v29 = vpop.permute.xlu1 %1356  ;;  %v1355_v13 = vpop.permute.xlu0 %1354 }
 0xa61   :  { %v1361_v30 = vmul.f32 %v7507_v18, %v1357_v29  ;;  %v1360_v1 = vmul.f32 %v7505_v39, %v1355_v13 }
 0xa63   :  { %1366 = vrot.lane.b32.xlu1 %v1361_v30, %s8395_s14  ;;  %1364 = vrot.lane.b32.xlu0 %v1360_v1, %s8395_s14 }
 0xa67   :  { %1292 = vrot.lane.b32.xlu1 %v1289_v16, %s8399_s26  ;;  %1290 = vrot.lane.b32.xlu0 %v1288_v24, %s8399_s26  ;;  %v8405_v16 = vmov 3   ;;  %v10859_v24 = vrot.slane %v9166_v26, 5 }
 0xad1   :  { %v1268_v31 = vpop.permute.xlu1 %1267  ;;  %v1266_v45 = vpop.permute.xlu0 %1265 }
 0xad2   :  { %v1272_v46 = vadd.f32 %v1268_v31, %v8780_v50  ;;  %v1271_v63 = vadd.f32 %v1266_v45, %v8783_v53  ;;  %v1341_v31 = vadd.f32 %v10859_v24, %v8800_v49  ;;  %v10860_v45 = vrot.slane %v9166_v26, 4 }
 0xad4   :  { %7508 = vtanh.f32 %v1272_v46  ;;  %v1340_v46 = vadd.f32 %v10860_v45, %v8803_v56 }
 0xad5   :  { %7510 = vtanh.f32 %v1271_v63  ;;  %v1367_v17 = vpop.permute.xlu1 %1366  ;;  %v1365_v41 = vpop.permute.xlu0 %1364  ;;  %v6964_v63 = vmul.f32 -1.442695, %v1341_v31 }
 0xad6   :  { %v1371_v39 = vadd.f32 %v1367_v17, %v8800_v49  ;;  %v1370_v18 = vadd.f32 %v1365_v41, %v8803_v56  ;;  %v6963_v17 = vmul.f32 -1.442695, %v1340_v46 }
 0xad8   :  { %7512 = vtanh.f32 %v1371_v39 }
 0xad9   :  { %7514 = vtanh.f32 %v1370_v18 }
 0xada   :  { %7516 = vpow2.f32 %v6964_v63 }
 0xadb   :  { %7518 = vpow2.f32 %v6963_v17 }
 0xae1   :  { %v7509_v29 = vpop.eup %7508 }
 0xae2   :  { %v7511_v13 = vpop.eup %7510  ;;  %1281 = vrot.lane.b32.xlu1 %v7509_v29, %s8397_s17 }
 0xae3   :  { %1279 = vrot.lane.b32.xlu0 %v7511_v13, %s8397_s17  ;;  %v1276_v13 = vsub.f32 1.0, %v9182_v22 }
 0xae5   :  { %v7513_v30 = vpop.eup %7512 }
 0xae6   :  { %v7515_v1 = vpop.eup %7514  ;;  %1380 = vrot.lane.b32.xlu1 %v7513_v30, %s8397_s17 }
 0xae7   :  { %1378 = vrot.lane.b32.xlu0 %v7515_v1, %s8397_s17  ;;  %v7517_v41 = vpop.eup %7516 }
 0xae8   :  { %v7519_v39 = vpop.eup %7518  ;;  %v1349_v18 = vadd.f32 1.0, %v7517_v41 }
 0xae9   :  { %v1348_v29 = vadd.f32 1.0, %v7519_v39  ;;  %v1387_v39 = vrot.slane %v9051_v43, 5 }
 0xaea   :  { %1406 = vperm.xlu1 %7392, %v8814_v62   ;;  %7520 = vrcp.f32 %v1349_v18 }
 0xaeb   :  { %1395 = vperm.xlu0 %7391, %v8809_v60   ;;  %7522 = vrcp.f32 %v1348_v29 }
 0xaee   :  { %7393 = vset.pattern.permute.xlu1 %v8405_v16 }
 0xaef   :  { %7394 = vset.pattern.permute.xlu0 %v8405_v16  ;;  %1301 = vperm.xlu1 %7393, %v8809_v60   ;;  %v1293_v60 = vpop.permute.xlu1 %1292  ;;  %v1275_v16 = vsub.f32 1.0, %v9184_v27 }
 0xaf0   :  { %1314 = vperm.xlu0 %7394, %v8814_v62   ;;  %v1297_v24 = vmul.f32 %v9182_v22, %v1293_v60 }
 0xaf4   :  { %7395 = vset.pattern.permute.xlu0 %v8404_v21  ;;  %v1291_v21 = vpop.permute.xlu0 %1290 }
 0xaf5   :  { %v1296_v46 = vmul.f32 %v9184_v27, %v1291_v21 }
 0xaf7   :  { %v7521_v30 = vpop.eup %7520 }
 0xaf8   :  { %v7523_v26 = vpop.eup %7522  ;;  %v1375_v41 = vsub.f32 1.0, %v7521_v30  ;;  %v1391_v20 = vmul.f32 %v7521_v30, %v1387_v39 }
 0xaf9   :  { %v1374_v62 = vsub.f32 1.0, %v7523_v26  ;;  %v1390_v22 = vmul.f32 %v7523_v26, %v1386_v9 }
 0xb54   :  { %v1282_v1 = vpop.permute.xlu1 %1281 }
 0xb55   :  { %v1286_v31 = vmul.f32 %v1282_v1, %v1276_v13  ;;  %v1280_v45 = vpop.permute.xlu0 %1279 }
 0xb56   :  { %v1285_v63 = vmul.f32 %v1280_v45, %v1275_v16 }
 0xb57   :  { %v1299_v17 = vadd.f32 %v1297_v24, %v1286_v31 }
 0xb58   :  { %v1298_v18 = vadd.f32 %v1296_v46, %v1285_v63  ;;  %v1381_v29 = vpop.permute.xlu1 %1380 }
 0xb59   :  { %v1307_v34 = vrot.slane %v1299_v17, 2  ;;  %v1385_v44 = vmul.f32 %v1381_v29, %v1375_v41  ;;  %v1379_v48 = vpop.permute.xlu0 %1378 }
 0xb5a   :  { %v1306_v32 = vrot.slane %v1298_v18, 3  ;;  %v1384_v60 = vmul.f32 %v1379_v48, %v1374_v62 }
 0xb5b   :  { %v1393_v13 = vadd.f32 %v1391_v20, %v1385_v44 }
 0xb5c   :  { %v1392_v1 = vadd.f32 %v1390_v22, %v1384_v60  ;;  %v1308_v27 = vsel %vm546_vm1, %v1307_v34, %v1306_v32 }
 0xb5d   :  { %v1401_v21 = vrot.slane %v1393_v13, 3  ;;  %1309 = vrot.lane.b32.xlu1 %v1308_v27, %s8397_s17 }
 0xb5e   :  { %v1400_v16 = vrot.slane %v1392_v1, 4 }
 0xb60   :  { %v1402_v24 = vsel %vm546_vm1, %v1401_v21, %v1400_v16 }
 0xb65   :  { %v9223_v31 = vpop.permute.xlu1 %1406 }
 0xb66   :  { %v1409_v30 = vmul.f32 %v9223_v31, %v9051_v43  ;;  %v9227_v45 = vpop.permute.xlu0 %1395 }
 0xb67   :  { %v9230_v9 = vmul.f32 %v1402_v24, %v9227_v45 }
 0xb69   :  { %v9233_v62 = vadd.f32 %v1409_v30, %v9230_v9 }
 0xb6a   :  { %v9237_v32 = vpop.permute.xlu1 %1301 }
 0xb6b   :  { %1412 = vrot.lane.b32.xlu1 %v9233_v62, %s8399_s26  ;;  %v9239_v20 = vpop.permute.xlu0 %1314 }
 0xb6c   :  { %10861 = vst [vmem:[#allocation57_spill] sm:$0xff] %v9239_v20  ;;  %v1317_v43 = vmul.f32 %v9239_v20, %v9065_v51 }
 0xbcf   :  { %v1310_v34 = vpop.permute.xlu1 %1309 }
 0xbd0   :  { %v9242_v44 = vmul.f32 %v1310_v34, %v9237_v32  ;;  %v1632_v34 = vrot.slane %v9233_v62, 5 }
 0xbd2   :  { %10862 = vst [vmem:[#allocation58_spill] sm:$0xff] %v9242_v44  ;;  %v9247_v48 = vadd.f32 %v1317_v43, %v9242_v44 }
 0xbdd   :  { %v1413_v26 = vpop.permute.xlu1 %1412 }
 0xbde   :  { %v1415_v46 = vsel %vm314_vm0, %v9247_v48, %v1413_v26  ;;  %v1633_v26 = vrot.slane %v9233_v62, 6 }
 0xbdf   :  { %6965 = vmatmul.mubr.msk.f32.vlgmr.msra.gmra.mxu1 %vm409_vm2, %v1415_v46 }
 0xbe0   :  { %1914 = vmatpush1.msra.mxu1 %v9073_v52  ;;  %1961 = vmatprep.mubr.f32.mxu1 %v10856_v61 }
 0xbe1   :  { %1915 = vmatprep.subr.mxu1 %v9080_v38 }
 0xbe2   :  { %1916 = vmatpush1.msra.mxu1 %v9086_v5 }
 0xbe3   :  { %1917 = vmatprep.subr.mxu1 %v9092_v15 }
 0xbe4   :  { %1918 = vmatpush1.msra.mxu1 %v9098_v57 }
 0xbe5   :  { %1919 = vmatprep.subr.mxu1 %v9104_v54 }
 0xbe6   :  { %1920 = vmatpush1.msra.mxu1 %v9110_v0 }
 0xbe7   :  { %1921 = vmatprep.subr.mxu1 %v9116_v11 }
 0xbe8   :  { %1922 = vmatpush1.msra.mxu1 %v9122_v47 }
 0xbe9   :  { %1923 = vmatprep.subr.mxu1 %v9128_v59 }
 0xbea   :  { %1924 = vmatpush1.msra.mxu1 %v9134_v2 }
 0xbeb   :  { %1925 = vmatprep.subr.mxu1 %v9140_v3 }
 0xbec   :  { %1926 = vmatpush1.msra.mxu1 %v9146_v4 }
 0xbed   :  { %1927 = vmatprep.subr.mxu1 %v9152_v8 }
 0xbee   :  { %1928 = vmatpush1.msra.mxu1 %v9158_v10 }
 0xc9f   :  { %v1485_v51 = vpop.f32.mrf.mxu1 }
 0xca0   :  { %v1486_v63 = vadd.f32 %v1485_v51, %v8760_v36 }
 0xca1   :  { %v1487_v17 = vpop.f32.mrf.mxu1 }
 0xca2   :  { %v1488_v41 = vadd.f32 %v1487_v17, %v8763_v37  ;;  %v1492_v39 = vrot.slane %v1486_v63, 5  ;;  %v1491_v18 = vrot.slane %v1486_v63, 4 }
 0xca4   :  { %v1582_v29 = vrot.slane %v1488_v41, 5  ;;  %v1583_v22 = vrot.slane %v1488_v41, 6  ;;  %1511 = vrot.lane.b32.xlu1 %v1492_v39, %s8395_s14  ;;  %1509 = vrot.lane.b32.xlu0 %v1491_v18, %s8395_s14  ;;  %v1565_v41 = vrot.slane %v1486_v63, 6 }
 0xca6   :  { %v1586_v60 = vadd.f32 %v1582_v29, %v8803_v56  ;;  %v1587_v13 = vadd.f32 %v1583_v22, %v8800_v49 }
 0xca8   :  { %v6970_v1 = vmul.f32 -1.442695, %v1586_v60  ;;  %v6971_v27 = vmul.f32 -1.442695, %v1587_v13  ;;  %1602 = vrot.lane.b32.xlu1 %v1583_v22, %s8395_s14  ;;  %1600 = vrot.lane.b32.xlu0 %v1582_v29, %s8395_s14  ;;  %v1496_v29 = vadd.f32 %v1492_v39, %v8780_v50  ;;  %v1495_v22 = vadd.f32 %v1491_v18, %v8783_v53 }
 0xca9   :  { %v1568_v60 = vadd.f32 %v1565_v41, %v8780_v50 }
 0xcaa   :  { %7524 = vpow2.f32 %v6970_v1  ;;  %v6967_v13 = vmul.f32 -1.442695, %v1496_v29  ;;  %v1567_v1 = vadd.f32 %v1492_v39, %v8783_v53 }
 0xcab   :  { %7526 = vpow2.f32 %v6971_v27  ;;  %v6966_v27 = vmul.f32 -1.442695, %v1495_v22 }
 0xcb7   :  { %v7525_v21 = vpop.eup %7524 }
 0xcb8   :  { %v7527_v16 = vpop.eup %7526  ;;  %v1594_v24 = vadd.f32 1.0, %v7525_v21  ;;  %v6969_v21 = vmul.f32 -1.442695, %v1568_v60 }
 0xcb9   :  { %v1595_v30 = vadd.f32 1.0, %v7527_v16  ;;  %v6968_v16 = vmul.f32 -1.442695, %v1567_v1 }
 0xcba   :  { %7528 = vrcp.f32 %v1594_v24 }
 0xcbb   :  { %7530 = vrcp.f32 %v1595_v30 }
 0xcbc   :  { %7532 = vpow2.f32 %v6967_v13 }
 0xcbd   :  { %7534 = vpow2.f32 %v6966_v27 }
 0xcbe   :  { %7536 = vpow2.f32 %v6969_v21 }
 0xcbf   :  { %7538 = vpow2.f32 %v6968_v16 }
 0xcc7   :  { %v9277_v43 = vpop.eup %7528 }
 0xcc8   :  { %v9280_v46 = vpop.eup %7530  ;;  %v9283_v51 = vmul.f32 %v9277_v43, %v1632_v34  ;;  %v1620_v33 = vsub.f32 1.0, %v9277_v43  ;;  %v1647_v43 = vmul.f32 %v9233_v62, %v9239_v20 }
 0xcc9   :  { %v9286_v17 = vmul.f32 %v9280_v46, %v1633_v26  ;;  %v7533_v24 = vpop.eup %7532 }
 0xcca   :  { %v7535_v30 = vpop.eup %7534  ;;  %v1504_v34 = vadd.f32 1.0, %v7533_v24 }
 0xccb   :  { %v7537_v63 = vpop.eup %7536  ;;  %v1503_v26 = vadd.f32 1.0, %v7535_v30 }
 0xccc   :  { %v7539_v44 = vpop.eup %7538  ;;  %v1576_v35 = vadd.f32 1.0, %v7537_v63  ;;  %7540 = vrcp.f32 %v1504_v34 }
 0xccd   :  { %v1575_v18 = vadd.f32 1.0, %v7539_v44  ;;  %7542 = vrcp.f32 %v1503_v26  ;;  %v1542_v44 = vrot.slane %v9247_v48, 4 }
 0xcce   :  { %7544 = vrcp.f32 %v1576_v35  ;;  %v1543_v35 = vrot.slane %v9247_v48, 5 }
 0xccf   :  { %7546 = vrcp.f32 %v1575_v18 }
 0xcd9   :  { %v7541_v39 = vpop.eup %7540 }
 0xcda   :  { %v7543_v41 = vpop.eup %7542 }
 0xcdb   :  { %v7545_v1 = vpop.eup %7544 }
 0xcdc   :  { %v7547_v27 = vpop.eup %7546 }
 0xd16   :  { %v1512_v29 = vpop.permute.xlu1 %1511  ;;  %v1510_v22 = vpop.permute.xlu0 %1509 }
 0xd17   :  { %v1516_v60 = vmul.f32 %v7541_v39, %v1512_v29  ;;  %v1515_v13 = vmul.f32 %v7543_v41, %v1510_v22 }
 0xd19   :  { %1521 = vrot.lane.b32.xlu1 %v1516_v60, %s8395_s14  ;;  %1519 = vrot.lane.b32.xlu0 %v1515_v13, %s8395_s14 }
 0xd1a   :  { %v1603_v21 = vpop.permute.xlu1 %1602  ;;  %v1601_v16 = vpop.permute.xlu0 %1600 }
 0xd1b   :  { %v1607_v24 = vmul.f32 %v7545_v1, %v1603_v21  ;;  %v1606_v30 = vmul.f32 %v7547_v27, %v1601_v16 }
 0xd1d   :  { %1612 = vrot.lane.b32.xlu1 %v1607_v24, %s8395_s14  ;;  %1610 = vrot.lane.b32.xlu0 %v1606_v30, %s8395_s14 }
 0xd21   :  { %1546 = vrot.lane.b32.xlu1 %v1543_v35, %s8399_s26  ;;  %1544 = vrot.lane.b32.xlu0 %v1542_v44, %s8399_s26  ;;  %v1530_v35 = vsub.f32 1.0, %v7541_v39 }
 0xd8b   :  { %v1522_v34 = vpop.permute.xlu1 %1521  ;;  %v1520_v63 = vpop.permute.xlu0 %1519 }
 0xd8c   :  { %v1526_v26 = vadd.f32 %v1522_v34, %v8780_v50  ;;  %v1525_v18 = vadd.f32 %v1520_v63, %v8783_v53  ;;  %v1529_v34 = vsub.f32 1.0, %v7543_v41 }
 0xd8e   :  { %7548 = vtanh.f32 %v1526_v26 }
 0xd8f   :  { %7550 = vtanh.f32 %v1525_v18  ;;  %v1613_v29 = vpop.permute.xlu1 %1612  ;;  %v1611_v22 = vpop.permute.xlu0 %1610 }
 0xd90   :  { %v1617_v60 = vadd.f32 %v1613_v29, %v8800_v49  ;;  %v1616_v13 = vadd.f32 %v1611_v22, %v8803_v56 }
 0xd92   :  { %7552 = vtanh.f32 %v1617_v60 }
 0xd93   :  { %7554 = vtanh.f32 %v1616_v13  ;;  %v1547_v24 = vpop.permute.xlu1 %1546  ;;  %v1545_v30 = vpop.permute.xlu0 %1544  ;;  %v1621_v13 = vsub.f32 1.0, %v9280_v46 }
 0xd94   :  { %v1551_v63 = vmul.f32 %v7541_v39, %v1547_v24  ;;  %v1550_v29 = vmul.f32 %v7543_v41, %v1545_v30 }
 0xd9b   :  { %v7549_v1 = vpop.eup %7548 }
 0xd9c   :  { %v7551_v27 = vpop.eup %7550  ;;  %1535 = vrot.lane.b32.xlu1 %v7549_v1, %s8397_s17 }
 0xd9d   :  { %1533 = vrot.lane.b32.xlu0 %v7551_v27, %s8397_s17 }
 0xd9f   :  { %v7553_v21 = vpop.eup %7552 }
 0xda0   :  { %v7555_v16 = vpop.eup %7554  ;;  %1626 = vrot.lane.b32.xlu1 %v7553_v21, %s8397_s17 }
 0xda1   :  { %1624 = vrot.lane.b32.xlu0 %v7555_v16, %s8397_s17 }
 0xe0e   :  { %v1536_v44 = vpop.permute.xlu1 %1535 }
 0xe0f   :  { %v1540_v26 = vmul.f32 %v1536_v44, %v1530_v35  ;;  %v1534_v18 = vpop.permute.xlu0 %1533 }
 0xe10   :  { %v1539_v22 = vmul.f32 %v1534_v18, %v1529_v34 }
 0xe11   :  { %v1553_v60 = vadd.f32 %v1551_v63, %v1540_v26 }
 0xe12   :  { %v1552_v1 = vadd.f32 %v1550_v29, %v1539_v22  ;;  %v1627_v27 = vpop.permute.xlu1 %1626 }
 0xe13   :  { %v1557_v21 = vrot.slane %v1553_v60, 3  ;;  %v1631_v55 = vmul.f32 %v1627_v27, %v1621_v13  ;;  %v1625_v16 = vpop.permute.xlu0 %1624 }
 0xe14   :  { %v1556_v7 = vrot.slane %v1552_v1, 4  ;;  %v1630_v12 = vmul.f32 %v1625_v16, %v1620_v33 }
 0xe15   :  { %v1639_v25 = vadd.f32 %v9286_v17, %v1631_v55  ;;  %v1563_v55 = vmul.f32 %v9223_v31, %v9247_v48 }
 0xe16   :  { %v1638_v39 = vadd.f32 %v9283_v51, %v1630_v12  ;;  %v1558_v24 = vsel %vm546_vm1, %v1557_v21, %v1556_v7 }
 0xe17   :  { %v1643_v41 = vrot.slane %v1639_v25, 2  ;;  %1559 = vrot.lane.b32.xlu0 %v1558_v24, %s8397_s17 }
 0xe18   :  { %v1642_v30 = vrot.slane %v1638_v39, 3 }
 0xe1a   :  { %v1644_v46 = vsel %vm546_vm1, %v1643_v41, %v1642_v30 }
 0xe1b   :  { %v9318_v35 = vmul.f32 %v1644_v46, %v9237_v32 }
 0xe1d   :  { %v9321_v33 = vadd.f32 %v1647_v43, %v9318_v35 }
 0xe1f   :  { %1650 = vrot.lane.b32.xlu1 %v9321_v33, %s8399_s26  ;;  %v1872_v17 = vrot.slane %v9321_v33, 6  ;;  %v1873_v34 = vrot.slane %v9321_v33, 7 }
 0xe89   :  { %v1560_v12 = vpop.permute.xlu0 %1559 }
 0xe8a   :  { %v9326_v7 = vmul.f32 %v1560_v12, %v9227_v45 }
 0xe8c   :  { %v9331_v25 = vadd.f32 %v1563_v55, %v9326_v7 }
 0xe91   :  { %v1651_v62 = vpop.permute.xlu1 %1650 }
 0xe92   :  { %v1653_v51 = vsel %vm314_vm0, %v9331_v25, %v1651_v62 }
 0xe93   :  { %6972 = vmatmul.mubr.msk.f32.vlgmr.msra.gmra.mxu0 %vm409_vm2, %v1653_v51 }
 0xe94   :  { %2150 = vmatpush1.msra.mxu0 %v9073_v52  ;;  %2197 = vmatprep.mubr.f32.mxu0 %v10856_v61 }
 0xe95   :  { %2151 = vmatprep.subr.mxu0 %v9080_v38 }
 0xe96   :  { %2152 = vmatpush1.msra.mxu0 %v9086_v5 }
 0xe97   :  { %2153 = vmatprep.subr.mxu0 %v9092_v15 }
 0xe98   :  { %2154 = vmatpush1.msra.mxu0 %v9098_v57 }
 0xe99   :  { %2155 = vmatprep.subr.mxu0 %v9104_v54 }
 0xe9a   :  { %2156 = vmatpush1.msra.mxu0 %v9110_v0 }
 0xe9b   :  { %2157 = vmatprep.subr.mxu0 %v9116_v11 }
 0xe9c   :  { %2158 = vmatpush1.msra.mxu0 %v9122_v47 }
 0xe9d   :  { %2159 = vmatprep.subr.mxu0 %v9128_v59 }
 0xe9e   :  { %2160 = vmatpush1.msra.mxu0 %v9134_v2 }
 0xe9f   :  { %2161 = vmatprep.subr.mxu0 %v9140_v3 }
 0xea0   :  { %2162 = vmatpush1.msra.mxu0 %v9146_v4 }
 0xea1   :  { %2163 = vmatprep.subr.mxu0 %v9152_v8 }
 0xea2   :  { %2164 = vmatpush1.msra.mxu0 %v9158_v10 }
 0xf53   :  { %v1723_v52 = vpop.f32.mrf.mxu0 }
 0xf54   :  { %v1724_v38 = vadd.f32 %v1723_v52, %v8760_v36 }
 0xf55   :  { %v1725_v5 = vpop.f32.mrf.mxu0 }
 0xf56   :  { %v1726_v15 = vadd.f32 %v1725_v5, %v8763_v37  ;;  %v1730_v57 = vrot.slane %v1724_v38, 4  ;;  %v1729_v54 = vrot.slane %v1724_v38, 3  ;;  %v1804_v29 = vrot.slane %v1724_v38, 7 }
 0xf57   :  { %v1803_v60 = vrot.slane %v1724_v38, 6 }
 0xf58   :  { %v1822_v0 = vrot.slane %v1726_v15, 6  ;;  %v1823_v11 = vrot.slane %v1726_v15, 7  ;;  %1749 = vrot.lane.b32.xlu1 %v1730_v57, %s8395_s14  ;;  %1747 = vrot.lane.b32.xlu0 %v1729_v54, %s8395_s14  ;;  %v1734_v22 = vadd.f32 %v1730_v57, %v8780_v50  ;;  %v1733_v13 = vadd.f32 %v1729_v54, %v8783_v53 }
 0xf59   :  { %v1808_v1 = vadd.f32 %v1804_v29, %v8780_v50  ;;  %v1807_v21 = vadd.f32 %v1803_v60, %v8783_v53 }
 0xf5a   :  { %v1826_v47 = vadd.f32 %v1822_v0, %v8803_v56  ;;  %v1827_v59 = vadd.f32 %v1823_v11, %v8800_v49  ;;  %v6974_v27 = vmul.f32 -1.442695, %v1734_v22  ;;  %v6973_v16 = vmul.f32 -1.442695, %v1733_v13 }
 0xf5b   :  { %v6976_v39 = vmul.f32 -1.442695, %v1808_v1  ;;  %v6975_v24 = vmul.f32 -1.442695, %v1807_v21 }
 0xf5c   :  { %v6977_v2 = vmul.f32 -1.442695, %v1826_v47  ;;  %v6978_v3 = vmul.f32 -1.442695, %v1827_v59  ;;  %1842 = vrot.lane.b32.xlu1 %v1823_v11, %s8395_s14  ;;  %1840 = vrot.lane.b32.xlu0 %v1822_v0, %s8395_s14 }
 0xf5e   :  { %7556 = vpow2.f32 %v6977_v2 }
 0xf5f   :  { %7558 = vpow2.f32 %v6978_v3 }
 0xf6b   :  { %v7557_v4 = vpop.eup %7556 }
 0xf6c   :  { %v7559_v8 = vpop.eup %7558  ;;  %v1834_v10 = vadd.f32 1.0, %v7557_v4  ;;  %v1781_v4 = vrot.slane %v9331_v25, 4 }
 0xf6d   :  { %v1835_v48 = vadd.f32 1.0, %v7559_v8  ;;  %v1780_v8 = vrot.slane %v9331_v25, 3 }
 0xf6e   :  { %7560 = vrcp.f32 %v1834_v10 }
 0xf6f   :  { %7562 = vrcp.f32 %v1835_v48 }
 0xf70   :  { %7564 = vpow2.f32 %v6974_v27 }
 0xf71   :  { %7566 = vpow2.f32 %v6973_v16 }
 0xf72   :  { %7568 = vpow2.f32 %v6976_v39 }
 0xf73   :  { %7570 = vpow2.f32 %v6975_v24 }
 0xf7b   :  { %v9361_v44 = vpop.eup %7560 }
 0xf7c   :  { %v9364_v63 = vpop.eup %7562  ;;  %v9367_v26 = vmul.f32 %v9361_v44, %v1872_v17 }
 0xf7d   :  { %v9370_v18 = vmul.f32 %v9364_v63, %v1873_v34  ;;  %v7565_v41 = vpop.eup %7564 }
 0xf7e   :  { %v7567_v30 = vpop.eup %7566  ;;  %v1742_v46 = vadd.f32 1.0, %v7565_v41 }
 0xf7f   :  { %v7569_v43 = vpop.eup %7568  ;;  %v1741_v12 = vadd.f32 1.0, %v7567_v30 }
 0xf80   :  { %v7571_v55 = vpop.eup %7570  ;;  %v1816_v62 = vadd.f32 1.0, %v7569_v43  ;;  %7572 = vrcp.f32 %v1742_v46 }
 0xf81   :  { %v1815_v51 = vadd.f32 1.0, %v7571_v55  ;;  %7574 = vrcp.f32 %v1741_v12 }
 0xf82   :  { %7576 = vrcp.f32 %v1816_v62 }
 0xf83   :  { %7578 = vrcp.f32 %v1815_v51 }
 0xf8d   :  { %v7573_v52 = vpop.eup %7572 }
 0xf8e   :  { %v7575_v5 = vpop.eup %7574  ;;  %v1768_v41 = vsub.f32 1.0, %v7573_v52 }
 0xf8f   :  { %v7577_v0 = vpop.eup %7576  ;;  %v1767_v46 = vsub.f32 1.0, %v7575_v5 }
 0xf90   :  { %v7579_v47 = vpop.eup %7578 }
 0xfca   :  { %v1750_v38 = vpop.permute.xlu1 %1749  ;;  %v1748_v57 = vpop.permute.xlu0 %1747 }
 0xfcb   :  { %v1754_v15 = vmul.f32 %v7573_v52, %v1750_v38  ;;  %v1753_v54 = vmul.f32 %v7575_v5, %v1748_v57 }
 0xfcd   :  { %1759 = vrot.lane.b32.xlu1 %v1754_v15, %s8395_s14  ;;  %1757 = vrot.lane.b32.xlu0 %v1753_v54, %s8395_s14  ;;  %v1861_v15 = vsub.f32 1.0, %v9364_v63 }
 0xfce   :  { %v1843_v11 = vpop.permute.xlu1 %1842  ;;  %v1841_v2 = vpop.permute.xlu0 %1840 }
 0xfcf   :  { %v1847_v59 = vmul.f32 %v7577_v0, %v1843_v11  ;;  %v1846_v3 = vmul.f32 %v7579_v47, %v1841_v2  ;;  %v1860_v0 = vsub.f32 1.0, %v9361_v44  ;;  %v1887_v44 = vmul.f32 %v9321_v33, %v9057_v40 }
 0xfd1   :  { %1852 = vrot.lane.b32.xlu1 %v1847_v59, %s8395_s14  ;;  %1850 = vrot.lane.b32.xlu0 %v1846_v3, %s8395_s14 }
 0xfd5   :  { %1784 = vrot.lane.b32.xlu1 %v1781_v4, %s8399_s26  ;;  %1782 = vrot.lane.b32.xlu0 %v1780_v8, %s8399_s26 }
0x103f   :  { %v1760_v10 = vpop.permute.xlu1 %1759  ;;  %v1758_v17 = vpop.permute.xlu0 %1757 }
0x1040   :  { %v1764_v48 = vadd.f32 %v1760_v10, %v8780_v50  ;;  %v1763_v34 = vadd.f32 %v1758_v17, %v8783_v53 }
0x1042   :  { %7580 = vtanh.f32 %v1764_v48 }
0x1043   :  { %7582 = vtanh.f32 %v1763_v34  ;;  %v1853_v29 = vpop.permute.xlu1 %1852  ;;  %v1851_v60 = vpop.permute.xlu0 %1850  ;;  %v1801_v34 = vmul.f32 %v9331_v25, %v9041_v6 }
0x1044   :  { %v1857_v22 = vadd.f32 %v1853_v29, %v8800_v49  ;;  %v1856_v13 = vadd.f32 %v1851_v60, %v8803_v56 }
0x1046   :  { %7584 = vtanh.f32 %v1857_v22 }
0x1047   :  { %7586 = vtanh.f32 %v1856_v13  ;;  %v1785_v39 = vpop.permute.xlu1 %1784  ;;  %v1783_v24 = vpop.permute.xlu0 %1782 }
0x1048   :  { %v1789_v43 = vmul.f32 %v7573_v52, %v1785_v39  ;;  %v1788_v62 = vmul.f32 %v7575_v5, %v1783_v24 }
0x104f   :  { %v7581_v1 = vpop.eup %7580 }
0x1050   :  { %v7583_v27 = vpop.eup %7582  ;;  %1773 = vrot.lane.b32.xlu1 %v7581_v1, %s8397_s17 }
0x1051   :  { %1771 = vrot.lane.b32.xlu0 %v7583_v27, %s8397_s17 }
0x1053   :  { %v7585_v21 = vpop.eup %7584 }
0x1054   :  { %v7587_v16 = vpop.eup %7586  ;;  %1866 = vrot.lane.b32.xlu1 %v7585_v21, %s8397_s17 }
0x1055   :  { %1864 = vrot.lane.b32.xlu0 %v7587_v16, %s8397_s17 }
0x10c2   :  { %v1774_v30 = vpop.permute.xlu1 %1773 }
0x10c3   :  { %v1778_v12 = vmul.f32 %v1774_v30, %v1768_v41  ;;  %v1772_v55 = vpop.permute.xlu0 %1771 }
0x10c4   :  { %v1777_v51 = vmul.f32 %v1772_v55, %v1767_v46 }
0x10c5   :  { %v1791_v38 = vadd.f32 %v1789_v43, %v1778_v12 }
0x10c6   :  { %v1790_v57 = vadd.f32 %v1788_v62, %v1777_v51  ;;  %v1867_v54 = vpop.permute.xlu1 %1866 }
0x10c7   :  { %v1795_v11 = vrot.slane %v1791_v38, 4  ;;  %v1871_v47 = vmul.f32 %v1867_v54, %v1861_v15  ;;  %v1865_v59 = vpop.permute.xlu0 %1864 }
0x10c8   :  { %v1794_v2 = vrot.slane %v1790_v57, 5  ;;  %v1870_v3 = vmul.f32 %v1865_v59, %v1860_v0 }
0x10c9   :  { %v1879_v4 = vadd.f32 %v9370_v18, %v1871_v47 }
0x10ca   :  { %v1878_v52 = vadd.f32 %v9367_v26, %v1870_v3  ;;  %v1796_v8 = vsel %vm546_vm1, %v1795_v11, %v1794_v2 }
0x10cb   :  { %v1883_v5 = vrot.slane %v1879_v4, 1  ;;  %1797 = vrot.lane.b32.xlu0 %v1796_v8, %s8397_s17 }
0x10cc   :  { %v1882_v10 = vrot.slane %v1878_v52, 2 }
0x10ce   :  { %v1884_v63 = vsel %vm546_vm1, %v1883_v5, %v1882_v10 }
0x10cf   :  { %v9400_v48 = vmul.f32 %v1884_v63, %v9055_v28 }
0x10d1   :  { %v9405_v17 = vadd.f32 %v1887_v44, %v9400_v48 }
0x10d3   :  { %1890 = vrot.lane.b32.xlu1 %v9405_v17, %s8399_s26 }
0x113d   :  { %v1798_v26 = vpop.permute.xlu0 %1797 }
0x113e   :  { %v9410_v18 = vmul.f32 %v1798_v26, %v9045_v23 }
0x1140   :  { %v9415_v29 = vadd.f32 %v1801_v34, %v9410_v18 }
0x1145   :  { %v1891_v22 = vpop.permute.xlu1 %1890 }
0x1146   :  { %v1893_v33 = vsel %vm314_vm0, %v9415_v29, %v1891_v22  ;;  %v2021_v22 = vrot.slane %v9415_v29, 3 }
0x1147   :  { %6979 = vmatmul.mubr.msk.f32.vlgmr.msra.gmra.mxu1 %vm409_vm2, %v1893_v33  ;;  %v2020_v33 = vrot.slane %v9415_v29, 2 }
0x1148   :  { %2787 = vmatprep.mubr.f32.mxu1 %v10856_v61 }
0x1207   :  { %v1963_v60 = vpop.f32.mrf.mxu1 }
0x1208   :  { %v1964_v13 = vadd.f32 %v1963_v60, %v8760_v36 }
0x1209   :  { %v1965_v1 = vpop.f32.mrf.mxu1 }
0x120a   :  { %v1970_v27 = vrot.slane %v1964_v13, 3  ;;  %v9423_v21 = vadd.f32 %v1965_v1, %v8763_v37  ;;  %v1969_v25 = vrot.slane %v1964_v13, 2  ;;  %v2043_v24 = vrot.slane %v1964_v13, 7 }
0x120b   :  { %v2047_v30 = vadd.f32 %v1964_v13, %v8780_v50 }
0x120c   :  { %1989 = vrot.lane.b32.xlu1 %v1970_v27, %s8395_s14  ;;  %1987 = vrot.lane.b32.xlu0 %v1969_v25, %s8395_s14  ;;  %v2061_v16 = vrot.slane %v9423_v21, 7  ;;  %v1974_v39 = vadd.f32 %v1970_v27, %v8780_v50  ;;  %v1973_v41 = vadd.f32 %v1969_v25, %v8783_v53  ;;  %v2046_v43 = vadd.f32 %v2043_v24, %v8783_v53 }
0x120d   :  { %v6983_v55 = vmul.f32 -1.442695, %v2047_v30 }
0x120e   :  { %v6981_v46 = vmul.f32 -1.442695, %v1974_v39  ;;  %v6980_v12 = vmul.f32 -1.442695, %v1973_v41  ;;  %v6982_v62 = vmul.f32 -1.442695, %v2046_v43 }
0x1210   :  { %2080 = vrot.lane.b32.xlu1 %v9423_v21, %s8395_s14  ;;  %2078 = vrot.lane.b32.xlu0 %v2061_v16, %s8395_s14  ;;  %7588 = vpow2.f32 %v6981_v46 }
0x1211   :  { %7590 = vpow2.f32 %v6980_v12 }
0x1212   :  { %7592 = vpow2.f32 %v6983_v55  ;;  %v2065_v55 = vadd.f32 %v9423_v21, %v8800_v49 }
0x1213   :  { %7594 = vpow2.f32 %v6982_v62  ;;  %v2064_v62 = vadd.f32 %v2061_v16, %v8803_v56 }
0x121d   :  { %v7589_v51 = vpop.eup %7588 }
0x121e   :  { %v7591_v38 = vpop.eup %7590  ;;  %v1982_v15 = vadd.f32 1.0, %v7589_v51  ;;  %v6985_v51 = vmul.f32 -1.442695, %v2065_v55 }
0x121f   :  { %v7593_v57 = vpop.eup %7592  ;;  %v1981_v54 = vadd.f32 1.0, %v7591_v38  ;;  %v6984_v38 = vmul.f32 -1.442695, %v2064_v62  ;;  %v2123_v62 = vmul.f32 %v9405_v17, %v8952_v14 }
0x1220   :  { %v7595_v0 = vpop.eup %7594  ;;  %v2055_v11 = vadd.f32 1.0, %v7593_v57  ;;  %7596 = vrcp.f32 %v1982_v15 }
0x1221   :  { %v2054_v47 = vadd.f32 1.0, %v7595_v0  ;;  %7598 = vrcp.f32 %v1981_v54 }
0x1222   :  { %7600 = vrcp.f32 %v2055_v11 }
0x1223   :  { %7602 = vrcp.f32 %v2054_v47 }
0x122d   :  { %v7597_v59 = vpop.eup %7596 }
0x122e   :  { %v7599_v3 = vpop.eup %7598 }
0x122f   :  { %v7601_v5 = vpop.eup %7600 }
0x1230   :  { %v7603_v63 = vpop.eup %7602 }
0x127e   :  { %v1990_v2 = vpop.permute.xlu1 %1989  ;;  %v1988_v52 = vpop.permute.xlu0 %1987 }
0x127f   :  { %v1994_v4 = vmul.f32 %v7597_v59, %v1990_v2  ;;  %v1993_v8 = vmul.f32 %v7599_v3, %v1988_v52  ;;  %v2008_v2 = vsub.f32 1.0, %v7597_v59 }
0x1281   :  { %1999 = vrot.lane.b32.xlu1 %v1994_v4, %s8395_s14  ;;  %1997 = vrot.lane.b32.xlu0 %v1993_v8, %s8395_s14  ;;  %v2007_v8 = vsub.f32 1.0, %v7599_v3 }
0x1282   :  { %v2081_v10 = vpop.permute.xlu1 %2080  ;;  %v2079_v26 = vpop.permute.xlu0 %2078 }
0x1283   :  { %v2085_v44 = vmul.f32 %v7601_v5, %v2081_v10  ;;  %v2084_v34 = vmul.f32 %v7603_v63, %v2079_v26 }
0x1285   :  { %2090 = vrot.lane.b32.xlu1 %v2085_v44, %s8395_s14  ;;  %2088 = vrot.lane.b32.xlu0 %v2084_v34, %s8395_s14 }
0x1289   :  { %2024 = vrot.lane.b32.xlu1 %v2021_v22, %s8399_s26  ;;  %2022 = vrot.lane.b32.xlu0 %v2020_v33, %s8399_s26 }
0x12f3   :  { %v2000_v60 = vpop.permute.xlu1 %1999  ;;  %v1998_v1 = vpop.permute.xlu0 %1997 }
0x12f4   :  { %v2004_v13 = vadd.f32 %v2000_v60, %v8780_v50  ;;  %v2003_v27 = vadd.f32 %v1998_v1, %v8783_v53 }
0x12f6   :  { %7604 = vtanh.f32 %v2004_v13  ;;  %v2110_v13 = vrot.slane %v9405_v17, 7 }
0x12f7   :  { %7606 = vtanh.f32 %v2003_v27  ;;  %v2091_v25 = vpop.permute.xlu1 %2090  ;;  %v2089_v24 = vpop.permute.xlu0 %2088 }
0x12f8   :  { %v2095_v39 = vadd.f32 %v2091_v25, %v8800_v49  ;;  %v2094_v41 = vadd.f32 %v2089_v24, %v8803_v56 }
0x12fa   :  { %7608 = vtanh.f32 %v2095_v39 }
0x12fb   :  { %7610 = vtanh.f32 %v2094_v41  ;;  %v2025_v11 = vpop.permute.xlu1 %2024  ;;  %v2023_v47 = vpop.permute.xlu0 %2022 }
0x12fc   :  { %7612 = vpow2.f32 %v6985_v51  ;;  %v2029_v10 = vmul.f32 %v7597_v59, %v2025_v11  ;;  %v2028_v63 = vmul.f32 %v7599_v3, %v2023_v47 }
0x12fd   :  { %7614 = vpow2.f32 %v6984_v38 }
0x1303   :  { %v7605_v30 = vpop.eup %7604 }
0x1304   :  { %v7607_v46 = vpop.eup %7606  ;;  %2013 = vrot.lane.b32.xlu1 %v7605_v30, %s8397_s17 }
0x1305   :  { %2011 = vrot.lane.b32.xlu0 %v7607_v46, %s8397_s17 }
0x1307   :  { %v7609_v43 = vpop.eup %7608 }
0x1308   :  { %v7611_v12 = vpop.eup %7610  ;;  %2104 = vrot.lane.b32.xlu1 %v7609_v43, %s8397_s17 }
0x1309   :  { %2102 = vrot.lane.b32.xlu0 %v7611_v12, %s8397_s17  ;;  %v7613_v15 = vpop.eup %7612 }
0x130a   :  { %v7615_v57 = vpop.eup %7614  ;;  %v2073_v54 = vadd.f32 1.0, %v7613_v15 }
0x130b   :  { %v2072_v0 = vadd.f32 1.0, %v7615_v57  ;;  %v2041_v57 = vmul.f32 %v9415_v29, %v8936_v58 }
0x130c   :  { %7616 = vrcp.f32 %v2073_v54 }
0x130d   :  { %7618 = vrcp.f32 %v2072_v0 }
0x1319   :  { %v7617_v4 = vpop.eup %7616 }
0x131a   :  { %v7619_v5 = vpop.eup %7618  ;;  %v2099_v22 = vsub.f32 1.0, %v7617_v4  ;;  %v2114_v30 = vmul.f32 %v7617_v4, %v9405_v17 }
0x131b   :  { %v2098_v60 = vsub.f32 1.0, %v7619_v5  ;;  %v2113_v24 = vmul.f32 %v7619_v5, %v2110_v13 }
0x1376   :  { %v2014_v52 = vpop.permute.xlu1 %2013 }
0x1377   :  { %v2018_v21 = vmul.f32 %v2014_v52, %v2008_v2  ;;  %v2012_v16 = vpop.permute.xlu0 %2011 }
0x1378   :  { %v2017_v44 = vmul.f32 %v2012_v16, %v2007_v8 }
0x1379   :  { %v2031_v26 = vadd.f32 %v2029_v10, %v2018_v21 }
0x137a   :  { %v2030_v34 = vadd.f32 %v2028_v63, %v2017_v44  ;;  %v2105_v33 = vpop.permute.xlu1 %2104 }
0x137b   :  { %v2035_v1 = vrot.slane %v2031_v26, 5  ;;  %v2103_v27 = vpop.permute.xlu0 %2102  ;;  %v2109_v39 = vmul.f32 %v2105_v33, %v2099_v22 }
0x137c   :  { %v2034_v25 = vrot.slane %v2030_v34, 6  ;;  %v2108_v41 = vmul.f32 %v2103_v27, %v2098_v60 }
0x137d   :  { %v2116_v3 = vadd.f32 %v2114_v30, %v2109_v39 }
0x137e   :  { %v2115_v59 = vadd.f32 %v2113_v24, %v2108_v41  ;;  %v2036_v46 = vsel %vm546_vm1, %v2035_v1, %v2034_v25 }
0x137f   :  { %2037 = vrot.lane.b32.xlu0 %v2036_v46, %s8397_s17 }
0x1380   :  { %v2119_v43 = vrot.slane %v2115_v59, 1 }
0x1382   :  { %v2120_v12 = vsel %vm546_vm1, %v2116_v3, %v2119_v43 }
0x1383   :  { %v9464_v55 = vmul.f32 %v2120_v12, %v8950_v19 }
0x1385   :  { %v9469_v51 = vadd.f32 %v2123_v62, %v9464_v55 }
0x1387   :  { %2126 = vrot.lane.b32.xlu1 %v9469_v51, %s8399_s26 }
0x13f1   :  { %v2038_v38 = vpop.permute.xlu0 %2037 }
0x13f2   :  { %v9474_v15 = vmul.f32 %v2038_v38, %v8938_v42 }
0x13f4   :  { %v9479_v54 = vadd.f32 %v2041_v57, %v9474_v15 }
0x13f9   :  { %v2127_v0 = vpop.permute.xlu1 %2126 }
0x13fa   :  { %v2129_v17 = vsel %vm314_vm0, %v9479_v54, %v2127_v0 }
0x13fb   :  { %6986 = vmatmul.mubr.msk.f32.vlgmr.msra.gmra.mxu0 %vm409_vm2, %v2129_v17 }
0x13fc   :  { %2875 = vmatprep.mubr.f32.mxu0 %v10856_v61 }
0x14bb   :  { %v2199_v11 = vpop.f32.mrf.mxu0 }
0x14bc   :  { %v2200_v2 = vadd.f32 %v2199_v11, %v8760_v36 }
0x14bd   :  { %v2201_v47 = vpop.f32.mrf.mxu0 }
0x14be   :  { %v9487_v4 = vadd.f32 %v2201_v47, %v8763_v37  ;;  %v2206_v52 = vrot.slane %v2200_v2, 2  ;;  %v2205_v8 = vrot.slane %v2200_v2, 1  ;;  %v2278_v36 = vadd.f32 %v2200_v2, %v8783_v53 }
0x14c0   :  { %2310 = vrot.lane.b32.xlu1 %v9487_v4, %s8395_s14  ;;  %v2293_v29 = vrot.slane %v9487_v4, 1  ;;  %v2279_v37 = vadd.f32 %v2205_v8, %v8780_v50  ;;  %v2210_v5 = vadd.f32 %v2206_v52, %v8780_v50  ;;  %v6989_v10 = vmul.f32 -1.442695, %v2278_v36 }
0x14c1   :  { %v2209_v21 = vadd.f32 %v2205_v8, %v8783_v53 }
0x14c2   :  { %2312 = vrot.lane.b32.xlu0 %v2293_v29, %s8395_s14  ;;  %v6990_v16 = vmul.f32 -1.442695, %v2279_v37  ;;  %v6988_v63 = vmul.f32 -1.442695, %v2210_v5  ;;  %7620 = vpow2.f32 %v6989_v10  ;;  %v2257_v10 = vrot.slane %v9479_v54, 2 }
0x14c3   :  { %v6987_v44 = vmul.f32 -1.442695, %v2209_v21  ;;  %v9529_v21 = vld [vmem:[#allocation11 + $0x78] sm:$0xff] }
0x14c4   :  { %2225 = vrot.lane.b32.xlu1 %v2206_v52, %s8395_s14  ;;  %7622 = vpow2.f32 %v6990_v16  ;;  %v9531_v16 = vld [vmem:[#allocation11 + $0x70] sm:$0xff]  ;;  %2827 = vmatprep.subr.mxu0 %v9529_v21 }
0x14c5   :  { %7624 = vpow2.f32 %v6988_v63  ;;  %v9533_v63 = vld [vmem:[#allocation11 + $0x68] sm:$0xff]  ;;  %2828 = vmatpush1.msra.mxu0 %v9531_v16 }
0x14c6   :  { %2223 = vrot.lane.b32.xlu0 %v2205_v8, %s8395_s14  ;;  %7626 = vpow2.f32 %v6987_v44  ;;  %v9536_v44 = vld [vmem:[#allocation11 + $0x60] sm:$0xff]  ;;  %2829 = vmatprep.subr.mxu0 %v9533_v63 }
0x14c7   :  { %2830 = vmatpush1.msra.mxu0 %v9536_v44 }
0x14cf   :  { %v7621_v26 = vpop.eup %7620 }
0x14d0   :  { %v2286_v22 = vadd.f32 1.0, %v7621_v26  ;;  %v10864_v26 = vld [vmem:[#allocation55_spill] sm:$0xff] }
0x14d1   :  { %v7623_v34 = vpop.eup %7622 }
0x14d2   :  { %v7625_v33 = vpop.eup %7624  ;;  %v2287_v60 = vadd.f32 1.0, %v7623_v34  ;;  %7628 = vrcp.f32 %v2286_v22  ;;  %v9558_v34 = vld [vmem:[#allocation11 + $0x38] sm:$0xff]  ;;  %v9561_v22 = vld [vmem:[#allocation11 + $0x30] sm:$0xff] }
0x14d3   :  { %v7627_v13 = vpop.eup %7626  ;;  %v2218_v1 = vadd.f32 1.0, %v7625_v33  ;;  %v9564_v33 = vld [vmem:[#allocation11 + $0x28] sm:$0xff] }
0x14d4   :  { %v2217_v27 = vadd.f32 1.0, %v7627_v13  ;;  %7630 = vrcp.f32 %v2287_v60  ;;  %v9567_v60 = vld [vmem:[#allocation11 + $0x20] sm:$0xff]  ;;  %v9570_v13 = vld [vmem:[#allocation11 + $0x18] sm:$0xff] }
0x14d5   :  { %7632 = vrcp.f32 %v2218_v1  ;;  %v9573_v1 = vld [vmem:[#allocation11 + $0x10] sm:$0xff] }
0x14d6   :  { %7634 = vrcp.f32 %v2217_v27  ;;  %v9576_v27 = vld [vmem:[#allocation11 + $0x8] sm:$0xff] }
0x14df   :  { %v7629_v25 = vpop.eup %7628 }
0x14e1   :  { %v7631_v41 = vpop.eup %7630 }
0x14e2   :  { %v9502_v59 = vpop.eup %7632 }
0x14e3   :  { %v9506_v12 = vpop.eup %7634 }
0x1532   :  { %v2311_v39 = vpop.permute.xlu1 %2310 }
0x1533   :  { %v2316_v24 = vmul.f32 %v7629_v25, %v2311_v39  ;;  %v9579_v25 = vld [vmem:[#allocation11] sm:$0xff]  ;;  %v2297_v39 = vadd.f32 %v2293_v29, %v8800_v49  ;;  %v2685_v29 = vld [vmem:[%s10863_s10 + $0x68] sm:$0xff] }
0x1534   :  { %v2313_v30 = vpop.permute.xlu0 %2312 }
0x1535   :  { %2320 = vrot.lane.b32.xlu1 %v2316_v24, %s8395_s14  ;;  %v2317_v46 = vmul.f32 %v7631_v41, %v2313_v30  ;;  %v2296_v24 = vadd.f32 %v9487_v4, %v8803_v56  ;;  %v6992_v41 = vmul.f32 -1.442695, %v2297_v39  ;;  %v2342_v4 = vrot.slane %v9469_v51, 1 }
0x1536   :  { %v2226_v3 = vpop.permute.xlu1 %2225  ;;  %v2243_v39 = vsub.f32 1.0, %v9506_v12 }
0x1537   :  { %v2230_v43 = vmul.f32 %v9502_v59, %v2226_v3  ;;  %2322 = vrot.lane.b32.xlu0 %v2317_v46, %s8395_s14  ;;  %v6991_v30 = vmul.f32 -1.442695, %v2296_v24 }
0x1538   :  { %v2224_v62 = vpop.permute.xlu0 %2223 }
0x1539   :  { %2235 = vrot.lane.b32.xlu1 %v2230_v43, %s8395_s14  ;;  %v2229_v38 = vmul.f32 %v9506_v12, %v2224_v62 }
0x153b   :  { %2233 = vrot.lane.b32.xlu0 %v2229_v38, %s8395_s14 }
0x15a7   :  { %v2321_v57 = vpop.permute.xlu1 %2320 }
0x15a8   :  { %v2326_v0 = vadd.f32 %v2321_v57, %v8803_v56 }
0x15a9   :  { %v2323_v17 = vpop.permute.xlu0 %2322 }
0x15aa   :  { %7636 = vtanh.f32 %v2326_v0  ;;  %v2327_v8 = vadd.f32 %v2323_v17, %v8800_v49  ;;  %v2686_v49 = vld [vmem:[%s10863_s10 + $0x70] sm:$0xff] }
0x15ab   :  { %v2236_v11 = vpop.permute.xlu1 %2235 }
0x15ac   :  { %v2240_v47 = vadd.f32 %v2236_v11, %v8780_v50 }
0x15ad   :  { %v2234_v2 = vpop.permute.xlu0 %2233 }
0x15ae   :  { %7638 = vtanh.f32 %v2240_v47  ;;  %v2239_v52 = vadd.f32 %v2234_v2, %v8783_v53  ;;  %v2256_v53 = vrot.slane %v9479_v54, 1  ;;  %v9550_v54 = vld [vmem:[#allocation11 + $0x40] sm:$0xff] }
0x15b0   :  { %7640 = vtanh.f32 %v2239_v52 }
0x15b1   :  { %7642 = vtanh.f32 %v2327_v8  ;;  %v2684_v8 = vld [vmem:[%s10863_s10 + $0x60] sm:$0xff] }
0x15b2   :  { %7644 = vpow2.f32 %v6992_v41 }
0x15b3   :  { %7646 = vpow2.f32 %v6991_v30 }
0x15b7   :  { %v7637_v36 = vpop.eup %7636 }
0x15b8   :  { %2334 = vrot.lane.b32.xlu1 %v7637_v36, %s8397_s17  ;;  %v2244_v36 = vsub.f32 1.0, %v9502_v59 }
0x15bb   :  { %v7639_v37 = vpop.eup %7638 }
0x15bc   :  { %2249 = vrot.lane.b32.xlu1 %v7639_v37, %s8397_s17 }
0x15bd   :  { %v7641_v5 = vpop.eup %7640 }
0x15be   :  { %2247 = vrot.lane.b32.xlu0 %v7641_v5, %s8397_s17  ;;  %v7643_v50 = vpop.eup %7642 }
0x15bf   :  { %v7645_v46 = vpop.eup %7644 }
0x15c0   :  { %2260 = vrot.lane.b32.xlu1 %v2257_v10, %s8399_s26  ;;  %v7647_v3 = vpop.eup %7646  ;;  %v2305_v43 = vadd.f32 1.0, %v7645_v46  ;;  %v2680_v46 = vld [vmem:[%s10863_s10 + $0x40] sm:$0xff] }
0x15c1   :  { %v2304_v62 = vadd.f32 1.0, %v7647_v3 }
0x15c2   :  { %2336 = vrot.lane.b32.xlu0 %v7643_v50, %s8397_s17  ;;  %7648 = vrcp.f32 %v2305_v43  ;;  %v2683_v50 = vld [vmem:[%s10863_s10 + $0x58] sm:$0xff] }
0x15c3   :  { %7650 = vrcp.f32 %v2304_v62 }
0x15c4   :  { %2414 = vrot.lane.b32.xlu1 %v9400_v48, %s8399_s26  ;;  %v9541_v48 = vld [vmem:[#allocation11 + $0x58] sm:$0xff] }
0x15c5   :  { %2831 = vmatprep.subr.mxu0 %v9541_v48 }
0x15c6   :  { %2258 = vrot.lane.b32.xlu0 %v2256_v53, %s8399_s26 }
0x15c8   :  { %2442 = vrot.lane.b32.xlu1 %v9318_v35, %s8399_s26  ;;  %v9544_v35 = vld [vmem:[#allocation11 + $0x50] sm:$0xff] }
0x15c9   :  { %2832 = vmatpush1.msra.mxu0 %v9544_v35 }
0x15ca   :  { %2386 = vrot.lane.b32.xlu0 %v9464_v55, %s8399_s26  ;;  %v9547_v55 = vld [vmem:[#allocation11 + $0x48] sm:$0xff] }
0x15cb   :  { %2833 = vmatprep.subr.mxu0 %v9547_v55 }
0x15cc   :  { %2834 = vmatpush1.msra.mxu0 %v9550_v54 }
0x15cd   :  { %2835 = vmatprep.subr.mxu0 %v9558_v34 }
0x15ce   :  { %2470 = vrot.lane.b32.xlu0 %v9230_v9, %s8399_s26  ;;  %v2687_v9 = vld [vmem:[%s10863_s10 + $0x78] sm:$0xff]  ;;  %2836 = vmatpush1.msra.mxu0 %v9561_v22 }
0x15cf   :  { %2739 = vmatprep.subr.mxu1 %v2687_v9  ;;  %2837 = vmatprep.subr.mxu0 %v9564_v33  ;;  %v7649_v0 = vpop.eup %7648  ;;  %v2682_v9 = vld [vmem:[%s10863_s10 + $0x50] sm:$0xff] }
0x15d0   :  { %2838 = vmatpush1.msra.mxu0 %v9567_v60  ;;  %v7651_v11 = vpop.eup %7650  ;;  %v2331_v56 = vsub.f32 1.0, %v7649_v0  ;;  %2740 = vmatpush1.msra.mxu1 %v2686_v49  ;;  %v2346_v5 = vmul.f32 %v7649_v0, %v2342_v4  ;;  %v2675_v4 = vld [vmem:[%s10863_s10 + $0x18] sm:$0xff] }
0x15d1   :  { %2839 = vmatprep.subr.mxu0 %v9570_v13  ;;  %v2330_v2 = vsub.f32 1.0, %v7651_v11  ;;  %2741 = vmatprep.subr.mxu1 %v2685_v29  ;;  %v2345_v41 = vmul.f32 %v7651_v11, %v9469_v51  ;;  %v2678_v51 = vld [vmem:[%s10863_s10 + $0x30] sm:$0xff] }
0x15d2   :  { %2498 = vrot.lane.b32.xlu0 %v10864_v26, %s8399_s26  ;;  %2840 = vmatpush1.msra.mxu0 %v9573_v1  ;;  %v10865_v29 = vld [vmem:[#allocation50_spill] sm:$0xff] }
0x15d3   :  { %2841 = vmatprep.subr.mxu0 %v9576_v27  ;;  %2742 = vmatpush1.msra.mxu1 %v2684_v8 }
0x15d4   :  { %2842 = vmatpush1.msra.mxu0 %v9579_v25  ;;  %2743 = vmatprep.subr.mxu1 %v2683_v50  ;;  %v2705_v50 = vld [vmem:[#allocation14] sm:$0x3] }
0x15d5   :  { %2876 = vmatmul.mubr.f32.vlgmr.msra.gmra.mxu0 %v10856_v61  ;;  %3285 = vmatprep.subr.mxu0 %v9529_v21 }
0x15d6   :  { %3286 = vmatpush1.msra.mxu0 %v9531_v16  ;;  %3333 = vmatprep.mubr.f32.mxu0 %v10856_v61 }
0x15d7   :  { %3287 = vmatprep.subr.mxu0 %v9533_v63  ;;  %2744 = vmatpush1.msra.mxu1 %v2682_v9 }
0x15d8   :  { %3288 = vmatpush1.msra.mxu0 %v9536_v44 }
0x15d9   :  { %3289 = vmatprep.subr.mxu0 %v9541_v48 }
0x15da   :  { %3290 = vmatpush1.msra.mxu0 %v9544_v35 }
0x15db   :  { %3291 = vmatprep.subr.mxu0 %v9547_v55 }
0x15dc   :  { %3292 = vmatpush1.msra.mxu0 %v9550_v54 }
0x15dd   :  { %3293 = vmatprep.subr.mxu0 %v9558_v34 }
0x15de   :  { %3294 = vmatpush1.msra.mxu0 %v9561_v22 }
0x15df   :  { %3295 = vmatprep.subr.mxu0 %v9564_v33 }
0x15e0   :  { %3296 = vmatpush1.msra.mxu0 %v9567_v60 }
0x15e1   :  { %3297 = vmatprep.subr.mxu0 %v9570_v13 }
0x15e2   :  { %3298 = vmatpush1.msra.mxu0 %v9573_v1 }
0x15e3   :  { %3299 = vmatprep.subr.mxu0 %v9576_v27 }
0x15e4   :  { %3300 = vmatpush1.msra.mxu0 %v9579_v25 }
0x15e5   :  { %3763 = vmatprep.subr.mxu0 %v9529_v21 }
0x162a   :  { %v2335_v38 = vpop.permute.xlu1 %2334 }
0x162b   :  { %v2340_v53 = vmul.f32 %v2335_v38, %v2330_v2 }
0x162d   :  { %v2347_v0 = vadd.f32 %v2345_v41, %v2340_v53  ;;  %v10868_v53 = vld [vmem:[#allocation44_spill] sm:$0xff] }
0x162e   :  { %v2250_v57 = vpop.permute.xlu1 %2249  ;;  %v9670_v9 = vrot.slane %v2705_v50, %v10868_v53 }
0x162f   :  { %v2254_v26 = vmul.f32 %v2250_v57, %v2244_v36  ;;  %v2679_v57 = vld [vmem:[%s10863_s10 + $0x38] sm:$0xff]  ;;  %v2673_v36 = vld [vmem:[%s10863_s10 + $0x8] sm:$0xff] }
0x1630   :  { %v2248_v17 = vpop.permute.xlu0 %2247 }
0x1631   :  { %v2253_v3 = vmul.f32 %v2248_v17, %v2243_v39  ;;  %v2677_v17 = vld [vmem:[%s10863_s10 + $0x28] sm:$0xff] }
0x1632   :  { %v2261_v47 = vpop.permute.xlu1 %2260 }
0x1633   :  { %v2265_v37 = vmul.f32 %v9502_v59, %v2261_v47  ;;  %v2681_v59 = vld [vmem:[%s10863_s10 + $0x48] sm:$0xff] }
0x1634   :  { %v2337_v52 = vpop.permute.xlu0 %2336  ;;  %2745 = vmatprep.subr.mxu1 %v2681_v59 }
0x1635   :  { %v2341_v10 = vmul.f32 %v2337_v52, %v2331_v56  ;;  %v2267_v43 = vadd.f32 %v2265_v37, %v2254_v26  ;;  %2746 = vmatpush1.msra.mxu1 %v2680_v46  ;;  %v2674_v52 = vld [vmem:[%s10863_s10 + $0x10] sm:$0xff]  ;;  %v2672_v37 = vld [vmem:[%s10863_s10] sm:$0xff]  ;;  %v8406_v26 = vmov 1966171168  }
0x1636   :  { %2747 = vmatprep.subr.mxu1 %v2679_v57  ;;  %v2362_v39 = vunpack.c.l.s4 %v8406_v26 }
0x1637   :  { %v2348_v24 = vadd.f32 %v2346_v5, %v2341_v10  ;;  %2748 = vmatpush1.msra.mxu1 %v2678_v51  ;;  %v2271_v49 = vrot.slane %v2267_v43, 6  ;;  %v10866_v5 = vld [vmem:[#allocation48_spill] sm:$0xff]  ;;  %v10867_v10 = vld [vmem:[#allocation53_spill] sm:$0xff] }
0x1638   :  { %v2259_v30 = vpop.permute.xlu0 %2258  ;;  %2749 = vmatprep.subr.mxu1 %v2677_v17 }
0x1639   :  { %v2351_v62 = vrot.slane %v2348_v24, 7  ;;  %v2264_v38 = vmul.f32 %v9506_v12, %v2259_v30  ;;  %v2676_v12 = vld [vmem:[%s10863_s10 + $0x20] sm:$0xff]  ;;  %v2415_v30 = vpop.permute.xlu1 %2414  ;;  %s8416_s10 = smov 40  }
0x163a   :  { %2750 = vmatpush1.msra.mxu1 %v2676_v12  ;;  %v10869_v24 = vld [vmem:[#allocation45_spill] sm:$0xff]  ;;  %v10872_v12 = vld [vmem:[#allocation56_spill] sm:$0xff] }
0x163b   :  { %v2266_v11 = vadd.f32 %v2264_v38, %v2253_v3  ;;  %v2352_v47 = vsel %vm546_vm1, %v2351_v62, %v2347_v0  ;;  %2751 = vmatprep.subr.mxu1 %v2675_v4  ;;  %v9673_v59 = vrot.slane %v2705_v50, %v10869_v24  ;;  %v2363_v62 = vunpack.c.0.s8 %v2362_v39  ;;  %v10873_v4 = vld [vmem:[#allocation58_spill] sm:$0xff] }
0x163c   :  { %v2354_v2 = vmul.f32 %v2352_v47, %v10865_v29  ;;  %2752 = vmatpush1.msra.mxu1 %v2674_v52  ;;  %v2387_v3 = vpop.permute.xlu0 %2386 }
0x163d   :  { %v2270_v56 = vrot.slane %v2266_v11, 7  ;;  %2753 = vmatprep.subr.mxu1 %v2673_v36  ;;  %v10870_v11 = vld [vmem:[#allocation43_spill] sm:$0xff]  ;;  %v2443_v47 = vpop.permute.xlu1 %2442 }
0x163e   :  { %2356 = vrot.lane.b32.xlu0 %v2354_v2, %s8399_s26  ;;  %2754 = vmatpush1.msra.mxu1 %v2672_v37  ;;  %v9689_v17 = vsub.s32 %v2363_v62, %v10870_v11  ;;  %v2445_v2 = vsel %vm314_vm0, %v10873_v4, %v2443_v47 }
0x163f   :  { %v2272_v8 = vsel %vm546_vm1, %v2271_v49, %v2270_v56  ;;  %3048 = vmatprep.subr.mxu1 %v9529_v21  ;;  %v2417_v49 = vsel %vm314_vm0, %v10872_v12, %v2415_v30 }
0x1640   :  { %2273 = vrot.lane.b32.xlu1 %v2272_v8, %s8397_s17  ;;  %10871 = vst [vmem:[#allocation55_spill] sm:$0xff] %v9689_v17  ;;  %v2471_v56 = vpop.permute.xlu0 %2470  ;;  %v2425_v52 = vrot.slane %v2417_v49, %v9689_v17  ;;  %v10874_v8 = vld [vmem:[#allocation54_spill] sm:$0xff]  ;;  %v2453_v37 = vrot.slane %v2445_v2, %v9689_v17  ;;  %v10875_v2 = vld [vmem:[#allocation52_spill] sm:$0xff] }
0x1641   :  { %v2389_v36 = vsel %vm314_vm0, %v10874_v8, %v2387_v3  ;;  %v10876_v8 = vld [vmem:[#allocation47_spill] sm:$0xff] }
0x1642   :  { %2554 = vrot.lane.b32.xlu0 %v10866_v5, %s8399_s26  ;;  %v2473_v5 = vsel %vm314_vm0, %v9326_v7, %v2471_v56  ;;  %v2426_v26 = vcombine.high %v2425_v52, %v2425_v52  ;;  %v2433_v3 = vrot.slane %v2425_v52, %v9689_v17  ;;  %v2461_v11 = vrot.slane %v2453_v37, %v9689_v17 }
0x1643   :  { %v2481_v39 = vrot.slane %v2473_v5, %v9689_v17 }
0x1644   :  { %2526 = vrot.lane.b32.xlu1 %v10867_v10, %s8399_s26  ;;  %v2397_v10 = vrot.slane %v2389_v36, %v9689_v17  ;;  %v2499_v50 = vpop.permute.xlu0 %2498  ;;  %v2440_v62 = vrot.slane %v2426_v26, %v9689_v17 }
0x1645   :  { %v2501_v30 = vsel %vm314_vm0, %v9410_v18, %v2499_v50  ;;  %v2482_v47 = vcombine.high %v2481_v39, %v2481_v39  ;;  %v2489_v26 = vrot.slane %v2481_v39, %v9689_v17 }
0x1646   :  { %v2509_v7 = vrot.slane %v2501_v30, %v9689_v17  ;;  %v2405_v49 = vrot.slane %v2397_v10, %v9689_v17  ;;  %v2598_v5 = vrot.slane %v2440_v62, %v10868_v53 }
0x1648   :  { %v2510_v30 = vcombine.high %v2509_v7, %v2509_v7 }
0x1695   :  { %v2877_v41 = vpop.f32.mrf.mxu0 }
0x1696   :  { %v9676_v46 = vadd.f32 %v2877_v41, %v9670_v9  ;;  %v2454_v41 = vcombine.high %v2453_v37, %v2453_v37  ;;  %v2594_v37 = vrot.slane %v2433_v3, %v10868_v53 }
0x1697   :  { %v2879_v43 = vpop.f32.mrf.mxu0 }
0x1698   :  { %v9679_v38 = vadd.f32 %v2879_v43, %v9673_v59  ;;  %v9682_v57 = vrot.slane %v9676_v46, 1  ;;  %v2398_v43 = vcombine.high %v2397_v10, %v2397_v10  ;;  %v2468_v12 = vrot.slane %v2454_v41, %v9689_v17 }
0x1699   :  { %v2604_v10 = vrot.slane %v2461_v11, %v10868_v53  ;;  %v2496_v41 = vrot.slane %v2482_v47, %v9689_v17 }
0x169a   :  { %v10814_v0 = vrot.slane %v9679_v38, 1  ;;  %v10813_v51 = vrot.slane %v9679_v38, 2  ;;  %2902 = vrot.lane.b32.xlu1 %v9682_v57, %s8395_s14  ;;  %v2412_v18 = vrot.slane %v2398_v43, %v9689_v17  ;;  %v2608_v43 = vrot.slane %v2468_v12, %v10868_v53 }
0x169b   :  { %v2618_v20 = vrot.slane %v2496_v41, %v10868_v53 }
0x169c   :  { %2980 = vrot.lane.b32.xlu0 %v10814_v0, %s8395_s14  ;;  %v2588_v62 = vrot.slane %v2412_v18, %v10868_v53  ;;  %v2524_v18 = vrot.slane %v2510_v30, %v9689_v17 }
0x169e   :  { %2982 = vrot.lane.b32.xlu1 %v10813_v51, %s8395_s14 }
0x16a0   :  { %2900 = vrot.lane.b32.xlu0 %v9676_v46, %s8395_s14 }
0x16b0   :  { %v2357_v56 = vpop.permute.xlu0 %2356 }
0x16b1   :  { %v2359_v52 = vsel %vm314_vm0, %v10875_v2, %v2357_v56  ;;  %v2584_v56 = vrot.slane %v2405_v49, %v10868_v53 }
0x16b2   :  { %v2274_v4 = vpop.permute.xlu1 %2273  ;;  %v2367_v50 = vrot.slane %v2359_v52, %v9689_v17  ;;  %v2517_v52 = vrot.slane %v2509_v7, %v9689_v17 }
0x16b3   :  { %v2276_v36 = vmul.f32 %v2274_v4, %v10876_v8 }
0x16b4   :  { %v2368_v4 = vcombine.high %v2367_v50, %v2367_v50  ;;  %v2375_v2 = vrot.slane %v2367_v50, %v9689_v17  ;;  %v2555_v3 = vpop.permute.xlu0 %2554  ;;  %v2614_v50 = vrot.slane %v2489_v26, %v10868_v53  ;;  %v2624_v41 = vrot.slane %v2517_v52, %v10868_v53 }
0x16b5   :  { %v2557_v11 = vsel %vm314_vm0, %v2276_v36, %v2555_v3 }
0x16b6   :  { %v2527_v51 = vpop.permute.xlu1 %2526  ;;  %v2382_v47 = vrot.slane %v2368_v4, %v9689_v17  ;;  %v2652_v12 = vsel %vm2651_vm3, %v2375_v2, %v2584_v56  ;;  %v2565_v49 = vrot.slane %v2557_v11, %v9689_v17  ;;  %v2628_v11 = vrot.slane %v2524_v18, %v10868_v53  ;;  %v2704_v18 = vld [vmem:[#allocation13] sm:$0x3] }
0x16b7   :  { %v2529_v39 = vsel %vm314_vm0, %v9474_v15, %v2527_v51  ;;  %v2655_v7 = vsel %vm2654_vm4, %v2652_v12, %v2594_v37 }
0x16b8   :  { %v2537_v0 = vrot.slane %v2529_v39, %v9689_v17  ;;  %v2653_v36 = vsel %vm2651_vm3, %v2382_v47, %v2588_v62  ;;  %v2658_v15 = vsel %vm2657_vm5, %v2655_v7, %v2604_v10  ;;  %v2566_v51 = vcombine.high %v2565_v49, %v2565_v49 }
0x16b9   :  { %v2573_v4 = vrot.slane %v2565_v49, %v9689_v17  ;;  %v2656_v56 = vsel %vm2654_vm4, %v2653_v36, %v2598_v5  ;;  %v2661_v26 = vsel %vm2660_vm6, %v2658_v15, %v2614_v50  ;;  %v2710_v7 = vrot.slane %v2704_v18, %v10868_v53 }
0x16ba   :  { %v2538_v2 = vcombine.high %v2537_v0, %v2537_v0  ;;  %v2545_v3 = vrot.slane %v2537_v0, %v9689_v17  ;;  %v2659_v30 = vsel %vm2657_vm5, %v2656_v56, %v2608_v43  ;;  %v2580_v5 = vrot.slane %v2566_v51, %v9689_v17 }
0x16bb   :  { %v2662_v10 = vsel %vm2660_vm6, %v2659_v30, %v2618_v20  ;;  %v2644_v0 = vrot.slane %v2573_v4, %v10868_v53  ;;  %v2664_v39 = vsel %vm2663_vm7, %v2661_v26, %v2624_v41 }
0x16bc   :  { %v2552_v37 = vrot.slane %v2538_v2, %v9689_v17  ;;  %v2634_v62 = vrot.slane %v2545_v3, %v10868_v53  ;;  %v2665_v12 = vsel %vm2663_vm7, %v2662_v10, %v2628_v11  ;;  %v2648_v49 = vrot.slane %v2580_v5, %v10868_v53 }
0x16bd   :  { %v2945_v3 = vrot.slane %v9676_v46, 2 }
0x16be   :  { %v2638_v52 = vrot.slane %v2552_v37, %v10868_v53  ;;  %v2667_v47 = vsel %vm2666_vm8, %v2664_v39, %v2634_v62 }
0x16bf   :  { %v2670_v43 = vsel %vm2669_vm9, %v2667_v47, %v2644_v0 }
0x16c0   :  { %6993 = vmatmul.mubr.msk.f32.vlgmr.msra.gmra.mxu1 %vm409_vm2, %v2670_v43  ;;  %v2668_v20 = vsel %vm2666_vm8, %v2665_v12, %v2638_v52 }
0x16c1   :  { %2793 = vmatprep.mubr.f32.mxu1 %v10856_v61  ;;  %3049 = vmatpush1.msra.mxu1 %v9531_v16  ;;  %v2671_v50 = vsel %vm2669_vm9, %v2668_v20, %v2648_v49 }
0x16c2   :  { %3050 = vmatprep.subr.mxu1 %v9533_v63 }
0x16c3   :  { %3051 = vmatpush1.msra.mxu1 %v9536_v44 }
0x16c4   :  { %6994 = vmatmul.mubr.msk.f32.gmra.mxu1 %vm409_vm2, %v2671_v50  ;;  %3052 = vmatprep.subr.mxu1 %v9541_v48 }
0x16c5   :  { %3053 = vmatpush1.msra.mxu1 %v9544_v35  ;;  %3096 = vmatprep.mubr.f32.mxu1 %v10856_v61 }
0x16c6   :  { %3054 = vmatprep.subr.mxu1 %v9547_v55 }
0x16c7   :  { %3055 = vmatpush1.msra.mxu1 %v9550_v54 }
0x16c8   :  { %3056 = vmatprep.subr.mxu1 %v9558_v34 }
0x16c9   :  { %3057 = vmatpush1.msra.mxu1 %v9561_v22 }
0x16ca   :  { %3058 = vmatprep.subr.mxu1 %v9564_v33 }
0x16cb   :  { %3059 = vmatpush1.msra.mxu1 %v9567_v60 }
0x16cc   :  { %3060 = vmatprep.subr.mxu1 %v9570_v13 }
0x16cd   :  { %3061 = vmatpush1.msra.mxu1 %v9573_v1 }
0x16ce   :  { %3062 = vmatprep.subr.mxu1 %v9576_v27 }
0x16cf   :  { %3063 = vmatpush1.msra.mxu1 %v9579_v25 }
0x16d0   :  { %3525 = vmatprep.subr.mxu1 %v9529_v21 }
0x170c   :  { %v2903_v49 = vpop.permute.xlu1 %2902 }
0x1780   :  { %v2789_v36 = vpop.f32.mrf.mxu1 }
0x1781   :  { %v9788_v15 = vadd.f32 %v2789_v36, %v2710_v7 }
0x1782   :  { %v2791_v51 = vpop.f32.mrf.mxu1 }
0x1783   :  { %v2947_v4 = vadd.f32 %v9682_v57, %v9788_v15  ;;  %v2886_v56 = vadd.f32 %v9676_v46, %v9788_v15 }
0x1784   :  { %v2795_v2 = vpop.f32.mrf.mxu1 }
0x1785   :  { %v9795_v26 = vadd.f32 %v2795_v2, %v2710_v7  ;;  %v6997_v41 = vmul.f32 -1.442695, %v2947_v4  ;;  %v6995_v30 = vmul.f32 -1.442695, %v2886_v56 }
0x1787   :  { %7652 = vpow2.f32 %v6997_v41  ;;  %v2887_v37 = vadd.f32 %v9682_v57, %v9795_v26  ;;  %v2948_v62 = vadd.f32 %v2945_v3, %v9795_v26  ;;  %v2981_v57 = vpop.permute.xlu0 %2980  ;;  %v2983_v41 = vpop.permute.xlu1 %2982 }
0x1788   :  { %7654 = vpow2.f32 %v6995_v30 }
0x1789   :  { %v6996_v10 = vmul.f32 -1.442695, %v2887_v37  ;;  %v6998_v11 = vmul.f32 -1.442695, %v2948_v62  ;;  %v2714_v37 = vrot.slane %v2704_v18, %v10869_v24 }
0x178b   :  { %7656 = vpow2.f32 %v6996_v10  ;;  %v2901_v36 = vpop.permute.xlu0 %2900  ;;  %v9805_v62 = vadd.f32 %v2791_v51, %v2714_v37 }
0x178c   :  { %7658 = vpow2.f32 %v6998_v11 }
0x1794   :  { %v7653_v5 = vpop.eup %7652 }
0x1795   :  { %v7655_v0 = vpop.eup %7654  ;;  %v2955_v39 = vadd.f32 1.0, %v7653_v5  ;;  %v2797_v5 = vpop.f32.mrf.mxu1 }
0x1796   :  { %v2894_v52 = vadd.f32 1.0, %v7655_v0 }
0x1797   :  { %7660 = vrcp.f32 %v2955_v39 }
0x1798   :  { %v7657_v46 = vpop.eup %7656  ;;  %7662 = vrcp.f32 %v2894_v52 }
0x1799   :  { %v7659_v47 = vpop.eup %7658  ;;  %v2895_v43 = vadd.f32 1.0, %v7657_v46 }
0x179a   :  { %v2956_v12 = vadd.f32 1.0, %v7659_v47  ;;  %v9810_v47 = vadd.f32 %v2797_v5, %v2714_v37 }
0x179b   :  { %7664 = vrcp.f32 %v2895_v43 }
0x179c   :  { %7666 = vrcp.f32 %v2956_v12 }
0x17a4   :  { %v7661_v20 = vpop.eup %7660 }
0x17a5   :  { %v2986_v50 = vmul.f32 %v7661_v20, %v2981_v57  ;;  %v7663_v7 = vpop.eup %7662  ;;  %v10877_v20 = vrot.slane %v9679_v38, 1 }
0x17a6   :  { %v2906_v2 = vmul.f32 %v7663_v7, %v2901_v36  ;;  %v10878_v36 = vrot.slane %v9679_v38, 2 }
0x17a7   :  { %2990 = vrot.lane.b32.xlu0 %v2986_v50, %s8395_s14 }
0x17a8   :  { %v7665_v4 = vpop.eup %7664 }
0x17a9   :  { %v2907_v56 = vmul.f32 %v7665_v4, %v2903_v49  ;;  %v7667_v3 = vpop.eup %7666  ;;  %v2966_v49 = vadd.f32 %v10877_v20, %v9805_v62  ;;  %v2932_v20 = vmul.f32 0.0, %v7663_v7 }
0x17aa   :  { %v2987_v30 = vmul.f32 %v7667_v3, %v2983_v41 }
0x17ab   :  { %2912 = vrot.lane.b32.xlu1 %v2907_v56, %s8395_s14  ;;  %2910 = vrot.lane.b32.xlu0 %v2906_v2, %s8395_s14  ;;  %v6999_v50 = vmul.f32 -1.442695, %v2966_v49  ;;  %v2967_v56 = vadd.f32 %v10878_v36, %v9810_v47 }
0x17ad   :  { %v7000_v2 = vmul.f32 -1.442695, %v2967_v56 }
0x17af   :  { %2992 = vrot.lane.b32.xlu1 %v2987_v30, %s8395_s14 }
0x1819   :  { %v2991_v10 = vpop.permute.xlu0 %2990 }
0x181a   :  { %v2996_v11 = vadd.f32 %v2991_v10, %v9805_v62 }
0x181c   :  { %7668 = vtanh.f32 %v2996_v11 }
0x181d   :  { %v2913_v0 = vpop.permute.xlu1 %2912  ;;  %v2911_v39 = vpop.permute.xlu0 %2910 }
0x181e   :  { %v2917_v52 = vadd.f32 %v2913_v0, %v9795_v26  ;;  %v2916_v46 = vadd.f32 %v2911_v39, %v9788_v15  ;;  %v2921_v0 = vsub.f32 1.0, %v7665_v4 }
0x1820   :  { %7670 = vtanh.f32 %v2917_v52 }
0x1821   :  { %7672 = vtanh.f32 %v2916_v46  ;;  %v2993_v43 = vpop.permute.xlu1 %2992  ;;  %v2920_v46 = vsub.f32 1.0, %v7663_v7  ;;  %v10880_v7 = vld [vmem:[#allocation49_spill] sm:$0xff] }
0x1822   :  { %v2997_v24 = vadd.f32 %v2993_v43, %v9810_v47 }
0x1824   :  { %7674 = vtanh.f32 %v2997_v24  ;;  %v2933_v24 = vmul.f32 0.0, %v7665_v4 }
0x1825   :  { %7676 = vpow2.f32 %v6999_v50 }
0x1826   :  { %7678 = vpow2.f32 %v7000_v2 }
0x1829   :  { %v7669_v18 = vpop.eup %7668 }
0x182a   :  { %3004 = vrot.lane.b32.xlu0 %v7669_v18, %s8397_s17 }
0x182d   :  { %v7671_v51 = vpop.eup %7670 }
0x182e   :  { %v7673_v12 = vpop.eup %7672  ;;  %2926 = vrot.lane.b32.xlu1 %v7671_v51, %s8397_s17 }
0x182f   :  { %2924 = vrot.lane.b32.xlu0 %v7673_v12, %s8397_s17 }
0x1831   :  { %v7675_v57 = vpop.eup %7674 }
0x1832   :  { %3006 = vrot.lane.b32.xlu1 %v7675_v57, %s8397_s17  ;;  %v7677_v3 = vpop.eup %7676 }
0x1833   :  { %v2974_v41 = vadd.f32 1.0, %v7677_v3  ;;  %v7679_v30 = vpop.eup %7678 }
0x1834   :  { %v2975_v37 = vadd.f32 1.0, %v7679_v30 }
0x1835   :  { %7680 = vrcp.f32 %v2974_v41 }
0x1836   :  { %7682 = vrcp.f32 %v2975_v37 }
0x1842   :  { %v7681_v10 = vpop.eup %7680 }
0x1843   :  { %v3000_v5 = vsub.f32 1.0, %v7681_v10  ;;  %v7683_v39 = vpop.eup %7682  ;;  %v3012_v12 = vmul.f32 0.0, %v7681_v10 }
0x1844   :  { %v3001_v49 = vsub.f32 1.0, %v7683_v39  ;;  %v3013_v50 = vmul.f32 0.0, %v7683_v39 }
0x189c   :  { %v3005_v11 = vpop.permute.xlu0 %3004 }
0x189d   :  { %v3010_v43 = vmul.f32 %v3005_v11, %v3000_v5 }
0x189f   :  { %v3014_v56 = vadd.f32 %v3012_v12, %v3010_v43 }
0x18a0   :  { %v2927_v52 = vpop.permute.xlu1 %2926 }
0x18a1   :  { %v2931_v38 = vmul.f32 %v2927_v52, %v2921_v0  ;;  %v2925_v18 = vpop.permute.xlu0 %2924  ;;  %v3018_v11 = vrot.slane %v3014_v56, 7 }
0x18a2   :  { %v2930_v51 = vmul.f32 %v2925_v18, %v2920_v46  ;;  %v10882_v46 = vld [vmem:[#allocation51_spill] sm:$0xff] }
0x18a3   :  { %v2935_v57 = vadd.f32 %v2933_v24, %v2931_v38 }
0x18a4   :  { %v3007_v36 = vpop.permute.xlu1 %3006  ;;  %v2934_v3 = vadd.f32 %v2932_v20, %v2930_v51 }
0x18a5   :  { %v2938_v2 = vrot.slane %v2935_v57, 7  ;;  %v3011_v41 = vmul.f32 %v3007_v36, %v3001_v49 }
0x18a7   :  { %v3015_v30 = vadd.f32 %v3013_v50, %v3011_v41  ;;  %v2939_v37 = vsel %vm546_vm1, %v2938_v2, %v2934_v3 }
0x18a8   :  { %2940 = vrot.lane.b32.xlu1 %v2939_v37, %s8397_s17 }
0x18a9   :  { %v3019_v4 = vrot.slane %v3015_v30, 6 }
0x18ab   :  { %v3020_v5 = vsel %vm546_vm1, %v3019_v4, %v3018_v11 }
0x18ac   :  { %v9827_v10 = vmul.f32 %v3020_v5, %v10876_v8 }
0x18ae   :  { %10879 = vst [vmem:[#allocation48_spill] sm:$0xff] %v9827_v10  ;;  %v9831_v0 = vadd.f32 %v9827_v10, %v10880_v7 }
0x18b0   :  { %3025 = vrot.lane.b32.xlu0 %v9831_v0, %s8399_s26  ;;  %v3244_v57 = vrot.slane %v9831_v0, 2  ;;  %v3245_v49 = vrot.slane %v9831_v0, 3 }
0x191a   :  { %v2941_v39 = vpop.permute.xlu1 %2940 }
0x191b   :  { %v9836_v52 = vmul.f32 %v2941_v39, %v10865_v29 }
0x191d   :  { %10881 = vst [vmem:[#allocation53_spill] sm:$0xff] %v9836_v52  ;;  %v9840_v43 = vadd.f32 %v9836_v52, %v10882_v46 }
0x1922   :  { %v3026_v24 = vpop.permute.xlu0 %3025 }
0x1923   :  { %v3028_v38 = vsel %vm314_vm0, %v9840_v43, %v3026_v24 }
0x1924   :  { %7001 = vmatmul.mubr.msk.f32.vlgmr.msra.gmra.mxu1 %vm409_vm2, %v3028_v38 }
0x1925   :  { %3526 = vmatpush1.msra.mxu1 %v9531_v16  ;;  %3573 = vmatprep.mubr.f32.mxu1 %v10856_v61 }
0x1926   :  { %3527 = vmatprep.subr.mxu1 %v9533_v63 }
0x1927   :  { %3528 = vmatpush1.msra.mxu1 %v9536_v44 }
0x1928   :  { %3529 = vmatprep.subr.mxu1 %v9541_v48 }
0x1929   :  { %3530 = vmatpush1.msra.mxu1 %v9544_v35 }
0x192a   :  { %3531 = vmatprep.subr.mxu1 %v9547_v55 }
0x192b   :  { %3532 = vmatpush1.msra.mxu1 %v9550_v54 }
0x192c   :  { %3533 = vmatprep.subr.mxu1 %v9558_v34 }
0x192d   :  { %3534 = vmatpush1.msra.mxu1 %v9561_v22 }
0x192e   :  { %3535 = vmatprep.subr.mxu1 %v9564_v33 }
0x192f   :  { %3536 = vmatpush1.msra.mxu1 %v9567_v60 }
0x1930   :  { %3537 = vmatprep.subr.mxu1 %v9570_v13 }
0x1931   :  { %3538 = vmatpush1.msra.mxu1 %v9573_v1 }
0x1932   :  { %3539 = vmatprep.subr.mxu1 %v9576_v27 }
0x1933   :  { %3540 = vmatpush1.msra.mxu1 %v9579_v25 }
0x1934   :  { %4001 = vmatprep.subr.mxu1 %v9529_v21 }
0x19e4   :  { %v3098_v16 = vpop.f32.mrf.mxu1 }
0x19e5   :  { %v3099_v63 = vadd.f32 %v3098_v16, %v9670_v9 }
0x19e6   :  { %v3100_v44 = vpop.f32.mrf.mxu1 }
0x19e7   :  { %v3101_v48 = vadd.f32 %v3100_v44, %v9673_v59  ;;  %v3104_v35 = vrot.slane %v3099_v63, 7  ;;  %v3175_v2 = vrot.slane %v3099_v63, 2  ;;  %v3176_v3 = vrot.slane %v3099_v63, 3 }
0x19e8   :  { %v3108_v4 = vadd.f32 %v3099_v63, %v9795_v26 }
0x19e9   :  { %v3194_v55 = vrot.slane %v3101_v48, 2  ;;  %v3195_v54 = vrot.slane %v3101_v48, 3  ;;  %3121 = vrot.lane.b32.xlu1 %v3104_v35, %s8395_s14  ;;  %v3107_v41 = vadd.f32 %v3104_v35, %v9788_v15  ;;  %v3179_v30 = vadd.f32 %v3175_v2, %v9788_v15 }
0x19ea   :  { %v3180_v37 = vadd.f32 %v3176_v3, %v9795_v26  ;;  %v7003_v39 = vmul.f32 -1.442695, %v3108_v4  ;;  %v3154_v2 = vrot.slane %v9840_v43, 7 }
0x19eb   :  { %v3198_v34 = vadd.f32 %v3194_v55, %v9805_v62  ;;  %3212 = vrot.lane.b32.xlu0 %v3194_v55, %s8395_s14  ;;  %v3199_v22 = vadd.f32 %v3195_v54, %v9810_v47  ;;  %v7002_v11 = vmul.f32 -1.442695, %v3107_v41  ;;  %v7004_v5 = vmul.f32 -1.442695, %v3179_v30 }
0x19ec   :  { %v7005_v7 = vmul.f32 -1.442695, %v3180_v37 }
0x19ed   :  { %v7006_v33 = vmul.f32 -1.442695, %v3198_v34  ;;  %v7007_v60 = vmul.f32 -1.442695, %v3199_v22  ;;  %3214 = vrot.lane.b32.xlu1 %v3195_v54, %s8395_s14 }
0x19ef   :  { %7684 = vpow2.f32 %v7006_v33  ;;  %3123 = vrot.lane.b32.xlu0 %v3099_v63, %s8395_s14 }
0x19f0   :  { %7686 = vpow2.f32 %v7007_v60 }
0x19fc   :  { %v7685_v21 = vpop.eup %7684 }
0x19fd   :  { %v7687_v18 = vpop.eup %7686  ;;  %v3206_v51 = vadd.f32 1.0, %v7685_v21 }
0x19fe   :  { %v3207_v12 = vadd.f32 1.0, %v7687_v18 }
0x19ff   :  { %7688 = vrcp.f32 %v3206_v51 }
0x1a00   :  { %7690 = vrcp.f32 %v3207_v12 }
0x1a01   :  { %7692 = vpow2.f32 %v7002_v11 }
0x1a02   :  { %7694 = vpow2.f32 %v7004_v5 }
0x1a03   :  { %7696 = vpow2.f32 %v7005_v7 }
0x1a04   :  { %7698 = vpow2.f32 %v7003_v39 }
0x1a0c   :  { %v9871_v20 = vpop.eup %7688 }
0x1a0d   :  { %v9874_v50 = vpop.eup %7690  ;;  %v9877_v36 = vmul.f32 %v9871_v20, %v3244_v57 }
0x1a0e   :  { %v9880_v56 = vmul.f32 %v9874_v50, %v3245_v49  ;;  %v7693_v46 = vpop.eup %7692 }
0x1a0f   :  { %v7695_v24 = vpop.eup %7694  ;;  %v3115_v38 = vadd.f32 1.0, %v7693_v46 }
0x1a10   :  { %v7697_v16 = vpop.eup %7696  ;;  %v3187_v44 = vadd.f32 1.0, %v7695_v24 }
0x1a11   :  { %v7699_v48 = vpop.eup %7698  ;;  %7700 = vrcp.f32 %v3115_v38  ;;  %v3188_v35 = vadd.f32 1.0, %v7697_v16 }
0x1a12   :  { %v3116_v55 = vadd.f32 1.0, %v7699_v48  ;;  %7702 = vrcp.f32 %v3187_v44 }
0x1a13   :  { %7704 = vrcp.f32 %v3188_v35 }
0x1a14   :  { %7706 = vrcp.f32 %v3116_v55  ;;  %v3233_v55 = vsub.f32 1.0, %v9874_v50 }
0x1a1e   :  { %v7701_v63 = vpop.eup %7700 }
0x1a1f   :  { %v7703_v34 = vpop.eup %7702  ;;  %v3141_v48 = vsub.f32 1.0, %v7701_v63 }
0x1a20   :  { %v7705_v21 = vpop.eup %7704 }
0x1a21   :  { %v7707_v51 = vpop.eup %7706 }
0x1a5b   :  { %v3122_v54 = vpop.permute.xlu1 %3121 }
0x1a5c   :  { %v3127_v22 = vmul.f32 %v7701_v63, %v3122_v54  ;;  %v3232_v54 = vsub.f32 1.0, %v9871_v20 }
0x1a5d   :  { %v3213_v33 = vpop.permute.xlu0 %3212 }
0x1a5e   :  { %v3218_v60 = vmul.f32 %v7703_v34, %v3213_v33  ;;  %3131 = vrot.lane.b32.xlu1 %v3127_v22, %s8395_s14 }
0x1a5f   :  { %v3215_v18 = vpop.permute.xlu1 %3214 }
0x1a60   :  { %3222 = vrot.lane.b32.xlu0 %v3218_v60, %s8395_s14  ;;  %v3219_v12 = vmul.f32 %v7705_v21, %v3215_v18 }
0x1a61   :  { %v3124_v57 = vpop.permute.xlu0 %3123 }
0x1a62   :  { %v3128_v49 = vmul.f32 %v7707_v51, %v3124_v57  ;;  %3224 = vrot.lane.b32.xlu1 %v3219_v12, %s8395_s14 }
0x1a64   :  { %3133 = vrot.lane.b32.xlu0 %v3128_v49, %s8395_s14  ;;  %v3142_v49 = vsub.f32 1.0, %v7707_v51 }
0x1a68   :  { %3155 = vrot.lane.b32.xlu0 %v3154_v2, %s8399_s26 }
0x1ad0   :  { %v3132_v3 = vpop.permute.xlu1 %3131 }
0x1ad1   :  { %v3137_v41 = vadd.f32 %v3132_v3, %v9788_v15 }
0x1ad2   :  { %v3223_v30 = vpop.permute.xlu0 %3222 }
0x1ad3   :  { %v3228_v37 = vadd.f32 %v3223_v30, %v9805_v62  ;;  %7708 = vtanh.f32 %v3137_v41 }
0x1ad4   :  { %v3225_v11 = vpop.permute.xlu1 %3224 }
0x1ad5   :  { %v3229_v4 = vadd.f32 %v3225_v11, %v9810_v47  ;;  %7710 = vtanh.f32 %v3228_v37 }
0x1ad6   :  { %v3134_v5 = vpop.permute.xlu0 %3133 }
0x1ad7   :  { %7712 = vtanh.f32 %v3229_v4  ;;  %v3138_v7 = vadd.f32 %v3134_v5, %v9795_v26  ;;  %v3259_v5 = vmul.f32 %v9831_v0, %v8936_v58 }
0x1ad9   :  { %7714 = vtanh.f32 %v3138_v7  ;;  %v3173_v7 = vmul.f32 %v9840_v43, %v8952_v14 }
0x1ada   :  { %v3156_v16 = vpop.permute.xlu0 %3155 }
0x1adb   :  { %v3161_v33 = vmul.f32 %v7701_v63, %v3156_v16  ;;  %v9934_v16 = vld [vmem:[#allocation11 + $0x68] sm:$0xff] }
0x1ae0   :  { %v7709_v39 = vpop.eup %7708 }
0x1ae1   :  { %3145 = vrot.lane.b32.xlu1 %v7709_v39, %s8397_s17 }
0x1ae2   :  { %v7711_v46 = vpop.eup %7710 }
0x1ae4   :  { %v7713_v24 = vpop.eup %7712 }
0x1ae5   :  { %3236 = vrot.lane.b32.xlu1 %v7711_v46, %s8397_s17  ;;  %3238 = vrot.lane.b32.xlu0 %v7713_v24, %s8397_s17 }
0x1ae6   :  { %v7715_v38 = vpop.eup %7714 }
0x1ae9   :  { %3147 = vrot.lane.b32.xlu1 %v7715_v38, %s8397_s17  ;;  %3157 = vrot.lane.b32.xlu0 %v9840_v43, %s8399_s26  ;;  %v9930_v38 = vld [vmem:[#allocation11 + $0x70] sm:$0xff]  ;;  %v9937_v43 = vld [vmem:[#allocation11 + $0x60] sm:$0xff] }
0x1b53   :  { %v3146_v44 = vpop.permute.xlu1 %3145 }
0x1b54   :  { %v3151_v35 = vmul.f32 %v3146_v44, %v3141_v48  ;;  %v9940_v44 = vld [vmem:[#allocation11 + $0x58] sm:$0xff]  ;;  %v9943_v48 = vld [vmem:[#allocation11 + $0x50] sm:$0xff] }
0x1b56   :  { %v3163_v18 = vadd.f32 %v3161_v33, %v3151_v35  ;;  %v9946_v35 = vld [vmem:[#allocation11 + $0x48] sm:$0xff]  ;;  %v9961_v33 = vld [vmem:[#allocation11 + $0x20] sm:$0xff] }
0x1b57   :  { %v3239_v34 = vpop.permute.xlu0 %3238  ;;  %v3237_v22 = vpop.permute.xlu1 %3236 }
0x1b58   :  { %v3243_v60 = vmul.f32 %v3239_v34, %v3233_v55  ;;  %v3242_v21 = vmul.f32 %v3237_v22, %v3232_v54  ;;  %v3167_v50 = vrot.slane %v3163_v18, 1  ;;  %v9949_v55 = vld [vmem:[#allocation11 + $0x40] sm:$0xff]  ;;  %v9952_v54 = vld [vmem:[#allocation11 + $0x38] sm:$0xff]  ;;  %v9955_v34 = vld [vmem:[#allocation11 + $0x30] sm:$0xff] }
0x1b59   :  { %v9958_v22 = vld [vmem:[#allocation11 + $0x28] sm:$0xff] }
0x1b5a   :  { %v3251_v12 = vadd.f32 %v9880_v56, %v3243_v60  ;;  %v3250_v57 = vadd.f32 %v9877_v36, %v3242_v21  ;;  %v9968_v60 = vld [vmem:[#allocation11 + $0x78] sm:$0xff] }
0x1b5b   :  { %v3158_v2 = vpop.permute.xlu0 %3157  ;;  %v3148_v3 = vpop.permute.xlu1 %3147 }
0x1b5c   :  { %v3255_v41 = vrot.slane %v3251_v12, 5  ;;  %v3254_v30 = vrot.slane %v3250_v57, 6  ;;  %v3162_v37 = vmul.f32 %v7707_v51, %v3158_v2  ;;  %v3152_v11 = vmul.f32 %v3148_v3, %v3142_v49 }
0x1b5e   :  { %v3256_v20 = vsel %vm546_vm1, %v3255_v41, %v3254_v30  ;;  %v3164_v4 = vadd.f32 %v3162_v37, %v3152_v11 }
0x1b5f   :  { %v9908_v63 = vmul.f32 %v3256_v20, %v8938_v42 }
0x1b60   :  { %v3168_v56 = vsel %vm546_vm1, %v3164_v4, %v3167_v50 }
0x1b61   :  { %10883 = vst [vmem:[#allocation45_spill] sm:$0xff] %v9908_v63  ;;  %3169 = vrot.lane.b32.xlu1 %v3168_v56, %s8397_s17  ;;  %v9915_v36 = vadd.f32 %v3259_v5, %v9908_v63 }
0x1b63   :  { %3262 = vrot.lane.b32.xlu0 %v9915_v36, %s8399_s26  ;;  %v3484_v20 = vrot.slane %v9915_v36, 3  ;;  %v3485_v5 = vrot.slane %v9915_v36, 4 }
0x1bd3   :  { %v3170_v51 = vpop.permute.xlu1 %3169 }
0x1bd4   :  { %v9922_v39 = vmul.f32 %v3170_v51, %v8950_v19 }
0x1bd5   :  { %v3263_v0 = vpop.permute.xlu0 %3262 }
0x1bd6   :  { %10884 = vst [vmem:[#allocation43_spill] sm:$0xff] %v9922_v39  ;;  %v9925_v46 = vadd.f32 %v3173_v7, %v9922_v39 }
0x1bd8   :  { %v3265_v24 = vsel %vm314_vm0, %v9925_v46, %v3263_v0 }
0x1bd9   :  { %7008 = vmatmul.mubr.msk.f32.vlgmr.msra.gmra.mxu0 %vm409_vm2, %v3265_v24 }
0x1bda   :  { %3764 = vmatpush1.msra.mxu0 %v9930_v38  ;;  %3811 = vmatprep.mubr.f32.mxu0 %v10856_v61 }
0x1bdb   :  { %3765 = vmatprep.subr.mxu0 %v9934_v16 }
0x1bdc   :  { %3766 = vmatpush1.msra.mxu0 %v9937_v43 }
0x1bdd   :  { %3767 = vmatprep.subr.mxu0 %v9940_v44 }
0x1bde   :  { %3768 = vmatpush1.msra.mxu0 %v9943_v48 }
0x1bdf   :  { %3769 = vmatprep.subr.mxu0 %v9946_v35 }
0x1be0   :  { %3770 = vmatpush1.msra.mxu0 %v9949_v55 }
0x1be1   :  { %3771 = vmatprep.subr.mxu0 %v9952_v54 }
0x1be2   :  { %3772 = vmatpush1.msra.mxu0 %v9955_v34 }
0x1be3   :  { %3773 = vmatprep.subr.mxu0 %v9958_v22 }
0x1be4   :  { %3774 = vmatpush1.msra.mxu0 %v9961_v33 }
0x1be5   :  { %3775 = vmatprep.subr.mxu0 %v9570_v13 }
0x1be6   :  { %3776 = vmatpush1.msra.mxu0 %v9573_v1 }
0x1be7   :  { %3777 = vmatprep.subr.mxu0 %v9576_v27 }
0x1be8   :  { %3778 = vmatpush1.msra.mxu0 %v9579_v25 }
0x1be9   :  { %4241 = vmatprep.subr.mxu0 %v9968_v60 }
0x1c99   :  { %v3335_v21 = vpop.f32.mrf.mxu0 }
0x1c9a   :  { %v3336_v18 = vadd.f32 %v3335_v21, %v9670_v9 }
0x1c9b   :  { %v3337_v12 = vpop.f32.mrf.mxu0 }
0x1c9c   :  { %v3338_v57 = vadd.f32 %v3337_v12, %v9673_v59  ;;  %v3342_v49 = vrot.slane %v3336_v18, 7  ;;  %v3341_v2 = vrot.slane %v3336_v18, 6  ;;  %v3416_v0 = vrot.slane %v3336_v18, 4 }
0x1c9d   :  { %v3415_v21 = vrot.slane %v3336_v18, 3 }
0x1c9e   :  { %v3434_v3 = vrot.slane %v3338_v57, 3  ;;  %v3435_v13 = vrot.slane %v3338_v57, 4  ;;  %3361 = vrot.lane.b32.xlu0 %v3342_v49, %s8395_s14  ;;  %3359 = vrot.lane.b32.xlu1 %v3341_v2, %s8395_s14  ;;  %v3346_v24 = vadd.f32 %v3342_v49, %v9795_v26  ;;  %v3345_v12 = vadd.f32 %v3341_v2, %v9788_v15 }
0x1c9f   :  { %v3420_v57 = vadd.f32 %v3416_v0, %v9795_v26 }
0x1ca0   :  { %v3438_v1 = vadd.f32 %v3434_v3, %v9805_v62  ;;  %v3439_v27 = vadd.f32 %v3435_v13, %v9810_v47 }
0x1ca2   :  { %v7013_v25 = vmul.f32 -1.442695, %v3438_v1  ;;  %v7014_v41 = vmul.f32 -1.442695, %v3439_v27  ;;  %3454 = vrot.lane.b32.xlu0 %v3435_v13, %s8395_s14  ;;  %3452 = vrot.lane.b32.xlu1 %v3434_v3, %s8395_s14  ;;  %v7010_v3 = vmul.f32 -1.442695, %v3346_v24  ;;  %v3419_v13 = vadd.f32 %v3415_v21, %v9788_v15 }
0x1ca3   :  { %v7009_v1 = vmul.f32 -1.442695, %v3345_v12  ;;  %v7012_v27 = vmul.f32 -1.442695, %v3420_v57 }
0x1ca4   :  { %7716 = vpow2.f32 %v7013_v25  ;;  %v7011_v25 = vmul.f32 -1.442695, %v3419_v13 }
0x1ca5   :  { %7718 = vpow2.f32 %v7014_v41 }
0x1cb1   :  { %v7717_v30 = vpop.eup %7716 }
0x1cb2   :  { %v7719_v37 = vpop.eup %7718  ;;  %v3446_v11 = vadd.f32 1.0, %v7717_v30 }
0x1cb3   :  { %v3447_v50 = vadd.f32 1.0, %v7719_v37 }
0x1cb4   :  { %7720 = vrcp.f32 %v3446_v11 }
0x1cb5   :  { %7722 = vrcp.f32 %v3447_v50 }
0x1cb6   :  { %7724 = vpow2.f32 %v7010_v3 }
0x1cb7   :  { %7726 = vpow2.f32 %v7009_v1 }
0x1cb8   :  { %7728 = vpow2.f32 %v7012_v27 }
0x1cb9   :  { %7730 = vpow2.f32 %v7011_v25 }
0x1cc1   :  { %v9980_v4 = vpop.eup %7720 }
0x1cc2   :  { %v9983_v56 = vpop.eup %7722  ;;  %v9986_v51 = vmul.f32 %v9980_v4, %v3484_v20 }
0x1cc3   :  { %v9989_v7 = vmul.f32 %v9983_v56, %v3485_v5  ;;  %v7725_v41 = vpop.eup %7724 }
0x1cc4   :  { %v7727_v30 = vpop.eup %7726  ;;  %v3354_v37 = vadd.f32 1.0, %v7725_v41  ;;  %v3393_v41 = vrot.slane %v9925_v46, 7 }
0x1cc5   :  { %v7729_v11 = vpop.eup %7728  ;;  %v3353_v49 = vadd.f32 1.0, %v7727_v30  ;;  %v3392_v30 = vrot.slane %v9925_v46, 6 }
0x1cc6   :  { %v7731_v18 = vpop.eup %7730  ;;  %v3428_v50 = vadd.f32 1.0, %v7729_v11  ;;  %7732 = vrcp.f32 %v3354_v37 }
0x1cc7   :  { %v3427_v2 = vadd.f32 1.0, %v7731_v18  ;;  %7734 = vrcp.f32 %v3353_v49 }
0x1cc8   :  { %7736 = vrcp.f32 %v3428_v50 }
0x1cc9   :  { %7738 = vrcp.f32 %v3427_v2 }
0x1cd3   :  { %v7733_v20 = vpop.eup %7732 }
0x1cd4   :  { %v7735_v0 = vpop.eup %7734 }
0x1cd5   :  { %v7737_v57 = vpop.eup %7736 }
0x1cd6   :  { %v7739_v13 = vpop.eup %7738 }
0x1d10   :  { %v3362_v5 = vpop.permute.xlu0 %3361  ;;  %v3360_v21 = vpop.permute.xlu1 %3359 }
0x1d11   :  { %v3366_v24 = vmul.f32 %v7733_v20, %v3362_v5  ;;  %v3365_v12 = vmul.f32 %v7735_v0, %v3360_v21 }
0x1d13   :  { %3371 = vrot.lane.b32.xlu0 %v3366_v24, %s8395_s14  ;;  %3369 = vrot.lane.b32.xlu1 %v3365_v12, %s8395_s14 }
0x1d14   :  { %v3455_v3 = vpop.permute.xlu0 %3454  ;;  %v3453_v27 = vpop.permute.xlu1 %3452 }
0x1d15   :  { %v3459_v1 = vmul.f32 %v7737_v57, %v3455_v3  ;;  %v3458_v25 = vmul.f32 %v7739_v13, %v3453_v27  ;;  %v3380_v27 = vsub.f32 1.0, %v7733_v20 }
0x1d17   :  { %3464 = vrot.lane.b32.xlu0 %v3459_v1, %s8395_s14  ;;  %3462 = vrot.lane.b32.xlu1 %v3458_v25, %s8395_s14 }
0x1d1b   :  { %3396 = vrot.lane.b32.xlu0 %v3393_v41, %s8399_s26  ;;  %3394 = vrot.lane.b32.xlu1 %v3392_v30, %s8399_s26  ;;  %v3379_v41 = vsub.f32 1.0, %v7735_v0 }
0x1d85   :  { %v3372_v37 = vpop.permute.xlu0 %3371  ;;  %v3370_v49 = vpop.permute.xlu1 %3369 }
0x1d86   :  { %v3376_v11 = vadd.f32 %v3372_v37, %v9795_v26  ;;  %v3375_v18 = vadd.f32 %v3370_v49, %v9788_v15 }
0x1d88   :  { %7740 = vtanh.f32 %v3376_v11 }
0x1d89   :  { %7742 = vtanh.f32 %v3375_v18  ;;  %v3465_v50 = vpop.permute.xlu0 %3464  ;;  %v3463_v5 = vpop.permute.xlu1 %3462 }
0x1d8a   :  { %v3469_v2 = vadd.f32 %v3465_v50, %v9810_v47  ;;  %v3468_v24 = vadd.f32 %v3463_v5, %v9805_v62 }
0x1d8c   :  { %7744 = vtanh.f32 %v3469_v2  ;;  %v3473_v2 = vsub.f32 1.0, %v9983_v56 }
0x1d8d   :  { %7746 = vtanh.f32 %v3468_v24  ;;  %v3397_v13 = vpop.permute.xlu0 %3396  ;;  %v3395_v1 = vpop.permute.xlu1 %3394 }
0x1d8e   :  { %v3401_v30 = vmul.f32 %v7733_v20, %v3397_v13  ;;  %v3400_v49 = vmul.f32 %v7735_v0, %v3395_v1 }
0x1d95   :  { %v7741_v21 = vpop.eup %7740 }
0x1d96   :  { %v7743_v12 = vpop.eup %7742  ;;  %3385 = vrot.lane.b32.xlu0 %v7741_v21, %s8397_s17  ;;  %v3472_v21 = vsub.f32 1.0, %v9980_v4  ;;  %v3499_v4 = vmul.f32 %v9915_v36, %v9041_v6 }
0x1d97   :  { %3383 = vrot.lane.b32.xlu1 %v7743_v12, %s8397_s17 }
0x1d99   :  { %v7745_v57 = vpop.eup %7744 }
0x1d9a   :  { %v7747_v3 = vpop.eup %7746  ;;  %3478 = vrot.lane.b32.xlu0 %v7745_v57, %s8397_s17 }
0x1d9b   :  { %3476 = vrot.lane.b32.xlu1 %v7747_v3, %s8397_s17 }
0x1e08   :  { %v3386_v25 = vpop.permute.xlu0 %3385 }
0x1e09   :  { %v3390_v37 = vmul.f32 %v3386_v25, %v3380_v27  ;;  %v3384_v11 = vpop.permute.xlu1 %3383 }
0x1e0a   :  { %v3389_v18 = vmul.f32 %v3384_v11, %v3379_v41  ;;  %v10054_v41 = vld [vmem:[#allocation11 + $0x10] sm:$0xff] }
0x1e0b   :  { %v3403_v50 = vadd.f32 %v3401_v30, %v3390_v37  ;;  %v10057_v30 = vld [vmem:[#allocation11 + $0x8] sm:$0xff]  ;;  %v10060_v37 = vld [vmem:[#allocation11] sm:$0xff] }
0x1e0c   :  { %v3402_v5 = vadd.f32 %v3400_v49, %v3389_v18  ;;  %v3479_v24 = vpop.permute.xlu0 %3478 }
0x1e0d   :  { %v3407_v12 = vrot.slane %v3403_v50, 1  ;;  %v3483_v57 = vmul.f32 %v3479_v24, %v3473_v2  ;;  %v3477_v3 = vpop.permute.xlu1 %3476 }
0x1e0e   :  { %v3406_v8 = vrot.slane %v3402_v5, 2  ;;  %v3482_v53 = vmul.f32 %v3477_v3, %v3472_v21 }
0x1e0f   :  { %v3491_v52 = vadd.f32 %v9989_v7, %v3483_v57 }
0x1e10   :  { %v3490_v20 = vadd.f32 %v9986_v51, %v3482_v53  ;;  %v3408_v13 = vsel %vm546_vm1, %v3407_v12, %v3406_v8 }
0x1e11   :  { %v3495_v0 = vrot.slane %v3491_v52, 4  ;;  %3409 = vrot.lane.b32.xlu1 %v3408_v13, %s8397_s17  ;;  %v3413_v52 = vmul.f32 %v9925_v46, %v9057_v40  ;;  %v10051_v46 = vld [vmem:[#allocation11 + $0x18] sm:$0xff] }
0x1e12   :  { %v3494_v1 = vrot.slane %v3490_v20, 5 }
0x1e14   :  { %v3496_v56 = vsel %vm546_vm1, %v3495_v0, %v3494_v1 }
0x1e15   :  { %v10019_v27 = vmul.f32 %v3496_v56, %v9045_v23 }
0x1e17   :  { %10885 = vst [vmem:[#allocation56_spill] sm:$0xff] %v10019_v27  ;;  %v10024_v25 = vadd.f32 %v3499_v4, %v10019_v27 }
0x1e19   :  { %3502 = vrot.lane.b32.xlu0 %v10024_v25, %s8399_s26  ;;  %v3722_v56 = vrot.slane %v10024_v25, 4 }
0x1e83   :  { %v3410_v53 = vpop.permute.xlu1 %3409 }
0x1e84   :  { %v10029_v8 = vmul.f32 %v3410_v53, %v9055_v28  ;;  %v3723_v53 = vrot.slane %v10024_v25, 5 }
0x1e86   :  { %10886 = vst [vmem:[#allocation58_spill] sm:$0xff] %v10029_v8  ;;  %v10034_v51 = vadd.f32 %v3413_v52, %v10029_v8 }
0x1e8b   :  { %v3503_v7 = vpop.permute.xlu0 %3502 }
0x1e8c   :  { %v3505_v36 = vsel %vm314_vm0, %v10034_v51, %v3503_v7 }
0x1e8d   :  { %7015 = vmatmul.mubr.msk.f32.vlgmr.msra.gmra.mxu1 %vm409_vm2, %v3505_v36 }
0x1e8e   :  { %4002 = vmatpush1.msra.mxu1 %v9930_v38  ;;  %4049 = vmatprep.mubr.f32.mxu1 %v10856_v61 }
0x1e8f   :  { %4003 = vmatprep.subr.mxu1 %v9934_v16 }
0x1e90   :  { %4004 = vmatpush1.msra.mxu1 %v9937_v43 }
0x1e91   :  { %4005 = vmatprep.subr.mxu1 %v9940_v44 }
0x1e92   :  { %4006 = vmatpush1.msra.mxu1 %v9943_v48 }
0x1e93   :  { %4007 = vmatprep.subr.mxu1 %v9946_v35 }
0x1e94   :  { %4008 = vmatpush1.msra.mxu1 %v9949_v55 }
0x1e95   :  { %4009 = vmatprep.subr.mxu1 %v9952_v54 }
0x1e96   :  { %4010 = vmatpush1.msra.mxu1 %v9955_v34 }
0x1e97   :  { %4011 = vmatprep.subr.mxu1 %v9958_v22 }
0x1e98   :  { %4012 = vmatpush1.msra.mxu1 %v9961_v33 }
0x1e99   :  { %4013 = vmatprep.subr.mxu1 %v10051_v46 }
0x1e9a   :  { %4014 = vmatpush1.msra.mxu1 %v10054_v41 }
0x1e9b   :  { %4015 = vmatprep.subr.mxu1 %v10057_v30 }
0x1e9c   :  { %4016 = vmatpush1.msra.mxu1 %v10060_v37 }
0x1e9d   :  { %4477 = vmatprep.subr.mxu1 %v9968_v60 }
0x1f4d   :  { %v3575_v11 = vpop.f32.mrf.mxu1 }
0x1f4e   :  { %v3576_v49 = vadd.f32 %v3575_v11, %v9670_v9 }
0x1f4f   :  { %v3577_v18 = vpop.f32.mrf.mxu1 }
0x1f50   :  { %v3581_v50 = vrot.slane %v3576_v49, 5  ;;  %v3582_v2 = vrot.slane %v3576_v49, 6  ;;  %v3578_v5 = vadd.f32 %v3577_v18, %v9673_v59 }
0x1f52   :  { %3601 = vrot.lane.b32.xlu0 %v3582_v2, %s8395_s14  ;;  %v3672_v24 = vrot.slane %v3578_v5, 4  ;;  %v3673_v21 = vrot.slane %v3578_v5, 5  ;;  %3599 = vrot.lane.b32.xlu1 %v3581_v50, %s8395_s14  ;;  %v3586_v11 = vadd.f32 %v3582_v2, %v9795_v26  ;;  %v3585_v18 = vadd.f32 %v3581_v50, %v9788_v15 }
0x1f53   :  { %v3655_v5 = vrot.slane %v3576_v49, 4 }
0x1f54   :  { %v3676_v12 = vadd.f32 %v3672_v24, %v9805_v62  ;;  %v3677_v57 = vadd.f32 %v3673_v21, %v9810_v47 }
0x1f56   :  { %3692 = vrot.lane.b32.xlu0 %v3673_v21, %s8395_s14  ;;  %v7020_v60 = vmul.f32 -1.442695, %v3676_v12  ;;  %v7021_v3 = vmul.f32 -1.442695, %v3677_v57  ;;  %3690 = vrot.lane.b32.xlu1 %v3672_v24, %s8395_s14  ;;  %v7017_v24 = vmul.f32 -1.442695, %v3586_v11  ;;  %v3658_v21 = vadd.f32 %v3581_v50, %v9795_v26 }
0x1f57   :  { %v7016_v12 = vmul.f32 -1.442695, %v3585_v18  ;;  %v3657_v57 = vadd.f32 %v3655_v5, %v9788_v15 }
0x1f58   :  { %7748 = vpow2.f32 %v7020_v60  ;;  %v7019_v60 = vmul.f32 -1.442695, %v3658_v21 }
0x1f59   :  { %7750 = vpow2.f32 %v7021_v3  ;;  %v7018_v3 = vmul.f32 -1.442695, %v3657_v57 }
0x1f65   :  { %v7749_v20 = vpop.eup %7748 }
0x1f66   :  { %v7751_v13 = vpop.eup %7750  ;;  %v3684_v0 = vadd.f32 1.0, %v7749_v20 }
0x1f67   :  { %v3685_v1 = vadd.f32 1.0, %v7751_v13 }
0x1f68   :  { %7752 = vrcp.f32 %v3684_v0 }
0x1f69   :  { %7754 = vrcp.f32 %v3685_v1 }
0x1f6a   :  { %7756 = vpow2.f32 %v7017_v24 }
0x1f6b   :  { %7758 = vpow2.f32 %v7016_v12 }
0x1f6c   :  { %7760 = vpow2.f32 %v7019_v60 }
0x1f6d   :  { %7762 = vpow2.f32 %v7018_v3 }
0x1f75   :  { %v10073_v4 = vpop.eup %7752 }
0x1f76   :  { %v10076_v52 = vpop.eup %7754  ;;  %v10079_v7 = vmul.f32 %v10073_v4, %v3722_v56  ;;  %v3710_v17 = vsub.f32 1.0, %v10073_v4  ;;  %v3737_v4 = vmul.f32 %v10024_v25, %v9223_v31 }
0x1f77   :  { %v10082_v36 = vmul.f32 %v10076_v52, %v3723_v53  ;;  %v7757_v20 = vpop.eup %7756 }
0x1f78   :  { %v7759_v13 = vpop.eup %7758  ;;  %v3594_v0 = vadd.f32 1.0, %v7757_v20 }
0x1f79   :  { %v7761_v1 = vpop.eup %7760  ;;  %v3593_v2 = vadd.f32 1.0, %v7759_v13 }
0x1f7a   :  { %v7763_v56 = vpop.eup %7762  ;;  %7764 = vrcp.f32 %v3594_v0  ;;  %v3666_v49 = vadd.f32 1.0, %v7761_v1  ;;  %v3633_v0 = vrot.slane %v10034_v51, 6  ;;  %v3632_v1 = vrot.slane %v10034_v51, 5 }
0x1f7b   :  { %7766 = vrcp.f32 %v3593_v2  ;;  %v3665_v53 = vadd.f32 1.0, %v7763_v56 }
0x1f7c   :  { %7768 = vrcp.f32 %v3666_v49 }
0x1f7d   :  { %7770 = vrcp.f32 %v3665_v53 }
0x1f87   :  { %v7765_v50 = vpop.eup %7764 }
0x1f88   :  { %v7767_v18 = vpop.eup %7766 }
0x1f89   :  { %v7769_v12 = vpop.eup %7768 }
0x1f8a   :  { %v7771_v60 = vpop.eup %7770 }
0x1fc4   :  { %v3602_v11 = vpop.permute.xlu0 %3601  ;;  %v3600_v24 = vpop.permute.xlu1 %3599 }
0x1fc5   :  { %v3606_v5 = vmul.f32 %v7765_v50, %v3602_v11  ;;  %v3605_v21 = vmul.f32 %v7767_v18, %v3600_v24 }
0x1fc7   :  { %3611 = vrot.lane.b32.xlu0 %v3606_v5, %s8395_s14  ;;  %3609 = vrot.lane.b32.xlu1 %v3605_v21, %s8395_s14 }
0x1fc8   :  { %v3693_v57 = vpop.permute.xlu0 %3692  ;;  %v3691_v20 = vpop.permute.xlu1 %3690 }
0x1fc9   :  { %v3697_v3 = vmul.f32 %v7769_v12, %v3693_v57  ;;  %v3696_v13 = vmul.f32 %v7771_v60, %v3691_v20 }
0x1fcb   :  { %3702 = vrot.lane.b32.xlu0 %v3697_v3, %s8395_s14  ;;  %3700 = vrot.lane.b32.xlu1 %v3696_v13, %s8395_s14 }
0x1fcf   :  { %3636 = vrot.lane.b32.xlu0 %v3633_v0, %s8399_s26  ;;  %3634 = vrot.lane.b32.xlu1 %v3632_v1, %s8399_s26  ;;  %v3620_v0 = vsub.f32 1.0, %v7765_v50 }
0x2039   :  { %v3612_v2 = vpop.permute.xlu0 %3611  ;;  %v3610_v49 = vpop.permute.xlu1 %3609 }
0x203a   :  { %v3616_v56 = vadd.f32 %v3612_v2, %v9795_v26  ;;  %v3615_v53 = vadd.f32 %v3610_v49, %v9788_v15  ;;  %v3619_v2 = vsub.f32 1.0, %v7767_v18 }
0x203c   :  { %7772 = vtanh.f32 %v3616_v56 }
0x203d   :  { %7774 = vtanh.f32 %v3615_v53  ;;  %v3703_v11 = vpop.permute.xlu0 %3702  ;;  %v3701_v24 = vpop.permute.xlu1 %3700 }
0x203e   :  { %v3707_v5 = vadd.f32 %v3703_v11, %v9810_v47  ;;  %v3706_v21 = vadd.f32 %v3701_v24, %v9805_v62 }
0x2040   :  { %7776 = vtanh.f32 %v3707_v5 }
0x2041   :  { %7778 = vtanh.f32 %v3706_v21  ;;  %v3637_v20 = vpop.permute.xlu0 %3636  ;;  %v3635_v13 = vpop.permute.xlu1 %3634  ;;  %v3711_v21 = vsub.f32 1.0, %v10076_v52 }
0x2042   :  { %v3641_v56 = vmul.f32 %v7765_v50, %v3637_v20  ;;  %v3640_v11 = vmul.f32 %v7767_v18, %v3635_v13 }
0x2049   :  { %v7773_v12 = vpop.eup %7772 }
0x204a   :  { %v7775_v57 = vpop.eup %7774  ;;  %3625 = vrot.lane.b32.xlu0 %v7773_v12, %s8397_s17 }
0x204b   :  { %3623 = vrot.lane.b32.xlu1 %v7775_v57, %s8397_s17 }
0x204d   :  { %v7777_v60 = vpop.eup %7776 }
0x204e   :  { %v7779_v3 = vpop.eup %7778  ;;  %3716 = vrot.lane.b32.xlu0 %v7777_v60, %s8397_s17 }
0x204f   :  { %3714 = vrot.lane.b32.xlu1 %v7779_v3, %s8397_s17 }
0x20bc   :  { %v3626_v1 = vpop.permute.xlu0 %3625 }
0x20bd   :  { %v3630_v49 = vmul.f32 %v3626_v1, %v3620_v0  ;;  %v3624_v53 = vpop.permute.xlu1 %3623 }
0x20be   :  { %v3629_v5 = vmul.f32 %v3624_v53, %v3619_v2 }
0x20bf   :  { %v3643_v24 = vadd.f32 %v3641_v56, %v3630_v49 }
0x20c0   :  { %v3642_v12 = vadd.f32 %v3640_v11, %v3629_v5  ;;  %v3717_v57 = vpop.permute.xlu0 %3716 }
0x20c1   :  { %v3647_v60 = vrot.slane %v3643_v24, 2  ;;  %v3721_v39 = vmul.f32 %v3717_v57, %v3711_v21  ;;  %v3715_v3 = vpop.permute.xlu1 %3714 }
0x20c2   :  { %v3646_v8 = vrot.slane %v3642_v12, 3  ;;  %v3720_v63 = vmul.f32 %v3715_v3, %v3710_v17 }
0x20c3   :  { %v3729_v10 = vadd.f32 %v10082_v36, %v3721_v39  ;;  %v10888_v39 = vld [vmem:[#allocation57_spill] sm:$0xff] }
0x20c4   :  { %v3728_v50 = vadd.f32 %v10079_v7, %v3720_v63  ;;  %v3648_v20 = vsel %vm546_vm1, %v3647_v60, %v3646_v8  ;;  %v3653_v8 = vmul.f32 %v10034_v51, %v10888_v39 }
0x20c5   :  { %v3733_v18 = vrot.slane %v3729_v10, 3  ;;  %3649 = vrot.lane.b32.xlu1 %v3648_v20, %s8397_s17 }
0x20c6   :  { %v3732_v13 = vrot.slane %v3728_v50, 4 }
0x20c8   :  { %v3734_v52 = vsel %vm546_vm1, %v3733_v18, %v3732_v13 }
0x20c9   :  { %v10112_v0 = vmul.f32 %v3734_v52, %v9227_v45 }
0x20cb   :  { %v10117_v17 = vadd.f32 %v3737_v4, %v10112_v0 }
0x20cd   :  { %3740 = vrot.lane.b32.xlu0 %v10117_v17, %s8399_s26  ;;  %v3960_v18 = vrot.slane %v10117_v17, 5  ;;  %v3961_v52 = vrot.slane %v10117_v17, 6 }
0x2137   :  { %v3650_v63 = vpop.permute.xlu1 %3649 }
0x2138   :  { %v10122_v10 = vmul.f32 %v3650_v63, %v9237_v32 }
0x213a   :  { %10887 = vst [vmem:[#allocation54_spill] sm:$0xff] %v10122_v10  ;;  %v10127_v7 = vadd.f32 %v3653_v8, %v10122_v10 }
0x213f   :  { %v3741_v36 = vpop.permute.xlu0 %3740 }
0x2140   :  { %v3743_v25 = vsel %vm314_vm0, %v10127_v7, %v3741_v36 }
0x2141   :  { %7022 = vmatmul.mubr.msk.f32.vlgmr.msra.gmra.mxu0 %vm409_vm2, %v3743_v25 }
0x2142   :  { %4242 = vmatpush1.msra.mxu0 %v9930_v38  ;;  %4289 = vmatprep.mubr.f32.mxu0 %v10856_v61 }
0x2143   :  { %4243 = vmatprep.subr.mxu0 %v9934_v16 }
0x2144   :  { %4244 = vmatpush1.msra.mxu0 %v9937_v43 }
0x2145   :  { %4245 = vmatprep.subr.mxu0 %v9940_v44 }
0x2146   :  { %4246 = vmatpush1.msra.mxu0 %v9943_v48 }
0x2147   :  { %4247 = vmatprep.subr.mxu0 %v9946_v35 }
0x2148   :  { %4248 = vmatpush1.msra.mxu0 %v9949_v55 }
0x2149   :  { %4249 = vmatprep.subr.mxu0 %v9952_v54 }
0x214a   :  { %4250 = vmatpush1.msra.mxu0 %v9955_v34 }
0x214b   :  { %4251 = vmatprep.subr.mxu0 %v9958_v22 }
0x214c   :  { %4252 = vmatpush1.msra.mxu0 %v9961_v33 }
0x214d   :  { %4253 = vmatprep.subr.mxu0 %v10051_v46 }
0x214e   :  { %4254 = vmatpush1.msra.mxu0 %v10054_v41 }
0x214f   :  { %4255 = vmatprep.subr.mxu0 %v10057_v30 }
0x2150   :  { %4256 = vmatpush1.msra.mxu0 %v10060_v37 }
0x2201   :  { %v3813_v51 = vpop.f32.mrf.mxu0 }
0x2202   :  { %v3814_v1 = vadd.f32 %v3813_v51, %v9670_v9 }
0x2203   :  { %v3815_v2 = vpop.f32.mrf.mxu0 }
0x2204   :  { %v3819_v56 = vrot.slane %v3814_v1, 4  ;;  %v3820_v49 = vrot.slane %v3814_v1, 5  ;;  %v3816_v53 = vadd.f32 %v3815_v2, %v9673_v59  ;;  %v3893_v25 = vrot.slane %v3814_v1, 6 }
0x2206   :  { %3839 = vrot.lane.b32.xlu0 %v3820_v49, %s8395_s14  ;;  %v3910_v11 = vrot.slane %v3816_v53, 5  ;;  %v3911_v5 = vrot.slane %v3816_v53, 6  ;;  %3837 = vrot.lane.b32.xlu1 %v3819_v56, %s8395_s14  ;;  %v3824_v36 = vadd.f32 %v3820_v49, %v9795_v26  ;;  %v3823_v51 = vadd.f32 %v3819_v56, %v9788_v15 }
0x2207   :  { %v3896_v53 = vadd.f32 %v3893_v25, %v9795_v26 }
0x2208   :  { %v3914_v24 = vadd.f32 %v3910_v11, %v9805_v62  ;;  %v3915_v21 = vadd.f32 %v3911_v5, %v9810_v47  ;;  %v7024_v2 = vmul.f32 -1.442695, %v3824_v36 }
0x220a   :  { %3930 = vrot.lane.b32.xlu0 %v3911_v5, %s8395_s14  ;;  %v7027_v12 = vmul.f32 -1.442695, %v3914_v24  ;;  %v7028_v57 = vmul.f32 -1.442695, %v3915_v21  ;;  %3928 = vrot.lane.b32.xlu1 %v3910_v11, %s8395_s14  ;;  %v7023_v11 = vmul.f32 -1.442695, %v3823_v51  ;;  %v3895_v5 = vadd.f32 %v3820_v49, %v9788_v15 }
0x220b   :  { %v7026_v24 = vmul.f32 -1.442695, %v3896_v53 }
0x220c   :  { %7780 = vpow2.f32 %v7027_v12  ;;  %v7025_v21 = vmul.f32 -1.442695, %v3895_v5 }
0x220d   :  { %7782 = vpow2.f32 %v7028_v57 }
0x2219   :  { %v7781_v60 = vpop.eup %7780 }
0x221a   :  { %v7783_v3 = vpop.eup %7782  ;;  %v3922_v50 = vadd.f32 1.0, %v7781_v60 }
0x221b   :  { %v3923_v20 = vadd.f32 1.0, %v7783_v3 }
0x221c   :  { %7784 = vrcp.f32 %v3922_v50 }
0x221d   :  { %7786 = vrcp.f32 %v3923_v20 }
0x221e   :  { %7788 = vpow2.f32 %v7024_v2 }
0x221f   :  { %7790 = vpow2.f32 %v7023_v11 }
0x2220   :  { %7792 = vpow2.f32 %v7026_v24 }
0x2221   :  { %7794 = vpow2.f32 %v7025_v21 }
0x2229   :  { %v10157_v13 = vpop.eup %7784 }
0x222a   :  { %v10160_v4 = vpop.eup %7786  ;;  %v10163_v63 = vmul.f32 %v10157_v13, %v3960_v18 }
0x222b   :  { %v10166_v8 = vmul.f32 %v10160_v4, %v3961_v52  ;;  %v7789_v12 = vpop.eup %7788 }
0x222c   :  { %v7791_v57 = vpop.eup %7790  ;;  %v3832_v60 = vadd.f32 1.0, %v7789_v12  ;;  %v3871_v12 = vrot.slane %v10127_v7, 5 }
0x222d   :  { %v7793_v3 = vpop.eup %7792  ;;  %v3831_v50 = vadd.f32 1.0, %v7791_v57  ;;  %v3870_v57 = vrot.slane %v10127_v7, 4 }
0x222e   :  { %v7795_v1 = vpop.eup %7794  ;;  %7796 = vrcp.f32 %v3832_v60  ;;  %v3904_v56 = vadd.f32 1.0, %v7793_v3 }
0x222f   :  { %7798 = vrcp.f32 %v3831_v50  ;;  %v3903_v20 = vadd.f32 1.0, %v7795_v1 }
0x2230   :  { %7800 = vrcp.f32 %v3904_v56 }
0x2231   :  { %7802 = vrcp.f32 %v3903_v20 }
0x223b   :  { %v7797_v18 = vpop.eup %7796 }
0x223c   :  { %v7799_v52 = vpop.eup %7798 }
0x223d   :  { %v7801_v2 = vpop.eup %7800 }
0x223e   :  { %v7803_v11 = vpop.eup %7802 }
0x2278   :  { %v3840_v49 = vpop.permute.xlu0 %3839  ;;  %v3838_v25 = vpop.permute.xlu1 %3837 }
0x2279   :  { %v3844_v36 = vmul.f32 %v7797_v18, %v3840_v49  ;;  %v3843_v51 = vmul.f32 %v7799_v52, %v3838_v25 }
0x227b   :  { %3849 = vrot.lane.b32.xlu0 %v3844_v36, %s8395_s14  ;;  %3847 = vrot.lane.b32.xlu1 %v3843_v51, %s8395_s14 }
0x227c   :  { %v3931_v53 = vpop.permute.xlu0 %3930  ;;  %v3929_v24 = vpop.permute.xlu1 %3928 }
0x227d   :  { %v3935_v5 = vmul.f32 %v7801_v2, %v3931_v53  ;;  %v3934_v21 = vmul.f32 %v7803_v11, %v3929_v24  ;;  %v3858_v24 = vsub.f32 1.0, %v7797_v18 }
0x227f   :  { %3940 = vrot.lane.b32.xlu0 %v3935_v5, %s8395_s14  ;;  %3938 = vrot.lane.b32.xlu1 %v3934_v21, %s8395_s14 }
0x2283   :  { %3874 = vrot.lane.b32.xlu0 %v3871_v12, %s8399_s26  ;;  %3872 = vrot.lane.b32.xlu1 %v3870_v57, %s8399_s26  ;;  %v3857_v12 = vsub.f32 1.0, %v7799_v52 }
0x22ed   :  { %v3850_v60 = vpop.permute.xlu0 %3849  ;;  %v3848_v50 = vpop.permute.xlu1 %3847 }
0x22ee   :  { %v3854_v3 = vadd.f32 %v3850_v60, %v9795_v26  ;;  %v3853_v1 = vadd.f32 %v3848_v50, %v9788_v15 }
0x22f0   :  { %7804 = vtanh.f32 %v3854_v3 }
0x22f1   :  { %7806 = vtanh.f32 %v3853_v1  ;;  %v3941_v56 = vpop.permute.xlu0 %3940  ;;  %v3939_v49 = vpop.permute.xlu1 %3938 }
0x22f2   :  { %v3945_v20 = vadd.f32 %v3941_v56, %v9810_v47  ;;  %v3944_v36 = vadd.f32 %v3939_v49, %v9805_v62 }
0x22f4   :  { %7808 = vtanh.f32 %v3945_v20  ;;  %v3949_v20 = vsub.f32 1.0, %v10160_v4 }
0x22f5   :  { %7810 = vtanh.f32 %v3944_v36  ;;  %v3875_v11 = vpop.permute.xlu0 %3874  ;;  %v3873_v5 = vpop.permute.xlu1 %3872 }
0x22f6   :  { %v3879_v57 = vmul.f32 %v7797_v18, %v3875_v11  ;;  %v3878_v50 = vmul.f32 %v7799_v52, %v3873_v5 }
0x22fd   :  { %v7805_v25 = vpop.eup %7804 }
0x22fe   :  { %v7807_v51 = vpop.eup %7806  ;;  %3863 = vrot.lane.b32.xlu0 %v7805_v25, %s8397_s17  ;;  %v3948_v25 = vsub.f32 1.0, %v10157_v13  ;;  %v3975_v13 = vmul.f32 %v10117_v17, %v10888_v39 }
0x22ff   :  { %3861 = vrot.lane.b32.xlu1 %v7807_v51, %s8397_s17 }
0x2301   :  { %v7809_v2 = vpop.eup %7808 }
0x2302   :  { %v7811_v53 = vpop.eup %7810  ;;  %3954 = vrot.lane.b32.xlu0 %v7809_v2, %s8397_s17 }
0x2303   :  { %3952 = vrot.lane.b32.xlu1 %v7811_v53, %s8397_s17 }
0x2370   :  { %v3864_v21 = vpop.permute.xlu0 %3863 }
0x2371   :  { %v3868_v60 = vmul.f32 %v3864_v21, %v3858_v24  ;;  %v3862_v3 = vpop.permute.xlu1 %3861 }
0x2372   :  { %v3867_v1 = vmul.f32 %v3862_v3, %v3857_v12 }
0x2373   :  { %v3881_v56 = vadd.f32 %v3879_v57, %v3868_v60 }
0x2374   :  { %v3880_v49 = vadd.f32 %v3878_v50, %v3867_v1  ;;  %v3955_v36 = vpop.permute.xlu0 %3954 }
0x2375   :  { %v3885_v51 = vrot.slane %v3881_v56, 3  ;;  %v3959_v2 = vmul.f32 %v3955_v36, %v3949_v20  ;;  %v3953_v53 = vpop.permute.xlu1 %3952 }
0x2376   :  { %v3884_v10 = vrot.slane %v3880_v49, 4  ;;  %v3958_v29 = vmul.f32 %v3953_v53, %v3948_v25 }
0x2377   :  { %v3967_v27 = vadd.f32 %v10166_v8, %v3959_v2 }
0x2378   :  { %v3966_v18 = vadd.f32 %v10163_v63, %v3958_v29  ;;  %v3886_v11 = vsel %vm546_vm1, %v3885_v51, %v3884_v10  ;;  %v3891_v10 = vmul.f32 %v10127_v7, %v9223_v31 }
0x2379   :  { %v3971_v52 = vrot.slane %v3967_v27, 2  ;;  %3887 = vrot.lane.b32.xlu1 %v3886_v11, %s8397_s17 }
0x237a   :  { %v3970_v5 = vrot.slane %v3966_v18, 3 }
0x237c   :  { %v3972_v4 = vsel %vm546_vm1, %v3971_v52, %v3970_v5 }
0x237d   :  { %v10196_v24 = vmul.f32 %v3972_v4, %v9237_v32 }
0x237f   :  { %v10201_v21 = vadd.f32 %v3975_v13, %v10196_v24 }
0x2381   :  { %3978 = vrot.lane.b32.xlu0 %v10201_v21, %s8399_s26  ;;  %v4201_v7 = vrot.slane %v10201_v21, 7 }
0x23eb   :  { %v3888_v29 = vpop.permute.xlu1 %3887 }
0x23ec   :  { %v10206_v27 = vmul.f32 %v3888_v29, %v9227_v45 }
0x23ee   :  { %v10211_v63 = vadd.f32 %v3891_v10, %v10206_v27 }
0x23f3   :  { %v3979_v32 = vpop.permute.xlu0 %3978 }
0x23f4   :  { %v3981_v17 = vsel %vm314_vm0, %v10211_v63, %v3979_v32 }
0x23f5   :  { %7029 = vmatmul.mubr.msk.f32.vlgmr.msra.gmra.mxu1 %vm409_vm2, %v3981_v17 }
0x23f6   :  { %4478 = vmatpush1.msra.mxu1 %v9930_v38  ;;  %4525 = vmatprep.mubr.f32.mxu1 %v10856_v61 }
0x23f7   :  { %4479 = vmatprep.subr.mxu1 %v9934_v16 }
0x23f8   :  { %4480 = vmatpush1.msra.mxu1 %v9937_v43 }
0x23f9   :  { %4481 = vmatprep.subr.mxu1 %v9940_v44 }
0x23fa   :  { %4482 = vmatpush1.msra.mxu1 %v9943_v48 }
0x23fb   :  { %4483 = vmatprep.subr.mxu1 %v9946_v35 }
0x23fc   :  { %4484 = vmatpush1.msra.mxu1 %v9949_v55 }
0x23fd   :  { %4485 = vmatprep.subr.mxu1 %v9952_v54 }
0x23fe   :  { %4486 = vmatpush1.msra.mxu1 %v9955_v34 }
0x23ff   :  { %4487 = vmatprep.subr.mxu1 %v9958_v22 }
0x2400   :  { %4488 = vmatpush1.msra.mxu1 %v9961_v33 }
0x2401   :  { %4489 = vmatprep.subr.mxu1 %v10051_v46 }
0x2402   :  { %4490 = vmatpush1.msra.mxu1 %v10054_v41 }
0x2403   :  { %4491 = vmatprep.subr.mxu1 %v10057_v30 }
0x2404   :  { %4492 = vmatpush1.msra.mxu1 %v10060_v37  ;;  %v4200_v37 = vrot.slane %v10201_v21, 6 }
0x24b5   :  { %v4051_v31 = vpop.f32.mrf.mxu1 }
0x24b6   :  { %v4052_v45 = vadd.f32 %v4051_v31, %v9670_v9 }
0x24b7   :  { %v4053_v38 = vpop.f32.mrf.mxu1 }
0x24b8   :  { %v4054_v16 = vadd.f32 %v4053_v38, %v9673_v59  ;;  %v4058_v43 = vrot.slane %v4052_v45, 4  ;;  %v4057_v44 = vrot.slane %v4052_v45, 3  ;;  %v4132_v60 = vrot.slane %v4052_v45, 7 }
0x24b9   :  { %v4131_v50 = vrot.slane %v4052_v45, 6 }
0x24ba   :  { %v4150_v48 = vrot.slane %v4054_v16, 6  ;;  %v4151_v35 = vrot.slane %v4054_v16, 7  ;;  %4077 = vrot.lane.b32.xlu0 %v4058_v43, %s8395_s14  ;;  %4075 = vrot.lane.b32.xlu1 %v4057_v44, %s8395_s14  ;;  %v4062_v3 = vadd.f32 %v4058_v43, %v9795_v26  ;;  %v4061_v1 = vadd.f32 %v4057_v44, %v9788_v15 }
0x24bb   :  { %v4136_v56 = vadd.f32 %v4132_v60, %v9795_v26  ;;  %v4135_v49 = vadd.f32 %v4131_v50, %v9788_v15 }
0x24bc   :  { %v4154_v55 = vadd.f32 %v4150_v48, %v9805_v62  ;;  %v4155_v54 = vadd.f32 %v4151_v35, %v9810_v47  ;;  %v7031_v20 = vmul.f32 -1.442695, %v4062_v3  ;;  %v7030_v36 = vmul.f32 -1.442695, %v4061_v1 }
0x24bd   :  { %v7033_v25 = vmul.f32 -1.442695, %v4136_v56  ;;  %v7032_v51 = vmul.f32 -1.442695, %v4135_v49 }
0x24be   :  { %v7034_v34 = vmul.f32 -1.442695, %v4154_v55  ;;  %v7035_v22 = vmul.f32 -1.442695, %v4155_v54  ;;  %4170 = vrot.lane.b32.xlu0 %v4151_v35, %s8395_s14  ;;  %4168 = vrot.lane.b32.xlu1 %v4150_v48, %s8395_s14  ;;  %v4109_v55 = vrot.slane %v10211_v63, 4  ;;  %v4108_v54 = vrot.slane %v10211_v63, 3 }
0x24c0   :  { %7812 = vpow2.f32 %v7034_v34 }
0x24c1   :  { %7814 = vpow2.f32 %v7035_v22 }
0x24cd   :  { %v7813_v33 = vpop.eup %7812 }
0x24ce   :  { %v7815_v46 = vpop.eup %7814  ;;  %v4162_v41 = vadd.f32 1.0, %v7813_v33 }
0x24cf   :  { %v4163_v30 = vadd.f32 1.0, %v7815_v46 }
0x24d0   :  { %7816 = vrcp.f32 %v4162_v41 }
0x24d1   :  { %7818 = vrcp.f32 %v4163_v30 }
0x24d2   :  { %7820 = vpow2.f32 %v7031_v20 }
0x24d3   :  { %7822 = vpow2.f32 %v7030_v36 }
0x24d4   :  { %7824 = vpow2.f32 %v7033_v25 }
0x24d5   :  { %7826 = vpow2.f32 %v7032_v51 }
0x24dd   :  { %v10241_v39 = vpop.eup %7816 }
0x24de   :  { %v10244_v8 = vpop.eup %7818  ;;  %v10247_v12 = vmul.f32 %v10241_v39, %v4200_v37 }
0x24df   :  { %v10250_v57 = vmul.f32 %v10244_v8, %v4201_v7  ;;  %v7821_v2 = vpop.eup %7820 }
0x24e0   :  { %v7823_v53 = vpop.eup %7822  ;;  %v4070_v18 = vadd.f32 1.0, %v7821_v2 }
0x24e1   :  { %v7825_v11 = vpop.eup %7824  ;;  %v4069_v52 = vadd.f32 1.0, %v7823_v53 }
0x24e2   :  { %v7827_v5 = vpop.eup %7826  ;;  %7828 = vrcp.f32 %v4070_v18  ;;  %v4144_v4 = vadd.f32 1.0, %v7825_v11 }
0x24e3   :  { %v4143_v13 = vadd.f32 1.0, %v7827_v5  ;;  %7830 = vrcp.f32 %v4069_v52  ;;  %v4189_v5 = vsub.f32 1.0, %v10244_v8 }
0x24e4   :  { %7832 = vrcp.f32 %v4144_v4 }
0x24e5   :  { %7834 = vrcp.f32 %v4143_v13 }
0x24ef   :  { %v7829_v29 = vpop.eup %7828 }
0x24f0   :  { %v7831_v32 = vpop.eup %7830  ;;  %v4096_v49 = vsub.f32 1.0, %v7829_v29 }
0x24f1   :  { %v7833_v38 = vpop.eup %7832  ;;  %v4095_v25 = vsub.f32 1.0, %v7831_v32 }
0x24f2   :  { %v7835_v43 = vpop.eup %7834 }
0x252c   :  { %v4078_v10 = vpop.permute.xlu0 %4077  ;;  %v4076_v31 = vpop.permute.xlu1 %4075 }
0x252d   :  { %v4082_v17 = vmul.f32 %v7829_v29, %v4078_v10  ;;  %v4081_v45 = vmul.f32 %v7831_v32, %v4076_v31  ;;  %v4188_v10 = vsub.f32 1.0, %v10241_v39  ;;  %v4215_v39 = vmul.f32 %v10201_v21, %v9057_v40 }
0x252f   :  { %4087 = vrot.lane.b32.xlu0 %v4082_v17, %s8395_s14  ;;  %4085 = vrot.lane.b32.xlu1 %v4081_v45, %s8395_s14 }
0x2530   :  { %v4171_v16 = vpop.permute.xlu0 %4170  ;;  %v4169_v48 = vpop.permute.xlu1 %4168 }
0x2531   :  { %v4175_v44 = vmul.f32 %v7833_v38, %v4171_v16  ;;  %v4174_v35 = vmul.f32 %v7835_v43, %v4169_v48 }
0x2533   :  { %4180 = vrot.lane.b32.xlu0 %v4175_v44, %s8395_s14  ;;  %4178 = vrot.lane.b32.xlu1 %v4174_v35, %s8395_s14 }
0x2537   :  { %4112 = vrot.lane.b32.xlu0 %v4109_v55, %s8399_s26  ;;  %4110 = vrot.lane.b32.xlu1 %v4108_v54, %s8399_s26  ;;  %v4129_v54 = vmul.f32 %v10211_v63, %v9041_v6 }
0x25a1   :  { %v4088_v34 = vpop.permute.xlu0 %4087  ;;  %v4086_v33 = vpop.permute.xlu1 %4085 }
0x25a2   :  { %v4092_v22 = vadd.f32 %v4088_v34, %v9795_v26  ;;  %v4091_v46 = vadd.f32 %v4086_v33, %v9788_v15 }
0x25a4   :  { %7836 = vtanh.f32 %v4092_v22 }
0x25a5   :  { %7838 = vtanh.f32 %v4091_v46  ;;  %v4181_v41 = vpop.permute.xlu0 %4180  ;;  %v4179_v37 = vpop.permute.xlu1 %4178 }
0x25a6   :  { %v4185_v30 = vadd.f32 %v4181_v41, %v9810_v47  ;;  %v4184_v7 = vadd.f32 %v4179_v37, %v9805_v62 }
0x25a8   :  { %7840 = vtanh.f32 %v4185_v30 }
0x25a9   :  { %7842 = vtanh.f32 %v4184_v7  ;;  %v4113_v56 = vpop.permute.xlu0 %4112  ;;  %v4111_v20 = vpop.permute.xlu1 %4110 }
0x25aa   :  { %v4117_v51 = vmul.f32 %v7829_v29, %v4113_v56  ;;  %v4116_v18 = vmul.f32 %v7831_v32, %v4111_v20 }
0x25b1   :  { %v7837_v60 = vpop.eup %7836 }
0x25b2   :  { %v7839_v3 = vpop.eup %7838  ;;  %4101 = vrot.lane.b32.xlu0 %v7837_v60, %s8397_s17 }
0x25b3   :  { %4099 = vrot.lane.b32.xlu1 %v7839_v3, %s8397_s17 }
0x25b5   :  { %v7841_v50 = vpop.eup %7840 }
0x25b6   :  { %v7843_v1 = vpop.eup %7842  ;;  %4194 = vrot.lane.b32.xlu0 %v7841_v50, %s8397_s17 }
0x25b7   :  { %4192 = vrot.lane.b32.xlu1 %v7843_v1, %s8397_s17 }
0x2624   :  { %v4102_v36 = vpop.permute.xlu0 %4101 }
0x2625   :  { %v4106_v2 = vmul.f32 %v4102_v36, %v4096_v49  ;;  %v4100_v53 = vpop.permute.xlu1 %4099 }
0x2626   :  { %v4105_v11 = vmul.f32 %v4100_v53, %v4095_v25 }
0x2627   :  { %v4119_v52 = vadd.f32 %v4117_v51, %v4106_v2 }
0x2628   :  { %v4118_v4 = vadd.f32 %v4116_v18, %v4105_v11  ;;  %v4195_v13 = vpop.permute.xlu0 %4194 }
0x2629   :  { %v4123_v17 = vrot.slane %v4119_v52, 4  ;;  %v4199_v31 = vmul.f32 %v4195_v13, %v4189_v5  ;;  %v4193_v45 = vpop.permute.xlu1 %4192 }
0x262a   :  { %v4122_v38 = vrot.slane %v4118_v4, 5  ;;  %v4198_v16 = vmul.f32 %v4193_v45, %v4188_v10 }
0x262b   :  { %v4207_v43 = vadd.f32 %v10250_v57, %v4199_v31 }
0x262c   :  { %v4206_v29 = vadd.f32 %v10247_v12, %v4198_v16  ;;  %v4124_v44 = vsel %vm546_vm1, %v4123_v17, %v4122_v38 }
0x262d   :  { %v4211_v32 = vrot.slane %v4207_v43, 1  ;;  %4125 = vrot.lane.b32.xlu1 %v4124_v44, %s8397_s17 }
0x262e   :  { %v4210_v48 = vrot.slane %v4206_v29, 2 }
0x2630   :  { %v4212_v8 = vsel %vm546_vm1, %v4211_v32, %v4210_v48 }
0x2631   :  { %v10280_v35 = vmul.f32 %v4212_v8, %v9055_v28 }
0x2633   :  { %v10285_v55 = vadd.f32 %v4215_v39, %v10280_v35 }
0x2635   :  { %4218 = vrot.lane.b32.xlu0 %v10285_v55, %s8399_s26 }
0x269f   :  { %v4126_v12 = vpop.permute.xlu1 %4125 }
0x26a0   :  { %v10290_v57 = vmul.f32 %v4126_v12, %v9045_v23 }
0x26a2   :  { %v10295_v34 = vadd.f32 %v4129_v54, %v10290_v57 }
0x26a4   :  { %v4349_v29 = vrot.slane %v10295_v34, 3  ;;  %v4348_v44 = vrot.slane %v10295_v34, 2 }
0x26a7   :  { %v4219_v28 = vpop.permute.xlu0 %4218 }
0x26a8   :  { %v4221_v40 = vsel %vm314_vm0, %v10295_v34, %v4219_v28 }
0x26a9   :  { %7036 = vmatmul.mubr.msk.f32.vlgmr.msra.gmra.mxu0 %vm409_vm2, %v4221_v40 }
0x2769   :  { %v4291_v21 = vpop.f32.mrf.mxu0 }
0x276a   :  { %v4292_v22 = vadd.f32 %v4291_v21, %v9670_v9 }
0x276b   :  { %v4293_v33 = vpop.f32.mrf.mxu0 }
0x276c   :  { %v4298_v46 = vrot.slane %v4292_v22, 3  ;;  %v10302_v23 = vadd.f32 %v4293_v33, %v9673_v59  ;;  %v4297_v41 = vrot.slane %v4292_v22, 2  ;;  %v4371_v30 = vrot.slane %v4292_v22, 7 }
0x276d   :  { %v4375_v7 = vadd.f32 %v4292_v22, %v9795_v26 }
0x276e   :  { %4317 = vrot.lane.b32.xlu0 %v4298_v46, %s8395_s14  ;;  %4315 = vrot.lane.b32.xlu1 %v4297_v41, %s8395_s14  ;;  %v4389_v6 = vrot.slane %v10302_v23, 7  ;;  %v4302_v63 = vadd.f32 %v4298_v46, %v9795_v26  ;;  %v4301_v37 = vadd.f32 %v4297_v41, %v9788_v15  ;;  %v4374_v3 = vadd.f32 %v4371_v30, %v9788_v15 }
0x276f   :  { %v7040_v1 = vmul.f32 -1.442695, %v4375_v7  ;;  %v4393_v41 = vadd.f32 %v10302_v23, %v9810_v47 }
0x2770   :  { %v7038_v60 = vmul.f32 -1.442695, %v4302_v63  ;;  %v7037_v50 = vmul.f32 -1.442695, %v4301_v37  ;;  %v7039_v56 = vmul.f32 -1.442695, %v4374_v3  ;;  %v4392_v63 = vadd.f32 %v4389_v6, %v9805_v62 }
0x2771   :  { %v7042_v30 = vmul.f32 -1.442695, %v4393_v41 }
0x2772   :  { %4408 = vrot.lane.b32.xlu0 %v10302_v23, %s8395_s14  ;;  %4406 = vrot.lane.b32.xlu1 %v4389_v6, %s8395_s14  ;;  %7844 = vpow2.f32 %v7038_v60  ;;  %v7041_v37 = vmul.f32 -1.442695, %v4392_v63 }
0x2773   :  { %7846 = vpow2.f32 %v7037_v50 }
0x2774   :  { %7848 = vpow2.f32 %v7040_v1 }
0x2775   :  { %7850 = vpow2.f32 %v7039_v56 }
0x277f   :  { %v7845_v20 = vpop.eup %7844 }
0x2780   :  { %v7847_v49 = vpop.eup %7846  ;;  %v4310_v36 = vadd.f32 1.0, %v7845_v20 }
0x2781   :  { %v7849_v25 = vpop.eup %7848  ;;  %v4309_v51 = vadd.f32 1.0, %v7847_v49 }
0x2782   :  { %v7851_v2 = vpop.eup %7850  ;;  %v4383_v53 = vadd.f32 1.0, %v7849_v25  ;;  %7852 = vrcp.f32 %v4310_v36 }
0x2783   :  { %7854 = vrcp.f32 %v4309_v51  ;;  %v4382_v18 = vadd.f32 1.0, %v7851_v2 }
0x2784   :  { %7856 = vrcp.f32 %v4383_v53 }
0x2785   :  { %7858 = vrcp.f32 %v4382_v18 }
0x278f   :  { %v7853_v11 = vpop.eup %7852 }
0x2790   :  { %v7855_v5 = vpop.eup %7854  ;;  %v4336_v20 = vsub.f32 1.0, %v7853_v11 }
0x2791   :  { %v7857_v17 = vpop.eup %7856  ;;  %v4335_v25 = vsub.f32 1.0, %v7855_v5 }
0x2792   :  { %v7859_v45 = vpop.eup %7858 }
0x27e0   :  { %v4318_v52 = vpop.permute.xlu0 %4317  ;;  %v4316_v13 = vpop.permute.xlu1 %4315 }
0x27e1   :  { %v4322_v4 = vmul.f32 %v7853_v11, %v4318_v52  ;;  %v4321_v10 = vmul.f32 %v7855_v5, %v4316_v13 }
0x27e3   :  { %4327 = vrot.lane.b32.xlu0 %v4322_v4, %s8395_s14  ;;  %4325 = vrot.lane.b32.xlu1 %v4321_v10, %s8395_s14 }
0x27e4   :  { %v4409_v31 = vpop.permute.xlu0 %4408  ;;  %v4407_v16 = vpop.permute.xlu1 %4406 }
0x27e5   :  { %v4413_v38 = vmul.f32 %v7857_v17, %v4409_v31  ;;  %v4412_v43 = vmul.f32 %v7859_v45, %v4407_v16  ;;  %v4438_v31 = vrot.slane %v10285_v55, 7 }
0x27e7   :  { %4418 = vrot.lane.b32.xlu0 %v4413_v38, %s8395_s14  ;;  %4416 = vrot.lane.b32.xlu1 %v4412_v43, %s8395_s14 }
0x27eb   :  { %4352 = vrot.lane.b32.xlu0 %v4349_v29, %s8399_s26  ;;  %4350 = vrot.lane.b32.xlu1 %v4348_v44, %s8399_s26 }
0x2855   :  { %v4328_v32 = vpop.permute.xlu0 %4327  ;;  %v4326_v8 = vpop.permute.xlu1 %4325 }
0x2856   :  { %v4332_v48 = vadd.f32 %v4328_v32, %v9795_v26  ;;  %v4331_v39 = vadd.f32 %v4326_v8, %v9788_v15 }
0x2858   :  { %7860 = vtanh.f32 %v4332_v48 }
0x2859   :  { %7862 = vtanh.f32 %v4331_v39  ;;  %v4419_v12 = vpop.permute.xlu0 %4418  ;;  %v4417_v28 = vpop.permute.xlu1 %4416 }
0x285a   :  { %v4423_v54 = vadd.f32 %v4419_v12, %v9810_v47  ;;  %v4422_v40 = vadd.f32 %v4417_v28, %v9805_v62 }
0x285c   :  { %7864 = vtanh.f32 %v4423_v54  ;;  %v4451_v54 = vmul.f32 %v10285_v55, %v8952_v14 }
0x285d   :  { %7866 = vtanh.f32 %v4422_v40  ;;  %v4353_v1 = vpop.permute.xlu0 %4352  ;;  %v4351_v56 = vpop.permute.xlu1 %4350 }
0x285e   :  { %7868 = vpow2.f32 %v7042_v30  ;;  %v4357_v2 = vmul.f32 %v7853_v11, %v4353_v1  ;;  %v4356_v53 = vmul.f32 %v7855_v5, %v4351_v56 }
0x285f   :  { %7870 = vpow2.f32 %v7041_v37 }
0x2865   :  { %v7861_v21 = vpop.eup %7860 }
0x2866   :  { %v7863_v22 = vpop.eup %7862  ;;  %4341 = vrot.lane.b32.xlu0 %v7861_v21, %s8397_s17 }
0x2867   :  { %4339 = vrot.lane.b32.xlu1 %v7863_v22, %s8397_s17  ;;  %v4369_v22 = vmul.f32 %v10295_v34, %v8936_v58 }
0x2869   :  { %v7865_v33 = vpop.eup %7864 }
0x286a   :  { %v7867_v46 = vpop.eup %7866  ;;  %4432 = vrot.lane.b32.xlu0 %v7865_v33, %s8397_s17 }
0x286b   :  { %4430 = vrot.lane.b32.xlu1 %v7867_v46, %s8397_s17  ;;  %v7869_v7 = vpop.eup %7868 }
0x286c   :  { %v7871_v60 = vpop.eup %7870  ;;  %v4401_v3 = vadd.f32 1.0, %v7869_v7 }
0x286d   :  { %v4400_v50 = vadd.f32 1.0, %v7871_v60 }
0x286e   :  { %7872 = vrcp.f32 %v4401_v3 }
0x286f   :  { %7874 = vrcp.f32 %v4400_v50 }
0x287b   :  { %v7873_v49 = vpop.eup %7872 }
0x287c   :  { %v7875_v51 = vpop.eup %7874  ;;  %v4427_v13 = vsub.f32 1.0, %v7873_v49  ;;  %v4442_v32 = vmul.f32 %v7873_v49, %v10285_v55 }
0x287d   :  { %v4426_v17 = vsub.f32 1.0, %v7875_v51  ;;  %v4441_v29 = vmul.f32 %v7875_v51, %v4438_v31 }
0x28d8   :  { %v4342_v36 = vpop.permute.xlu0 %4341 }
0x28d9   :  { %v4346_v23 = vmul.f32 %v4342_v36, %v4336_v20  ;;  %v4340_v6 = vpop.permute.xlu1 %4339 }
0x28da   :  { %v4345_v18 = vmul.f32 %v4340_v6, %v4335_v25 }
0x28db   :  { %v4359_v52 = vadd.f32 %v4357_v2, %v4346_v23 }
0x28dc   :  { %v4358_v4 = vadd.f32 %v4356_v53, %v4345_v18  ;;  %v4433_v10 = vpop.permute.xlu0 %4432 }
0x28dd   :  { %v4363_v45 = vrot.slane %v4359_v52, 5  ;;  %v4431_v38 = vpop.permute.xlu1 %4430  ;;  %v4437_v43 = vmul.f32 %v4433_v10, %v4427_v13 }
0x28de   :  { %v4362_v16 = vrot.slane %v4358_v4, 6  ;;  %v4436_v44 = vmul.f32 %v4431_v38, %v4426_v17 }
0x28df   :  { %v4444_v5 = vadd.f32 %v4442_v32, %v4437_v43 }
0x28e0   :  { %v4443_v11 = vadd.f32 %v4441_v29, %v4436_v44  ;;  %v4364_v48 = vsel %vm546_vm1, %v4363_v45, %v4362_v16 }
0x28e1   :  { %4365 = vrot.lane.b32.xlu1 %v4364_v48, %s8397_s17 }
0x28e2   :  { %v4447_v8 = vrot.slane %v4443_v11, 1 }
0x28e4   :  { %v4448_v39 = vsel %vm546_vm1, %v4444_v5, %v4447_v8 }
0x28e5   :  { %v10343_v12 = vmul.f32 %v4448_v39, %v8950_v19 }
0x28e7   :  { %v10348_v28 = vadd.f32 %v4451_v54, %v10343_v12 }
0x28e9   :  { %4454 = vrot.lane.b32.xlu0 %v10348_v28, %s8399_s26 }
0x2953   :  { %v4366_v40 = vpop.permute.xlu1 %4365 }
0x2954   :  { %v10353_v21 = vmul.f32 %v4366_v40, %v8938_v42 }
0x2956   :  { %v10358_v33 = vadd.f32 %v4369_v22, %v10353_v21  ;;  %v10889_v22 = vld [vmem:[#allocation56_spill] sm:$0xff] }
0x2958   :  { %v4585_v40 = vrot.slane %v10358_v33, 2 }
0x295b   :  { %v4455_v19 = vpop.permute.xlu0 %4454 }
0x295c   :  { %v4457_v14 = vsel %vm314_vm0, %v10358_v33, %v4455_v19 }
0x295d   :  { %7043 = vmatmul.mubr.msk.f32.vlgmr.msra.gmra.mxu1 %vm409_vm2, %v4457_v14 }
0x2a1d   :  { %v4527_v55 = vpop.f32.mrf.mxu1 }
0x2a1e   :  { %v4528_v41 = vadd.f32 %v4527_v55, %v9670_v9 }
0x2a1f   :  { %v4529_v46 = vpop.f32.mrf.mxu1 }
0x2a20   :  { %v10365_v63 = vadd.f32 %v4529_v46, %v9673_v59  ;;  %v4534_v42 = vrot.slane %v4528_v41, 2  ;;  %v4533_v34 = vrot.slane %v4528_v41, 1  ;;  %v4606_v9 = vadd.f32 %v4528_v41, %v9788_v15 }
0x2a22   :  { %4638 = vrot.lane.b32.xlu0 %v10365_v63, %s8395_s14  ;;  %v4621_v58 = vrot.slane %v10365_v63, 1  ;;  %v4607_v59 = vadd.f32 %v4533_v34, %v9795_v26  ;;  %v4538_v30 = vadd.f32 %v4534_v42, %v9795_v26  ;;  %v7046_v37 = vmul.f32 -1.442695, %v4606_v9 }
0x2a23   :  { %v4537_v7 = vadd.f32 %v4533_v34, %v9788_v15  ;;  %v4624_v19 = vadd.f32 %v10365_v63, %v9805_v62  ;;  %v5000_v63 = vld [vmem:[%s10774_s11 + $0x38] sm:$0xff] }
0x2a24   :  { %4640 = vrot.lane.b32.xlu1 %v4621_v58, %s8395_s14  ;;  %v7047_v60 = vmul.f32 -1.442695, %v4607_v59  ;;  %v7045_v3 = vmul.f32 -1.442695, %v4538_v30  ;;  %7876 = vpow2.f32 %v7046_v37  ;;  %7165 = vmatprep.subr.mxu0 %v5000_v63 }
0x2a25   :  { %v7044_v50 = vmul.f32 -1.442695, %v4537_v7  ;;  %7166 = vmatpush3.msra.mxu0 %v5000_v63 }
0x2a26   :  { %4553 = vrot.lane.b32.xlu0 %v4534_v42, %s8395_s14  ;;  %7878 = vpow2.f32 %v7047_v60 }
0x2a27   :  { %7880 = vpow2.f32 %v7045_v3 }
0x2a28   :  { %4551 = vrot.lane.b32.xlu1 %v4533_v34, %s8395_s14  ;;  %7882 = vpow2.f32 %v7044_v50 }
0x2a31   :  { %v7877_v1 = vpop.eup %7876 }
0x2a32   :  { %v4614_v20 = vadd.f32 1.0, %v7877_v1  ;;  %v4999_v1 = vld [vmem:[%s10774_s11 + $0x30] sm:$0xff] }
0x2a33   :  { %v7879_v56 = vpop.eup %7878  ;;  %7167 = vmatprep.subr.mxu0 %v4999_v1 }
0x2a34   :  { %v7881_v49 = vpop.eup %7880  ;;  %v4615_v36 = vadd.f32 1.0, %v7879_v56  ;;  %7884 = vrcp.f32 %v4614_v20  ;;  %7168 = vmatpush3.msra.mxu0 %v4999_v1 }
0x2a35   :  { %v7883_v25 = vpop.eup %7882  ;;  %v4546_v51 = vadd.f32 1.0, %v7881_v49 }
0x2a36   :  { %v4545_v2 = vadd.f32 1.0, %v7883_v25  ;;  %7886 = vrcp.f32 %v4615_v36  ;;  %v4998_v25 = vld [vmem:[%s10774_s11 + $0x28] sm:$0xff] }
0x2a37   :  { %7888 = vrcp.f32 %v4546_v51  ;;  %7169 = vmatprep.subr.mxu0 %v4998_v25 }
0x2a38   :  { %7890 = vrcp.f32 %v4545_v2  ;;  %7170 = vmatpush3.msra.mxu0 %v4998_v25 }
0x2a41   :  { %v7885_v23 = vpop.eup %7884 }
0x2a43   :  { %v7887_v18 = vpop.eup %7886 }
0x2a44   :  { %v10380_v4 = vpop.eup %7888 }
0x2a45   :  { %v10384_v31 = vpop.eup %7890  ;;  %v4572_v7 = vsub.f32 1.0, %v10380_v4 }
0x2a46   :  { %v4571_v49 = vsub.f32 1.0, %v10384_v31 }
0x2a94   :  { %v4639_v6 = vpop.permute.xlu0 %4638 }
0x2a95   :  { %v4644_v53 = vmul.f32 %v7885_v23, %v4639_v6 }
0x2a96   :  { %v4641_v52 = vpop.permute.xlu1 %4640 }
0x2a97   :  { %4648 = vrot.lane.b32.xlu0 %v4644_v53, %s8395_s14  ;;  %v4645_v13 = vmul.f32 %v7887_v18, %v4641_v52 }
0x2a98   :  { %v4554_v10 = vpop.permute.xlu0 %4553 }
0x2a99   :  { %v4558_v17 = vmul.f32 %v10380_v4, %v4554_v10  ;;  %4650 = vrot.lane.b32.xlu1 %v4645_v13, %s8395_s14  ;;  %v4996_v13 = vld [vmem:[%s10774_s11 + $0x18] sm:$0xff]  ;;  %v10890_v10 = vld [vmem:[#allocation50_spill] sm:$0xff] }
0x2a9a   :  { %v4552_v45 = vpop.permute.xlu1 %4551 }
0x2a9b   :  { %4563 = vrot.lane.b32.xlu0 %v4558_v17, %s8395_s14  ;;  %v4557_v38 = vmul.f32 %v10384_v31, %v4552_v45 }
0x2a9d   :  { %4561 = vrot.lane.b32.xlu1 %v4557_v38, %s8395_s14 }
0x2b09   :  { %v4649_v16 = vpop.permute.xlu0 %4648 }
0x2b0a   :  { %v4654_v43 = vadd.f32 %v4649_v16, %v9805_v62  ;;  %v4994_v16 = vld [vmem:[%s10774_s11 + $0x8] sm:$0xff] }
0x2b0b   :  { %v4651_v29 = vpop.permute.xlu1 %4650 }
0x2b0c   :  { %7892 = vtanh.f32 %v4654_v43  ;;  %v4655_v5 = vadd.f32 %v4651_v29, %v9810_v47  ;;  %v4993_v29 = vld [vmem:[%s10774_s11] sm:$0xff] }
0x2b0d   :  { %v4564_v44 = vpop.permute.xlu0 %4563 }
0x2b0e   :  { %v4568_v32 = vadd.f32 %v4564_v44, %v9795_v26  ;;  %v10891_v44 = vld [vmem:[#allocation48_spill] sm:$0xff] }
0x2b0f   :  { %v4562_v11 = vpop.permute.xlu1 %4561 }
0x2b10   :  { %7894 = vtanh.f32 %v4568_v32  ;;  %v4567_v48 = vadd.f32 %v4562_v11, %v9788_v15  ;;  %v4584_v15 = vrot.slane %v10358_v33, 1  ;;  %v7048_v33 = vmul.f32 -1.442695, %v4624_v19  ;;  %v5094_v32 = vld [vmem:[#allocation17 + $0x18] sm:$0xff]  ;;  %v10892_v11 = vld [vmem:[#allocation45_spill] sm:$0xff] }
0x2b11   :  { %7184 = vmatprep.subr.mxu1 %v5094_v32 }
0x2b12   :  { %7896 = vtanh.f32 %v4567_v48  ;;  %7185 = vmatpush3.msra.mxu1 %v5094_v32 }
0x2b13   :  { %7898 = vtanh.f32 %v4655_v5 }
0x2b14   :  { %7900 = vpow2.f32 %v7048_v33 }
0x2b19   :  { %v7893_v8 = vpop.eup %7892 }
0x2b1a   :  { %4662 = vrot.lane.b32.xlu0 %v7893_v8, %s8397_s17  ;;  %v10893_v8 = vld [vmem:[#allocation58_spill] sm:$0xff] }
0x2b1d   :  { %v7895_v39 = vpop.eup %7894 }
0x2b1e   :  { %4577 = vrot.lane.b32.xlu0 %v7895_v39, %s8397_s17 }
0x2b1f   :  { %v7897_v54 = vpop.eup %7896 }
0x2b20   :  { %4575 = vrot.lane.b32.xlu1 %v7897_v54, %s8397_s17  ;;  %v7899_v26 = vpop.eup %7898 }
0x2b22   :  { %4588 = vrot.lane.b32.xlu0 %v4585_v40, %s8399_s26 }
0x2b24   :  { %4664 = vrot.lane.b32.xlu1 %v7899_v26, %s8397_s17  ;;  %v10894_v26 = vld [vmem:[#allocation43_spill] sm:$0xff] }
0x2b26   :  { %4742 = vrot.lane.b32.xlu0 %v10280_v35, %s8399_s26  ;;  %v4625_v35 = vadd.f32 %v4621_v58, %v9810_v47  ;;  %v4670_v47 = vrot.slane %v10348_v28, 1 }
0x2b28   :  { %4586 = vrot.lane.b32.xlu1 %v4584_v15, %s8399_s26  ;;  %v7049_v14 = vmul.f32 -1.442695, %v4625_v35  ;;  %v10896_v35 = vld [vmem:[#allocation54_spill] sm:$0xff] }
0x2b2a   :  { %4770 = vrot.lane.b32.xlu0 %v10196_v24, %s8399_s26  ;;  %7902 = vpow2.f32 %v7049_v14  ;;  %v7901_v24 = vpop.eup %7900 }
0x2b2c   :  { %4714 = vrot.lane.b32.xlu1 %v10343_v12, %s8399_s26  ;;  %v4632_v12 = vadd.f32 1.0, %v7901_v24 }
0x2b2e   :  { %7904 = vrcp.f32 %v4632_v12 }
0x2b30   :  { %4798 = vrot.lane.b32.xlu1 %v10112_v0, %s8399_s26 }
0x2b34   :  { %4826 = vrot.lane.b32.xlu1 %v10889_v22, %s8399_s26  ;;  %v10895_v22 = vld [vmem:[#allocation55_spill] sm:$0xff] }
0x2b37   :  { %v7903_v55 = vpop.eup %7902 }
0x2b38   :  { %v4633_v46 = vadd.f32 1.0, %v7903_v55 }
0x2b3a   :  { %7906 = vrcp.f32 %v4633_v46 }
0x2b3b   :  { %v7905_v42 = vpop.eup %7904 }
0x2b3c   :  { %v4658_v62 = vsub.f32 1.0, %v7905_v42  ;;  %v4673_v56 = vmul.f32 %v7905_v42, %v10348_v28  ;;  %v4997_v28 = vld [vmem:[%s10774_s11 + $0x20] sm:$0xff] }
0x2b3d   :  { %7171 = vmatprep.subr.mxu0 %v4997_v28 }
0x2b3e   :  { %7172 = vmatpush3.msra.mxu0 %v4997_v28 }
0x2b3f   :  { %7173 = vmatprep.subr.mxu0 %v4996_v13 }
0x2b40   :  { %7174 = vmatpush3.msra.mxu0 %v4996_v13 }
0x2b47   :  { %v7907_v34 = vpop.eup %7906 }
0x2b48   :  { %v4659_v30 = vsub.f32 1.0, %v7907_v34  ;;  %v4674_v3 = vmul.f32 %v7907_v34, %v4670_v47 }
0x2b8c   :  { %v4663_v0 = vpop.permute.xlu0 %4662 }
0x2b8d   :  { %v4668_v58 = vmul.f32 %v4663_v0, %v4658_v62 }
0x2b8f   :  { %v4675_v51 = vadd.f32 %v4673_v56, %v4668_v58  ;;  %v10897_v58 = vld [vmem:[#allocation53_spill] sm:$0xff] }
0x2b90   :  { %v4578_v41 = vpop.permute.xlu0 %4577 }
0x2b91   :  { %v4582_v20 = vmul.f32 %v4578_v41, %v4572_v7 }
0x2b92   :  { %v4576_v9 = vpop.permute.xlu1 %4575 }
0x2b93   :  { %v4581_v23 = vmul.f32 %v4576_v9, %v4571_v49 }
0x2b94   :  { %v4589_v59 = vpop.permute.xlu0 %4588 }
0x2b95   :  { %v4593_v60 = vmul.f32 %v10380_v4, %v4589_v59 }
0x2b96   :  { %v4665_v37 = vpop.permute.xlu1 %4664 }
0x2b97   :  { %v4669_v50 = vmul.f32 %v4665_v37, %v4659_v30  ;;  %v4595_v6 = vadd.f32 %v4593_v60, %v4582_v20  ;;  %v10899_v20 = vld [vmem:[#allocation47_spill] sm:$0xff] }
0x2b98   :  { %v4743_v48 = vpop.permute.xlu0 %4742 }
0x2b99   :  { %v4676_v36 = vadd.f32 %v4674_v3, %v4669_v50  ;;  %v4599_v45 = vrot.slane %v4595_v6, 6  ;;  %v4745_v39 = vsel %vm314_vm0, %v10893_v8, %v4743_v48  ;;  %v10898_v3 = vld [vmem:[#allocation44_spill] sm:$0xff] }
0x2b9a   :  { %v4587_v2 = vpop.permute.xlu1 %4586  ;;  %v4753_v19 = vrot.slane %v4745_v39, %v10895_v22 }
0x2b9b   :  { %v4679_v53 = vrot.slane %v4676_v36, 7  ;;  %v4592_v18 = vmul.f32 %v10384_v31, %v4587_v2  ;;  %v4995_v31 = vld [vmem:[%s10774_s11 + $0x10] sm:$0xff]  ;;  %s8408_s11 = smov 88  }
0x2b9c   :  { %7175 = vmatprep.subr.mxu0 %v4995_v31  ;;  %v4771_v54 = vpop.permute.xlu0 %4770  ;;  %v4754_v24 = vcombine.high %v4753_v19, %v4753_v19  ;;  %v4761_v34 = vrot.slane %v4753_v19, %v10895_v22 }
0x2b9d   :  { %v4680_v52 = vsel %vm546_vm1, %v4679_v53, %v4675_v51  ;;  %v4594_v4 = vadd.f32 %v4592_v18, %v4581_v23  ;;  %7176 = vmatpush3.msra.mxu0 %v4995_v31  ;;  %v4773_v33 = vsel %vm314_vm0, %v10896_v35, %v4771_v54 }
0x2b9e   :  { %v4682_v17 = vmul.f32 %v4680_v52, %v10890_v10  ;;  %7177 = vmatprep.subr.mxu0 %v4994_v16  ;;  %v4715_v5 = vpop.permute.xlu1 %4714  ;;  %v4781_v55 = vrot.slane %v4773_v33, %v10895_v22  ;;  %v4768_v9 = vrot.slane %v4754_v24, %v10895_v22  ;;  %v4922_v50 = vrot.slane %v4761_v34, %v10898_v3 }
0x2b9f   :  { %v4598_v38 = vrot.slane %v4594_v4, 7  ;;  %7178 = vmatpush3.msra.mxu0 %v4994_v16  ;;  %v4717_v15 = vsel %vm314_vm0, %v10894_v26, %v4715_v5 }
0x2ba0   :  { %4684 = vrot.lane.b32.xlu1 %v4682_v17, %s8399_s26  ;;  %7179 = vmatprep.subr.mxu0 %v4993_v29  ;;  %v4725_v14 = vrot.slane %v4717_v15, %v10895_v22  ;;  %v4782_v62 = vcombine.high %v4781_v55, %v4781_v55  ;;  %v4789_v47 = vrot.slane %v4781_v55, %v10895_v22 }
0x2ba1   :  { %v4600_v43 = vsel %vm546_vm1, %v4599_v45, %v4598_v38  ;;  %7180 = vmatpush3.msra.mxu0 %v4993_v29  ;;  %v4926_v1 = vrot.slane %v4768_v9, %v10898_v3 }
0x2ba2   :  { %4601 = vrot.lane.b32.xlu0 %v4600_v43, %s8397_s17  ;;  %7195 = vmatprep.subr.mxu0 %v10856_v61  ;;  %v4799_v40 = vpop.permute.xlu1 %4798  ;;  %v4726_v0 = vcombine.high %v4725_v14, %v4725_v14  ;;  %v4733_v59 = vrot.slane %v4725_v14, %v10895_v22  ;;  %v4796_v56 = vrot.slane %v4782_v62, %v10895_v22 }
0x2ba3   :  { %v4801_v12 = vsel %vm314_vm0, %v10206_v27, %v4799_v40  ;;  %v4932_v6 = vrot.slane %v4789_v47, %v10898_v3  ;;  %v5091_v47 = vld [vmem:[#allocation17] sm:$0xff] }
0x2ba4   :  { %4882 = vrot.lane.b32.xlu1 %v10891_v44, %s8399_s26  ;;  %v4809_v41 = vrot.slane %v4801_v12, %v10895_v22  ;;  %v4740_v63 = vrot.slane %v4726_v0, %v10895_v22  ;;  %v4912_v36 = vrot.slane %v4733_v59, %v10898_v3  ;;  %v4936_v45 = vrot.slane %v4796_v56, %v10898_v3  ;;  %v5093_v59 = vld [vmem:[#allocation17 + $0x10] sm:$0xff] }
0x2ba5   :  { %7186 = vmatprep.subr.mxu1 %v5093_v59 }
0x2ba6   :  { %4854 = vrot.lane.b32.xlu0 %v10892_v11, %s8399_s26  ;;  %v4827_v46 = vpop.permute.xlu1 %4826  ;;  %v4810_v7 = vcombine.high %v4809_v41, %v4809_v41  ;;  %v4817_v25 = vrot.slane %v4809_v41, %v10895_v22  ;;  %v4916_v53 = vrot.slane %v4740_v63, %v10898_v3  ;;  %7187 = vmatpush3.msra.mxu1 %v5093_v59  ;;  %v7050_v63 = vld [vmem:[#allocation16] ss:$0 sm:$0xff]  ;;  %s8411_s26 = smov 80  }
0x2ba7   :  { %v4829_v42 = vsel %vm314_vm0, %v10290_v57, %v4827_v46 }
0x2ba8   :  { %v4837_v27 = vrot.slane %v4829_v42, %v10895_v22  ;;  %v4824_v52 = vrot.slane %v4810_v7, %v10895_v22  ;;  %v4942_v43 = vrot.slane %v4817_v25, %v10898_v3 }
0x2baa   :  { %v4838_v18 = vcombine.high %v4837_v27, %v4837_v27  ;;  %v4845_v38 = vrot.slane %v4837_v27, %v10895_v22  ;;  %v4946_v39 = vrot.slane %v4824_v52, %v10898_v3 }
0x2bac   :  { %v4852_v11 = vrot.slane %v4838_v18, %v10895_v22  ;;  %v4952_v40 = vrot.slane %v4845_v38, %v10898_v3 }
0x2bae   :  { %v4956_v14 = vrot.slane %v4852_v11, %v10898_v3 }
0x2c12   :  { %v4685_v30 = vpop.permute.xlu1 %4684 }
0x2c13   :  { %v4687_v37 = vsel %vm314_vm0, %v10897_v58, %v4685_v30  ;;  %v5092_v30 = vld [vmem:[#allocation17 + $0x8] sm:$0xff] }
0x2c14   :  { %v4695_v57 = vrot.slane %v4687_v37, %v10895_v22  ;;  %v4602_v60 = vpop.permute.xlu0 %4601  ;;  %7188 = vmatprep.subr.mxu1 %v5092_v30 }
0x2c15   :  { %v4604_v49 = vmul.f32 %v4602_v60, %v10899_v20  ;;  %7189 = vmatpush3.msra.mxu1 %v5092_v30 }
0x2c16   :  { %v4696_v51 = vcombine.high %v4695_v57, %v4695_v57  ;;  %v4703_v2 = vrot.slane %v4695_v57, %v10895_v22  ;;  %v4883_v23 = vpop.permute.xlu1 %4882  ;;  %7190 = vmatprep.subr.mxu1 %v5091_v47  ;;  %v7053_v57 = vld [vmem:[#allocation19] ss:$0 sm:$0xff] }
0x2c17   :  { %v4885_v28 = vsel %vm314_vm0, %v4604_v49, %v4883_v23  ;;  %7191 = vmatpush3.msra.mxu1 %v5091_v47 }
0x2c18   :  { %v4710_v4 = vrot.slane %v4696_v51, %v10895_v22  ;;  %v4979_v13 = vsel %vm2651_vm3, %v4703_v2, %v4912_v36  ;;  %v4893_v10 = vrot.slane %v4885_v28, %v10895_v22  ;;  %v4855_v17 = vpop.permute.xlu0 %4854  ;;  %7200 = vmatprep.subr.mxu1 %v10856_v61  ;;  %v10900_v36 = vld [vmem:[#allocation46_spill] sm:$0xff] }
0x2c19   :  { %v4981_v31 = vsel %vm2654_vm4, %v4979_v13, %v4922_v50  ;;  %v4857_v16 = vsel %vm314_vm0, %v10353_v21, %v4855_v17  ;;  %v5183_v25 = vmul.f32 -1e+09, %v10900_v36 }
0x2c1a   :  { %v4980_v29 = vsel %vm2651_vm3, %v4710_v4, %v4916_v53  ;;  %v4894_v44 = vcombine.high %v4893_v10, %v4893_v10  ;;  %v4865_v32 = vrot.slane %v4857_v16, %v10895_v22  ;;  %v4901_v5 = vrot.slane %v4893_v10, %v10895_v22 }
0x2c1b   :  { %v4982_v48 = vsel %vm2654_vm4, %v4980_v29, %v4926_v1  ;;  %v4983_v8 = vsel %vm2657_vm5, %v4981_v31, %v4932_v6  ;;  %v5191_v51 = vrot.slane %v5183_v25, %v10895_v22 }
0x2c1c   :  { %v4866_v54 = vcombine.high %v4865_v32, %v4865_v32  ;;  %v4873_v21 = vrot.slane %v4865_v32, %v10895_v22  ;;  %v4908_v26 = vrot.slane %v4894_v44, %v10895_v22  ;;  %v4985_v15 = vsel %vm2660_vm6, %v4983_v8, %v4942_v43 }
0x2c1d   :  { %v4984_v19 = vsel %vm2657_vm5, %v4982_v48, %v4936_v45  ;;  %v4972_v24 = vrot.slane %v4901_v5, %v10898_v3  ;;  %v4987_v55 = vsel %vm2663_vm7, %v4985_v15, %v4952_v40  ;;  %v5192_v2 = vcombine.high %v5191_v51, %v5191_v51 }
0x2c1e   :  { %v4880_v35 = vrot.slane %v4866_v54, %v10895_v22  ;;  %v4962_v33 = vrot.slane %v4873_v21, %v10898_v3  ;;  %v4986_v12 = vsel %vm2660_vm6, %v4984_v19, %v4946_v39  ;;  %v4976_v41 = vrot.slane %v4908_v26, %v10898_v3 }
0x2c1f   :  { %v4988_v34 = vsel %vm2663_vm7, %v4986_v12, %v4956_v14  ;;  %v5206_v23 = vrot.slane %v5192_v2, %v10895_v22  ;;  %v5199_v6 = vrot.slane %v5191_v51, %v10895_v22 }
0x2c20   :  { %v4966_v46 = vrot.slane %v4880_v35, %v10898_v3  ;;  %v4989_v0 = vsel %vm2666_vm8, %v4987_v55, %v4962_v33 }
0x2c21   :  { %v4991_v42 = vsel %vm2669_vm9, %v4989_v0, %v4972_v24  ;;  %v10560_v53 = vrot.slane %v5206_v23, %v10898_v3  ;;  %v10563_v52 = vrot.slane %v5199_v6, %v10898_v3 }
0x2c22   :  { %7181 = vmatprep.mubr.msk.f32.mxu0 %vm409_vm2, %v4991_v42  ;;  %v4990_v9 = vsel %vm2666_vm8, %v4988_v34, %v4966_v46 }
0x2c23   :  { %v4992_v62 = vsel %vm2669_vm9, %v4990_v9, %v4976_v41 }
0x2c24   :  { %7182 = vmatmul.mubr.msk.f32.vlgmr.msra.gmra.mxu0 %vm409_vm2, %v4992_v62 }
0x2c25   :  { %7197 = vmatprep.mubr.msk.f32.mxu0 %vm8407_vm10, %v10856_v61 }
0x2ce4   :  { %v7183_v27 = vpop.f32.mrf.mxu0 }
0x2ce5   :  { %v5086_v58 = vadd.f32 %v7183_v27, %v7050_v63 }
0x2ce6   :  { %v5080_v37 = vpop.f32.mrf.mxu0 }
0x2ce7   :  { %5090 = vst.msk [vmem:[#allocation28 + $0x8] sm:$0xff] %vm314_vm0, %v5086_v58  ;;  %v5081_v7 = vadd.f32 %v7050_v63, %v5080_v37 }
0x2ce9   :  { %5089 = vst.msk [vmem:[#allocation28] sm:$0xff] %vm314_vm0, %v5081_v7  ;;  %7192 = vmatprep.mubr.msk.f32.mxu1 %vm314_vm0, %v5081_v7 }
0x2cea   :  { %7193 = vmatmul.mubr.msk.f32.vlgmr.msra.gmra.mxu1 %vm314_vm0, %v5086_v58 }
0x2ceb   :  { %7202 = vmatprep.mubr.msk.f32.mxu1 %vm8407_vm10, %v10856_v61 }
0x2daa   :  { %v7194_v60 = vpop.f32.mrf.mxu1 }
0x2dab   :  { %v10535_v50 = vadd.f32 %v7194_v60, %v7053_v57 }
0x2dac   :  { %v5174_v1 = vpop.f32.mrf.mxu1 }
0x2dad   :  { %v10537_v56 = vadd.f32 %v7053_v57, %v5174_v1  ;;  %5286 = vrot.lane.b32.xlu1 %v10535_v50, %s8397_s17 }
0x2daf   :  { %5208 = vrot.lane.b32.xlu0 %v10537_v56, %s8397_s17  ;;  %s8409_s17 = smov 120  }
0x2e1f   :  { %v5287_v20 = vpop.permute.xlu1 %5286 }
0x2e20   :  { %7201 = vmatpush3.xpose.msk.msra.mxu1 %vm5210_vm11, %v5287_v20 }
0x2e21   :  { %v5209_v49 = vpop.permute.xlu0 %5208  ;;  %7210 = vmatprep.subr.mxu1 %v10856_v61 }
0x2e22   :  { %7196 = vmatpush3.xpose.msk.msra.mxu0 %vm5210_vm11, %v5209_v49 }
0x2e23   :  { %7203 = vmatmul.mubr.msk.f32.vlgmr.msra.gmra.mxu1 %vm5210_vm11, %v10535_v50  ;;  %7205 = vmatprep.subr.mxu0 %v10856_v61 }
0x2e24   :  { %7212 = vmatprep.mubr.msk.f32.mxu1 %vm8407_vm10, %v10856_v61 }
0x2e25   :  { %7198 = vmatmul.mubr.msk.f32.vlgmr.msra.gmra.mxu0 %vm5210_vm11, %v10537_v56 }
0x2e26   :  { %7207 = vmatprep.mubr.msk.f32.mxu0 %vm8407_vm10, %v10856_v61 }
0x2ee3   :  { %v5358_v18 = vpop.f32.mrf.mxu1 }
0x2ee4   :  { %v5363_v28 = vmul.f32 0.35355338, %v5358_v18 }
0x2ee5   :  { %v5281_v4 = vpop.f32.mrf.mxu0  ;;  %v7204_v13 = vpop.f32.mrf.mxu1 }
0x2ee6   :  { %v5375_v10 = vadd.f32 %v10560_v53, %v5363_v28  ;;  %v5362_v17 = vmul.f32 0.35355338, %v5281_v4 }
0x2ee7   :  { %v7199_v45 = vpop.f32.mrf.mxu0 }
0x2ee8   :  { %v5374_v38 = vadd.f32 %v10563_v52, %v5362_v17  ;;  %v5379_v31 = vsel %vm5210_vm11, %v5375_v10, -inf }
0x2ee9   :  { %5380 = vmax.xlane.f32.xlu1 %v5379_v31 }
0x2eea   :  { %v5376_v22 = vsel %vm5210_vm11, %v5374_v38, -inf }
0x2eeb   :  { %5377 = vmax.xlane.f32.xlu0 %v5376_v22 }
0x2efa   :  { %5398 = vrot.lane.b32.xlu1 %v10537_v56, %s8395_s14 }
0x2efe   :  { %5552 = vrot.lane.b32.xlu1 %v10537_v56, %s8408_s11 }
0x2f02   :  { %5630 = vrot.lane.b32.xlu1 %v10535_v50, %s8408_s11 }
0x2f06   :  { %5628 = vrot.lane.b32.xlu1 %v10535_v50, %s8409_s17 }
0x2f72   :  { %v5381_v3 = vpop.xlane.xlu1 %5380 }
0x2f73   :  { %v5383_v16 = vsub.f32 %v5375_v10, %v5381_v3 }
0x2f74   :  { %v5378_v43 = vpop.xlane.xlu0 %5377 }
0x2f75   :  { %v5386_v29 = vmul.f32 1.442695, %v5383_v16  ;;  %v5382_v44 = vsub.f32 %v5374_v38, %v5378_v43 }
0x2f76   :  { %v5399_v32 = vpop.permute.xlu1 %5398 }
0x2f77   :  { %7908 = vpow2.f32 %v5386_v29  ;;  %v5384_v11 = vmul.f32 1.442695, %v5382_v44  ;;  %7206 = vmatpush3.msra.mxu0 %v5399_v32 }
0x2f78   :  { %7215 = vmatprep.subr.mxu0 %v10856_v61 }
0x2f79   :  { %7910 = vpow2.f32 %v5384_v11 }
0x2f7a   :  { %v5553_v40 = vpop.permute.xlu1 %5552 }
0x2f7e   :  { %v5631_v19 = vpop.permute.xlu1 %5630 }
0x2f82   :  { %v5629_v24 = vpop.permute.xlu1 %5628 }
0x2f84   :  { %v7909_v48 = vpop.eup %7908 }
0x2f85   :  { %v5391_v5 = vsel %vm5210_vm11, %v7909_v48, 0.0 }
0x2f86   :  { %v7911_v8 = vpop.eup %7910  ;;  %5392 = vadd.xlane.f32.xlu0 %v5391_v5 }
0x2f87   :  { %v5388_v39 = vsel %vm5210_vm11, %v7911_v8, 0.0 }
0x2f8a   :  { %5389 = vadd.xlane.f32.xlu0 %v5388_v39 }
0x2fa0   :  { %5474 = vrot.lane.b32.xlu0 %v10535_v50, %s8395_s14  ;;  %s8410_s14 = smov 56  }
0x2fa4   :  { %5550 = vrot.lane.b32.xlu0 %v10537_v56, %s8409_s17 }
0x300f   :  { %v5393_v54 = vpop.xlane.xlu0 %5392 }
0x3010   :  { %7912 = vrcp.f32 %v5393_v54 }
0x3013   :  { %v5390_v21 = vpop.xlane.xlu0 %5389 }
0x3014   :  { %7914 = vrcp.f32 %v5390_v21 }
0x3017   :  { %v5475_v26 = vpop.permute.xlu0 %5474 }
0x3018   :  { %7211 = vmatpush3.msra.mxu1 %v5475_v26 }
0x3019   :  { %7220 = vmatprep.subr.mxu1 %v10856_v61 }
0x301b   :  { %v5551_v55 = vpop.permute.xlu0 %5550 }
0x301d   :  { %v7913_v15 = vpop.eup %7912 }
0x301e   :  { %v5397_v35 = vmul.f32 %v7913_v15, %v7909_v48 }
0x3020   :  { %7213 = vmatmul.mubr.msk.f32.vlgmr.msra.gmra.mxu1 %vm5210_vm11, %v5397_v35 }
0x3021   :  { %v7915_v33 = vpop.eup %7914  ;;  %7221 = vmatpush3.xpose.msk.msra.mxu1 %vm5210_vm11, %v5631_v19  ;;  %7222 = vmatprep.mubr.msk.f32.mxu1 %vm8407_vm10, %v10856_v61 }
0x3022   :  { %v5396_v14 = vmul.f32 %v7915_v33, %v7911_v8  ;;  %7230 = vmatprep.subr.mxu1 %v10856_v61 }
0x3024   :  { %7208 = vmatmul.mubr.msk.f32.vlgmr.msra.gmra.mxu0 %vm5210_vm11, %v5396_v14  ;;  %7223 = vmatmul.mubr.msk.f32.vlgmr.msra.gmra.mxu1 %vm5210_vm11, %v5629_v24 }
0x3025   :  { %7216 = vmatpush3.xpose.msk.msra.mxu0 %vm5210_vm11, %v5553_v40  ;;  %7217 = vmatprep.mubr.msk.f32.mxu0 %vm8407_vm10, %v10856_v61 }
0x3026   :  { %7225 = vmatprep.subr.mxu0 %v10856_v61  ;;  %7232 = vmatprep.mubr.msk.f32.mxu1 %vm8407_vm10, %v10856_v61 }
0x3028   :  { %7218 = vmatmul.mubr.msk.f32.vlgmr.msra.gmra.mxu0 %vm5210_vm11, %v5551_v55 }
0x3029   :  { %7227 = vmatprep.mubr.msk.f32.mxu0 %vm8407_vm10, %v10856_v61 }
0x30e0   :  { %v10599_v12 = vpop.f32.mrf.mxu1 }
0x30e2   :  { %v7214_v46 = vpop.f32.mrf.mxu1 }
0x30e4   :  { %v10601_v0 = vpop.f32.mrf.mxu0  ;;  %v5702_v41 = vpop.f32.mrf.mxu1 }
0x30e5   :  { %v5707_v42 = vmul.f32 0.35355338, %v5702_v41 }
0x30e6   :  { %v7209_v34 = vpop.f32.mrf.mxu0  ;;  %v7224_v9 = vpop.f32.mrf.mxu1 }
0x30e7   :  { %v5709_v62 = vadd.f32 %v5707_v42, %v10560_v53 }
0x30e8   :  { %v5624_v59 = vpop.f32.mrf.mxu0 }
0x30e9   :  { %v5706_v30 = vmul.f32 0.35355338, %v5624_v59  ;;  %v5713_v47 = vsel %vm5210_vm11, %v5709_v62, -inf }
0x30ea   :  { %v7219_v63 = vpop.f32.mrf.mxu0  ;;  %5714 = vmax.xlane.f32.xlu1 %v5713_v47 }
0x30eb   :  { %v5708_v27 = vadd.f32 %v5706_v30, %v10563_v52 }
0x30ed   :  { %v5710_v58 = vsel %vm5210_vm11, %v5708_v27, -inf }
0x30ee   :  { %5711 = vmax.xlane.f32.xlu0 %v5710_v58 }
0x30fb   :  { %5732 = vrot.lane.b32.xlu1 %v10537_v56, %s8410_s14 }
0x30ff   :  { %5886 = vrot.lane.b32.xlu1 %v10537_v56, %s8411_s26 }
0x3103   :  { %5964 = vrot.lane.b32.xlu1 %v10535_v50, %s8411_s26 }
0x3107   :  { %5962 = vrot.lane.b32.xlu1 %v10535_v50, %s8412_s27 }
0x3173   :  { %v5715_v37 = vpop.xlane.xlu1 %5714 }
0x3174   :  { %v5717_v7 = vsub.f32 %v5709_v62, %v5715_v37 }
0x3176   :  { %v5720_v57 = vmul.f32 1.442695, %v5717_v7 }
0x3177   :  { %v5712_v60 = vpop.xlane.xlu0 %5711  ;;  %v5733_v1 = vpop.permute.xlu1 %5732 }
0x3178   :  { %7916 = vpow2.f32 %v5720_v57  ;;  %v5716_v20 = vsub.f32 %v5708_v27, %v5712_v60  ;;  %7226 = vmatpush3.msra.mxu0 %v5733_v1 }
0x3179   :  { %7235 = vmatprep.subr.mxu0 %v10856_v61 }
0x317a   :  { %v5718_v49 = vmul.f32 1.442695, %v5716_v20 }
0x317b   :  { %v5887_v18 = vpop.permute.xlu1 %5886 }
0x317c   :  { %7918 = vpow2.f32 %v5718_v49 }
0x317f   :  { %v5965_v13 = vpop.permute.xlu1 %5964 }
0x3183   :  { %v5963_v38 = vpop.permute.xlu1 %5962 }
0x3185   :  { %v7917_v36 = vpop.eup %7916 }
0x3186   :  { %v5725_v25 = vsel %vm5210_vm11, %v7917_v36, 0.0 }
0x3187   :  { %5726 = vadd.xlane.f32.xlu0 %v5725_v25 }
0x3189   :  { %v7919_v51 = vpop.eup %7918 }
0x318a   :  { %v5722_v2 = vsel %vm5210_vm11, %v7919_v51, 0.0 }
0x318b   :  { %5723 = vadd.xlane.f32.xlu0 %v5722_v2 }
0x31a1   :  { %5808 = vrot.lane.b32.xlu0 %v10535_v50, %s8410_s14 }
0x31a5   :  { %5884 = vrot.lane.b32.xlu0 %v10537_v56, %s8412_s27 }
0x3210   :  { %v5727_v23 = vpop.xlane.xlu0 %5726 }
0x3211   :  { %7920 = vrcp.f32 %v5727_v23 }
0x3214   :  { %v5724_v6 = vpop.xlane.xlu0 %5723 }
0x3215   :  { %7922 = vrcp.f32 %v5724_v6 }
0x3218   :  { %v5809_v28 = vpop.permute.xlu0 %5808 }
0x3219   :  { %7231 = vmatpush3.msra.mxu1 %v5809_v28 }
0x321a   :  { %7240 = vmatprep.subr.mxu1 %v10856_v61 }
0x321c   :  { %v5885_v31 = vpop.permute.xlu0 %5884 }
0x321e   :  { %v7921_v4 = vpop.eup %7920 }
0x321f   :  { %v5731_v10 = vmul.f32 %v7921_v4, %v7917_v36 }
0x3221   :  { %7233 = vmatmul.mubr.msk.f32.vlgmr.msra.gmra.mxu1 %vm5210_vm11, %v5731_v10 }
0x3222   :  { %v7923_v17 = vpop.eup %7922  ;;  %7241 = vmatpush3.xpose.msk.msra.mxu1 %vm5210_vm11, %v5965_v13  ;;  %7242 = vmatprep.mubr.msk.f32.mxu1 %vm8407_vm10, %v10856_v61 }
0x3223   :  { %v5730_v45 = vmul.f32 %v7923_v17, %v7919_v51  ;;  %7250 = vmatprep.subr.mxu1 %v10856_v61 }
0x3225   :  { %7228 = vmatmul.mubr.msk.f32.vlgmr.msra.gmra.mxu0 %vm5210_vm11, %v5730_v45  ;;  %7243 = vmatmul.mubr.msk.f32.vlgmr.msra.gmra.mxu1 %vm5210_vm11, %v5963_v38 }
0x3226   :  { %7236 = vmatpush3.xpose.msk.msra.mxu0 %vm5210_vm11, %v5887_v18  ;;  %7237 = vmatprep.mubr.msk.f32.mxu0 %vm8407_vm10, %v10856_v61 }
0x3227   :  { %7245 = vmatprep.subr.mxu0 %v10856_v61  ;;  %7252 = vmatprep.mubr.msk.f32.mxu1 %vm8407_vm10, %v10856_v61 }
0x3229   :  { %7238 = vmatmul.mubr.msk.f32.vlgmr.msra.gmra.mxu0 %vm5210_vm11, %v5885_v31 }
0x322a   :  { %7247 = vmatprep.mubr.msk.f32.mxu0 %vm8407_vm10, %v10856_v61 }
0x32e1   :  { %v10633_v22 = vpop.f32.mrf.mxu1 }
0x32e3   :  { %v7234_v3 = vpop.f32.mrf.mxu1 }
0x32e5   :  { %v10635_v16 = vpop.f32.mrf.mxu0  ;;  %v6036_v43 = vpop.f32.mrf.mxu1 }
0x32e6   :  { %v6041_v29 = vmul.f32 0.35355338, %v6036_v43 }
0x32e7   :  { %v7229_v44 = vpop.f32.mrf.mxu0  ;;  %v7244_v32 = vpop.f32.mrf.mxu1 }
0x32e8   :  { %v6043_v11 = vadd.f32 %v6041_v29, %v10560_v53 }
0x32e9   :  { %v5958_v48 = vpop.f32.mrf.mxu0 }
0x32ea   :  { %v6040_v5 = vmul.f32 0.35355338, %v5958_v48  ;;  %v6047_v8 = vsel %vm5210_vm11, %v6043_v11, -inf  ;;  %v6585_v48 = vld [vmem:[#allocation20 + $0x8] sm:$0xff] }
0x32eb   :  { %v7239_v39 = vpop.f32.mrf.mxu0  ;;  %6048 = vmax.xlane.f32.xlu1 %v6047_v8  ;;  %v6679_v8 = vld [vmem:[#allocation23 + $0x18] sm:$0xff] }
0x32ec   :  { %v6042_v54 = vadd.f32 %v6040_v5, %v10563_v52  ;;  %v6584_v5 = vld [vmem:[#allocation20] sm:$0xff] }
0x32ee   :  { %v6044_v21 = vsel %vm5210_vm11, %v6042_v54, -inf }
0x32ef   :  { %6045 = vmax.xlane.f32.xlu0 %v6044_v21 }
0x32fc   :  { %6066 = vrot.lane.b32.xlu1 %v10537_v56, %s8413_s18 }
0x3300   :  { %6220 = vrot.lane.b32.xlu1 %v10537_v56, %s8414_s20 }
0x3304   :  { %6298 = vrot.lane.b32.xlu1 %v10535_v50, %s8414_s20 }
0x3308   :  { %6296 = vrot.lane.b32.xlu1 %v10535_v50, %s8415_s7 }
0x3374   :  { %v6049_v40 = vpop.xlane.xlu1 %6048 }
0x3375   :  { %v6051_v26 = vsub.f32 %v6043_v11, %v6049_v40  ;;  %v6587_v11 = vld [vmem:[#allocation20 + $0x18] sm:$0xff] }
0x3377   :  { %v6054_v15 = vmul.f32 1.442695, %v6051_v26 }
0x3378   :  { %v6046_v19 = vpop.xlane.xlu0 %6045  ;;  %v6067_v35 = vpop.permute.xlu1 %6066 }
0x3379   :  { %7924 = vpow2.f32 %v6054_v15  ;;  %v6050_v33 = vsub.f32 %v6042_v54, %v6046_v19  ;;  %7246 = vmatpush3.msra.mxu0 %v6067_v35 }
0x337a   :  { %7255 = vmatprep.subr.mxu0 %v10856_v61 }
0x337b   :  { %v6052_v14 = vmul.f32 1.442695, %v6050_v33 }
0x337c   :  { %v6221_v9 = vpop.permute.xlu1 %6220 }
0x337d   :  { %7926 = vpow2.f32 %v6052_v14 }
0x3380   :  { %v6299_v30 = vpop.permute.xlu1 %6298 }
0x3384   :  { %v6297_v58 = vpop.permute.xlu1 %6296 }
0x3386   :  { %v7925_v24 = vpop.eup %7924 }
0x3387   :  { %v6059_v55 = vsel %vm5210_vm11, %v7925_v24, 0.0 }
0x3388   :  { %6060 = vadd.xlane.f32.xlu0 %v6059_v55 }
0x338a   :  { %v7927_v46 = vpop.eup %7926 }
0x338b   :  { %v6056_v41 = vsel %vm5210_vm11, %v7927_v46, 0.0 }
0x338c   :  { %6057 = vadd.xlane.f32.xlu0 %v6056_v41 }
0x33a2   :  { %6142 = vrot.lane.b32.xlu0 %v10535_v50, %s8413_s18 }
0x33a6   :  { %6218 = vrot.lane.b32.xlu0 %v10537_v56, %s8415_s7 }
0x3411   :  { %v6061_v42 = vpop.xlane.xlu0 %6060 }
0x3412   :  { %7928 = vrcp.f32 %v6061_v42 }
0x3415   :  { %v6058_v34 = vpop.xlane.xlu0 %6057 }
0x3416   :  { %7930 = vrcp.f32 %v6058_v34 }
0x3419   :  { %v6143_v62 = vpop.permute.xlu0 %6142 }
0x341a   :  { %7251 = vmatpush3.msra.mxu1 %v6143_v62  ;;  %v6677_v62 = vld [vmem:[#allocation23 + $0x8] sm:$0xff] }
0x341b   :  { %7260 = vmatprep.subr.mxu1 %v10856_v61 }
0x341d   :  { %v6219_v37 = vpop.permute.xlu0 %6218 }
0x341f   :  { %v7929_v59 = vpop.eup %7928 }
0x3420   :  { %v6065_v47 = vmul.f32 %v7929_v59, %v7925_v24  ;;  %v6676_v59 = vld [vmem:[#allocation23] sm:$0xff] }
0x3422   :  { %7253 = vmatmul.mubr.msk.f32.vlgmr.msra.gmra.mxu1 %vm5210_vm11, %v6065_v47  ;;  %v6782_v47 = vld [vmem:[%s10782_s19 + $0x60] sm:$0xff] }
0x3423   :  { %v7931_v63 = vpop.eup %7930  ;;  %7261 = vmatpush3.xpose.msk.msra.mxu1 %vm5210_vm11, %v6299_v30  ;;  %7262 = vmatprep.mubr.msk.f32.mxu1 %vm8407_vm10, %v10856_v61  ;;  %v6783_v30 = vld [vmem:[%s10782_s19 + $0x68] sm:$0xff] }
0x3424   :  { %v6064_v27 = vmul.f32 %v7931_v63, %v7927_v46  ;;  %7270 = vmatprep.subr.mxu1 %v10856_v61  ;;  %v6781_v63 = vld [vmem:[%s10782_s19 + $0x58] sm:$0xff] }
0x3426   :  { %7248 = vmatmul.mubr.msk.f32.vlgmr.msra.gmra.mxu0 %vm5210_vm11, %v6064_v27  ;;  %7263 = vmatmul.mubr.msk.f32.vlgmr.msra.gmra.mxu1 %vm5210_vm11, %v6297_v58  ;;  %v6780_v27 = vld [vmem:[%s10782_s19 + $0x50] sm:$0xff]  ;;  %v6779_v58 = vld [vmem:[%s10782_s19 + $0x48] sm:$0xff] }
0x3427   :  { %7256 = vmatpush3.xpose.msk.msra.mxu0 %vm5210_vm11, %v6221_v9  ;;  %7257 = vmatprep.mubr.msk.f32.mxu0 %vm8407_vm10, %v10856_v61  ;;  %v6678_v9 = vld [vmem:[#allocation23 + $0x10] sm:$0xff] }
0x3428   :  { %7265 = vmatprep.subr.mxu0 %v10856_v61  ;;  %7272 = vmatprep.mubr.msk.f32.mxu1 %vm8407_vm10, %v10856_v61 }
0x342a   :  { %7258 = vmatmul.mubr.msk.f32.vlgmr.msra.gmra.mxu0 %vm5210_vm11, %v6219_v37  ;;  %v6778_v37 = vld [vmem:[%s10782_s19 + $0x40] sm:$0xff] }
0x342b   :  { %7267 = vmatprep.mubr.msk.f32.mxu0 %vm8407_vm10, %v10856_v61 }
0x34e2   :  { %v6214_v7 = vpop.f32.mrf.mxu1 }
0x34e4   :  { %v7254_v57 = vpop.f32.mrf.mxu1 }
0x34e5   :  { %v6776_v57 = vld [vmem:[%s10782_s19 + $0x30] sm:$0xff] }
0x34e6   :  { %v6138_v60 = vpop.f32.mrf.mxu0  ;;  %v6370_v1 = vpop.f32.mrf.mxu1 }
0x34e7   :  { %v6375_v20 = vmul.f32 0.35355338, %v6370_v1  ;;  %v6774_v1 = vld [vmem:[%s10782_s19 + $0x20] sm:$0xff] }
0x34e8   :  { %v7249_v49 = vpop.f32.mrf.mxu0  ;;  %v7264_v36 = vpop.f32.mrf.mxu1 }
0x34e9   :  { %v6377_v25 = vadd.f32 %v6375_v20, %v10560_v53  ;;  %v7080_v49 = vld [vmem:[#allocation22] ss:$0 sm:$0xff] }
0x34ea   :  { %v6292_v51 = vpop.f32.mrf.mxu0 }
0x34eb   :  { %v6374_v2 = vmul.f32 0.35355338, %v6292_v51  ;;  %v6381_v23 = vsel %vm5210_vm11, %v6377_v25, -inf }
0x34ec   :  { %v7259_v6 = vpop.f32.mrf.mxu0  ;;  %6382 = vmax.xlane.f32.xlu1 %v6381_v23  ;;  %v6772_v23 = vld [vmem:[%s10782_s19 + $0x10] sm:$0xff] }
0x34ed   :  { %v6376_v18 = vadd.f32 %v6374_v2, %v10563_v52  ;;  %v6773_v2 = vld [vmem:[%s10782_s19 + $0x18] sm:$0xff]  ;;  %v6771_v6 = vld [vmem:[%s10782_s19 + $0x8] sm:$0xff] }
0x34ef   :  { %v6378_v28 = vsel %vm5210_vm11, %v6376_v18, -inf }
0x34f0   :  { %6379 = vmax.xlane.f32.xlu0 %v6378_v28  ;;  %v7083_v28 = vld [vmem:[#allocation25] ss:$0 sm:$0xff] }
0x34fd   :  { %6400 = vrot.lane.b32.xlu1 %v10537_v56, %s8416_s10 }
0x3501   :  { %6554 = vrot.lane.b32.xlu1 %v10635_v16, %s8383_s3 }
0x3505   :  { %6556 = vrot.lane.b32.xlu1 %v10633_v22, %s8383_s3 }
0x3509   :  { %6564 = vrot.lane.b32.xlu1 %v6214_v7, %s8379_s5  ;;  %v6777_v7 = vld [vmem:[%s10782_s19 + $0x38] sm:$0xff] }
0x3575   :  { %v6383_v61 = vpop.xlane.xlu1 %6382 }
0x3576   :  { %v6385_v53 = vsub.f32 %v6377_v25, %v6383_v61 }
0x3578   :  { %v6388_v4 = vmul.f32 1.442695, %v6385_v53 }
0x3579   :  { %v6380_v13 = vpop.xlane.xlu0 %6379  ;;  %v6401_v10 = vpop.permute.xlu1 %6400 }
0x357a   :  { %7932 = vpow2.f32 %v6388_v4  ;;  %v6384_v52 = vsub.f32 %v6376_v18, %v6380_v13  ;;  %7266 = vmatpush3.msra.mxu0 %v6401_v10  ;;  %v6770_v18 = vld [vmem:[%s10782_s19] sm:$0xff] }
0x357b   :  { %7275 = vmatprep.subr.mxu0 %v6587_v11 }
0x357c   :  { %v6386_v17 = vmul.f32 1.442695, %v6384_v52 }
0x357d   :  { %v6555_v26 = vpop.permute.xlu1 %6554 }
0x357e   :  { %7934 = vpow2.f32 %v6386_v17  ;;  %v6576_v33 = vsel %vm5210_vm11, %v10601_v0, %v6555_v26  ;;  %v6784_v0 = vld [vmem:[%s10782_s19 + $0x70] sm:$0xff] }
0x3581   :  { %v6557_v15 = vpop.permute.xlu1 %6556 }
0x3582   :  { %v6577_v24 = vsel %vm5210_vm11, %v10599_v12, %v6557_v15  ;;  %v6785_v12 = vld [vmem:[%s10782_s19 + $0x78] sm:$0xff] }
0x3585   :  { %v6565_v19 = vpop.permute.xlu1 %6564 }
0x3586   :  { %v6580_v41 = vsel %vm6578_vm12, %v6577_v24, %v6565_v19 }
0x3587   :  { %v7933_v45 = vpop.eup %7932 }
0x3588   :  { %v6393_v56 = vsel %vm5210_vm11, %v7933_v45, 0.0 }
0x3589   :  { %6394 = vadd.xlane.f32.xlu0 %v6393_v56 }
0x358b   :  { %v7935_v38 = vpop.eup %7934 }
0x358c   :  { %v6390_v31 = vsel %vm5210_vm11, %v7935_v38, 0.0 }
0x358d   :  { %6391 = vadd.xlane.f32.xlu0 %v6390_v31 }
0x35a3   :  { %6476 = vrot.lane.b32.xlu0 %v10535_v50, %s8416_s10  ;;  %v6586_v50 = vld [vmem:[#allocation20 + $0x10] sm:$0xff] }
0x35a7   :  { %6562 = vrot.lane.b32.xlu0 %v6138_v60, %s8379_s5  ;;  %s8417_s5 = smov 24   ;;  %v6775_v60 = vld [vmem:[%s10782_s19 + $0x28] sm:$0xff] }
0x3612   :  { %v6395_v22 = vpop.xlane.xlu0 %6394 }
0x3613   :  { %7936 = vrcp.f32 %v6395_v22 }
0x3616   :  { %v6392_v3 = vpop.xlane.xlu0 %6391 }
0x3617   :  { %7938 = vrcp.f32 %v6392_v3 }
0x361a   :  { %v6477_v16 = vpop.permute.xlu0 %6476 }
0x361b   :  { %7271 = vmatpush3.msra.mxu1 %v6477_v16 }
0x361c   :  { %7286 = vmatprep.subr.mxu1 %v6679_v8 }
0x361e   :  { %v6563_v35 = vpop.permute.xlu0 %6562 }
0x361f   :  { %v6579_v55 = vsel %vm6578_vm12, %v6576_v33, %v6563_v35 }
0x3620   :  { %v7937_v43 = vpop.eup %7936 }
0x3621   :  { %v6399_v29 = vmul.f32 %v7937_v43, %v7933_v45 }
0x3623   :  { %7273 = vmatmul.mubr.msk.f32.vlgmr.msra.gmra.mxu1 %vm5210_vm11, %v6399_v29 }
0x3624   :  { %v7939_v44 = vpop.eup %7938  ;;  %7287 = vmatpush3.msra.mxu1 %v6679_v8 }
0x3625   :  { %v6398_v32 = vmul.f32 %v7939_v44, %v7935_v38  ;;  %7288 = vmatprep.subr.mxu1 %v6678_v9 }
0x3626   :  { %7289 = vmatpush3.msra.mxu1 %v6678_v9 }
0x3627   :  { %7268 = vmatmul.mubr.msk.f32.vlgmr.msra.gmra.mxu0 %vm5210_vm11, %v6398_v32  ;;  %7290 = vmatprep.subr.mxu1 %v6677_v62 }
0x3628   :  { %7276 = vmatpush3.msra.mxu0 %v6587_v11  ;;  %7291 = vmatpush3.msra.mxu1 %v6677_v62 }
0x3629   :  { %7277 = vmatprep.subr.mxu0 %v6586_v50  ;;  %7292 = vmatprep.subr.mxu1 %v6676_v59 }
0x362a   :  { %7278 = vmatpush3.msra.mxu0 %v6586_v50  ;;  %7293 = vmatpush3.msra.mxu1 %v6676_v59 }
0x362b   :  { %7279 = vmatprep.subr.mxu0 %v6585_v48 }
0x362c   :  { %7280 = vmatpush3.msra.mxu0 %v6585_v48 }
0x362d   :  { %7281 = vmatprep.subr.mxu0 %v6584_v5 }
0x362e   :  { %7282 = vmatpush3.msra.mxu0 %v6584_v5 }
0x362f   :  { %7297 = vmatprep.subr.mxu0 %v6785_v12 }
0x36e3   :  { %v6548_v39 = vpop.f32.mrf.mxu1 }
0x36e4   :  { %6572 = vrot.lane.b32.xlu1 %v6548_v39, %s8417_s5 }
0x36e5   :  { %v7274_v54 = vpop.f32.mrf.mxu1 }
0x36e7   :  { %v6472_v21 = vpop.f32.mrf.mxu0 }
0x36e8   :  { %6570 = vrot.lane.b32.xlu0 %v6472_v21, %s8417_s5 }
0x36e9   :  { %v7269_v40 = vpop.f32.mrf.mxu0 }
0x3756   :  { %v6573_v14 = vpop.permute.xlu1 %6572 }
0x3757   :  { %v6583_v34 = vsel %vm6581_vm13, %v6580_v41, %v6573_v14 }
0x375a   :  { %v6571_v46 = vpop.permute.xlu0 %6570 }
0x375b   :  { %v6582_v42 = vsel %vm6581_vm13, %v6579_v55, %v6571_v46 }
0x375c   :  { %7283 = vmatprep.mubr.msk.f32.mxu0 %vm314_vm0, %v6582_v42 }
0x375d   :  { %7284 = vmatmul.mubr.msk.f32.vlgmr.msra.gmra.mxu0 %vm314_vm0, %v6583_v34 }
0x375e   :  { %7298 = vmatpush3.msra.mxu0 %v6785_v12 }
0x375f   :  { %7299 = vmatprep.subr.mxu0 %v6784_v0 }
0x3760   :  { %7300 = vmatpush3.msra.mxu0 %v6784_v0 }
0x3761   :  { %7301 = vmatprep.subr.mxu0 %v6783_v30 }
0x3762   :  { %7302 = vmatpush3.msra.mxu0 %v6783_v30 }
0x3763   :  { %7303 = vmatprep.subr.mxu0 %v6782_v47 }
0x3764   :  { %7304 = vmatpush3.msra.mxu0 %v6782_v47 }
0x3765   :  { %7305 = vmatprep.subr.mxu0 %v6781_v63 }
0x3766   :  { %7306 = vmatpush3.msra.mxu0 %v6781_v63 }
0x3767   :  { %7307 = vmatprep.subr.mxu0 %v6780_v27 }
0x3768   :  { %7308 = vmatpush3.msra.mxu0 %v6780_v27 }
0x3769   :  { %7309 = vmatprep.subr.mxu0 %v6779_v58 }
0x376a   :  { %7310 = vmatpush3.msra.mxu0 %v6779_v58 }
0x376b   :  { %7311 = vmatprep.subr.mxu0 %v6778_v37 }
0x376c   :  { %7312 = vmatpush3.msra.mxu0 %v6778_v37 }
0x376d   :  { %7313 = vmatprep.subr.mxu0 %v6777_v7 }
0x376e   :  { %7314 = vmatpush3.msra.mxu0 %v6777_v7 }
0x376f   :  { %7315 = vmatprep.subr.mxu0 %v6776_v57 }
0x3770   :  { %7316 = vmatpush3.msra.mxu0 %v6776_v57 }
0x3771   :  { %7317 = vmatprep.subr.mxu0 %v6775_v60 }
0x3772   :  { %7318 = vmatpush3.msra.mxu0 %v6775_v60 }
0x3773   :  { %7319 = vmatprep.subr.mxu0 %v6774_v1 }
0x3774   :  { %7320 = vmatpush3.msra.mxu0 %v6774_v1 }
0x3775   :  { %7321 = vmatprep.subr.mxu0 %v6773_v2 }
0x3776   :  { %7322 = vmatpush3.msra.mxu0 %v6773_v2 }
0x3777   :  { %7323 = vmatprep.subr.mxu0 %v6772_v23 }
0x3778   :  { %7324 = vmatpush3.msra.mxu0 %v6772_v23 }
0x3779   :  { %7325 = vmatprep.subr.mxu0 %v6771_v6 }
0x377a   :  { %7326 = vmatpush3.msra.mxu0 %v6771_v6 }
0x377b   :  { %7327 = vmatprep.subr.mxu0 %v6770_v18 }
0x377c   :  { %7328 = vmatpush3.msra.mxu0 %v6770_v18 }
0x381d   :  { %v7285_v20 = vpop.f32.mrf.mxu0 }
0x381e   :  { %v6673_v51 = vadd.f32 %v7285_v20, %v7080_v49 }
0x381f   :  { %v6667_v36 = vpop.f32.mrf.mxu0 }
0x3820   :  { %v6668_v25 = vadd.f32 %v7080_v49, %v6667_v36 }
0x3822   :  { %7294 = vmatprep.mubr.msk.f32.mxu1 %vm314_vm0, %v6668_v25 }
0x3823   :  { %7295 = vmatmul.mubr.msk.f32.vlgmr.msra.gmra.mxu1 %vm314_vm0, %v6673_v51 }
0x38e3   :  { %v7296_v61 = vpop.f32.mrf.mxu1 }
0x38e4   :  { %v6765_v53 = vadd.f32 %v7296_v61, %v7083_v28 }
0x38e5   :  { %v6759_v4 = vpop.f32.mrf.mxu1 }
0x38e6   :  { %v6760_v13 = vadd.f32 %v7083_v28, %v6759_v4  ;;  %v6769_v52 = vmax.f32 %v6765_v53, 0.0 }
0x38e8   :  { %v6768_v10 = vmax.f32 %v6760_v13, 0.0 }
0x38ea   :  { %7329 = vmatprep.mubr.f32.mxu0 %v6768_v10 }
0x38eb   :  { %7330 = vmatmul.mubr.f32.vlgmr.msra.gmra.mxu0 %v6769_v52 }
0x38ec   :  { %8303 = shalt.err (!%p8300_p0)
}
0x38ed   :  { %6891 = dma.vmem_to_hbm [thread:$0]  %s6886_s4, 256, %s10784_s21, [#allocation4], %s8382_s8, %s8382_s8, %s8383_s3   ;;  %v7086_v17 = vld [vmem:[#allocation26] ss:$0 sm:$0xff] }
0x38ee   :  { %s8419_s2 = smov [#allocation29]  }
0x38ef   :  { %s6897_s16 = sshll.u32 %s8419_s2, 4  ;;  %s6898_s16 = int_to_ptr.vmem [resolvable:$true] %s6897_s16 }
0x38f0   :  { %s8312_s6 = scalar_lea.vmem %s6898_s16, 256  ;;  %p8317_p2 = scmp.lt.s32.totalorder %s6898_s16, %s6898_s16 }
0x38f1   :  { %p8313_p1 = scmp.ne.s32.totalorder %s6898_s16, %s8312_s6  ;;  %p8318_p3 = scmp.lt.s32.totalorder %s8312_s6, %s8312_s6 }
0x38f3   :  { %p8319_p4 = por %p8318_p3, %p8317_p2 }
0x38f5   :  { %p8320_p5 = pnand %p8319_p4, %p8313_p1 }
0x39ab   :  { %v7331_v45 = vpop.f32.mrf.mxu0 }
0x39ac   :  { %v6865_v56 = vadd.f32 %v7331_v45, %v7086_v17 }
0x39ad   :  { %v6859_v38 = vpop.f32.mrf.mxu0 }
0x39ae   :  { %6869 = vst.msk [vmem:[#allocation29 + $0x8] sm:$0xff] %vm5210_vm11, %v6865_v56  ;;  %v6860_v31 = vadd.f32 %v7086_v17, %v6859_v38  ;;  %6874 = vrot.lane.b32.xlu1 %v6865_v56, %s8409_s17 }
0x39b0   :  { %6868 = vst.msk [vmem:[#allocation29] sm:$0xff] %vm5210_vm11, %v6860_v31  ;;  %6872 = vrot.lane.b32.xlu0 %v6860_v31, %s8409_s17 }
0x39b1   :  { %8323 = shalt.err (!%p8320_p5)
}
0x39b2   :  { %6903 = dma.vmem_to_hbm [thread:$0]  %s6898_s16, 256, %s10785_s22, [#allocation30], %s8382_s8, %s8382_s8, %s8383_s3  }
0x39b3   :  { %s8420_s14 = smov [#allocation31]  }
0x39b4   :  { %s6909_s26 = sshll.u32 %s8420_s14, 4  ;;  %s6910_s26 = int_to_ptr.vmem [resolvable:$true] %s6909_s26 }
0x39b5   :  { %s8332_s17 = scalar_lea.vmem %s6910_s26, 256  ;;  %p8337_p7 = scmp.lt.s32.totalorder %s6910_s26, %s6910_s26 }
0x39b6   :  { %p8333_p6 = scmp.ne.s32.totalorder %s6910_s26, %s8332_s17  ;;  %p8338_p8 = scmp.lt.s32.totalorder %s8332_s17, %s8332_s17 }
0x39b8   :  { %p8339_p9 = por %p8338_p8, %p8337_p7 }
0x39ba   :  { %p8340_p10 = pnand %p8339_p9, %p8333_p6 }
0x3a20   :  { %v6875_v22 = vpop.permute.xlu1 %6874 }
0x3a21   :  { %6879 = vst.msk [vmem:[#allocation31 + $0x8] sm:$0xff] %vm5210_vm11, %v6875_v22 }
0x3a22   :  { %v6873_v3 = vpop.permute.xlu0 %6872 }
0x3a23   :  { %6878 = vst.msk [vmem:[#allocation31] sm:$0xff] %vm5210_vm11, %v6873_v3 }
0x3a24   :  { %8343 = shalt.err (!%p8340_p10)
}
0x3a25   :  { %6915 = dma.vmem_to_hbm [thread:$0]  %s6910_s26, 256, %s10786_s23, [#allocation30], %s8382_s8, %s8382_s8, %s8383_s3  }
0x3a26   :  { %8370 = dma.done.wait [#allocation4], 256  }
0x3a27   :  { %8371 = vsyncadd [#allocation4], 4294967040 }
0x3a28   :  { %8372 = dma.done.wait [#allocation30], 512  }
0x3a29   :  { %8373 = vsyncadd [#allocation30], 4294966784 }
0x3a2a   :  { %6925 = vsyncpa [#allocation3], 1 }
0x3a2b   :  { %6926 = vsyncpa [#allocation6], 1 }
0x3a2c   :  { %6927 = vsyncpa [#allocation9], 1 }
0x3a2d   :  { %6928 = vsyncpa [#allocation12], 1 }
0x3a2e   :  { %6929 = vsyncpa [#allocation15], 1 }
0x3a2f   :  { %6930 = vsyncpa [#allocation18], 1 }
0x3a30   :  { %6931 = vsyncpa [#allocation21], 1 }
0x3a31   :  { %6932 = vsyncpa [#allocation24], 1 }
0x3a32   :  { %6933 = vsyncpa [#allocation27], 1 }
0x3a33   :  { %6934 = vsyncpa [#allocation4], 1 }
0x3a34   :  { %6935 = vsyncpa [#allocation30], 1 }

</bundles_post_ra>
